<compile_context>
chip_gen: v7x
topology: tpu7x:2x2x1
jax: 0.10.0
libtpu: 0.0.40
codegen_flags: <defaults>
</compile_context>

<pallas_src>
import functools
import math

import jax
import jax.numpy as jnp
from jax.experimental import pallas as pl
from jax.experimental.pallas import tpu as pltpu


# ----------------------------------------------------------------------------
# Static model architecture (name, out_ch, in_ch, kernel, stride, pad)
# ----------------------------------------------------------------------------
_CONV_CFG = [
    ("c1", 64, 3, 11, 4, 2),
    ("c2", 192, 64, 5, 1, 2),
    ("c3", 384, 192, 3, 1, 1),
    ("c4", 256, 384, 3, 1, 1),
    ("c5", 256, 256, 3, 1, 1),
]


def _round_up(x, m):
    return ((x + m - 1) // m) * m


# ----------------------------------------------------------------------------
# Matmul + bias + activation kernels (bf16 operands, f32 accumulation on MXU)
# ----------------------------------------------------------------------------
def _mm_bias_act_kernel(x_ref, w_ref, b_ref, o_ref, *, activation):
    """Single-K-block variant: no accumulator scratch, write straight to o_ref."""
    y = jnp.dot(x_ref[...], w_ref[...], preferred_element_type=jnp.float32)
    y = y + b_ref[...]
    if activation == "relu":
        y = jnp.maximum(y, 0.0)
    elif activation == "sigmoid":
        y = jax.nn.sigmoid(y)
    o_ref[...] = y.astype(o_ref.dtype)


def _mm_bias_act_acc_kernel(x_ref, w_ref, b_ref, o_ref, acc_ref, *, activation):
    """Multi-K-block variant with f32 VMEM accumulator (used only by the fallback fc1)."""
    k = pl.program_id(2)

    @pl.when(k == 0)
    def _():
        acc_ref[...] = jnp.zeros_like(acc_ref)

    acc_ref[...] += jnp.dot(x_ref[...], w_ref[...],
                            preferred_element_type=jnp.float32)

    @pl.when(k == pl.num_programs(2) - 1)
    def _():
        y = acc_ref[...] + b_ref[...]
        if activation == "relu":
            y = jnp.maximum(y, 0.0)
        elif activation == "sigmoid":
            y = jax.nn.sigmoid(y)
        o_ref[...] = y.astype(o_ref.dtype)


def matmul_bias_act(x, w_p, b_p, n_out, activation="none", out_dtype=jnp.float32,
                    tm_cap=256, tn_cap=512, tk_cap=3584):
    """y = act(x @ w + b)[:M, :n_out].

    x:   (M, K) float (bf16 preferred), un-padded.
    w_p: (Kp, Np) bf16, PRE-padded to multiples of 128 in prepare_params().
    b_p: (1, Np) f32, PRE-padded.
    """
    M, K = x.shape
    Kp, Np = w_p.shape

    tm = min(tm_cap, _round_up(M, 16))            # 16: bf16 sublane packing
    Mp = _round_up(M, tm)
    tn = Np if Np <= tn_cap else tn_cap           # Np is a multiple of 128
    assert Np % tn == 0
    if Kp <= tk_cap:
        tk = Kp                                   # single K block (all conv layers)
    else:
        tk = 128
        t = tk_cap - (tk_cap % 128)
        while t >= 128:
            if Kp % t == 0:
                tk = t
                break
            t -= 128
    gk = Kp // tk

    x_p = jnp.pad(x.astype(jnp.bfloat16), ((0, Mp - M), (0, Kp - K)))

    if gk == 1:
        grid = (Mp // tm, Np // tn)
        out = pl.pallas_call(
            functools.partial(_mm_bias_act_kernel, activation=activation),
            out_shape=jax.ShapeDtypeStruct((Mp, Np), out_dtype),
            grid_spec=pltpu.PrefetchScalarGridSpec(
                num_scalar_prefetch=0,
                grid=grid,
                in_specs=[
                    pl.BlockSpec((tm, tk), lambda i, j: (i, 0)),
                    pl.BlockSpec((tk, tn), lambda i, j: (0, j)),
                    pl.BlockSpec((1, tn), lambda i, j: (0, j)),
                ],
                out_specs=pl.BlockSpec((tm, tn), lambda i, j: (i, j)),
            ),
            compiler_params=pltpu.CompilerParams(
                dimension_semantics=("parallel", "parallel")),
        )(x_p, w_p, b_p)
    else:
        grid = (Mp // tm, Np // tn, gk)
        out = pl.pallas_call(
            functools.partial(_mm_bias_act_acc_kernel, activation=activation),
            out_shape=jax.ShapeDtypeStruct((Mp, Np), out_dtype),
            grid_spec=pltpu.PrefetchScalarGridSpec(
                num_scalar_prefetch=0,
                grid=grid,
                in_specs=[
                    pl.BlockSpec((tm, tk), lambda i, j, k: (i, k)),
                    pl.BlockSpec((tk, tn), lambda i, j, k: (k, j)),
                    pl.BlockSpec((1, tn), lambda i, j, k: (0, j)),
                ],
                out_specs=pl.BlockSpec((tm, tn), lambda i, j, k: (i, j)),
                scratch_shapes=[pltpu.VMEM((tm, tn), jnp.float32)],
            ),
            compiler_params=pltpu.CompilerParams(
                dimension_semantics=("parallel", "parallel", "arbitrary")),
        )(x_p, w_p, b_p)
    return out[:M, :n_out]


# ----------------------------------------------------------------------------
# Fused classifier head: fc1(folded) -> sigmoid -> fc2 -> sigmoid -> fc3
# All weights resident in VMEM for a single launch (head is latency-bound at M=2).
# ----------------------------------------------------------------------------
def _fused_head_kernel(x_ref, w1_ref, b1_ref, w2_ref, b2_ref, w3_ref, b3_ref,
                       yp_ref, h2_ref):
    h1 = jnp.dot(x_ref[...], w1_ref[...], preferred_element_type=jnp.float32)
    h1 = jax.nn.sigmoid(h1 + b1_ref[...])
    h2 = jnp.dot(h1.astype(jnp.bfloat16), w2_ref[...],
                 preferred_element_type=jnp.float32)
    h2 = jax.nn.sigmoid(h2 + b2_ref[...])
    h2_ref[...] = h2
    yp = jnp.dot(h2.astype(jnp.bfloat16), w3_ref[...],
                 preferred_element_type=jnp.float32)
    yp_ref[...] = yp + b3_ref[...]


def fused_head(pooled_bf16, p):
    """pooled_bf16: (N, 256) channel vector of the 1x1 pooled map."""
    M, K1 = pooled_bf16.shape
    Mp = _round_up(M, 16)
    x_p = jnp.pad(pooled_bf16.astype(jnp.bfloat16), ((0, Mp - M), (0, 0)))
    w1, b1 = p["fc1_wf"], p["fc1_b2d"]            # (256, 1024), (1, 1024)
    w2, b2 = p["fc2_w"], p["fc2_b2d"]             # (1024, 512), (1, 512)
    w3, b3 = p["fc3_wp"], p["fc3_b2d"]            # (512, 128),  (1, 128)
    N1, N2, N3 = w1.shape[1], w2.shape[1], w3.shape[1]

    yp, h2 = pl.pallas_call(
        _fused_head_kernel,
        out_shape=(jax.ShapeDtypeStruct((Mp, N3), jnp.float32),
                   jax.ShapeDtypeStruct((Mp, N2), jnp.float32)),
        grid_spec=pltpu.PrefetchScalarGridSpec(
            num_scalar_prefetch=0,
            grid=(1,),
            in_specs=[
                pl.BlockSpec((Mp, K1), lambda i: (0, 0)),
                pl.BlockSpec((K1, N1), lambda i: (0, 0)),
                pl.BlockSpec((1, N1), lambda i: (0, 0)),
                pl.BlockSpec((N1, N2), lambda i: (0, 0)),
                pl.BlockSpec((1, N2), lambda i: (0, 0)),
                pl.BlockSpec((N2, N3), lambda i: (0, 0)),
                pl.BlockSpec((1, N3), lambda i: (0, 0)),
            ],
            out_specs=[
                pl.BlockSpec((Mp, N3), lambda i: (0, 0)),
                pl.BlockSpec((Mp, N2), lambda i: (0, 0)),
            ],
        ),
        compiler_params=pltpu.CompilerParams(dimension_semantics=("arbitrary",)),
    )(x_p, w1, b1, w2, b2, w3, b3)
    return yp[:M, :7], h2[:M, :]


# ----------------------------------------------------------------------------
# Conv as NHWC im2col + Pallas matmul; pooling glue in plain JAX (NHWC, bf16)
# ----------------------------------------------------------------------------
def _im2col_nhwc(x, kh, kw, stride, pad):
    """x: (N, H, W, C) -> patches (N*OH*OW, KH*KW*C), (KH, KW, C) flatten order."""
    N, H, W, C = x.shape
    xp = jnp.pad(x, ((0, 0), (pad, pad), (pad, pad), (0, 0)))
    OH = (H + 2 * pad - kh) // stride + 1
    OW = (W + 2 * pad - kw) // stride + 1
    cols = []
    for i in range(kh):
        for j in range(kw):
            cols.append(xp[:, i:i + stride * OH:stride, j:j + stride * OW:stride, :])
    col = jnp.concatenate(cols, axis=-1)           # (N, OH, OW, KH*KW*C), bf16
    # TODO(synk): patch extraction still materializes in HBM; fusing it into the kernel
    # DMA via a scalar-prefetch row-gather index_map is a further optimization.
    return col.reshape(N * OH * OW, kh * kw * C), OH, OW


def conv2d_relu(x_nhwc, w2d_p, b2d_p, oc, kh, kw, stride, pad):
    """w2d_p is pre-flattened/padded (Kp, Np) bf16.  Returns bf16 NHWC output."""
    N = x_nhwc.shape[0]
    patches, OH, OW = _im2col_nhwc(x_nhwc, kh, kw, stride, pad)
    y = matmul_bias_act(patches, w2d_p, b2d_p, oc, activation="relu",
                        out_dtype=jnp.bfloat16)
    return y.reshape(N, OH, OW, oc)


def maxpool2d(x, k=3, s=2):
    N, H, W, C = x.shape
    OH, OW = (H - k) // s + 1, (W - k) // s + 1
    out = jnp.full((N, OH, OW, C), -jnp.inf, x.dtype)
    for i in range(k):
        for j in range(k):
            out = jnp.maximum(out, x[:, i:i + s * OH:s, j:j + s * OW:s, :])
    return out


def adaptive_avg_pool2d(x, out_size=6):
    N, H, W, C = x.shape
    rows = []
    for i in range(out_size):
        hs, he = (i * H) // out_size, math.ceil((i + 1) * H / out_size)
        cols = []
        for j in range(out_size):
            ws, we = (j * W) // out_size, math.ceil((j + 1) * W / out_size)
            cols.append(jnp.mean(x[:, hs:he, ws:we, :], axis=(1, 2)))   # (N, C)
        rows.append(jnp.stack(cols, axis=1))                            # (N, ow, C)
    return jnp.stack(rows, axis=1)                                      # (N, oh, ow, C)


# ----------------------------------------------------------------------------
# Net forward (AlexNet features + 3-layer classifier head)
# ----------------------------------------------------------------------------
def net_forward(x_nchw, p):
    x = jnp.transpose(x_nchw, (0, 2, 3, 1)).astype(jnp.bfloat16)  # one NCHW->NHWC + bf16
    h = conv2d_relu(x, p["c1_w2d"], p["c1_b2d"], 64, 11, 11, 4, 2)
    h = maxpool2d(h)
    h = conv2d_relu(h, p["c2_w2d"], p["c2_b2d"], 192, 5, 5, 1, 2)
    h = maxpool2d(h)
    h = conv2d_relu(h, p["c3_w2d"], p["c3_b2d"], 384, 3, 3, 1, 1)
    h = conv2d_relu(h, p["c4_w2d"], p["c4_b2d"], 256, 3, 3, 1, 1)
    h = conv2d_relu(h, p["c5_w2d"], p["c5_b2d"], 256, 3, 3, 1, 1)
    h = maxpool2d(h)                                              # (N, H, W, 256)
    N, H, W, C = h.shape
    # TODO(synk): nn.Dropout implemented as identity (inference / eval mode).
    if H == 1 and W == 1:
        # adaptive_avg_pool2d(1x1 -> 6x6) only replicates the single 256-vector 36x;
        # the replication is folded into fc1's weight (prepare_params), so feed the
        # pooled channel vector directly to the fused head kernel.
        pooled = h.reshape(N, C)
        ypred, h2 = fused_head(pooled, p)
    else:
        # General path for larger inputs (e.g. 224x224): full adaptive pool + streamed fc1.
        h6 = adaptive_avg_pool2d(h, 6)                            # (N, 6, 6, 256)
        h0 = h6.reshape(N, -1)                                    # (N, 9216) NHWC flatten
        h1 = matmul_bias_act(h0, p["fc1_w"], p["fc1_b2d"], 1024, activation="sigmoid")
        h2 = matmul_bias_act(h1, p["fc2_w"], p["fc2_b2d"], 512, activation="sigmoid")
        ypred = h2 @ p["fc3_w"] + p["fc3_b"]                      # tiny tail, plain dot
    return ypred, h2


# ----------------------------------------------------------------------------
# Deterministic parameter init (PyTorch layout) + one-time layout/dtype/pad prep
# ----------------------------------------------------------------------------
def init_params(key):
    def conv_p(key, oc, ic, k):
        kw_, kb = jax.random.split(key)
        fan_in = ic * k * k
        w = jax.random.normal(kw_, (oc, ic, k, k), jnp.float32) / jnp.sqrt(fan_in)
        b = 0.01 * jax.random.normal(kb, (oc,), jnp.float32)
        return w, b

    def lin_p(key, out_f, in_f):
        kw_, kb = jax.random.split(key)
        w = jax.random.normal(kw_, (out_f, in_f), jnp.float32) / jnp.sqrt(in_f)
        b = 0.01 * jax.random.normal(kb, (out_f,), jnp.float32)
        return w, b

    ks = jax.random.split(key, 8)
    p = {}
    for i, (name, oc, ic, k, _, _) in enumerate(_CONV_CFG):
        p[name + "_w"], p[name + "_b"] = conv_p(ks[i], oc, ic, k)
    p["fc1_w"], p["fc1_b"] = lin_p(ks[5], 1024, 9216)
    p["fc2_w"], p["fc2_b"] = lin_p(ks[6], 512, 1024)
    p["fc3_w"], p["fc3_b"] = lin_p(ks[7], 7, 512)
    return p


def prepare_params(raw):
    """One-time weight reshape/transpose/cast/PAD so the forward pass has zero weight plumbing."""
    p = {}
    for name, oc, ic, k, _, _ in _CONV_CFG:
        w = raw[name + "_w"]                                      # (OC, IC, KH, KW)
        kdim = k * k * ic
        Kp, Np = _round_up(kdim, 128), _round_up(oc, 128)
        w2d = (jnp.transpose(w, (2, 3, 1, 0))                     # (KH, KW, IC, OC)
               .reshape(kdim, oc).astype(jnp.bfloat16))
        p[name + "_w2d"] = jnp.pad(w2d, ((0, Kp - kdim), (0, Np - oc)))
        p[name + "_b2d"] = jnp.pad(raw[name + "_b"].astype(jnp.float32),
                                   ((0, Np - oc),)).reshape(1, Np)
    # fc1: raw weight is (1024, 9216) with PyTorch (C=256, H=6, W=6) flatten order.
    w1 = raw["fc1_w"].reshape(1024, 256, 6, 6)
    # Folded weight for the 1x1 pooled-map fast path: sum the 6x6 replication -> (256, 1024).
    p["fc1_wf"] = jnp.transpose(w1.sum(axis=(2, 3)), (1, 0)).astype(jnp.bfloat16)
    # Full weight (NHWC (H,W,C) flatten order) for the general path: (9216, 1024).
    w1_nhwc = jnp.transpose(w1, (0, 2, 3, 1)).reshape(1024, 9216)
    p["fc1_w"] = w1_nhwc.T.astype(jnp.bfloat16)
    p["fc1_b2d"] = raw["fc1_b"].astype(jnp.float32).reshape(1, 1024)
    p["fc2_w"] = raw["fc2_w"].T.astype(jnp.bfloat16)              # (1024, 512)
    p["fc2_b2d"] = raw["fc2_b"].astype(jnp.float32).reshape(1, 512)
    w3 = raw["fc3_w"].T                                           # (512, 7)
    p["fc3_wp"] = jnp.pad(w3.astype(jnp.bfloat16), ((0, 0), (0, 128 - 7)))   # (512, 128)
    p["fc3_b2d"] = jnp.pad(raw["fc3_b"].astype(jnp.float32),
                           ((0, 128 - 7),)).reshape(1, 128)
    p["fc3_w"] = w3.astype(jnp.float32)                           # plain-dot fallback
    p["fc3_b"] = raw["fc3_b"].astype(jnp.float32)
    return p


if __name__ == "__main__":
    key = jax.random.PRNGKey(0)
    pkey, xkey = jax.random.split(key)
    params = prepare_params(init_params(pkey))
    # Small input consistent with the AlexNet feature extractor (NCHW).
    x = jax.random.normal(xkey, (2, 3, 64, 64), jnp.float32)

    fwd = jax.jit(net_forward)
    ypred, h2_out = fwd(x, params)
    ypred = jax.block_until_ready(ypred)
    h2_out = jax.block_until_ready(h2_out)

    assert ypred.shape == (2, 7) and ypred.dtype == jnp.float32
    assert h2_out.shape == (2, 512) and h2_out.dtype == jnp.float32
    assert bool(jnp.all(jnp.isfinite(ypred))) and bool(jnp.all(jnp.isfinite(h2_out)))
    print("KERNEL_OK")
</pallas_src>

<mosaic_0001>
module attributes {stable_mosaic.version = 11 : i64} {
  func.func @_mm_bias_act_kernel(%arg0: i32, %arg1: i32, %arg2: memref<256x384xbf16, #tpu.memory_space<vmem>>, %arg3: memref<384x128xbf16, #tpu.memory_space<vmem>>, %arg4: memref<1x128xf32, #tpu.memory_space<vmem>>, %arg5: memref<256x128xbf16, #tpu.memory_space<vmem>>) attributes {dimension_semantics = [#tpu.dimension_semantics<parallel>, #tpu.dimension_semantics<parallel>], iteration_bounds = array<i64: 2, 1>, scalar_prefetch = 0 : i64, scratch_operands = 0 : i64, tpu.core_type = #tpu.core_type<tc>, window_params = [{transform_indices = @transform_0, window_bounds = array<i64: 256, 384>}, {transform_indices = @transform_1, window_bounds = array<i64: 384, 128>}, {transform_indices = @transform_2, window_bounds = array<i64: 1, 128>}, {transform_indices = @transform_3, window_bounds = array<i64: 256, 128>}]} {
    %c0 = arith.constant 0 : index
    %c0_0 = arith.constant 0 : index
    %0 = vector.load %arg2[%c0, %c0_0] : memref<256x384xbf16, #tpu.memory_space<vmem>>, vector<256x384xbf16>
    %c0_1 = arith.constant 0 : index
    %c0_2 = arith.constant 0 : index
    %1 = vector.load %arg3[%c0_1, %c0_2] : memref<384x128xbf16, #tpu.memory_space<vmem>>, vector<384x128xbf16>
    %cst = arith.constant dense<0.000000e+00> : vector<256x128xf32>
    %2 = tpu.matmul %0, %1, %cst {dimension_numbers = #tpu.dot_dimension_numbers<[1], [0], [0], [1], [0, 0, 1, 1], [], []>} : vector<256x384xbf16>, vector<384x128xbf16>, vector<256x128xf32> -> vector<256x128xf32>
    %c0_3 = arith.constant 0 : index
    %c0_4 = arith.constant 0 : index
    %3 = vector.load %arg4[%c0_3, %c0_4] : memref<1x128xf32, #tpu.memory_space<vmem>>, vector<1x128xf32>
    %4 = vector.broadcast %3 : vector<1x128xf32> to vector<256x128xf32>
    %5 = arith.addf %2, %4 : vector<256x128xf32>
    %cst_5 = arith.constant 0.000000e+00 : f32
    %6 = vector.broadcast %cst_5 : f32 to vector<256x128xf32>
    %7 = arith.maximumf %5, %6 : vector<256x128xf32>
    %8 = arith.truncf %7 : vector<256x128xf32> to vector<256x128xbf16>
    %c0_6 = arith.constant 0 : index
    %c0_7 = arith.constant 0 : index
    %9 = vector.load %arg5[%c0_6, %c0_7] : memref<256x128xbf16, #tpu.memory_space<vmem>>, vector<256x128xbf16>
    tpu.vector_store %arg5[%c0_6, %c0_7], %8 {strides = array<i32>} : memref<256x128xbf16, #tpu.memory_space<vmem>>, vector<256x128xbf16>,
    return
  }
  func.func @transform_0(%arg0: i32, %arg1: i32) -> (i32, i32) {
    %c0_i32 = arith.constant 0 : i32
    %c0_i32_0 = arith.constant 0 : i32
    return %arg0, %c0_i32 : i32, i32
  }
  func.func @transform_1(%arg0: i32, %arg1: i32) -> (i32, i32) {
    %c0_i32 = arith.constant 0 : i32
    %c0_i32_0 = arith.constant 0 : i32
    return %c0_i32, %arg1 : i32, i32
  }
  func.func @transform_2(%arg0: i32, %arg1: i32) -> (i32, i32) {
    %c0_i32 = arith.constant 0 : i32
    %c0_i32_0 = arith.constant 0 : i32
    return %c0_i32, %arg1 : i32, i32
  }
  func.func @transform_3(%arg0: i32, %arg1: i32) -> (i32, i32) {
    %c0_i32 = arith.constant 0 : i32
    return %arg0, %arg1 : i32, i32
  }
}

module attributes {stable_mosaic.version = 11 : i64} {
  func.func @_mm_bias_act_kernel(%arg0: i32, %arg1: i32, %arg2: memref<112x1664xbf16, #tpu.memory_space<vmem>>, %arg3: memref<1664x256xbf16, #tpu.memory_space<vmem>>, %arg4: memref<1x256xf32, #tpu.memory_space<vmem>>, %arg5: memref<112x256xbf16, #tpu.memory_space<vmem>>) attributes {dimension_semantics = [#tpu.dimension_semantics<parallel>, #tpu.dimension_semantics<parallel>], iteration_bounds = array<i64: 1, 1>, scalar_prefetch = 0 : i64, scratch_operands = 0 : i64, tpu.core_type = #tpu.core_type<tc>, window_params = [{transform_indices = @transform_0, window_bounds = array<i64: 112, 1664>}, {transform_indices = @transform_1, window_bounds = array<i64: 1664, 256>}, {transform_indices = @transform_2, window_bounds = array<i64: 1, 256>}, {transform_indices = @transform_3, window_bounds = array<i64: 112, 256>}]} {
    %c0 = arith.constant 0 : index
    %c0_0 = arith.constant 0 : index
    %0 = vector.load %arg2[%c0, %c0_0] : memref<112x1664xbf16, #tpu.memory_space<vmem>>, vector<112x1664xbf16>
    %c0_1 = arith.constant 0 : index
    %c0_2 = arith.constant 0 : index
    %1 = vector.load %arg3[%c0_1, %c0_2] : memref<1664x256xbf16, #tpu.memory_space<vmem>>, vector<1664x256xbf16>
    %cst = arith.constant dense<0.000000e+00> : vector<112x256xf32>
    %2 = tpu.matmul %0, %1, %cst {dimension_numbers = #tpu.dot_dimension_numbers<[1], [0], [0], [1], [0, 0, 1, 1], [], []>} : vector<112x1664xbf16>, vector<1664x256xbf16>, vector<112x256xf32> -> vector<112x256xf32>
    %c0_3 = arith.constant 0 : index
    %c0_4 = arith.constant 0 : index
    %3 = vector.load %arg4[%c0_3, %c0_4] : memref<1x256xf32, #tpu.memory_space<vmem>>, vector<1x256xf32>
    %4 = vector.broadcast %3 : vector<1x256xf32> to vector<112x256xf32>
    %5 = arith.addf %2, %4 : vector<112x256xf32>
    %cst_5 = arith.constant 0.000000e+00 : f32
    %6 = vector.broadcast %cst_5 : f32 to vector<112x256xf32>
    %7 = arith.maximumf %5, %6 : vector<112x256xf32>
    %8 = arith.truncf %7 : vector<112x256xf32> to vector<112x256xbf16>
    %c0_6 = arith.constant 0 : index
    %c0_7 = arith.constant 0 : index
    %9 = vector.load %arg5[%c0_6, %c0_7] : memref<112x256xbf16, #tpu.memory_space<vmem>>, vector<112x256xbf16>
    tpu.vector_store %arg5[%c0_6, %c0_7], %8 {strides = array<i32>} : memref<112x256xbf16, #tpu.memory_space<vmem>>, vector<112x256xbf16>,
    return
  }
  func.func @transform_0(%arg0: i32, %arg1: i32) -> (i32, i32) {
    %c0_i32 = arith.constant 0 : i32
    %c0_i32_0 = arith.constant 0 : i32
    return %arg0, %c0_i32 : i32, i32
  }
  func.func @transform_1(%arg0: i32, %arg1: i32) -> (i32, i32) {
    %c0_i32 = arith.constant 0 : i32
    %c0_i32_0 = arith.constant 0 : i32
    return %c0_i32, %arg1 : i32, i32
  }
  func.func @transform_2(%arg0: i32, %arg1: i32) -> (i32, i32) {
    %c0_i32 = arith.constant 0 : i32
    %c0_i32_0 = arith.constant 0 : i32
    return %c0_i32, %arg1 : i32, i32
  }
  func.func @transform_3(%arg0: i32, %arg1: i32) -> (i32, i32) {
    %c0_i32 = arith.constant 0 : i32
    return %arg0, %arg1 : i32, i32
  }
}

module attributes {stable_mosaic.version = 11 : i64} {
  func.func @_mm_bias_act_kernel(%arg0: i32, %arg1: i32, %arg2: memref<32x1792xbf16, #tpu.memory_space<vmem>>, %arg3: memref<1792x384xbf16, #tpu.memory_space<vmem>>, %arg4: memref<1x384xf32, #tpu.memory_space<vmem>>, %arg5: memref<32x384xbf16, #tpu.memory_space<vmem>>) attributes {dimension_semantics = [#tpu.dimension_semantics<parallel>, #tpu.dimension_semantics<parallel>], iteration_bounds = array<i64: 1, 1>, scalar_prefetch = 0 : i64, scratch_operands = 0 : i64, tpu.core_type = #tpu.core_type<tc>, window_params = [{transform_indices = @transform_0, window_bounds = array<i64: 32, 1792>}, {transform_indices = @transform_1, window_bounds = array<i64: 1792, 384>}, {transform_indices = @transform_2, window_bounds = array<i64: 1, 384>}, {transform_indices = @transform_3, window_bounds = array<i64: 32, 384>}]} {
    %c0 = arith.constant 0 : index
    %c0_0 = arith.constant 0 : index
    %0 = vector.load %arg2[%c0, %c0_0] : memref<32x1792xbf16, #tpu.memory_space<vmem>>, vector<32x1792xbf16>
    %c0_1 = arith.constant 0 : index
    %c0_2 = arith.constant 0 : index
    %1 = vector.load %arg3[%c0_1, %c0_2] : memref<1792x384xbf16, #tpu.memory_space<vmem>>, vector<1792x384xbf16>
    %cst = arith.constant dense<0.000000e+00> : vector<32x384xf32>
    %2 = tpu.matmul %0, %1, %cst {dimension_numbers = #tpu.dot_dimension_numbers<[1], [0], [0], [1], [0, 0, 1, 1], [], []>} : vector<32x1792xbf16>, vector<1792x384xbf16>, vector<32x384xf32> -> vector<32x384xf32>
    %c0_3 = arith.constant 0 : index
    %c0_4 = arith.constant 0 : index
    %3 = vector.load %arg4[%c0_3, %c0_4] : memref<1x384xf32, #tpu.memory_space<vmem>>, vector<1x384xf32>
    %4 = vector.broadcast %3 : vector<1x384xf32> to vector<32x384xf32>
    %5 = arith.addf %2, %4 : vector<32x384xf32>
    %cst_5 = arith.constant 0.000000e+00 : f32
    %6 = vector.broadcast %cst_5 : f32 to vector<32x384xf32>
    %7 = arith.maximumf %5, %6 : vector<32x384xf32>
    %8 = arith.truncf %7 : vector<32x384xf32> to vector<32x384xbf16>
    %c0_6 = arith.constant 0 : index
    %c0_7 = arith.constant 0 : index
    %9 = vector.load %arg5[%c0_6, %c0_7] : memref<32x384xbf16, #tpu.memory_space<vmem>>, vector<32x384xbf16>
    tpu.vector_store %arg5[%c0_6, %c0_7], %8 {strides = array<i32>} : memref<32x384xbf16, #tpu.memory_space<vmem>>, vector<32x384xbf16>,
    return
  }
  func.func @transform_0(%arg0: i32, %arg1: i32) -> (i32, i32) {
    %c0_i32 = arith.constant 0 : i32
    %c0_i32_0 = arith.constant 0 : i32
    return %arg0, %c0_i32 : i32, i32
  }
  func.func @transform_1(%arg0: i32, %arg1: i32) -> (i32, i32) {
    %c0_i32 = arith.constant 0 : i32
    %c0_i32_0 = arith.constant 0 : i32
    return %c0_i32, %arg1 : i32, i32
  }
  func.func @transform_2(%arg0: i32, %arg1: i32) -> (i32, i32) {
    %c0_i32 = arith.constant 0 : i32
    %c0_i32_0 = arith.constant 0 : i32
    return %c0_i32, %arg1 : i32, i32
  }
  func.func @transform_3(%arg0: i32, %arg1: i32) -> (i32, i32) {
    %c0_i32 = arith.constant 0 : i32
    return %arg0, %arg1 : i32, i32
  }
}

module attributes {stable_mosaic.version = 11 : i64} {
  func.func @_mm_bias_act_kernel(%arg0: i32, %arg1: i32, %arg2: memref<32x3456xbf16, #tpu.memory_space<vmem>>, %arg3: memref<3456x256xbf16, #tpu.memory_space<vmem>>, %arg4: memref<1x256xf32, #tpu.memory_space<vmem>>, %arg5: memref<32x256xbf16, #tpu.memory_space<vmem>>) attributes {dimension_semantics = [#tpu.dimension_semantics<parallel>, #tpu.dimension_semantics<parallel>], iteration_bounds = array<i64: 1, 1>, scalar_prefetch = 0 : i64, scratch_operands = 0 : i64, tpu.core_type = #tpu.core_type<tc>, window_params = [{transform_indices = @transform_0, window_bounds = array<i64: 32, 3456>}, {transform_indices = @transform_1, window_bounds = array<i64: 3456, 256>}, {transform_indices = @transform_2, window_bounds = array<i64: 1, 256>}, {transform_indices = @transform_3, window_bounds = array<i64: 32, 256>}]} {
    %c0 = arith.constant 0 : index
    %c0_0 = arith.constant 0 : index
    %0 = vector.load %arg2[%c0, %c0_0] : memref<32x3456xbf16, #tpu.memory_space<vmem>>, vector<32x3456xbf16>
    %c0_1 = arith.constant 0 : index
    %c0_2 = arith.constant 0 : index
    %1 = vector.load %arg3[%c0_1, %c0_2] : memref<3456x256xbf16, #tpu.memory_space<vmem>>, vector<3456x256xbf16>
    %cst = arith.constant dense<0.000000e+00> : vector<32x256xf32>
    %2 = tpu.matmul %0, %1, %cst {dimension_numbers = #tpu.dot_dimension_numbers<[1], [0], [0], [1], [0, 0, 1, 1], [], []>} : vector<32x3456xbf16>, vector<3456x256xbf16>, vector<32x256xf32> -> vector<32x256xf32>
    %c0_3 = arith.constant 0 : index
    %c0_4 = arith.constant 0 : index
    %3 = vector.load %arg4[%c0_3, %c0_4] : memref<1x256xf32, #tpu.memory_space<vmem>>, vector<1x256xf32>
    %4 = vector.broadcast %3 : vector<1x256xf32> to vector<32x256xf32>
    %5 = arith.addf %2, %4 : vector<32x256xf32>
    %cst_5 = arith.constant 0.000000e+00 : f32
    %6 = vector.broadcast %cst_5 : f32 to vector<32x256xf32>
    %7 = arith.maximumf %5, %6 : vector<32x256xf32>
    %8 = arith.truncf %7 : vector<32x256xf32> to vector<32x256xbf16>
    %c0_6 = arith.constant 0 : index
    %c0_7 = arith.constant 0 : index
    %9 = vector.load %arg5[%c0_6, %c0_7] : memref<32x256xbf16, #tpu.memory_space<vmem>>, vector<32x256xbf16>
    tpu.vector_store %arg5[%c0_6, %c0_7], %8 {strides = array<i32>} : memref<32x256xbf16, #tpu.memory_space<vmem>>, vector<32x256xbf16>,
    return
  }
  func.func @transform_0(%arg0: i32, %arg1: i32) -> (i32, i32) {
    %c0_i32 = arith.constant 0 : i32
    %c0_i32_0 = arith.constant 0 : i32
    return %arg0, %c0_i32 : i32, i32
  }
  func.func @transform_1(%arg0: i32, %arg1: i32) -> (i32, i32) {
    %c0_i32 = arith.constant 0 : i32
    %c0_i32_0 = arith.constant 0 : i32
    return %c0_i32, %arg1 : i32, i32
  }
  func.func @transform_2(%arg0: i32, %arg1: i32) -> (i32, i32) {
    %c0_i32 = arith.constant 0 : i32
    %c0_i32_0 = arith.constant 0 : i32
    return %c0_i32, %arg1 : i32, i32
  }
  func.func @transform_3(%arg0: i32, %arg1: i32) -> (i32, i32) {
    %c0_i32 = arith.constant 0 : i32
    return %arg0, %arg1 : i32, i32
  }
}

module attributes {stable_mosaic.version = 11 : i64} {
  func.func @_mm_bias_act_kernel(%arg0: i32, %arg1: i32, %arg2: memref<32x2304xbf16, #tpu.memory_space<vmem>>, %arg3: memref<2304x256xbf16, #tpu.memory_space<vmem>>, %arg4: memref<1x256xf32, #tpu.memory_space<vmem>>, %arg5: memref<32x256xbf16, #tpu.memory_space<vmem>>) attributes {dimension_semantics = [#tpu.dimension_semantics<parallel>, #tpu.dimension_semantics<parallel>], iteration_bounds = array<i64: 1, 1>, scalar_prefetch = 0 : i64, scratch_operands = 0 : i64, tpu.core_type = #tpu.core_type<tc>, window_params = [{transform_indices = @transform_0, window_bounds = array<i64: 32, 2304>}, {transform_indices = @transform_1, window_bounds = array<i64: 2304, 256>}, {transform_indices = @transform_2, window_bounds = array<i64: 1, 256>}, {transform_indices = @transform_3, window_bounds = array<i64: 32, 256>}]} {
    %c0 = arith.constant 0 : index
    %c0_0 = arith.constant 0 : index
    %0 = vector.load %arg2[%c0, %c0_0] : memref<32x2304xbf16, #tpu.memory_space<vmem>>, vector<32x2304xbf16>
    %c0_1 = arith.constant 0 : index
    %c0_2 = arith.constant 0 : index
    %1 = vector.load %arg3[%c0_1, %c0_2] : memref<2304x256xbf16, #tpu.memory_space<vmem>>, vector<2304x256xbf16>
    %cst = arith.constant dense<0.000000e+00> : vector<32x256xf32>
    %2 = tpu.matmul %0, %1, %cst {dimension_numbers = #tpu.dot_dimension_numbers<[1], [0], [0], [1], [0, 0, 1, 1], [], []>} : vector<32x2304xbf16>, vector<2304x256xbf16>, vector<32x256xf32> -> vector<32x256xf32>
    %c0_3 = arith.constant 0 : index
    %c0_4 = arith.constant 0 : index
    %3 = vector.load %arg4[%c0_3, %c0_4] : memref<1x256xf32, #tpu.memory_space<vmem>>, vector<1x256xf32>
    %4 = vector.broadcast %3 : vector<1x256xf32> to vector<32x256xf32>
    %5 = arith.addf %2, %4 : vector<32x256xf32>
    %cst_5 = arith.constant 0.000000e+00 : f32
    %6 = vector.broadcast %cst_5 : f32 to vector<32x256xf32>
    %7 = arith.maximumf %5, %6 : vector<32x256xf32>
    %8 = arith.truncf %7 : vector<32x256xf32> to vector<32x256xbf16>
    %c0_6 = arith.constant 0 : index
    %c0_7 = arith.constant 0 : index
    %9 = vector.load %arg5[%c0_6, %c0_7] : memref<32x256xbf16, #tpu.memory_space<vmem>>, vector<32x256xbf16>
    tpu.vector_store %arg5[%c0_6, %c0_7], %8 {strides = array<i32>} : memref<32x256xbf16, #tpu.memory_space<vmem>>, vector<32x256xbf16>,
    return
  }
  func.func @transform_0(%arg0: i32, %arg1: i32) -> (i32, i32) {
    %c0_i32 = arith.constant 0 : i32
    %c0_i32_0 = arith.constant 0 : i32
    return %arg0, %c0_i32 : i32, i32
  }
  func.func @transform_1(%arg0: i32, %arg1: i32) -> (i32, i32) {
    %c0_i32 = arith.constant 0 : i32
    %c0_i32_0 = arith.constant 0 : i32
    return %c0_i32, %arg1 : i32, i32
  }
  func.func @transform_2(%arg0: i32, %arg1: i32) -> (i32, i32) {
    %c0_i32 = arith.constant 0 : i32
    %c0_i32_0 = arith.constant 0 : i32
    return %c0_i32, %arg1 : i32, i32
  }
  func.func @transform_3(%arg0: i32, %arg1: i32) -> (i32, i32) {
    %c0_i32 = arith.constant 0 : i32
    return %arg0, %arg1 : i32, i32
  }
}

module attributes {stable_mosaic.version = 11 : i64} {
  func.func @_fused_head_kernel(%arg0: i32, %arg1: memref<16x256xbf16, #tpu.memory_space<vmem>>, %arg2: memref<256x1024xbf16, #tpu.memory_space<vmem>>, %arg3: memref<1x1024xf32, #tpu.memory_space<vmem>>, %arg4: memref<1024x512xbf16, #tpu.memory_space<vmem>>, %arg5: memref<1x512xf32, #tpu.memory_space<vmem>>, %arg6: memref<512x128xbf16, #tpu.memory_space<vmem>>, %arg7: memref<1x128xf32, #tpu.memory_space<vmem>>, %arg8: memref<16x128xf32, #tpu.memory_space<vmem>>, %arg9: memref<16x512xf32, #tpu.memory_space<vmem>>) attributes {dimension_semantics = [#tpu.dimension_semantics<arbitrary>], iteration_bounds = array<i64: 1>, scalar_prefetch = 0 : i64, scratch_operands = 0 : i64, tpu.core_type = #tpu.core_type<tc>, window_params = [{pipeline_mode = #tpu.pipeline_mode<synchronous>, transform_indices = @transform_0, window_bounds = array<i64: 16, 256>}, {pipeline_mode = #tpu.pipeline_mode<synchronous>, transform_indices = @transform_1, window_bounds = array<i64: 256, 1024>}, {pipeline_mode = #tpu.pipeline_mode<synchronous>, transform_indices = @transform_2, window_bounds = array<i64: 1, 1024>}, {pipeline_mode = #tpu.pipeline_mode<synchronous>, transform_indices = @transform_3, window_bounds = array<i64: 1024, 512>}, {pipeline_mode = #tpu.pipeline_mode<synchronous>, transform_indices = @transform_4, window_bounds = array<i64: 1, 512>}, {pipeline_mode = #tpu.pipeline_mode<synchronous>, transform_indices = @transform_5, window_bounds = array<i64: 512, 128>}, {pipeline_mode = #tpu.pipeline_mode<synchronous>, transform_indices = @transform_6, window_bounds = array<i64: 1, 128>}, {pipeline_mode = #tpu.pipeline_mode<synchronous>, transform_indices = @transform_7, window_bounds = array<i64: 16, 128>}, {pipeline_mode = #tpu.pipeline_mode<synchronous>, transform_indices = @transform_8, window_bounds = array<i64: 16, 512>}]} {
    %c0 = arith.constant 0 : index
    %c0_0 = arith.constant 0 : index
    %0 = vector.load %arg1[%c0, %c0_0] : memref<16x256xbf16, #tpu.memory_space<vmem>>, vector<16x256xbf16>
    %c0_1 = arith.constant 0 : index
    %c0_2 = arith.constant 0 : index
    %1 = vector.load %arg2[%c0_1, %c0_2] : memref<256x1024xbf16, #tpu.memory_space<vmem>>, vector<256x1024xbf16>
    %cst = arith.constant dense<0.000000e+00> : vector<16x1024xf32>
    %2 = tpu.matmul %0, %1, %cst {dimension_numbers = #tpu.dot_dimension_numbers<[1], [0], [0], [1], [0, 0, 1, 1], [], []>} : vector<16x256xbf16>, vector<256x1024xbf16>, vector<16x1024xf32> -> vector<16x1024xf32>
    %c0_3 = arith.constant 0 : index
    %c0_4 = arith.constant 0 : index
    %3 = vector.load %arg3[%c0_3, %c0_4] : memref<1x1024xf32, #tpu.memory_space<vmem>>, vector<1x1024xf32>
    %4 = vector.broadcast %3 : vector<1x1024xf32> to vector<16x1024xf32>
    %5 = arith.addf %2, %4 : vector<16x1024xf32>
    %6 = arith.negf %5 : vector<16x1024xf32>
    %7 = math.exp %6 : vector<16x1024xf32>
    %cst_5 = arith.constant 1.000000e+00 : f32
    %8 = vector.broadcast %cst_5 : f32 to vector<16x1024xf32>
    %9 = arith.addf %8, %7 : vector<16x1024xf32>
    %10 = arith.divf %8, %9 : vector<16x1024xf32>
    %11 = arith.truncf %10 : vector<16x1024xf32> to vector<16x1024xbf16>
    %c0_6 = arith.constant 0 : index
    %c0_7 = arith.constant 0 : index
    %12 = vector.load %arg4[%c0_6, %c0_7] : memref<1024x512xbf16, #tpu.memory_space<vmem>>, vector<1024x512xbf16>
    %cst_8 = arith.constant dense<0.000000e+00> : vector<16x512xf32>
    %13 = tpu.matmul %11, %12, %cst_8 {dimension_numbers = #tpu.dot_dimension_numbers<[1], [0], [0], [1], [0, 0, 1, 1], [], []>} : vector<16x1024xbf16>, vector<1024x512xbf16>, vector<16x512xf32> -> vector<16x512xf32>
    %c0_9 = arith.constant 0 : index
    %c0_10 = arith.constant 0 : index
    %14 = vector.load %arg5[%c0_9, %c0_10] : memref<1x512xf32, #tpu.memory_space<vmem>>, vector<1x512xf32>
    %15 = vector.broadcast %14 : vector<1x512xf32> to vector<16x512xf32>
    %16 = arith.addf %13, %15 : vector<16x512xf32>
    %17 = arith.negf %16 : vector<16x512xf32>
    %18 = math.exp %17 : vector<16x512xf32>
    %cst_11 = arith.constant 1.000000e+00 : f32
    %19 = vector.broadcast %cst_11 : f32 to vector<16x512xf32>
    %20 = arith.addf %19, %18 : vector<16x512xf32>
    %21 = arith.divf %19, %20 : vector<16x512xf32>
    %c0_12 = arith.constant 0 : index
    %c0_13 = arith.constant 0 : index
    %22 = vector.load %arg9[%c0_12, %c0_13] : memref<16x512xf32, #tpu.memory_space<vmem>>, vector<16x512xf32>
    tpu.vector_store %arg9[%c0_12, %c0_13], %21 {strides = array<i32>} : memref<16x512xf32, #tpu.memory_space<vmem>>, vector<16x512xf32>,
    %23 = arith.truncf %21 : vector<16x512xf32> to vector<16x512xbf16>
    %c0_14 = arith.constant 0 : index
    %c0_15 = arith.constant 0 : index
    %24 = vector.load %arg6[%c0_14, %c0_15] : memref<512x128xbf16, #tpu.memory_space<vmem>>, vector<512x128xbf16>
    %cst_16 = arith.constant dense<0.000000e+00> : vector<16x128xf32>
    %25 = tpu.matmul %23, %24, %cst_16 {dimension_numbers = #tpu.dot_dimension_numbers<[1], [0], [0], [1], [0, 0, 1, 1], [], []>} : vector<16x512xbf16>, vector<512x128xbf16>, vector<16x128xf32> -> vector<16x128xf32>
    %c0_17 = arith.constant 0 : index
    %c0_18 = arith.constant 0 : index
    %26 = vector.load %arg7[%c0_17, %c0_18] : memref<1x128xf32, #tpu.memory_space<vmem>>, vector<1x128xf32>
    %27 = vector.broadcast %26 : vector<1x128xf32> to vector<16x128xf32>
    %28 = arith.addf %25, %27 : vector<16x128xf32>
    %c0_19 = arith.constant 0 : index
    %c0_20 = arith.constant 0 : index
    %29 = vector.load %arg8[%c0_19, %c0_20] : memref<16x128xf32, #tpu.memory_space<vmem>>, vector<16x128xf32>
    tpu.vector_store %arg8[%c0_19, %c0_20], %28 {strides = array<i32>} : memref<16x128xf32, #tpu.memory_space<vmem>>, vector<16x128xf32>,
    return
  }
  func.func @transform_0(%arg0: i32) -> (i32, i32) {
    %c0_i32 = arith.constant 0 : i32
    %c0_i32_0 = arith.constant 0 : i32
    %c0_i32_1 = arith.constant 0 : i32
    return %c0_i32, %c0_i32_0 : i32, i32
  }
  func.func @transform_1(%arg0: i32) -> (i32, i32) {
    %c0_i32 = arith.constant 0 : i32
    %c0_i32_0 = arith.constant 0 : i32
    %c0_i32_1 = arith.constant 0 : i32
    return %c0_i32, %c0_i32_0 : i32, i32
  }
  func.func @transform_2(%arg0: i32) -> (i32, i32) {
    %c0_i32 = arith.constant 0 : i32
    %c0_i32_0 = arith.constant 0 : i32
    %c0_i32_1 = arith.constant 0 : i32
    return %c0_i32, %c0_i32_0 : i32, i32
  }
  func.func @transform_3(%arg0: i32) -> (i32, i32) {
    %c0_i32 = arith.constant 0 : i32
    %c0_i32_0 = arith.constant 0 : i32
    %c0_i32_1 = arith.constant 0 : i32
    return %c0_i32, %c0_i32_0 : i32, i32
  }
  func.func @transform_4(%arg0: i32) -> (i32, i32) {
    %c0_i32 = arith.constant 0 : i32
    %c0_i32_0 = arith.constant 0 : i32
    %c0_i32_1 = arith.constant 0 : i32
    return %c0_i32, %c0_i32_0 : i32, i32
  }
  func.func @transform_5(%arg0: i32) -> (i32, i32) {
    %c0_i32 = arith.constant 0 : i32
    %c0_i32_0 = arith.constant 0 : i32
    %c0_i32_1 = arith.constant 0 : i32
    return %c0_i32, %c0_i32_0 : i32, i32
  }
  func.func @transform_6(%arg0: i32) -> (i32, i32) {
    %c0_i32 = arith.constant 0 : i32
    %c0_i32_0 = arith.constant 0 : i32
    %c0_i32_1 = arith.constant 0 : i32
    return %c0_i32, %c0_i32_0 : i32, i32
  }
  func.func @transform_7(%arg0: i32) -> (i32, i32) {
    %c0_i32 = arith.constant 0 : i32
    %c0_i32_0 = arith.constant 0 : i32
    %c0_i32_1 = arith.constant 0 : i32
    return %c0_i32, %c0_i32_0 : i32, i32
  }
  func.func @transform_8(%arg0: i32) -> (i32, i32) {
    %c0_i32 = arith.constant 0 : i32
    %c0_i32_0 = arith.constant 0 : i32
    %c0_i32_1 = arith.constant 0 : i32
    return %c0_i32, %c0_i32_0 : i32, i32
  }
}

</mosaic_0001>

<bundles_post_ra>
// kernel: net_forward.6
= control target key start
LH: loop header
LB: loop body
LE: loop exit
PB: predicated region body
PF: predicated region fallthrough
CT: control target
= control target key end

     0   :  { %s1966_s12 = smov 0   ;;  %s1968_s13 = smov 0   ;;  %s2210_s0 = inlined_call_operand.vmem [shape: bf16[512,384], index: 0, kind: input, shape index: {}]   ;;  %s2211_s1 = inlined_call_operand.vmem [shape: bf16[384,128], index: 1, kind: input, shape index: {}]   ;;  %s2212_s2 = inlined_call_operand.vmem [shape: f32[1,128], index: 2, kind: input, shape index: {}]   ;;  %s2213_s3 = inlined_call_operand.vmem [shape: bf16[512,128], index: 3, kind: output, shape index: {}]  }
   0x1   :  { %s1970_s14 = smov 0  }
   0x2 LB: > { %s25_s15 = sadd.s32 1, %s1940_s13  ;;  %p1370_p0 = scmp.ge.s32.totalorder %s1944_s14, 1  ;;  %s1944_s14 = sphi %s1970_s14, %s13_s14   ;;  %s1940_s13 = sphi %s1968_s13, %s2215_s13   ;;  %s1936_s12 = sphi %s1966_s12, %s2214_s12  }
   0x3   : > { %p27_p1 = scmp.ge.s32.totalorder %s25_s15, 2  ;;  %p170_p2 = scmp.lt.s32.totalorder %s1944_s14, 3 }
   0x5   : > { %s2217_s15 = smov (%p27_p1, %s25_s15), 0  ;;  %p171_p3 = pnand %p1370_p0, %p170_p2 }
   0x6   : > { %v1834_v0 = vld [vmem:[%s2211_s1 + $0x40] sm:$0xff] (!%p171_p3)   ;;  %s1371_s18 = sshll.u32 (!%p171_p3), %s1936_s12, 5  ;;  %v1836_v2 = vld [vmem:[%s2211_s1 + $0x48] sm:$0xff] (!%p171_p3)   ;;  %v1838_v4 = vld [vmem:[%s2211_s1 + $0x50] sm:$0xff] (!%p171_p3)  }
   0x7   : > { %174 = sbr.rel (%p171_p3) target bundleno = 353 (0x161), region = 32  ;;  %v1835_v1 = vld [vmem:[%s2211_s1] sm:$0xff] (!%p171_p3)   ;;  %1609 = vmatprep.subr.bf16.mxu0 (!%p171_p3), %v1834_v0  ;;  %1793 = vmatprep.subr.bf16.mxu1 (!%p171_p3), %v1834_v0  ;;  %p206_p4 = scmp.lt.s32.totalorder (!%p171_p3), %s1371_s18, 63  ;;  %v1837_v3 = vld [vmem:[%s2211_s1 + $0x8] sm:$0xff] (!%p171_p3)   ;;  %v1839_v5 = vld [vmem:[%s2211_s1 + $0x10] sm:$0xff] (!%p171_p3)  }
   0x8   : > { %1610 = vmatpush3.bf16.msra.mxu0 (!%p171_p3), %v1835_v1  ;;  %1801 = vmatpush3.bf16.msra.mxu1 (!%p171_p3), %v1835_v1  ;;  %v1840_v6 = vld [vmem:[%s2211_s1 + $0x58] sm:$0xff] (!%p171_p3)   ;;  %v1842_v8 = vld [vmem:[%s2211_s1 + $0x60] sm:$0xff] (!%p171_p3)   ;;  %v1844_v10 = vld [vmem:[%s2211_s1 + $0x68] sm:$0xff] (!%p171_p3)  }
   0x9   : > { %1611 = vmatprep.subr.bf16.mxu0 (!%p171_p3), %v1836_v2  ;;  %1794 = vmatprep.subr.bf16.mxu1 (!%p171_p3), %v1836_v2  ;;  %v1841_v7 = vld [vmem:[%s2211_s1 + $0x18] sm:$0xff] (!%p171_p3)   ;;  %v1843_v9 = vld [vmem:[%s2211_s1 + $0x20] sm:$0xff] (!%p171_p3)   ;;  %v1845_v13 = vld [vmem:[%s2211_s1 + $0x28] sm:$0xff] (!%p171_p3)  }
   0xa   : > { %v1846_v14 = vld [vmem:[%s2211_s1 + $0x70] sm:$0xff] (!%p171_p3)   ;;  %v1848_v16 = vld [vmem:[%s2211_s1 + $0x78] sm:$0xff] (!%p171_p3)   ;;  %v1856_v18 = vld [vmem:[%s2211_s1 + $0x80] sm:$0xff] (!%p171_p3)  }
   0xb   : > { %v1847_v15 = vld [vmem:[%s2211_s1 + $0x30] sm:$0xff] (!%p171_p3)   ;;  %v1849_v17 = vld [vmem:[%s2211_s1 + $0x38] sm:$0xff] (!%p171_p3)   ;;  %v1857_v22 = vld [vmem:[%s2211_s1 + $0x88] sm:$0xff] (!%p171_p3)  }
   0xc   : > { %1612 = vmatpush3.bf16.msra.mxu0 (!%p171_p3), %v1837_v3  ;;  %1802 = vmatpush3.bf16.msra.mxu1 (!%p171_p3), %v1837_v3  ;;  %v1864_v25 = vld [vmem:[%s2211_s1 + $0x90] sm:$0xff] (!%p171_p3)   ;;  %v1865_v27 = vld [vmem:[%s2211_s1 + $0x98] sm:$0xff] (!%p171_p3)   ;;  %v1872_v30 = vld [vmem:[%s2211_s1 + $0xa0] sm:$0xff] (!%p171_p3)  }
   0xd   : > { %1613 = vmatprep.subr.bf16.mxu0 (!%p171_p3), %v1838_v4  ;;  %1795 = vmatprep.subr.bf16.mxu1 (!%p171_p3), %v1838_v4  ;;  %v1873_v33 = vld [vmem:[%s2211_s1 + $0xa8] sm:$0xff] (!%p171_p3)   ;;  %v1880_v36 = vld [vmem:[%s2211_s1 + $0xb0] sm:$0xff] (!%p171_p3)   ;;  %v1881_v40 = vld [vmem:[%s2211_s1 + $0xb8] sm:$0xff] (!%p171_p3)  }
   0xe   : > { %s2219_s18 = smov (!%p206_p4, %s1371_s18), 63 }
   0xf   : > { %s1809_s4 = smul.u32 12, %s2219_s18  ;;  %s1374_s25 = sshll.u32 %s2219_s18, 2 }
  0x10   : > { %1614 = vmatpush3.bf16.msra.mxu0 %v1839_v5  ;;  %1803 = vmatpush3.bf16.msra.mxu1 %v1839_v5  ;;  %s2141_s28 = scalar_lea.vmem %s2213_s3, %s1374_s25 }
  0x11   : > { %1615 = vmatprep.subr.bf16.mxu0 %v1840_v6  ;;  %1796 = vmatprep.subr.bf16.mxu1 %v1840_v6  ;;  %s2017_s11 = scalar_lea.vmem %s2210_s0, %s1809_s4 }
  0x12   : > { %v1852_v11 = vld [vmem:[%s2017_s11 + $0x4] ss:$12 sps:$4 sm:$0xff]   ;;  %v1850_v19 = vld [vmem:[%s2017_s11] ss:$12 sps:$4 sm:$0xff]   ;;  %v1858_v21 = vld [vmem:[%s2017_s11 + $0x1c] ss:$12 sps:$4 sm:$0xff]  }
  0x13   : > { %v1855_v12 = vld [vmem:[%s2017_s11 + $0x124] ss:$12 sps:$4 sm:$0xff]   ;;  %780 = vmatprep.mubr.bf16.mxu0 %v1852_v11  ;;  %v1853_v20 = vld [vmem:[%s2017_s11 + $0x120] ss:$12 sps:$4 sm:$0xff]   ;;  %v1860_v23 = vld [vmem:[%s2017_s11 + $0x13c] ss:$12 sps:$4 sm:$0xff]  }
  0x14   : > { %1616 = vmatpush3.bf16.msra.mxu0 %v1841_v7  ;;  %1804 = vmatpush3.bf16.msra.mxu1 %v1841_v7  ;;  %v1862_v24 = vld [vmem:[%s2017_s11 + $0x18] ss:$12 sps:$4 sm:$0xff]   ;;  %v1866_v28 = vld [vmem:[%s2017_s11 + $0x34] ss:$12 sps:$4 sm:$0xff]   ;;  %v1870_v31 = vld [vmem:[%s2017_s11 + $0x30] ss:$12 sps:$4 sm:$0xff]  }
  0x15   : > { %1617 = vmatprep.subr.bf16.mxu0 %v1842_v8  ;;  %1797 = vmatprep.subr.bf16.mxu1 %v1842_v8  ;;  %v1863_v26 = vld [vmem:[%s2017_s11 + $0x138] ss:$12 sps:$4 sm:$0xff]   ;;  %v1868_v29 = vld [vmem:[%s2017_s11 + $0x154] ss:$12 sps:$4 sm:$0xff]   ;;  %v1871_v32 = vld [vmem:[%s2017_s11 + $0x150] ss:$12 sps:$4 sm:$0xff]  }
  0x16   : > { %876 = vmatprep.mubr.bf16.mxu1 %v1855_v12  ;;  %v1874_v34 = vld [vmem:[%s2017_s11 + $0x4c] ss:$12 sps:$4 sm:$0xff]   ;;  %v1878_v37 = vld [vmem:[%s2017_s11 + $0x48] ss:$12 sps:$4 sm:$0xff]   ;;  %v1882_v39 = vld [vmem:[%s2017_s11 + $0x64] ss:$12 sps:$4 sm:$0xff]  }
  0x17   : > { %v1876_v35 = vld [vmem:[%s2017_s11 + $0x16c] ss:$12 sps:$4 sm:$0xff]   ;;  %v1879_v38 = vld [vmem:[%s2017_s11 + $0x168] ss:$12 sps:$4 sm:$0xff]   ;;  %v1891_v47 = vld [vmem:[%s2017_s11 + $0x50] ss:$12 sps:$4 sm:$0xff]  }
  0x18   : > { %1618 = vmatpush3.bf16.msra.mxu0 %v1843_v9  ;;  %1805 = vmatpush3.bf16.msra.mxu1 %v1843_v9  ;;  %v1884_v41 = vld [vmem:[%s2017_s11 + $0x8] ss:$12 sps:$4 sm:$0xff]   ;;  %v1885_v42 = vld [vmem:[%s2017_s11 + $0x60] ss:$12 sps:$4 sm:$0xff]   ;;  %v1889_v45 = vld [vmem:[%s2017_s11 + $0x38] ss:$12 sps:$4 sm:$0xff]  }
  0x19   : > { %1619 = vmatprep.subr.bf16.mxu0 %v1844_v10  ;;  %1798 = vmatprep.subr.bf16.mxu1 %v1844_v10  ;;  %v1886_v43 = vld [vmem:[%s2017_s11 + $0x20] ss:$12 sps:$4 sm:$0xff]   ;;  %v1887_v44 = vld [vmem:[%s2017_s11 + $0x7c] ss:$12 sps:$4 sm:$0xff]   ;;  %v1890_v46 = vld [vmem:[%s2017_s11 + $0x78] ss:$12 sps:$4 sm:$0xff]  }
  0x1a   : > { %v1892_v48 = vld [vmem:[%s2017_s11 + $0x94] ss:$12 sps:$4 sm:$0xff]   ;;  %v1895_v50 = vld [vmem:[%s2017_s11 + $0x90] ss:$12 sps:$4 sm:$0xff]   ;;  %v1897_v52 = vld [vmem:[%s2017_s11 + $0xac] ss:$12 sps:$4 sm:$0xff]  }
  0x1b   : > { %v1894_v49 = vld [vmem:[%s2017_s11 + $0x68] ss:$12 sps:$4 sm:$0xff]   ;;  %v1896_v51 = vld [vmem:[%s2017_s11 + $0x80] ss:$12 sps:$4 sm:$0xff]   ;;  %v1899_v53 = vld [vmem:[%s2017_s11 + $0x98] ss:$12 sps:$4 sm:$0xff]  }
  0x1c   : > { %1620 = vmatpush3.bf16.msra.mxu0 %v1845_v13  ;;  %1806 = vmatpush3.bf16.msra.mxu1 %v1845_v13  ;;  %v1900_v54 = vld [vmem:[%s2017_s11 + $0xa8] ss:$12 sps:$4 sm:$0xff]   ;;  %v1901_v55 = vld [vmem:[%s2017_s11 + $0xb0] ss:$12 sps:$4 sm:$0xff]   ;;  %v1905_v58 = vld [vmem:[%s2017_s11 + $0xc0] ss:$12 sps:$4 sm:$0xff]  }
  0x1d   : > { %1621 = vmatprep.subr.bf16.mxu0 %v1846_v14  ;;  %1799 = vmatprep.subr.bf16.mxu1 %v1846_v14  ;;  %v1902_v56 = vld [vmem:[%s2017_s11 + $0xc4] ss:$12 sps:$4 sm:$0xff]   ;;  %v1904_v57 = vld [vmem:[%s2017_s11 + $0xc8] ss:$12 sps:$4 sm:$0xff]   ;;  %v1906_v59 = vld [vmem:[%s2017_s11 + $0xe0] ss:$12 sps:$4 sm:$0xff]  }
  0x1e   : > { %v1907_v60 = vld [vmem:[%s2017_s11 + $0xdc] ss:$12 sps:$4 sm:$0xff]   ;;  %v1909_v61 = vld [vmem:[%s2017_s11 + $0xf8] ss:$12 sps:$4 sm:$0xff]   ;;  %v1912_v0 = vld [vmem:[%s2017_s11 + $0xf4] ss:$12 sps:$4 sm:$0xff]  }
  0x1f   : > { %v1910_v62 = vld [vmem:[%s2017_s11 + $0xd8] ss:$12 sps:$4 sm:$0xff]   ;;  %v1911_v63 = vld [vmem:[%s2017_s11 + $0x110] ss:$12 sps:$4 sm:$0xff]   ;;  %v1914_v1 = vld [vmem:[%s2017_s11 + $0x128] ss:$12 sps:$4 sm:$0xff]  }
  0x20   : > { %1622 = vmatpush3.bf16.msra.mxu0 %v1847_v15  ;;  %1807 = vmatpush3.bf16.msra.mxu1 %v1847_v15  ;;  %v1915_v2 = vld [vmem:[%s2017_s11 + $0xf0] ss:$12 sps:$4 sm:$0xff]   ;;  %v1916_v3 = vld [vmem:[%s2017_s11 + $0x140] ss:$12 sps:$4 sm:$0xff]   ;;  %v1919_v5 = vld [vmem:[%s2017_s11 + $0x158] ss:$12 sps:$4 sm:$0xff]  }
  0x21   : > { %1623 = vmatprep.subr.bf16.mxu0 %v1848_v16  ;;  %1800 = vmatprep.subr.bf16.mxu1 %v1848_v16  ;;  %v1917_v4 = vld [vmem:[%s2017_s11 + $0x10c] ss:$12 sps:$4 sm:$0xff]   ;;  %v1920_v6 = vld [vmem:[%s2017_s11 + $0x108] ss:$12 sps:$4 sm:$0xff]   ;;  %v1921_v7 = vld [vmem:[%s2017_s11 + $0x170] ss:$12 sps:$4 sm:$0xff]  }
  0x24   : > { %1624 = vmatpush3.bf16.msra.mxu0 %v1849_v17  ;;  %1808 = vmatpush3.bf16.msra.mxu1 %v1849_v17 }
  0x25   : > { %1745 = vmatprep.subr.bf16.mxu1 %v1856_v18 }
  0x27   : > { %781 = vmatmul.mubr.bf16.vlgmr.msra.gmra.mrb[0].mxu0 %v1850_v19  ;;  %877 = vmatmul.mubr.bf16.vlgmr.msra.gmra.mrb[0].mxu1 %v1853_v20 }
  0x28   : > { %1746 = vmatpush3.bf16.msra.mxu1 %v1856_v18  ;;  %788 = vmatprep.mubr.bf16.mxu0 %v1858_v21 }
  0x29   : > { %1747 = vmatprep.subr.bf16.mxu1 %v1857_v22  ;;  %884 = vmatprep.mubr.bf16.mxu1 %v1860_v23 }
  0x2c   : > { %1748 = vmatpush3.bf16.msra.mxu1 %v1857_v22 }
  0x2d   : > { %1749 = vmatprep.subr.bf16.mxu1 %v1864_v25 }
  0x2f   : > { %789 = vmatmul.mubr.bf16.gmra.mrb[4].mxu0 %v1862_v24  ;;  %885 = vmatmul.mubr.bf16.gmra.mrb[4].mxu1 %v1863_v26 }
  0x30   : > { %1750 = vmatpush3.bf16.msra.mxu1 %v1864_v25  ;;  %796 = vmatprep.mubr.bf16.mxu0 %v1866_v28 }
  0x31   : > { %1751 = vmatprep.subr.bf16.mxu1 %v1865_v27  ;;  %892 = vmatprep.mubr.bf16.mxu1 %v1868_v29 }
  0x34   : > { %1752 = vmatpush3.bf16.msra.mxu1 %v1865_v27 }
  0x35   : > { %1753 = vmatprep.subr.bf16.mxu1 %v1872_v30 }
  0x37   : > { %797 = vmatmul.mubr.bf16.gmra.mrb[8].mxu0 %v1870_v31  ;;  %893 = vmatmul.mubr.bf16.gmra.mrb[8].mxu1 %v1871_v32 }
  0x38   : > { %1754 = vmatpush3.bf16.msra.mxu1 %v1872_v30  ;;  %804 = vmatprep.mubr.bf16.mxu0 %v1874_v34 }
  0x39   : > { %1755 = vmatprep.subr.bf16.mxu1 %v1873_v33  ;;  %900 = vmatprep.mubr.bf16.mxu1 %v1876_v35 }
  0x3c   : > { %1756 = vmatpush3.bf16.msra.mxu1 %v1873_v33 }
  0x3d   : > { %1757 = vmatprep.subr.bf16.mxu1 %v1880_v36 }
  0x3f   : > { %805 = vmatmul.mubr.bf16.gmra.mrb[12].mxu0 %v1878_v37  ;;  %901 = vmatmul.mubr.bf16.gmra.mrb[12].mxu1 %v1879_v38 }
  0x40   : > { %1758 = vmatpush3.bf16.msra.mxu1 %v1880_v36  ;;  %812 = vmatprep.mubr.bf16.mxu0 %v1882_v39 }
  0x41   : > { %1759 = vmatprep.subr.bf16.mxu1 %v1881_v40  ;;  %1761 = vmatprep.mubr.bf16.mxu1 %v1884_v41 }
  0x44   : > { %1760 = vmatpush3.bf16.msra.mxu1 %v1881_v40 }
  0x47   : > { %813 = vmatmul.mubr.bf16.gmra.mrb[16].mxu0 %v1885_v42  ;;  %1762 = vmatmul.mubr.bf16.vlgmr.msra.gmra.mrb[16].mxu1 %v1886_v43 }
  0x48   : > { %820 = vmatprep.mubr.bf16.mxu0 %v1887_v44  ;;  %1765 = vmatprep.mubr.bf16.mxu1 %v1889_v45 }
  0x4f   : > { %821 = vmatmul.mubr.bf16.gmra.mrb[20].mxu0 %v1890_v46  ;;  %1766 = vmatmul.mubr.bf16.gmra.mrb[20].mxu1 %v1891_v47 }
  0x50   : > { %828 = vmatprep.mubr.bf16.mxu0 %v1892_v48  ;;  %1769 = vmatprep.mubr.bf16.mxu1 %v1894_v49 }
  0x57   : > { %829 = vmatmul.mubr.bf16.gmra.mrb[24].mxu0 %v1895_v50  ;;  %1770 = vmatmul.mubr.bf16.gmra.mrb[24].mxu1 %v1896_v51 }
  0x58   : > { %836 = vmatprep.mubr.bf16.mxu0 %v1897_v52  ;;  %1773 = vmatprep.mubr.bf16.mxu1 %v1899_v53 }
  0x5f   : > { %837 = vmatmul.mubr.bf16.gmra.mrb[28].mxu0 %v1900_v54  ;;  %1774 = vmatmul.mubr.bf16.gmra.mrb[28].mxu1 %v1901_v55 }
  0x60   : > { %844 = vmatprep.mubr.bf16.mxu0 %v1902_v56  ;;  %1777 = vmatprep.mubr.bf16.mxu1 %v1904_v57  ;;  %v2131_v56 = vld [vmem:[%s2212_s2] ss:$0 sm:$0xff] }
  0x67   : > { %845 = vmatmul.mubr.bf16.gmra.mrb[32].mxu0 %v1905_v58  ;;  %1778 = vmatmul.mubr.bf16.gmra.mrb[32].mxu1 %v1906_v59 }
  0x68   : > { %852 = vmatprep.mubr.bf16.mxu0 %v1907_v60  ;;  %1781 = vmatprep.mubr.bf16.mxu1 %v1909_v61 }
  0x6f   : > { %853 = vmatmul.mubr.bf16.gmra.mrb[36].mxu0 %v1910_v62  ;;  %1782 = vmatmul.mubr.bf16.gmra.mrb[36].mxu1 %v1911_v63 }
  0x70   : > { %860 = vmatprep.mubr.bf16.mxu0 %v1912_v0  ;;  %1785 = vmatprep.mubr.bf16.mxu1 %v1914_v1 }
  0x77   : > { %861 = vmatmul.mubr.bf16.gmra.mrb[40].mxu0 %v1915_v2  ;;  %1786 = vmatmul.mubr.bf16.gmra.mrb[40].mxu1 %v1916_v3 }
  0x78   : > { %868 = vmatprep.mubr.bf16.mxu0 %v1917_v4  ;;  %1789 = vmatprep.mubr.bf16.mxu1 %v1919_v5 }
  0x7f   : > { %869 = vmatmul.mubr.bf16.gmra.mrb[44].mxu0 %v1920_v6  ;;  %1790 = vmatmul.mubr.bf16.gmra.mrb[44].mxu1 %v1921_v7 }
  0xfa   : > { %v1625_v8 = vpop.f32.mrb[0].mxu0  ;;  %v1697_v9 = vpop.f32.mrb[0].mxu1 }
  0xfb   : > { %v1626_v10 = vpop.f32.mrb[1].mxu0  ;;  %v1698_v11 = vpop.f32.mrb[1].mxu1 }
  0xfc   : > { %v1627_v12 = vadd.f32 %v1626_v10, %v1625_v8  ;;  %v1628_v13 = vpop.f32.mrb[2].mxu0  ;;  %v2112_v14 = vadd.f32 %v1698_v11, %v1697_v9  ;;  %v1700_v15 = vpop.f32.mrb[2].mxu1 }
  0xfd   : > { %v1629_v16 = vpop.f32.mrb[3].mxu0  ;;  %v1701_v17 = vpop.f32.mrb[3].mxu1 }
  0xfe   : > { %v1630_v18 = vadd.f32 %v1629_v16, %v1628_v13  ;;  %v2114_v19 = vadd.f32 %v1701_v17, %v1700_v15  ;;  %v783_v60 = vadd.f32 %v1627_v12, %v2131_v56 }
 0x100   : > { %v786_v5 = vadd.f32 %v1630_v18, %v2131_v56 }
 0x102   : > { %v1631_v20 = vpop.f32.mrb[4].mxu0  ;;  %v1703_v21 = vpop.f32.mrb[4].mxu1 }
 0x103   : > { %v1632_v22 = vpop.f32.mrb[5].mxu0  ;;  %v1704_v23 = vpop.f32.mrb[5].mxu1 }
 0x104   : > { %v1633_v24 = vadd.f32 %v1632_v22, %v1631_v20  ;;  %v1634_v25 = vpop.f32.mrb[6].mxu0  ;;  %v2116_v26 = vadd.f32 %v1704_v23, %v1703_v21  ;;  %v1706_v27 = vpop.f32.mrb[6].mxu1 }
 0x105   : > { %v1635_v28 = vpop.f32.mrb[7].mxu0  ;;  %v1707_v29 = vpop.f32.mrb[7].mxu1 }
 0x106   : > { %v1636_v30 = vadd.f32 %v1635_v28, %v1634_v25  ;;  %v2118_v31 = vadd.f32 %v1707_v29, %v1706_v27  ;;  %v791_v57 = vadd.f32 %v1633_v24, %v2131_v56 }
 0x108   : > { %v794_v0 = vadd.f32 %v1636_v30, %v2131_v56 }
 0x10a   : > { %v1637_v32 = vpop.f32.mrb[8].mxu0  ;;  %v1709_v33 = vpop.f32.mrb[8].mxu1 }
 0x10b   : > { %v1638_v34 = vpop.f32.mrb[9].mxu0  ;;  %v1710_v35 = vpop.f32.mrb[9].mxu1 }
 0x10c   : > { %v1639_v36 = vadd.f32 %v1638_v34, %v1637_v32  ;;  %v1640_v37 = vpop.f32.mrb[10].mxu0  ;;  %v2120_v38 = vadd.f32 %v1710_v35, %v1709_v33  ;;  %v1712_v39 = vpop.f32.mrb[10].mxu1 }
 0x10d   : > { %v1641_v40 = vpop.f32.mrb[11].mxu0  ;;  %v1713_v41 = vpop.f32.mrb[11].mxu1 }
 0x10e   : > { %v1642_v42 = vadd.f32 %v1641_v40, %v1640_v37  ;;  %v2122_v43 = vadd.f32 %v1713_v41, %v1712_v39  ;;  %v799_v22 = vadd.f32 %v1639_v36, %v2131_v56 }
 0x110   : > { %v802_v33 = vadd.f32 %v1642_v42, %v2131_v56 }
 0x112   : > { %v1643_v44 = vpop.f32.mrb[12].mxu0  ;;  %v1715_v45 = vpop.f32.mrb[12].mxu1 }
 0x113   : > { %v1644_v46 = vpop.f32.mrb[13].mxu0  ;;  %v1716_v47 = vpop.f32.mrb[13].mxu1 }
 0x114   : > { %v1645_v48 = vadd.f32 %v1644_v46, %v1643_v44  ;;  %v1646_v49 = vpop.f32.mrb[14].mxu0  ;;  %v2124_v50 = vadd.f32 %v1716_v47, %v1715_v45  ;;  %v1718_v51 = vpop.f32.mrb[14].mxu1 }
 0x115   : > { %v1647_v52 = vpop.f32.mrb[15].mxu0  ;;  %v1719_v53 = vpop.f32.mrb[15].mxu1 }
 0x116   : > { %v1648_v54 = vadd.f32 %v1647_v52, %v1646_v49  ;;  %v2126_v55 = vadd.f32 %v1719_v53, %v1718_v51  ;;  %v807_v17 = vadd.f32 %v1645_v48, %v2131_v56 }
 0x118   : > { %v810_v27 = vadd.f32 %v1648_v54, %v2131_v56 }
 0x11a   : > { %v1649_v58 = vpop.f32.mrb[16].mxu0  ;;  %v1763_v59 = vpop.f32.mrb[16].mxu1 }
 0x11b   : > { %v952_v61 = vadd.f32 %v1763_v59, %v791_v57  ;;  %v1650_v62 = vpop.f32.mrb[17].mxu0  ;;  %v943_v63 = vpop.f32.mrb[17].mxu1 }
 0x11c   : > { %v1651_v1 = vadd.f32 %v1650_v62, %v1649_v58  ;;  %v944_v2 = vadd.f32 %v943_v63, %v783_v60  ;;  %v1652_v3 = vpop.f32.mrb[18].mxu0  ;;  %v1764_v4 = vpop.f32.mrb[18].mxu1 }
 0x11d   : > { %v955_v6 = vadd.f32 %v1764_v4, %v794_v0  ;;  %v1653_v7 = vpop.f32.mrb[19].mxu0  ;;  %v946_v8 = vpop.f32.mrb[19].mxu1  ;;  %v1072_v11 = vmax.f32 %v952_v61, 0.0 }
 0x11e   : > { %v1654_v9 = vadd.f32 %v1653_v7, %v1652_v3  ;;  %v947_v10 = vadd.f32 %v946_v8, %v786_v5  ;;  %v1070_v12 = vmax.f32 %v944_v2, 0.0  ;;  %v815_v52 = vadd.f32 %v1651_v1, %v2131_v56 }
 0x11f   : > { %v1073_v13 = vmax.f32 %v955_v6, 0.0 }
 0x120   : > { %v1071_v15 = vmax.f32 %v947_v10, 0.0  ;;  %v818_v62 = vadd.f32 %v1654_v9, %v2131_v56 }
 0x121   : > { %v1522_v16 = vpack.c.bf16 %v1073_v13, %v1072_v11 }
 0x122   : > { %v1517_v18 = vpack.c.bf16 %v1071_v15, %v1070_v12  ;;  %v1655_v20 = vpop.f32.mrb[20].mxu0  ;;  %v1767_v21 = vpop.f32.mrb[20].mxu1 }
 0x123   : > { %1594 = vst [vmem:[%s2141_s28 + $0x8] sm:$0xff] %v1522_v16   ;;  %v968_v23 = vadd.f32 %v1767_v21, %v807_v17  ;;  %v1656_v24 = vpop.f32.mrb[21].mxu0  ;;  %v959_v25 = vpop.f32.mrb[21].mxu1 }
 0x124   : > { %1518 = vst [vmem:[%s2141_s28] sm:$0xff] %v1517_v18   ;;  %v1657_v28 = vadd.f32 %v1656_v24, %v1655_v20  ;;  %v960_v29 = vadd.f32 %v959_v25, %v799_v22  ;;  %v1658_v30 = vpop.f32.mrb[22].mxu0  ;;  %v1768_v32 = vpop.f32.mrb[22].mxu1 }
 0x125   : > { %v971_v34 = vadd.f32 %v1768_v32, %v810_v27  ;;  %v1659_v35 = vpop.f32.mrb[23].mxu0  ;;  %v962_v37 = vpop.f32.mrb[23].mxu1  ;;  %v1076_v36 = vmax.f32 %v968_v23, 0.0 }
 0x126   : > { %v1660_v39 = vadd.f32 %v1659_v35, %v1658_v30  ;;  %v963_v40 = vadd.f32 %v962_v37, %v802_v33  ;;  %v1074_v44 = vmax.f32 %v960_v29, 0.0  ;;  %v823_v47 = vadd.f32 %v1657_v28, %v2131_v56 }
 0x127   : > { %v1077_v41 = vmax.f32 %v971_v34, 0.0 }
 0x128   : > { %v1075_v45 = vmax.f32 %v963_v40, 0.0  ;;  %v826_v57 = vadd.f32 %v1660_v39, %v2131_v56 }
 0x129   : > { %v1532_v46 = vpack.c.bf16 %v1077_v41, %v1076_v36 }
 0x12a   : > { %v1527_v48 = vpack.c.bf16 %v1075_v45, %v1074_v44  ;;  %v1661_v49 = vpop.f32.mrb[24].mxu0  ;;  %v1771_v51 = vpop.f32.mrb[24].mxu1 }
 0x12b   : > { %1596 = vst [vmem:[%s2141_s28 + $0x18] sm:$0xff] %v1532_v46   ;;  %v984_v42 = vadd.f32 %v1771_v51, %v823_v47  ;;  %v1662_v53 = vpop.f32.mrb[25].mxu0  ;;  %v975_v54 = vpop.f32.mrb[25].mxu1 }
 0x12c   : > { %1595 = vst [vmem:[%s2141_s28 + $0x10] sm:$0xff] %v1527_v48   ;;  %v1663_v58 = vadd.f32 %v1662_v53, %v1661_v49  ;;  %v976_v59 = vadd.f32 %v975_v54, %v815_v52  ;;  %v1664_v60 = vpop.f32.mrb[26].mxu0  ;;  %v1772_v61 = vpop.f32.mrb[26].mxu1 }
 0x12d   : > { %v987_v63 = vadd.f32 %v1772_v61, %v826_v57  ;;  %v1665_v0 = vpop.f32.mrb[27].mxu0  ;;  %v978_v2 = vpop.f32.mrb[27].mxu1  ;;  %v1080_v4 = vmax.f32 %v984_v42, 0.0 }
 0x12e   : > { %v1666_v3 = vadd.f32 %v1665_v0, %v1664_v60  ;;  %v979_v1 = vadd.f32 %v978_v2, %v818_v62  ;;  %v1078_v6 = vmax.f32 %v976_v59, 0.0  ;;  %v831_v12 = vadd.f32 %v1663_v58, %v2131_v56 }
 0x12f   : > { %v1081_v5 = vmax.f32 %v987_v63, 0.0 }
 0x130   : > { %v1079_v7 = vmax.f32 %v979_v1, 0.0  ;;  %v834_v21 = vadd.f32 %v1666_v3, %v2131_v56 }
 0x131   : > { %v1542_v8 = vpack.c.bf16 %v1081_v5, %v1080_v4 }
 0x132   : > { %v1537_v10 = vpack.c.bf16 %v1079_v7, %v1078_v6  ;;  %v1667_v11 = vpop.f32.mrb[28].mxu0  ;;  %v1775_v13 = vpop.f32.mrb[28].mxu1 }
 0x133   : > { %1598 = vst [vmem:[%s2141_s28 + $0x28] sm:$0xff] %v1542_v8   ;;  %v1668_v15 = vpop.f32.mrb[29].mxu0  ;;  %v991_v16 = vpop.f32.mrb[29].mxu1 }
 0x134   : > { %1597 = vst [vmem:[%s2141_s28 + $0x20] sm:$0xff] %v1537_v10   ;;  %v1669_v9 = vadd.f32 %v1668_v15, %v1667_v11  ;;  %v992_v17 = vadd.f32 %v991_v16, %v831_v12  ;;  %v1670_v18 = vpop.f32.mrb[30].mxu0  ;;  %v1776_v20 = vpop.f32.mrb[30].mxu1  ;;  %v887_v10 = vadd.f32 %v2116_v26, %v2131_v56  ;;  %v879_v15 = vadd.f32 %v2112_v14, %v2131_v56 }
 0x135   : > { %v1671_v22 = vpop.f32.mrb[31].mxu0  ;;  %v994_v23 = vpop.f32.mrb[31].mxu1 }
 0x136   : > { %v839_v24 = vadd.f32 %v1669_v9, %v2131_v56  ;;  %v1672_v25 = vadd.f32 %v1671_v22, %v1670_v18  ;;  %v995_v27 = vadd.f32 %v994_v23, %v834_v21  ;;  %v1082_v29 = vmax.f32 %v992_v17, 0.0 }
 0x137   : > { %v890_v18 = vadd.f32 %v2118_v31, %v2131_v56 }
 0x138   : > { %v1000_v28 = vadd.f32 %v1775_v13, %v839_v24  ;;  %v842_v30 = vadd.f32 %v1672_v25, %v2131_v56  ;;  %v1083_v32 = vmax.f32 %v995_v27, 0.0 }
 0x13a   : > { %v1003_v33 = vadd.f32 %v1776_v20, %v842_v30  ;;  %v1547_v34 = vpack.c.bf16 %v1083_v32, %v1082_v29  ;;  %v1673_v35 = vpop.f32.mrb[32].mxu0  ;;  %v1779_v37 = vpop.f32.mrb[32].mxu1  ;;  %v1084_v36 = vmax.f32 %v1000_v28, 0.0  ;;  %v882_v28 = vadd.f32 %v2114_v19, %v2131_v56 }
 0x13b   : > { %v1674_v39 = vpop.f32.mrb[33].mxu0  ;;  %v1007_v40 = vpop.f32.mrb[33].mxu1 }
 0x13c   : > { %v1085_v41 = vmax.f32 %v1003_v33, 0.0  ;;  %1599 = vst [vmem:[%s2141_s28 + $0x30] sm:$0xff] %v1547_v34   ;;  %v1675_v44 = vadd.f32 %v1674_v39, %v1673_v35  ;;  %v1676_v45 = vpop.f32.mrb[34].mxu0  ;;  %v1780_v46 = vpop.f32.mrb[34].mxu1 }
 0x13d   : > { %v1677_v47 = vpop.f32.mrb[35].mxu0  ;;  %v1010_v48 = vpop.f32.mrb[35].mxu1 }
 0x13e   : > { %v1552_v49 = vpack.c.bf16 %v1085_v41, %v1084_v36  ;;  %v847_v51 = vadd.f32 %v1675_v44, %v2131_v56  ;;  %v1678_v52 = vadd.f32 %v1677_v47, %v1676_v45  ;;  %v903_v41 = vadd.f32 %v2124_v50, %v2131_v56 }
 0x140   : > { %1600 = vst [vmem:[%s2141_s28 + $0x38] sm:$0xff] %v1552_v49   ;;  %v1008_v42 = vadd.f32 %v1007_v40, %v847_v51  ;;  %v850_v53 = vadd.f32 %v1678_v52, %v2131_v56  ;;  %v906_v52 = vadd.f32 %v2126_v55, %v2131_v56 }
 0x142   : > { %v1011_v54 = vadd.f32 %v1010_v48, %v850_v53  ;;  %v1679_v57 = vpop.f32.mrb[36].mxu0  ;;  %v2165_v58 = vpop.f32.mrb[36].mxu1  ;;  %v1086_v61 = vmax.f32 %v1008_v42, 0.0 }
 0x143   : > { %v1680_v59 = vpop.f32.mrb[37].mxu0  ;;  %v1023_v60 = vpop.f32.mrb[37].mxu1 }
 0x144   : > { %v1087_v62 = vmax.f32 %v1011_v54, 0.0  ;;  %v1681_v63 = vadd.f32 %v1680_v59, %v1679_v57  ;;  %v1682_v0 = vpop.f32.mrb[38].mxu0  ;;  %v2167_v2 = vpop.f32.mrb[38].mxu1 }
 0x145   : > { %v1683_v3 = vpop.f32.mrb[39].mxu0  ;;  %v1026_v1 = vpop.f32.mrb[39].mxu1 }
 0x146   : > { %v1557_v4 = vpack.c.bf16 %v1087_v62, %v1086_v61  ;;  %v855_v5 = vadd.f32 %v1681_v63, %v2131_v56  ;;  %v1684_v6 = vadd.f32 %v1683_v3, %v1682_v0 }
 0x148   : > { %1601 = vst [vmem:[%s2141_s28 + $0x40] sm:$0xff] %v1557_v4   ;;  %v1016_v7 = vadd.f32 %v1779_v37, %v855_v5  ;;  %v858_v8 = vadd.f32 %v1684_v6, %v2131_v56 }
 0x14a   : > { %v1019_v11 = vadd.f32 %v1780_v46, %v858_v8  ;;  %v1685_v13 = vpop.f32.mrb[40].mxu0  ;;  %v1787_v12 = vpop.f32.mrb[40].mxu1  ;;  %v1088_v20 = vmax.f32 %v1016_v7, 0.0  ;;  %v895_v46 = vadd.f32 %v2120_v38, %v2131_v56  ;;  %v898_v38 = vadd.f32 %v2122_v43, %v2131_v56 }
 0x14b   : > { %v1048_v16 = vadd.f32 %v1787_v12, %v887_v10  ;;  %v1686_v9 = vpop.f32.mrb[41].mxu0  ;;  %v1039_v17 = vpop.f32.mrb[41].mxu1 }
 0x14c   : > { %v1089_v21 = vmax.f32 %v1019_v11, 0.0  ;;  %v1687_v22 = vadd.f32 %v1686_v9, %v1685_v13  ;;  %v1040_v23 = vadd.f32 %v1039_v17, %v879_v15  ;;  %v1688_v24 = vpop.f32.mrb[42].mxu0  ;;  %v1788_v25 = vpop.f32.mrb[42].mxu1 }
 0x14d   : > { %v1051_v26 = vadd.f32 %v1788_v25, %v890_v18  ;;  %v1689_v27 = vpop.f32.mrb[43].mxu0  ;;  %v1042_v29 = vpop.f32.mrb[43].mxu1  ;;  %v1096_v33 = vmax.f32 %v1048_v16, 0.0 }
 0x14e   : > { %v1562_v14 = vpack.c.bf16 %v1089_v21, %v1088_v20  ;;  %v863_v30 = vadd.f32 %v1687_v22, %v2131_v56  ;;  %v1690_v32 = vadd.f32 %v1689_v27, %v1688_v24  ;;  %v1043_v34 = vadd.f32 %v1042_v29, %v882_v28 }
 0x14f   : > { %v1097_v31 = vmax.f32 %v1051_v26, 0.0  ;;  %v1094_v39 = vmax.f32 %v1040_v23, 0.0 }
 0x150   : > { %1602 = vst [vmem:[%s2141_s28 + $0x48] sm:$0xff] %v1562_v14   ;;  %v1024_v35 = vadd.f32 %v1023_v60, %v863_v30  ;;  %v866_v37 = vadd.f32 %v1690_v32, %v2131_v56  ;;  %v1095_v36 = vmax.f32 %v1043_v34, 0.0 }
 0x151   : > { %v1582_v40 = vpack.c.bf16 %v1097_v31, %v1096_v33 }
 0x152   : > { %v1027_v19 = vadd.f32 %v1026_v1, %v866_v37  ;;  %v1691_v44 = vpop.f32.mrb[44].mxu0  ;;  %v1791_v45 = vpop.f32.mrb[44].mxu1  ;;  %v1577_v47 = vpack.c.bf16 %v1095_v36, %v1094_v39  ;;  %v1090_v42 = vmax.f32 %v1024_v35, 0.0 }
 0x153   : > { %1606 = vst [vmem:[%s2141_s28 + $0x68] sm:$0xff] %v1582_v40   ;;  %v1064_v48 = vadd.f32 %v1791_v45, %v903_v41  ;;  %v1692_v49 = vpop.f32.mrb[45].mxu0  ;;  %v1055_v51 = vpop.f32.mrb[45].mxu1 }
 0x154   : > { %v1091_v53 = vmax.f32 %v1027_v19, 0.0  ;;  %v1693_v54 = vadd.f32 %v1692_v49, %v1691_v44  ;;  %v1056_v50 = vadd.f32 %v1055_v51, %v895_v46  ;;  %v1694_v57 = vpop.f32.mrb[46].mxu0  ;;  %v1792_v59 = vpop.f32.mrb[46].mxu1  ;;  %1605 = vst [vmem:[%s2141_s28 + $0x60] sm:$0xff] %v1577_v47  }
 0x155   : > { %v1067_v60 = vadd.f32 %v1792_v59, %v906_v52  ;;  %v1695_v61 = vpop.f32.mrb[47].mxu0  ;;  %v1058_v62 = vpop.f32.mrb[47].mxu1  ;;  %v1100_v3 = vmax.f32 %v1064_v48, 0.0 }
 0x156   : > { %v1567_v63 = vpack.c.bf16 %v1091_v53, %v1090_v42  ;;  %v871_v0 = vadd.f32 %v1693_v54, %v2131_v56  ;;  %v1696_v55 = vadd.f32 %v1695_v61, %v1694_v57  ;;  %v1059_v4 = vadd.f32 %v1058_v62, %v898_v38 }
 0x157   : > { %v1101_v1 = vmax.f32 %v1067_v60, 0.0  ;;  %v1098_v7 = vmax.f32 %v1056_v50, 0.0 }
 0x158   : > { %1603 = vst [vmem:[%s2141_s28 + $0x50] sm:$0xff] %v1567_v63   ;;  %v1032_v5 = vadd.f32 %v2165_v58, %v871_v0  ;;  %v874_v6 = vadd.f32 %v1696_v55, %v2131_v56  ;;  %v1099_v10 = vmax.f32 %v1059_v4, 0.0 }
 0x159   : > { %v1592_v8 = vpack.c.bf16 %v1101_v1, %v1100_v3 }
 0x15a   : > { %v1035_v43 = vadd.f32 %v2167_v2, %v874_v6  ;;  %v1587_v11 = vpack.c.bf16 %v1099_v10, %v1098_v7  ;;  %v1092_v13 = vmax.f32 %v1032_v5, 0.0 }
 0x15b   : > { %1608 = vst [vmem:[%s2141_s28 + $0x78] sm:$0xff] %v1592_v8  }
 0x15c   : > { %v1093_v12 = vmax.f32 %v1035_v43, 0.0  ;;  %1607 = vst [vmem:[%s2141_s28 + $0x70] sm:$0xff] %v1587_v11  }
 0x15e   : > { %v1572_v15 = vpack.c.bf16 %v1093_v12, %v1092_v13 }
 0x160   : > { %1604 = vst [vmem:[%s2141_s28 + $0x58] sm:$0xff] %v1572_v15  }
 0x161 PF: > { %s13_s14 = sadd.s32 1, %s1944_s14   ;;  %s2214_s12 = smov %s1940_s13 }
 0x162   : > { %p10_p5 = scmp.ge.s32.totalorder %s13_s14, 4   ;;  %s2215_s13 = smov %s2217_s15 }
 0x164   :  { %12 = sbr.rel (!%p10_p5) target bundleno = 2 (0x2), region = 68 }

// kernel: net_forward.7
= control target key start
LH: loop header
LB: loop body
LE: loop exit
PB: predicated region body
PF: predicated region fallthrough
CT: control target
= control target key end

     0   :  { %s4894_s1 = inlined_call_operand.vmem [shape: bf16[1664,256], index: 1, kind: input, shape index: {}]   ;;  %s4895_s0 = inlined_call_operand.vmem [shape: bf16[112,1664], index: 0, kind: input, shape index: {}]   ;;  %s4896_s2 = inlined_call_operand.vmem [shape: f32[1,256], index: 2, kind: input, shape index: {}]   ;;  %s4897_s3 = inlined_call_operand.vmem [shape: bf16[112,256], index: 3, kind: output, shape index: {}]  }
   0x1   :  { %v3242_v0 = vld [vmem:[%s4894_s1 + $0x4] ss:$8 sps:$4 sm:$0xff]   ;;  %v3246_v2 = vld [vmem:[%s4894_s1] ss:$8 sps:$4 sm:$0xff]   ;;  %v3248_v4 = vld [vmem:[%s4894_s1 + $0x14] ss:$8 sps:$4 sm:$0xff]  }
   0x2   :  { %v3244_v1 = vld [vmem:[%s4894_s1 + $0x304] ss:$8 sps:$4 sm:$0xff]   ;;  %1835 = vmatprep.subr.bf16.mxu1 %v3242_v0  ;;  %v3247_v3 = vld [vmem:[%s4894_s1 + $0x300] ss:$8 sps:$4 sm:$0xff]   ;;  %v3250_v5 = vld [vmem:[%s4894_s1 + $0x314] ss:$8 sps:$4 sm:$0xff]  }
   0x3   :  { %2144 = vmatprep.subr.bf16.mxu0 %v3244_v1  ;;  %1836 = vmatpush1.bf16.msra.mxu1 %v3246_v2  ;;  %v3252_v6 = vld [vmem:[%s4894_s1 + $0x10] ss:$8 sps:$4 sm:$0xff]   ;;  %v3254_v8 = vld [vmem:[%s4894_s1 + $0x24] ss:$8 sps:$4 sm:$0xff]   ;;  %v3258_v10 = vld [vmem:[%s4894_s1 + $0x20] ss:$8 sps:$4 sm:$0xff]  }
   0x4   :  { %2145 = vmatpush1.bf16.msra.mxu0 %v3247_v3  ;;  %1837 = vmatprep.subr.bf16.mxu1 %v3248_v4  ;;  %v3253_v7 = vld [vmem:[%s4894_s1 + $0x310] ss:$8 sps:$4 sm:$0xff]   ;;  %v3256_v9 = vld [vmem:[%s4894_s1 + $0x324] ss:$8 sps:$4 sm:$0xff]   ;;  %v3259_v11 = vld [vmem:[%s4894_s1 + $0x320] ss:$8 sps:$4 sm:$0xff]  }
   0x5   :  { %2146 = vmatprep.subr.bf16.mxu0 %v3250_v5  ;;  %v3260_v12 = vld [vmem:[%s4894_s1 + $0x34] ss:$8 sps:$4 sm:$0xff]   ;;  %v3264_v14 = vld [vmem:[%s4894_s1 + $0x30] ss:$8 sps:$4 sm:$0xff]   ;;  %v3266_v16 = vld [vmem:[%s4894_s1 + $0x44] ss:$8 sps:$4 sm:$0xff]  }
   0x6   :  { %v3262_v13 = vld [vmem:[%s4894_s1 + $0x334] ss:$8 sps:$4 sm:$0xff]   ;;  %v3265_v15 = vld [vmem:[%s4894_s1 + $0x330] ss:$8 sps:$4 sm:$0xff]   ;;  %v3268_v17 = vld [vmem:[%s4894_s1 + $0x344] ss:$8 sps:$4 sm:$0xff]  }
   0x7   :  { %1838 = vmatpush1.bf16.msra.mxu1 %v3252_v6  ;;  %v3270_v18 = vld [vmem:[%s4894_s1 + $0x40] ss:$8 sps:$4 sm:$0xff]   ;;  %v3272_v20 = vld [vmem:[%s4894_s1 + $0x54] ss:$8 sps:$4 sm:$0xff]   ;;  %v3276_v22 = vld [vmem:[%s4894_s1 + $0x50] ss:$8 sps:$4 sm:$0xff]  }
   0x8   :  { %2147 = vmatpush1.bf16.msra.mxu0 %v3253_v7  ;;  %1839 = vmatprep.subr.bf16.mxu1 %v3254_v8  ;;  %v3271_v19 = vld [vmem:[%s4894_s1 + $0x340] ss:$8 sps:$4 sm:$0xff]   ;;  %v3274_v21 = vld [vmem:[%s4894_s1 + $0x354] ss:$8 sps:$4 sm:$0xff]   ;;  %v3277_v23 = vld [vmem:[%s4894_s1 + $0x350] ss:$8 sps:$4 sm:$0xff]  }
   0x9   :  { %2148 = vmatprep.subr.bf16.mxu0 %v3256_v9  ;;  %v3278_v24 = vld [vmem:[%s4894_s1 + $0x64] ss:$8 sps:$4 sm:$0xff]   ;;  %v3282_v26 = vld [vmem:[%s4894_s1 + $0x60] ss:$8 sps:$4 sm:$0xff]   ;;  %v3284_v28 = vld [vmem:[%s4894_s1 + $0x74] ss:$8 sps:$4 sm:$0xff]  }
   0xa   :  { %v3280_v25 = vld [vmem:[%s4894_s1 + $0x364] ss:$8 sps:$4 sm:$0xff]   ;;  %v3283_v27 = vld [vmem:[%s4894_s1 + $0x360] ss:$8 sps:$4 sm:$0xff]   ;;  %v3286_v29 = vld [vmem:[%s4894_s1 + $0x374] ss:$8 sps:$4 sm:$0xff]  }
   0xb   :  { %1840 = vmatpush1.bf16.msra.mxu1 %v3258_v10  ;;  %v3288_v30 = vld [vmem:[%s4894_s1 + $0x70] ss:$8 sps:$4 sm:$0xff]   ;;  %v3290_v32 = vld [vmem:[%s4894_s1 + $0x84] ss:$8 sps:$4 sm:$0xff]   ;;  %v3294_v34 = vld [vmem:[%s4894_s1 + $0x80] ss:$8 sps:$4 sm:$0xff]  }
   0xc   :  { %2149 = vmatpush1.bf16.msra.mxu0 %v3259_v11  ;;  %1841 = vmatprep.subr.bf16.mxu1 %v3260_v12  ;;  %v3289_v31 = vld [vmem:[%s4894_s1 + $0x370] ss:$8 sps:$4 sm:$0xff]   ;;  %v3292_v33 = vld [vmem:[%s4894_s1 + $0x384] ss:$8 sps:$4 sm:$0xff]   ;;  %v3295_v35 = vld [vmem:[%s4894_s1 + $0x380] ss:$8 sps:$4 sm:$0xff]  }
   0xd   :  { %2150 = vmatprep.subr.bf16.mxu0 %v3262_v13  ;;  %v3296_v36 = vld [vmem:[%s4894_s1 + $0x94] ss:$8 sps:$4 sm:$0xff]   ;;  %v3300_v38 = vld [vmem:[%s4894_s1 + $0x90] ss:$8 sps:$4 sm:$0xff]   ;;  %v3302_v40 = vld [vmem:[%s4894_s1 + $0xa4] ss:$8 sps:$4 sm:$0xff]  }
   0xe   :  { %v3298_v37 = vld [vmem:[%s4894_s1 + $0x394] ss:$8 sps:$4 sm:$0xff]   ;;  %v3301_v39 = vld [vmem:[%s4894_s1 + $0x390] ss:$8 sps:$4 sm:$0xff]   ;;  %v3304_v41 = vld [vmem:[%s4894_s1 + $0x3a4] ss:$8 sps:$4 sm:$0xff]  }
   0xf   :  { %1842 = vmatpush1.bf16.msra.mxu1 %v3264_v14  ;;  %v3306_v42 = vld [vmem:[%s4894_s1 + $0xa0] ss:$8 sps:$4 sm:$0xff]   ;;  %v3308_v44 = vld [vmem:[%s4894_s1 + $0xb4] ss:$8 sps:$4 sm:$0xff]   ;;  %v3312_v46 = vld [vmem:[%s4894_s1 + $0xb0] ss:$8 sps:$4 sm:$0xff]  }
  0x10   :  { %2151 = vmatpush1.bf16.msra.mxu0 %v3265_v15  ;;  %1843 = vmatprep.subr.bf16.mxu1 %v3266_v16  ;;  %v3307_v43 = vld [vmem:[%s4894_s1 + $0x3a0] ss:$8 sps:$4 sm:$0xff]   ;;  %v3310_v45 = vld [vmem:[%s4894_s1 + $0x3b4] ss:$8 sps:$4 sm:$0xff]   ;;  %v3313_v47 = vld [vmem:[%s4894_s1 + $0x3b0] ss:$8 sps:$4 sm:$0xff]  }
  0x11   :  { %2152 = vmatprep.subr.bf16.mxu0 %v3268_v17  ;;  %v3340_v48 = vld [vmem:[%s4895_s0 + $0x4] ss:$52 sps:$4 sm:$0xff]   ;;  %v3346_v51 = vld [vmem:[%s4895_s0 + $0x1c] ss:$52 sps:$4 sm:$0xff]   ;;  %v3318_v52 = vld [vmem:[%s4894_s1 + $0xc0] ss:$8 sps:$4 sm:$0xff]  }
  0x12   :  { %v3314_v49 = vld [vmem:[%s4894_s1 + $0xc4] ss:$8 sps:$4 sm:$0xff]   ;;  %1867 = vmatprep.mubr.bf16.mxu1 %v3340_v48  ;;  %v3319_v53 = vld [vmem:[%s4894_s1 + $0x3c0] ss:$8 sps:$4 sm:$0xff]   ;;  %v3320_v54 = vld [vmem:[%s4894_s1 + $0xd4] ss:$8 sps:$4 sm:$0xff]   ;;  %2176 = vmatprep.mubr.bf16.mxu0 %v3346_v51 }
  0x13   :  { %1844 = vmatpush1.bf16.msra.mxu1 %v3270_v18  ;;  %v3316_v50 = vld [vmem:[%s4894_s1 + $0x3c4] ss:$8 sps:$4 sm:$0xff]   ;;  %v3322_v55 = vld [vmem:[%s4894_s1 + $0x3d4] ss:$8 sps:$4 sm:$0xff]   ;;  %v3324_v56 = vld [vmem:[%s4894_s1 + $0xd0] ss:$8 sps:$4 sm:$0xff]  }
  0x14   :  { %2153 = vmatpush1.bf16.msra.mxu0 %v3271_v19  ;;  %1845 = vmatprep.subr.bf16.mxu1 %v3272_v20  ;;  %v3325_v57 = vld [vmem:[%s4894_s1 + $0x3d0] ss:$8 sps:$4 sm:$0xff]   ;;  %v3326_v58 = vld [vmem:[%s4894_s1 + $0xe4] ss:$8 sps:$4 sm:$0xff]   ;;  %v3330_v60 = vld [vmem:[%s4894_s1 + $0xe0] ss:$8 sps:$4 sm:$0xff]  }
  0x15   :  { %2154 = vmatprep.subr.bf16.mxu0 %v3274_v21  ;;  %v3328_v59 = vld [vmem:[%s4894_s1 + $0x3e4] ss:$8 sps:$4 sm:$0xff]   ;;  %v3331_v61 = vld [vmem:[%s4894_s1 + $0x3e0] ss:$8 sps:$4 sm:$0xff]   ;;  %v3332_v62 = vld [vmem:[%s4894_s1 + $0xf4] ss:$8 sps:$4 sm:$0xff]  }
  0x16   :  { %v3334_v63 = vld [vmem:[%s4894_s1 + $0x3f4] ss:$8 sps:$4 sm:$0xff]   ;;  %v3336_v0 = vld [vmem:[%s4894_s1 + $0xf0] ss:$8 sps:$4 sm:$0xff]   ;;  %v3343_v2 = vld [vmem:[%s4894_s1 + $0x104] ss:$8 sps:$4 sm:$0xff]  }
  0x17   :  { %1846 = vmatpush1.bf16.msra.mxu1 %v3276_v22  ;;  %v3337_v1 = vld [vmem:[%s4894_s1 + $0x3f0] ss:$8 sps:$4 sm:$0xff]   ;;  %v3338_v3 = vld [vmem:[%s4895_s0] ss:$52 sps:$4 sm:$0xff]   ;;  %v3349_v4 = vld [vmem:[%s4894_s1 + $0x404] ss:$8 sps:$4 sm:$0xff]  }
  0x18   :  { %2155 = vmatpush1.bf16.msra.mxu0 %v3277_v23  ;;  %1847 = vmatprep.subr.bf16.mxu1 %v3278_v24  ;;  %v3341_v5 = vld [vmem:[%s4894_s1 + $0x100] ss:$8 sps:$4 sm:$0xff]   ;;  %v3344_v6 = vld [vmem:[%s4895_s0 + $0x18] ss:$52 sps:$4 sm:$0xff]   ;;  %v3352_v8 = vld [vmem:[%s4894_s1 + $0x114] ss:$8 sps:$4 sm:$0xff]  }
  0x19   :  { %2156 = vmatprep.subr.bf16.mxu0 %v3280_v25  ;;  %v3347_v7 = vld [vmem:[%s4894_s1 + $0x400] ss:$8 sps:$4 sm:$0xff]   ;;  %v3355_v9 = vld [vmem:[%s4894_s1 + $0x414] ss:$8 sps:$4 sm:$0xff]   ;;  %v3368_v10 = vld [vmem:[%s4895_s0 + $0x84] ss:$52 sps:$4 sm:$0xff]  }
  0x1a   :  { %v3370_v11 = vld [vmem:[%s4895_s0 + $0x6c] ss:$52 sps:$4 sm:$0xff]   ;;  %v3350_v12 = vld [vmem:[%s4894_s1 + $0x110] ss:$8 sps:$4 sm:$0xff]   ;;  %v3364_v18 = vld [vmem:[%s4894_s1 + $0x134] ss:$8 sps:$4 sm:$0xff]  }
  0x1b   :  { %1848 = vmatpush1.bf16.msra.mxu1 %v3282_v26  ;;  %v3353_v13 = vld [vmem:[%s4894_s1 + $0x410] ss:$8 sps:$4 sm:$0xff]   ;;  %v3358_v14 = vld [vmem:[%s4894_s1 + $0x124] ss:$8 sps:$4 sm:$0xff]   ;;  %v3356_v16 = vld [vmem:[%s4894_s1 + $0x120] ss:$8 sps:$4 sm:$0xff]  }
  0x1c   :  { %2157 = vmatpush1.bf16.msra.mxu0 %v3283_v27  ;;  %1849 = vmatprep.subr.bf16.mxu1 %v3284_v28  ;;  %v3361_v15 = vld [vmem:[%s4894_s1 + $0x424] ss:$8 sps:$4 sm:$0xff]   ;;  %v3359_v17 = vld [vmem:[%s4894_s1 + $0x420] ss:$8 sps:$4 sm:$0xff]   ;;  %v3367_v21 = vld [vmem:[%s4894_s1 + $0x434] ss:$8 sps:$4 sm:$0xff]  }
  0x1d   :  { %2158 = vmatprep.subr.bf16.mxu0 %v3286_v29  ;;  %v3375_v19 = vld [vmem:[%s4895_s0 + $0x80] ss:$52 sps:$4 sm:$0xff]   ;;  %v3379_v20 = vld [vmem:[%s4895_s0 + $0x68] ss:$52 sps:$4 sm:$0xff]   ;;  %v3362_v24 = vld [vmem:[%s4894_s1 + $0x130] ss:$8 sps:$4 sm:$0xff]  }
  0x1e   :  { %v3386_v22 = vld [vmem:[%s4895_s0 + $0xec] ss:$52 sps:$4 sm:$0xff]   ;;  %v3388_v23 = vld [vmem:[%s4895_s0 + $0xd4] ss:$52 sps:$4 sm:$0xff]   ;;  %v3365_v25 = vld [vmem:[%s4894_s1 + $0x430] ss:$8 sps:$4 sm:$0xff]  }
  0x1f   :  { %1850 = vmatpush1.bf16.msra.mxu1 %v3288_v30  ;;  %v3374_v26 = vld [vmem:[%s4894_s1 + $0x144] ss:$8 sps:$4 sm:$0xff]   ;;  %v3372_v28 = vld [vmem:[%s4894_s1 + $0x140] ss:$8 sps:$4 sm:$0xff]   ;;  %v3382_v30 = vld [vmem:[%s4894_s1 + $0x154] ss:$8 sps:$4 sm:$0xff]  }
  0x20   :  { %2159 = vmatpush1.bf16.msra.mxu0 %v3289_v31  ;;  %1851 = vmatprep.subr.bf16.mxu1 %v3290_v32  ;;  %v3378_v27 = vld [vmem:[%s4894_s1 + $0x444] ss:$8 sps:$4 sm:$0xff]   ;;  %v3376_v29 = vld [vmem:[%s4894_s1 + $0x440] ss:$8 sps:$4 sm:$0xff]   ;;  %v3398_v48 = vld [vmem:[%s4894_s1 + $0x170] ss:$8 sps:$4 sm:$0xff]  }
  0x21   :  { %2160 = vmatprep.subr.bf16.mxu0 %v3292_v33  ;;  %v3393_v31 = vld [vmem:[%s4895_s0 + $0xe8] ss:$52 sps:$4 sm:$0xff]   ;;  %v3397_v32 = vld [vmem:[%s4895_s0 + $0xd0] ss:$52 sps:$4 sm:$0xff]  }
  0x22   :  { %v3385_v33 = vld [vmem:[%s4894_s1 + $0x454] ss:$8 sps:$4 sm:$0xff]   ;;  %v3414_v51 = vld [vmem:[%s4894_s1 + $0x484] ss:$8 sps:$4 sm:$0xff]  }
  0x23   :  { %1852 = vmatpush1.bf16.msra.mxu1 %v3294_v34  ;;  %v3404_v34 = vld [vmem:[%s4895_s0 + $0x154] ss:$52 sps:$4 sm:$0xff]  }
  0x24   :  { %2161 = vmatpush1.bf16.msra.mxu0 %v3295_v35  ;;  %1853 = vmatprep.subr.bf16.mxu1 %v3296_v36  ;;  %v3406_v35 = vld [vmem:[%s4895_s0 + $0x13c] ss:$52 sps:$4 sm:$0xff]  }
  0x25   :  { %2162 = vmatprep.subr.bf16.mxu0 %v3298_v37  ;;  %v3380_v36 = vld [vmem:[%s4894_s1 + $0x150] ss:$8 sps:$4 sm:$0xff]  }
  0x26   :  { %v3383_v37 = vld [vmem:[%s4894_s1 + $0x450] ss:$8 sps:$4 sm:$0xff]  }
  0x27   :  { %1854 = vmatpush1.bf16.msra.mxu1 %v3300_v38  ;;  %v3392_v38 = vld [vmem:[%s4894_s1 + $0x164] ss:$8 sps:$4 sm:$0xff]  }
  0x28   :  { %2163 = vmatpush1.bf16.msra.mxu0 %v3301_v39  ;;  %1855 = vmatprep.subr.bf16.mxu1 %v3302_v40  ;;  %v3396_v39 = vld [vmem:[%s4894_s1 + $0x464] ss:$8 sps:$4 sm:$0xff]   ;;  %v3390_v40 = vld [vmem:[%s4894_s1 + $0x160] ss:$8 sps:$4 sm:$0xff]  }
  0x29   :  { %2164 = vmatprep.subr.bf16.mxu0 %v3304_v41  ;;  %v3394_v41 = vld [vmem:[%s4894_s1 + $0x460] ss:$8 sps:$4 sm:$0xff]  }
  0x2b   :  { %1856 = vmatpush1.bf16.msra.mxu1 %v3306_v42  ;;  %v3400_v42 = vld [vmem:[%s4894_s1 + $0x174] ss:$8 sps:$4 sm:$0xff]  }
  0x2c   :  { %2165 = vmatpush1.bf16.msra.mxu0 %v3307_v43  ;;  %1857 = vmatprep.subr.bf16.mxu1 %v3308_v44  ;;  %v3411_v43 = vld [vmem:[%s4895_s0 + $0x150] ss:$52 sps:$4 sm:$0xff]   ;;  %v3415_v44 = vld [vmem:[%s4895_s0 + $0x138] ss:$52 sps:$4 sm:$0xff]  }
  0x2d   :  { %2166 = vmatprep.subr.bf16.mxu0 %v3310_v45  ;;  %v3403_v45 = vld [vmem:[%s4894_s1 + $0x474] ss:$8 sps:$4 sm:$0xff]  }
  0x2f   :  { %1858 = vmatpush1.bf16.msra.mxu1 %v3312_v46  ;;  %v3422_v46 = vld [vmem:[%s4895_s0 + $0x1bc] ss:$52 sps:$4 sm:$0xff]  }
  0x30   :  { %2167 = vmatpush1.bf16.msra.mxu0 %v3313_v47  ;;  %1859 = vmatprep.subr.bf16.mxu1 %v3314_v49  ;;  %v3424_v47 = vld [vmem:[%s4895_s0 + $0x1a4] ss:$52 sps:$4 sm:$0xff]  }
  0x31   :  { %2168 = vmatprep.subr.bf16.mxu0 %v3316_v50  ;;  %v3401_v49 = vld [vmem:[%s4894_s1 + $0x470] ss:$8 sps:$4 sm:$0xff]   ;;  %v3410_v50 = vld [vmem:[%s4894_s1 + $0x184] ss:$8 sps:$4 sm:$0xff]  }
  0x33   :  { %1860 = vmatpush1.bf16.msra.mxu1 %v3318_v52  ;;  %v3408_v52 = vld [vmem:[%s4894_s1 + $0x180] ss:$8 sps:$4 sm:$0xff]  }
  0x34   :  { %2169 = vmatpush1.bf16.msra.mxu0 %v3319_v53  ;;  %1861 = vmatprep.subr.bf16.mxu1 %v3320_v54  ;;  %v3412_v53 = vld [vmem:[%s4894_s1 + $0x480] ss:$8 sps:$4 sm:$0xff]   ;;  %v3418_v54 = vld [vmem:[%s4894_s1 + $0x194] ss:$8 sps:$4 sm:$0xff]  }
  0x35   :  { %2170 = vmatprep.subr.bf16.mxu0 %v3322_v55  ;;  %v3429_v55 = vld [vmem:[%s4895_s0 + $0x1b8] ss:$52 sps:$4 sm:$0xff]  }
  0x37   :  { %1862 = vmatpush1.bf16.msra.mxu1 %v3324_v56  ;;  %v3433_v56 = vld [vmem:[%s4895_s0 + $0x1a0] ss:$52 sps:$4 sm:$0xff]  }
  0x38   :  { %2171 = vmatpush1.bf16.msra.mxu0 %v3325_v57  ;;  %1863 = vmatprep.subr.bf16.mxu1 %v3326_v58  ;;  %v3421_v57 = vld [vmem:[%s4894_s1 + $0x494] ss:$8 sps:$4 sm:$0xff]   ;;  %v3440_v58 = vld [vmem:[%s4895_s0 + $0x224] ss:$52 sps:$4 sm:$0xff]  }
  0x39   :  { %2172 = vmatprep.subr.bf16.mxu0 %v3328_v59  ;;  %v3442_v59 = vld [vmem:[%s4895_s0 + $0x20c] ss:$52 sps:$4 sm:$0xff]  }
  0x3b   :  { %1864 = vmatpush1.bf16.msra.mxu1 %v3330_v60  ;;  %v3416_v60 = vld [vmem:[%s4894_s1 + $0x190] ss:$8 sps:$4 sm:$0xff]  }
  0x3c   :  { %2173 = vmatpush1.bf16.msra.mxu0 %v3331_v61  ;;  %1865 = vmatprep.subr.bf16.mxu1 %v3332_v62  ;;  %v3419_v61 = vld [vmem:[%s4894_s1 + $0x490] ss:$8 sps:$4 sm:$0xff]   ;;  %v3428_v62 = vld [vmem:[%s4894_s1 + $0x1a4] ss:$8 sps:$4 sm:$0xff]  }
  0x3d   :  { %2174 = vmatprep.subr.bf16.mxu0 %v3334_v63  ;;  %v3432_v63 = vld [vmem:[%s4894_s1 + $0x4a4] ss:$8 sps:$4 sm:$0xff]  }
  0x3f   :  { %1866 = vmatpush1.bf16.msra.mxu1 %v3336_v0  ;;  %v3426_v0 = vld [vmem:[%s4894_s1 + $0x1a0] ss:$8 sps:$4 sm:$0xff]  }
  0x40   :  { %2175 = vmatpush1.bf16.msra.mxu0 %v3337_v1  ;;  %1938 = vmatprep.subr.bf16.mxu1 %v3343_v2  ;;  %v3430_v1 = vld [vmem:[%s4894_s1 + $0x4a0] ss:$8 sps:$4 sm:$0xff]  }
  0x41   :  { %2247 = vmatprep.subr.bf16.mxu0 %v3349_v4  ;;  %v3447_v2 = vld [vmem:[%s4895_s0 + $0x220] ss:$52 sps:$4 sm:$0xff]  }
  0x42   :  { %1868 = vmatmul.mubr.bf16.vlgmr.msra.gmra.mrb[0].mxu1 %v3338_v3  ;;  %v3451_v3 = vld [vmem:[%s4895_s0 + $0x208] ss:$52 sps:$4 sm:$0xff]  }
  0x43   :  { %2177 = vmatmul.mubr.bf16.vlgmr.msra.gmra.mrb[0].mxu0 %v3344_v6  ;;  %1939 = vmatpush1.bf16.msra.mxu1 %v3341_v5  ;;  %v3436_v4 = vld [vmem:[%s4894_s1 + $0x1b4] ss:$8 sps:$4 sm:$0xff]   ;;  %v3458_v6 = vld [vmem:[%s4895_s0 + $0x28c] ss:$52 sps:$4 sm:$0xff]  }
  0x44   :  { %2248 = vmatpush1.bf16.msra.mxu0 %v3347_v7  ;;  %1940 = vmatprep.subr.bf16.mxu1 %v3352_v8  ;;  %v3439_v5 = vld [vmem:[%s4894_s1 + $0x4b4] ss:$8 sps:$4 sm:$0xff]   ;;  %v3434_v8 = vld [vmem:[%s4894_s1 + $0x1b0] ss:$8 sps:$4 sm:$0xff]  }
  0x45   :  { %2249 = vmatprep.subr.bf16.mxu0 %v3355_v9  ;;  %2186 = vmatprep.mubr.bf16.mxu0 %v3368_v10  ;;  %v3460_v7 = vld [vmem:[%s4895_s0 + $0x274] ss:$52 sps:$4 sm:$0xff]   ;;  %v3437_v9 = vld [vmem:[%s4894_s1 + $0x4b0] ss:$8 sps:$4 sm:$0xff]   ;;  %v3446_v10 = vld [vmem:[%s4894_s1 + $0x1c4] ss:$8 sps:$4 sm:$0xff]  }
  0x46   :  { %1877 = vmatprep.mubr.bf16.mxu1 %v3370_v11  ;;  %v3450_v11 = vld [vmem:[%s4894_s1 + $0x4c4] ss:$8 sps:$4 sm:$0xff]  }
  0x47   :  { %1941 = vmatpush1.bf16.msra.mxu1 %v3350_v12  ;;  %v3444_v12 = vld [vmem:[%s4894_s1 + $0x1c0] ss:$8 sps:$4 sm:$0xff]  }
  0x48   :  { %2250 = vmatpush1.bf16.msra.mxu0 %v3353_v13  ;;  %1942 = vmatprep.subr.bf16.mxu1 %v3358_v14  ;;  %v3448_v13 = vld [vmem:[%s4894_s1 + $0x4c0] ss:$8 sps:$4 sm:$0xff]  }
  0x49   :  { %2251 = vmatprep.subr.bf16.mxu0 %v3361_v15  ;;  %v3465_v14 = vld [vmem:[%s4895_s0 + $0x288] ss:$52 sps:$4 sm:$0xff]   ;;  %v3469_v15 = vld [vmem:[%s4895_s0 + $0x270] ss:$52 sps:$4 sm:$0xff]  }
  0x4a   :  { %1878 = vmatmul.mubr.bf16.gmra.mrb[4].mxu1 %v3379_v20  ;;  %v3452_v20 = vld [vmem:[%s4894_s1 + $0x1d0] ss:$8 sps:$4 sm:$0xff]  }
  0x4b   :  { %2187 = vmatmul.mubr.bf16.gmra.mrb[4].mxu0 %v3375_v19  ;;  %1943 = vmatpush1.bf16.msra.mxu1 %v3356_v16  ;;  %v3454_v16 = vld [vmem:[%s4894_s1 + $0x1d4] ss:$8 sps:$4 sm:$0xff]   ;;  %v3481_v19 = vld [vmem:[%s4895_s0 + $0xc] ss:$52 sps:$4 sm:$0xff]  }
  0x4c   :  { %2252 = vmatpush1.bf16.msra.mxu0 %v3359_v17  ;;  %1944 = vmatprep.subr.bf16.mxu1 %v3364_v18  ;;  %v3457_v17 = vld [vmem:[%s4894_s1 + $0x4d4] ss:$8 sps:$4 sm:$0xff]   ;;  %v3478_v18 = vld [vmem:[%s4895_s0 + $0x24] ss:$52 sps:$4 sm:$0xff]  }
  0x4d   :  { %2253 = vmatprep.subr.bf16.mxu0 %v3367_v21  ;;  %2196 = vmatprep.mubr.bf16.mxu0 %v3386_v22  ;;  %v3455_v21 = vld [vmem:[%s4894_s1 + $0x4d0] ss:$8 sps:$4 sm:$0xff]   ;;  %v3464_v22 = vld [vmem:[%s4894_s1 + $0x1e4] ss:$8 sps:$4 sm:$0xff]  }
  0x4e   :  { %1887 = vmatprep.mubr.bf16.mxu1 %v3388_v23  ;;  %v3468_v23 = vld [vmem:[%s4894_s1 + $0x4e4] ss:$8 sps:$4 sm:$0xff]  }
  0x4f   :  { %1945 = vmatpush1.bf16.msra.mxu1 %v3362_v24  ;;  %v3462_v24 = vld [vmem:[%s4894_s1 + $0x1e0] ss:$8 sps:$4 sm:$0xff]  }
  0x50   :  { %2254 = vmatpush1.bf16.msra.mxu0 %v3365_v25  ;;  %1946 = vmatprep.subr.bf16.mxu1 %v3374_v26  ;;  %v3466_v25 = vld [vmem:[%s4894_s1 + $0x4e0] ss:$8 sps:$4 sm:$0xff]   ;;  %v3472_v26 = vld [vmem:[%s4894_s1 + $0x1f4] ss:$8 sps:$4 sm:$0xff]  }
  0x51   :  { %2255 = vmatprep.subr.bf16.mxu0 %v3378_v27  ;;  %v3475_v27 = vld [vmem:[%s4894_s1 + $0x4f4] ss:$8 sps:$4 sm:$0xff]  }
  0x52   :  { %1888 = vmatmul.mubr.bf16.gmra.mrb[8].mxu1 %v3397_v32  ;;  %v3476_v32 = vld [vmem:[%s4895_s0 + $0x20] ss:$52 sps:$4 sm:$0xff]  }
  0x53   :  { %2197 = vmatmul.mubr.bf16.gmra.mrb[8].mxu0 %v3393_v31  ;;  %1947 = vmatpush1.bf16.msra.mxu1 %v3372_v28  ;;  %v3470_v28 = vld [vmem:[%s4894_s1 + $0x1f0] ss:$8 sps:$4 sm:$0xff]   ;;  %v4188_v31 = vld [vmem:[%s4894_s1 + $0x504] ss:$8 sps:$4 sm:$0xff]  }
  0x54   :  { %2256 = vmatpush1.bf16.msra.mxu0 %v3376_v29  ;;  %1948 = vmatprep.subr.bf16.mxu1 %v3382_v30  ;;  %v3473_v29 = vld [vmem:[%s4894_s1 + $0x4f0] ss:$8 sps:$4 sm:$0xff]   ;;  %v3484_v30 = vld [vmem:[%s4894_s1 + $0x204] ss:$8 sps:$4 sm:$0xff]  }
  0x55   :  { %2257 = vmatprep.subr.bf16.mxu0 %v3385_v33  ;;  %2206 = vmatprep.mubr.bf16.mxu0 %v3404_v34  ;;  %v3479_v33 = vld [vmem:[%s4895_s0 + $0x8] ss:$52 sps:$4 sm:$0xff]  }
  0x56   :  { %1897 = vmatprep.mubr.bf16.mxu1 %v3406_v35  ;;  %v3482_v34 = vld [vmem:[%s4894_s1 + $0x200] ss:$8 sps:$4 sm:$0xff]  }
  0x57   :  { %1949 = vmatpush1.bf16.msra.mxu1 %v3380_v36  ;;  %v4202_v35 = vld [vmem:[%s4894_s1 + $0x500] ss:$8 sps:$4 sm:$0xff]   ;;  %v3490_v36 = vld [vmem:[%s4894_s1 + $0x214] ss:$8 sps:$4 sm:$0xff]  }
  0x58   :  { %2258 = vmatpush1.bf16.msra.mxu0 %v3383_v37  ;;  %1950 = vmatprep.subr.bf16.mxu1 %v3392_v38  ;;  %v4211_v37 = vld [vmem:[%s4894_s1 + $0x514] ss:$8 sps:$4 sm:$0xff]   ;;  %v3494_v38 = vld [vmem:[%s4895_s0 + $0x8c] ss:$52 sps:$4 sm:$0xff]  }
  0x59   :  { %2259 = vmatprep.subr.bf16.mxu0 %v3396_v39  ;;  %v3509_v39 = vld [vmem:[%s4895_s0 + $0x74] ss:$52 sps:$4 sm:$0xff]  }
  0x5a   :  { %1898 = vmatmul.mubr.bf16.gmra.mrb[12].mxu1 %v3415_v44  ;;  %v3496_v44 = vld [vmem:[%s4894_s1 + $0x220] ss:$8 sps:$4 sm:$0xff]  }
  0x5b   :  { %2207 = vmatmul.mubr.bf16.gmra.mrb[12].mxu0 %v3411_v43  ;;  %1951 = vmatpush1.bf16.msra.mxu1 %v3390_v40  ;;  %v3488_v40 = vld [vmem:[%s4894_s1 + $0x210] ss:$8 sps:$4 sm:$0xff]   ;;  %v4235_v43 = vld [vmem:[%s4894_s1 + $0x524] ss:$8 sps:$4 sm:$0xff]  }
  0x5c   :  { %2260 = vmatpush1.bf16.msra.mxu0 %v3394_v41  ;;  %1952 = vmatprep.subr.bf16.mxu1 %v3400_v42  ;;  %v4225_v41 = vld [vmem:[%s4894_s1 + $0x510] ss:$8 sps:$4 sm:$0xff]   ;;  %v3498_v42 = vld [vmem:[%s4894_s1 + $0x224] ss:$8 sps:$4 sm:$0xff]  }
  0x5d   :  { %2261 = vmatprep.subr.bf16.mxu0 %v3403_v45  ;;  %2216 = vmatprep.mubr.bf16.mxu0 %v3422_v46  ;;  %v3499_v45 = vld [vmem:[%s4895_s0 + $0x88] ss:$52 sps:$4 sm:$0xff]   ;;  %v3513_v46 = vld [vmem:[%s4895_s0 + $0x70] ss:$52 sps:$4 sm:$0xff]  }
  0x5e   :  { %1907 = vmatprep.mubr.bf16.mxu1 %v3424_v47  ;;  %v4250_v47 = vld [vmem:[%s4894_s1 + $0x520] ss:$8 sps:$4 sm:$0xff]  }
  0x5f   :  { %1953 = vmatpush1.bf16.msra.mxu1 %v3398_v48  ;;  %v3505_v48 = vld [vmem:[%s4894_s1 + $0x234] ss:$8 sps:$4 sm:$0xff]  }
  0x60   :  { %2262 = vmatpush1.bf16.msra.mxu0 %v3401_v49  ;;  %1954 = vmatprep.subr.bf16.mxu1 %v3410_v50  ;;  %v4259_v49 = vld [vmem:[%s4894_s1 + $0x534] ss:$8 sps:$4 sm:$0xff]  }
  0x61   :  { %2263 = vmatprep.subr.bf16.mxu0 %v3414_v51  ;;  %v3511_v50 = vld [vmem:[%s4895_s0 + $0xf4] ss:$52 sps:$4 sm:$0xff]   ;;  %v3527_v51 = vld [vmem:[%s4895_s0 + $0xdc] ss:$52 sps:$4 sm:$0xff]  }
  0x62   :  { %1908 = vmatmul.mubr.bf16.gmra.mrb[16].mxu1 %v3433_v56  ;;  %v3514_v56 = vld [vmem:[%s4894_s1 + $0x240] ss:$8 sps:$4 sm:$0xff]  }
  0x63   :  { %2217 = vmatmul.mubr.bf16.gmra.mrb[16].mxu0 %v3429_v55  ;;  %1955 = vmatpush1.bf16.msra.mxu1 %v3408_v52  ;;  %v3503_v52 = vld [vmem:[%s4894_s1 + $0x230] ss:$8 sps:$4 sm:$0xff]   ;;  %v4283_v55 = vld [vmem:[%s4894_s1 + $0x544] ss:$8 sps:$4 sm:$0xff]  }
  0x64   :  { %2264 = vmatpush1.bf16.msra.mxu0 %v3412_v53  ;;  %1956 = vmatprep.subr.bf16.mxu1 %v3418_v54  ;;  %v4273_v53 = vld [vmem:[%s4894_s1 + $0x530] ss:$8 sps:$4 sm:$0xff]   ;;  %v3516_v54 = vld [vmem:[%s4894_s1 + $0x244] ss:$8 sps:$4 sm:$0xff]  }
  0x65   :  { %2265 = vmatprep.subr.bf16.mxu0 %v3421_v57  ;;  %2226 = vmatprep.mubr.bf16.mxu0 %v3440_v58  ;;  %v3517_v57 = vld [vmem:[%s4895_s0 + $0xf0] ss:$52 sps:$4 sm:$0xff]   ;;  %v3531_v58 = vld [vmem:[%s4895_s0 + $0xd8] ss:$52 sps:$4 sm:$0xff]  }
  0x66   :  { %1917 = vmatprep.mubr.bf16.mxu1 %v3442_v59  ;;  %v4298_v59 = vld [vmem:[%s4894_s1 + $0x540] ss:$8 sps:$4 sm:$0xff]  }
  0x67   :  { %1957 = vmatpush1.bf16.msra.mxu1 %v3416_v60  ;;  %v3523_v60 = vld [vmem:[%s4894_s1 + $0x254] ss:$8 sps:$4 sm:$0xff]  }
  0x68   :  { %2266 = vmatpush1.bf16.msra.mxu0 %v3419_v61  ;;  %1958 = vmatprep.subr.bf16.mxu1 %v3428_v62  ;;  %v4307_v61 = vld [vmem:[%s4894_s1 + $0x554] ss:$8 sps:$4 sm:$0xff]  }
  0x69   :  { %2267 = vmatprep.subr.bf16.mxu0 %v3432_v63  ;;  %v3529_v62 = vld [vmem:[%s4895_s0 + $0x15c] ss:$52 sps:$4 sm:$0xff]   ;;  %v3545_v63 = vld [vmem:[%s4895_s0 + $0x144] ss:$52 sps:$4 sm:$0xff]  }
  0x6a   :  { %1918 = vmatmul.mubr.bf16.gmra.mrb[20].mxu1 %v3451_v3  ;;  %v4331_v3 = vld [vmem:[%s4894_s1 + $0x564] ss:$8 sps:$4 sm:$0xff]  }
  0x6b   :  { %2227 = vmatmul.mubr.bf16.gmra.mrb[20].mxu0 %v3447_v2  ;;  %1959 = vmatpush1.bf16.msra.mxu1 %v3426_v0  ;;  %v3521_v0 = vld [vmem:[%s4894_s1 + $0x250] ss:$8 sps:$4 sm:$0xff]   ;;  %v3534_v2 = vld [vmem:[%s4894_s1 + $0x264] ss:$8 sps:$4 sm:$0xff]  }
  0x6c   :  { %2268 = vmatpush1.bf16.msra.mxu0 %v3430_v1  ;;  %1960 = vmatprep.subr.bf16.mxu1 %v3436_v4  ;;  %v4321_v1 = vld [vmem:[%s4894_s1 + $0x550] ss:$8 sps:$4 sm:$0xff]   ;;  %v3532_v4 = vld [vmem:[%s4894_s1 + $0x260] ss:$8 sps:$4 sm:$0xff]  }
  0x6d   :  { %2269 = vmatprep.subr.bf16.mxu0 %v3439_v5  ;;  %2236 = vmatprep.mubr.bf16.mxu0 %v3458_v6  ;;  %v3535_v5 = vld [vmem:[%s4895_s0 + $0x158] ss:$52 sps:$4 sm:$0xff]   ;;  %v3549_v6 = vld [vmem:[%s4895_s0 + $0x140] ss:$52 sps:$4 sm:$0xff]  }
  0x6e   :  { %1927 = vmatprep.mubr.bf16.mxu1 %v3460_v7  ;;  %v4346_v7 = vld [vmem:[%s4894_s1 + $0x560] ss:$8 sps:$4 sm:$0xff]  }
  0x6f   :  { %1961 = vmatpush1.bf16.msra.mxu1 %v3434_v8  ;;  %v3541_v8 = vld [vmem:[%s4894_s1 + $0x274] ss:$8 sps:$4 sm:$0xff]  }
  0x70   :  { %2270 = vmatpush1.bf16.msra.mxu0 %v3437_v9  ;;  %1962 = vmatprep.subr.bf16.mxu1 %v3446_v10  ;;  %v4355_v9 = vld [vmem:[%s4894_s1 + $0x574] ss:$8 sps:$4 sm:$0xff]   ;;  %v3547_v10 = vld [vmem:[%s4895_s0 + $0x1c4] ss:$52 sps:$4 sm:$0xff]  }
  0x71   :  { %2271 = vmatprep.subr.bf16.mxu0 %v3450_v11  ;;  %v3563_v11 = vld [vmem:[%s4895_s0 + $0x1ac] ss:$52 sps:$4 sm:$0xff]  }
  0x72   :  { %1928 = vmatmul.mubr.bf16.gmra.mrb[24].mxu1 %v3469_v15  ;;  %v4379_v15 = vld [vmem:[%s4894_s1 + $0x584] ss:$8 sps:$4 sm:$0xff]  }
  0x73   :  { %2237 = vmatmul.mubr.bf16.gmra.mrb[24].mxu0 %v3465_v14  ;;  %1963 = vmatpush1.bf16.msra.mxu1 %v3444_v12  ;;  %v3539_v12 = vld [vmem:[%s4894_s1 + $0x270] ss:$8 sps:$4 sm:$0xff]   ;;  %v3552_v14 = vld [vmem:[%s4894_s1 + $0x284] ss:$8 sps:$4 sm:$0xff]  }
  0x74   :  { %2272 = vmatpush1.bf16.msra.mxu0 %v3448_v13  ;;  %1964 = vmatprep.subr.bf16.mxu1 %v3454_v16  ;;  %v4369_v13 = vld [vmem:[%s4894_s1 + $0x570] ss:$8 sps:$4 sm:$0xff]   ;;  %v3550_v16 = vld [vmem:[%s4894_s1 + $0x280] ss:$8 sps:$4 sm:$0xff]  }
  0x75   :  { %2273 = vmatprep.subr.bf16.mxu0 %v3457_v17  ;;  %2279 = vmatprep.mubr.bf16.mxu0 %v3478_v18  ;;  %v3553_v17 = vld [vmem:[%s4895_s0 + $0x1c0] ss:$52 sps:$4 sm:$0xff]  }
  0x76   :  { %1970 = vmatprep.mubr.bf16.mxu1 %v3481_v19  ;;  %v4390_v18 = vld [vmem:[%s4894_s1 + $0x580] ss:$8 sps:$4 sm:$0xff]  }
  0x77   :  { %1965 = vmatpush1.bf16.msra.mxu1 %v3452_v20  ;;  %v3567_v19 = vld [vmem:[%s4895_s0 + $0x1a8] ss:$52 sps:$4 sm:$0xff]  }
  0x78   :  { %2274 = vmatpush1.bf16.msra.mxu0 %v3455_v21  ;;  %1966 = vmatprep.subr.bf16.mxu1 %v3464_v22  ;;  %v3559_v20 = vld [vmem:[%s4894_s1 + $0x294] ss:$8 sps:$4 sm:$0xff]   ;;  %v3565_v22 = vld [vmem:[%s4895_s0 + $0x22c] ss:$52 sps:$4 sm:$0xff]  }
  0x79   :  { %2275 = vmatprep.subr.bf16.mxu0 %v3468_v23  ;;  %v4403_v21 = vld [vmem:[%s4894_s1 + $0x594] ss:$8 sps:$4 sm:$0xff]  }
  0x7a   :  { %v3581_v23 = vld [vmem:[%s4895_s0 + $0x214] ss:$52 sps:$4 sm:$0xff]  }
  0x7b   :  { %1967 = vmatpush1.bf16.msra.mxu1 %v3462_v24  ;;  %v3557_v24 = vld [vmem:[%s4894_s1 + $0x290] ss:$8 sps:$4 sm:$0xff]  }
  0x7c   :  { %2276 = vmatpush1.bf16.msra.mxu0 %v3466_v25  ;;  %1968 = vmatprep.subr.bf16.mxu1 %v3472_v26  ;;  %v4417_v25 = vld [vmem:[%s4894_s1 + $0x590] ss:$8 sps:$4 sm:$0xff]   ;;  %v3570_v26 = vld [vmem:[%s4894_s1 + $0x2a4] ss:$8 sps:$4 sm:$0xff]  }
  0x7d   :  { %2277 = vmatprep.subr.bf16.mxu0 %v3475_v27  ;;  %v4427_v27 = vld [vmem:[%s4894_s1 + $0x5a4] ss:$8 sps:$4 sm:$0xff]  }
  0x7f   :  { %1969 = vmatpush1.bf16.msra.mxu1 %v3470_v28  ;;  %v3568_v28 = vld [vmem:[%s4894_s1 + $0x2a0] ss:$8 sps:$4 sm:$0xff]  }
  0x80   :  { %2278 = vmatpush1.bf16.msra.mxu0 %v3473_v29  ;;  %2041 = vmatprep.subr.bf16.mxu1 %v3484_v30  ;;  %v3571_v29 = vld [vmem:[%s4895_s0 + $0x228] ss:$52 sps:$4 sm:$0xff]  }
  0x81   :  { %2350 = vmatprep.subr.bf16.mxu0 %v4188_v31  ;;  %v4438_v30 = vld [vmem:[%s4894_s1 + $0x5a0] ss:$8 sps:$4 sm:$0xff]  }
  0x82   :  { %1971 = vmatmul.mubr.bf16.vlgmr.msra.gmra.mrb[0].mxu1 %v3479_v33  ;;  %v3577_v33 = vld [vmem:[%s4894_s1 + $0x2b4] ss:$8 sps:$4 sm:$0xff]  }
  0x83   :  { %2280 = vmatmul.mubr.bf16.vlgmr.msra.gmra.mrb[0].mxu0 %v3476_v32  ;;  %2042 = vmatpush1.bf16.msra.mxu1 %v3482_v34  ;;  %v3585_v32 = vld [vmem:[%s4895_s0 + $0x210] ss:$52 sps:$4 sm:$0xff]   ;;  %v4451_v34 = vld [vmem:[%s4894_s1 + $0x5b4] ss:$8 sps:$4 sm:$0xff]  }
  0x84   :  { %2351 = vmatpush1.bf16.msra.mxu0 %v4202_v35  ;;  %2043 = vmatprep.subr.bf16.mxu1 %v3490_v36  ;;  %v3583_v36 = vld [vmem:[%s4895_s0 + $0x294] ss:$52 sps:$4 sm:$0xff]  }
  0x85   :  { %2352 = vmatprep.subr.bf16.mxu0 %v4211_v37  ;;  %2289 = vmatprep.mubr.bf16.mxu0 %v3494_v38  ;;  %v3599_v38 = vld [vmem:[%s4895_s0 + $0x27c] ss:$52 sps:$4 sm:$0xff]  }
  0x86   :  { %1980 = vmatprep.mubr.bf16.mxu1 %v3509_v39  ;;  %v3575_v39 = vld [vmem:[%s4894_s1 + $0x2b0] ss:$8 sps:$4 sm:$0xff]  }
  0x87   :  { %2044 = vmatpush1.bf16.msra.mxu1 %v3488_v40  ;;  %v4466_v40 = vld [vmem:[%s4894_s1 + $0x5b0] ss:$8 sps:$4 sm:$0xff]  }
  0x88   :  { %2353 = vmatpush1.bf16.msra.mxu0 %v4225_v41  ;;  %2045 = vmatprep.subr.bf16.mxu1 %v3498_v42  ;;  %v3588_v42 = vld [vmem:[%s4894_s1 + $0x2c4] ss:$8 sps:$4 sm:$0xff]  }
  0x89   :  { %2354 = vmatprep.subr.bf16.mxu0 %v4235_v43 }
  0x8a   :  { %1981 = vmatmul.mubr.bf16.gmra.mrb[4].mxu1 %v3513_v46  ;;  %v3589_v46 = vld [vmem:[%s4895_s0 + $0x290] ss:$52 sps:$4 sm:$0xff]  }
  0x8b   :  { %2290 = vmatmul.mubr.bf16.gmra.mrb[4].mxu0 %v3499_v45  ;;  %2046 = vmatpush1.bf16.msra.mxu1 %v3496_v44  ;;  %v4475_v44 = vld [vmem:[%s4894_s1 + $0x5c4] ss:$8 sps:$4 sm:$0xff]   ;;  %v3586_v45 = vld [vmem:[%s4894_s1 + $0x2c0] ss:$8 sps:$4 sm:$0xff]  }
  0x8c   :  { %2355 = vmatpush1.bf16.msra.mxu0 %v4250_v47  ;;  %2047 = vmatprep.subr.bf16.mxu1 %v3505_v48  ;;  %v4486_v48 = vld [vmem:[%s4894_s1 + $0x5c0] ss:$8 sps:$4 sm:$0xff]  }
  0x8d   :  { %2356 = vmatprep.subr.bf16.mxu0 %v4259_v49  ;;  %2299 = vmatprep.mubr.bf16.mxu0 %v3511_v50  ;;  %v3601_v50 = vld [vmem:[%s4895_s0 + $0x278] ss:$52 sps:$4 sm:$0xff]  }
  0x8e   :  { %1990 = vmatprep.mubr.bf16.mxu1 %v3527_v51  ;;  %v3595_v51 = vld [vmem:[%s4894_s1 + $0x2d4] ss:$8 sps:$4 sm:$0xff]  }
  0x8f   :  { %2048 = vmatpush1.bf16.msra.mxu1 %v3503_v52  ;;  %v4499_v52 = vld [vmem:[%s4894_s1 + $0x5d4] ss:$8 sps:$4 sm:$0xff]  }
  0x90   :  { %2357 = vmatpush1.bf16.msra.mxu0 %v4273_v53  ;;  %2049 = vmatprep.subr.bf16.mxu1 %v3516_v54  ;;  %v3616_v54 = vld [vmem:[%s4895_s0 + $0x14] ss:$52 sps:$4 sm:$0xff]  }
  0x91   :  { %2358 = vmatprep.subr.bf16.mxu0 %v4283_v55 }
  0x92   :  { %1991 = vmatmul.mubr.bf16.gmra.mrb[8].mxu1 %v3531_v58  ;;  %v4513_v58 = vld [vmem:[%s4894_s1 + $0x5d0] ss:$8 sps:$4 sm:$0xff]  }
  0x93   :  { %2300 = vmatmul.mubr.bf16.gmra.mrb[8].mxu0 %v3517_v57  ;;  %2050 = vmatpush1.bf16.msra.mxu1 %v3514_v56  ;;  %v3619_v56 = vld [vmem:[%s4895_s0 + $0x2c] ss:$52 sps:$4 sm:$0xff]   ;;  %v3593_v57 = vld [vmem:[%s4894_s1 + $0x2d0] ss:$8 sps:$4 sm:$0xff]  }
  0x94   :  { %2359 = vmatpush1.bf16.msra.mxu0 %v4298_v59  ;;  %2051 = vmatprep.subr.bf16.mxu1 %v3523_v60  ;;  %v3604_v60 = vld [vmem:[%s4894_s1 + $0x2e4] ss:$8 sps:$4 sm:$0xff]  }
  0x95   :  { %2360 = vmatprep.subr.bf16.mxu0 %v4307_v61  ;;  %2309 = vmatprep.mubr.bf16.mxu0 %v3529_v62  ;;  %v4523_v62 = vld [vmem:[%s4894_s1 + $0x5e4] ss:$8 sps:$4 sm:$0xff]  }
  0x96   :  { %2000 = vmatprep.mubr.bf16.mxu1 %v3545_v63  ;;  %v3602_v63 = vld [vmem:[%s4894_s1 + $0x2e0] ss:$8 sps:$4 sm:$0xff]  }
  0x97   :  { %2052 = vmatpush1.bf16.msra.mxu1 %v3521_v0  ;;  %v4531_v0 = vld [vmem:[%s4894_s1 + $0x5e0] ss:$8 sps:$4 sm:$0xff]  }
  0x98   :  { %2361 = vmatpush1.bf16.msra.mxu0 %v4321_v1  ;;  %2053 = vmatprep.subr.bf16.mxu1 %v3534_v2  ;;  %v3610_v2 = vld [vmem:[%s4894_s1 + $0x2f4] ss:$8 sps:$4 sm:$0xff]  }
  0x99   :  { %2362 = vmatprep.subr.bf16.mxu0 %v4331_v3 }
  0x9a   :  { %2001 = vmatmul.mubr.bf16.gmra.mrb[12].mxu1 %v3549_v6  ;;  %v4550_v6 = vld [vmem:[%s4894_s1 + $0x5f0] ss:$8 sps:$4 sm:$0xff]  }
  0x9b   :  { %2310 = vmatmul.mubr.bf16.gmra.mrb[12].mxu0 %v3535_v5  ;;  %2054 = vmatpush1.bf16.msra.mxu1 %v3532_v4  ;;  %v4541_v4 = vld [vmem:[%s4894_s1 + $0x5f4] ss:$8 sps:$4 sm:$0xff]   ;;  %v3608_v5 = vld [vmem:[%s4894_s1 + $0x2f0] ss:$8 sps:$4 sm:$0xff]  }
  0x9c   :  { %2363 = vmatpush1.bf16.msra.mxu0 %v4346_v7  ;;  %2055 = vmatprep.subr.bf16.mxu1 %v3541_v8  ;;  %v3622_v8 = vld [vmem:[%s4894_s1 + $0x604] ss:$8 sps:$4 sm:$0xff]  }
  0x9d   :  { %2364 = vmatprep.subr.bf16.mxu0 %v4355_v9  ;;  %2319 = vmatprep.mubr.bf16.mxu0 %v3547_v10  ;;  %v3614_v10 = vld [vmem:[%s4895_s0 + $0x10] ss:$52 sps:$4 sm:$0xff]  }
  0x9e   :  { %2010 = vmatprep.mubr.bf16.mxu1 %v3563_v11  ;;  %v3617_v11 = vld [vmem:[%s4895_s0 + $0x28] ss:$52 sps:$4 sm:$0xff]  }
  0x9f   :  { %2056 = vmatpush1.bf16.msra.mxu1 %v3539_v12  ;;  %v3620_v12 = vld [vmem:[%s4894_s1 + $0x600] ss:$8 sps:$4 sm:$0xff]  }
  0xa0   :  { %2365 = vmatpush1.bf16.msra.mxu0 %v4369_v13  ;;  %2057 = vmatprep.subr.bf16.mxu1 %v3552_v14  ;;  %v3625_v14 = vld [vmem:[%s4894_s1 + $0x614] ss:$8 sps:$4 sm:$0xff]  }
  0xa1   :  { %2366 = vmatprep.subr.bf16.mxu0 %v4379_v15 }
  0xa2   :  { %2011 = vmatmul.mubr.bf16.gmra.mrb[16].mxu1 %v3567_v19  ;;  %v3623_v19 = vld [vmem:[%s4894_s1 + $0x610] ss:$8 sps:$4 sm:$0xff]  }
  0xa3   :  { %2320 = vmatmul.mubr.bf16.gmra.mrb[16].mxu0 %v3553_v17  ;;  %2058 = vmatpush1.bf16.msra.mxu1 %v3550_v16  ;;  %v3626_v16 = vld [vmem:[%s4895_s0 + $0x7c] ss:$52 sps:$4 sm:$0xff]   ;;  %v3628_v17 = vld [vmem:[%s4895_s0 + $0x94] ss:$52 sps:$4 sm:$0xff]  }
  0xa4   :  { %2367 = vmatpush1.bf16.msra.mxu0 %v4390_v18  ;;  %2059 = vmatprep.subr.bf16.mxu1 %v3559_v20  ;;  %v3630_v20 = vld [vmem:[%s4895_s0 + $0x78] ss:$52 sps:$4 sm:$0xff]  }
  0xa5   :  { %2368 = vmatprep.subr.bf16.mxu0 %v4403_v21  ;;  %2329 = vmatprep.mubr.bf16.mxu0 %v3565_v22  ;;  %v3637_v22 = vld [vmem:[%s4894_s1 + $0x634] ss:$8 sps:$4 sm:$0xff]  }
  0xa6   :  { %2020 = vmatprep.mubr.bf16.mxu1 %v3581_v23  ;;  %v3638_v23 = vld [vmem:[%s4895_s0 + $0xe4] ss:$52 sps:$4 sm:$0xff]  }
  0xa7   :  { %2060 = vmatpush1.bf16.msra.mxu1 %v3557_v24  ;;  %v3646_v24 = vld [vmem:[%s4894_s1 + $0x644] ss:$8 sps:$4 sm:$0xff]  }
  0xa8   :  { %2369 = vmatpush1.bf16.msra.mxu0 %v4417_v25  ;;  %2061 = vmatprep.subr.bf16.mxu1 %v3570_v26  ;;  %v3642_v26 = vld [vmem:[%s4895_s0 + $0xe0] ss:$52 sps:$4 sm:$0xff]  }
  0xa9   :  { %2370 = vmatprep.subr.bf16.mxu0 %v4427_v27 }
  0xaa   :  { %2021 = vmatmul.mubr.bf16.gmra.mrb[20].mxu1 %v3585_v32  ;;  %v3658_v32 = vld [vmem:[%s4894_s1 + $0x664] ss:$8 sps:$4 sm:$0xff]  }
  0xab   :  { %2330 = vmatmul.mubr.bf16.gmra.mrb[20].mxu0 %v3571_v29  ;;  %2062 = vmatpush1.bf16.msra.mxu1 %v3568_v28  ;;  %v3649_v28 = vld [vmem:[%s4894_s1 + $0x654] ss:$8 sps:$4 sm:$0xff]   ;;  %v3650_v29 = vld [vmem:[%s4895_s0 + $0x14c] ss:$52 sps:$4 sm:$0xff]  }
  0xac   :  { %2371 = vmatpush1.bf16.msra.mxu0 %v4438_v30  ;;  %2063 = vmatprep.subr.bf16.mxu1 %v3577_v33  ;;  %v3654_v33 = vld [vmem:[%s4895_s0 + $0x148] ss:$52 sps:$4 sm:$0xff]  }
  0xad   :  { %2372 = vmatprep.subr.bf16.mxu0 %v4451_v34  ;;  %2339 = vmatprep.mubr.bf16.mxu0 %v3583_v36  ;;  %v3661_v36 = vld [vmem:[%s4894_s1 + $0x674] ss:$8 sps:$4 sm:$0xff]  }
  0xae   :  { %2030 = vmatprep.mubr.bf16.mxu1 %v3599_v38  ;;  %v3662_v38 = vld [vmem:[%s4895_s0 + $0x1b4] ss:$52 sps:$4 sm:$0xff]  }
  0xaf   :  { %2064 = vmatpush1.bf16.msra.mxu1 %v3575_v39  ;;  %v3664_v39 = vld [vmem:[%s4895_s0 + $0x1b0] ss:$52 sps:$4 sm:$0xff]  }
  0xb0   :  { %2373 = vmatpush1.bf16.msra.mxu0 %v4466_v40  ;;  %2065 = vmatprep.subr.bf16.mxu1 %v3588_v42  ;;  %v3665_v42 = vld [vmem:[%s4895_s0 + $0x30] ss:$52 sps:$4 sm:$0xff]  }
  0xb1   :  { %2374 = vmatprep.subr.bf16.mxu0 %v4475_v44 }
  0xb2   :  { %2031 = vmatmul.mubr.bf16.gmra.mrb[24].mxu1 %v3601_v50  ;;  %v3686_v50 = vld [vmem:[%s4895_s0 + $0x2a0] ss:$52 sps:$4 sm:$0xff]  }
  0xb3   :  { %2340 = vmatmul.mubr.bf16.gmra.mrb[24].mxu0 %v3589_v46  ;;  %2066 = vmatpush1.bf16.msra.mxu1 %v3586_v45  ;;  %v3682_v45 = vld [vmem:[%s4895_s0 + $0x238] ss:$52 sps:$4 sm:$0xff]   ;;  %v3683_v46 = vld [vmem:[%s4895_s0 + $0x29c] ss:$52 sps:$4 sm:$0xff]  }
  0xb4   :  { %2375 = vmatpush1.bf16.msra.mxu0 %v4486_v48  ;;  %2067 = vmatprep.subr.bf16.mxu1 %v3595_v51 }
  0xb5   :  { %2376 = vmatprep.subr.bf16.mxu0 %v4499_v52  ;;  %2073 = vmatprep.mubr.bf16.mxu1 %v3616_v54 }
  0xb6   :  { %2382 = vmatprep.mubr.bf16.mxu0 %v3619_v56 }
  0xb7   :  { %2068 = vmatpush1.bf16.msra.mxu1 %v3593_v57 }
  0xb8   :  { %2377 = vmatpush1.bf16.msra.mxu0 %v4513_v58  ;;  %2069 = vmatprep.subr.bf16.mxu1 %v3604_v60 }
  0xb9   :  { %2378 = vmatprep.subr.bf16.mxu0 %v4523_v62 }
  0xbb   :  { %2070 = vmatpush1.bf16.msra.mxu1 %v3602_v63 }
  0xbc   :  { %2379 = vmatpush1.bf16.msra.mxu0 %v4531_v0  ;;  %2071 = vmatprep.subr.bf16.mxu1 %v3610_v2 }
  0xbd   :  { %2380 = vmatprep.subr.bf16.mxu0 %v4541_v4 }
  0xbf   :  { %2072 = vmatpush1.bf16.msra.mxu1 %v3608_v5 }
  0xc0   :  { %2381 = vmatpush1.bf16.msra.mxu0 %v4550_v6  ;;  %3013 = vmatprep.subr.bf16.mxu1 %v4188_v31  ;;  %v3634_v31 = vld [vmem:[%s4894_s1 + $0x624] ss:$8 sps:$4 sm:$0xff]  }
  0xc1   :  { %2453 = vmatprep.subr.bf16.mxu0 %v3622_v8 }
  0xc2   :  { %2074 = vmatmul.mubr.bf16.vlgmr.msra.gmra.mrb[0].mxu1 %v3614_v10 }
  0xc3   :  { %2383 = vmatmul.mubr.bf16.vlgmr.msra.gmra.mrb[0].mxu0 %v3617_v11  ;;  %3029 = vmatpush1.bf16.msra.mxu1 %v4202_v35  ;;  %v3631_v35 = vld [vmem:[%s4895_s0 + $0x90] ss:$52 sps:$4 sm:$0xff]  }
  0xc4   :  { %2454 = vmatpush1.bf16.msra.mxu0 %v3620_v12  ;;  %3014 = vmatprep.subr.bf16.mxu1 %v4211_v37  ;;  %v3632_v37 = vld [vmem:[%s4894_s1 + $0x620] ss:$8 sps:$4 sm:$0xff]  }
  0xc5   :  { %2455 = vmatprep.subr.bf16.mxu0 %v3625_v14  ;;  %2083 = vmatprep.mubr.bf16.mxu1 %v3626_v16 }
  0xc6   :  { %2392 = vmatprep.mubr.bf16.mxu0 %v3628_v17  ;;  %v323_v17 = vlaneseq }
  0xc7   :  { %3030 = vmatpush1.bf16.msra.mxu1 %v4225_v41  ;;  %v3640_v41 = vld [vmem:[%s4895_s0 + $0xfc] ss:$52 sps:$4 sm:$0xff]  }
  0xc8   :  { %2456 = vmatpush1.bf16.msra.mxu0 %v3623_v19  ;;  %3015 = vmatprep.subr.bf16.mxu1 %v4235_v43  ;;  %v3635_v43 = vld [vmem:[%s4894_s1 + $0x630] ss:$8 sps:$4 sm:$0xff]  }
  0xc9   :  { %2457 = vmatprep.subr.bf16.mxu0 %v3634_v31 }
  0xca   :  { %2084 = vmatmul.mubr.bf16.gmra.mrb[4].mxu1 %v3630_v20 }
  0xcb   :  { %2393 = vmatmul.mubr.bf16.gmra.mrb[4].mxu0 %v3631_v35  ;;  %3031 = vmatpush1.bf16.msra.mxu1 %v4250_v47  ;;  %v3643_v47 = vld [vmem:[%s4895_s0 + $0xf8] ss:$52 sps:$4 sm:$0xff]   ;;  %v324_v35 = vshrl.u32 %v323_v17, 7 }
  0xcc   :  { %2458 = vmatpush1.bf16.msra.mxu0 %v3632_v37  ;;  %3016 = vmatprep.subr.bf16.mxu1 %v4259_v49  ;;  %v3644_v49 = vld [vmem:[%s4894_s1 + $0x640] ss:$8 sps:$4 sm:$0xff]  }
  0xcd   :  { %2459 = vmatprep.subr.bf16.mxu0 %v3637_v22  ;;  %2093 = vmatprep.mubr.bf16.mxu1 %v3638_v23  ;;  %v325_v22 = vsub.s32 0, %v324_v35  ;;  %v321_v23 = vld [vmem:[%s4896_s2] sm:$0x3] }
  0xce   :  { %2402 = vmatprep.mubr.bf16.mxu0 %v3640_v41  ;;  %v329_v41 = vsub.s32 1, %v324_v35 }
  0xcf   :  { %3032 = vmatpush1.bf16.msra.mxu1 %v4273_v53  ;;  %v3652_v53 = vld [vmem:[%s4895_s0 + $0x164] ss:$52 sps:$4 sm:$0xff]  }
  0xd0   :  { %2460 = vmatpush1.bf16.msra.mxu0 %v3635_v43  ;;  %3017 = vmatprep.subr.bf16.mxu1 %v4283_v55  ;;  %v3647_v55 = vld [vmem:[%s4894_s1 + $0x650] ss:$8 sps:$4 sm:$0xff]  }
  0xd1   :  { %2461 = vmatprep.subr.bf16.mxu0 %v3646_v24 }
  0xd2   :  { %2094 = vmatmul.mubr.bf16.gmra.mrb[8].mxu1 %v3642_v26 }
  0xd3   :  { %2403 = vmatmul.mubr.bf16.gmra.mrb[8].mxu0 %v3643_v47  ;;  %3033 = vmatpush1.bf16.msra.mxu1 %v4298_v59  ;;  %v3655_v59 = vld [vmem:[%s4895_s0 + $0x160] ss:$52 sps:$4 sm:$0xff]   ;;  %v4766_v47 = vrot.slane %v321_v23, %v325_v22 }
  0xd4   :  { %2462 = vmatpush1.bf16.msra.mxu0 %v3644_v49  ;;  %3018 = vmatprep.subr.bf16.mxu1 %v4307_v61  ;;  %v3656_v61 = vld [vmem:[%s4894_s1 + $0x660] ss:$8 sps:$4 sm:$0xff]  }
  0xd5   :  { %2463 = vmatprep.subr.bf16.mxu0 %v3649_v28  ;;  %2103 = vmatprep.mubr.bf16.mxu1 %v3650_v29  ;;  %v4770_v28 = vrot.slane %v321_v23, %v329_v41 }
  0xd6   :  { %2412 = vmatprep.mubr.bf16.mxu0 %v3652_v53 }
  0xd7   :  { %3034 = vmatpush1.bf16.msra.mxu1 %v4321_v1  ;;  %v3659_v1 = vld [vmem:[%s4894_s1 + $0x670] ss:$8 sps:$4 sm:$0xff]  }
  0xd8   :  { %2464 = vmatpush1.bf16.msra.mxu0 %v3647_v55  ;;  %3019 = vmatprep.subr.bf16.mxu1 %v4331_v3  ;;  %v3687_v3 = vmov 0  }
  0xd9   :  { %2465 = vmatprep.subr.bf16.mxu0 %v3658_v32 }
  0xda   :  { %2104 = vmatmul.mubr.bf16.gmra.mrb[12].mxu1 %v3654_v33 }
  0xdb   :  { %2413 = vmatmul.mubr.bf16.gmra.mrb[12].mxu0 %v3655_v59  ;;  %3035 = vmatpush1.bf16.msra.mxu1 %v4346_v7  ;;  %v3666_v7 = vld [vmem:[%s4895_s0 + $0x21c] ss:$52 sps:$4 sm:$0xff]  }
  0xdc   :  { %2466 = vmatpush1.bf16.msra.mxu0 %v3656_v61  ;;  %3020 = vmatprep.subr.bf16.mxu1 %v4355_v9  ;;  %v3668_v9 = vld [vmem:[%s4895_s0 + $0x218] ss:$52 sps:$4 sm:$0xff]  }
  0xdd   :  { %2467 = vmatprep.subr.bf16.mxu0 %v3661_v36  ;;  %2113 = vmatprep.mubr.bf16.mxu1 %v3662_v38 }
  0xde   :  { %2485 = vmatprep.mubr.bf16.mxu0 %v3687_v3 }
  0xdf   :  { %3036 = vmatpush1.bf16.msra.mxu1 %v4369_v13  ;;  %v3669_v13 = vld [vmem:[%s4895_s0 + $0x98] ss:$52 sps:$4 sm:$0xff]  }
  0xe0   :  { %2468 = vmatpush1.bf16.msra.mxu0 %v3659_v1  ;;  %3021 = vmatprep.subr.bf16.mxu1 %v4379_v15  ;;  %v3670_v15 = vld [vmem:[%s4895_s0 + $0x284] ss:$52 sps:$4 sm:$0xff]  }
  0xe2   :  { %2114 = vmatmul.mubr.bf16.gmra.mrb[16].mxu1 %v3664_v39 }
  0xe3   :  { %2486 = vmatmul.mubr.bf16.vlgmr.msra.gmra.mrb[0].mxu0 %v3665_v42  ;;  %3037 = vmatpush1.bf16.msra.mxu1 %v4390_v18  ;;  %v3672_v18 = vld [vmem:[%s4895_s0 + $0x280] ss:$52 sps:$4 sm:$0xff]  }
  0xe4   :  { %2123 = vmatprep.mubr.bf16.mxu1 %v3666_v7  ;;  %3022 = vmatprep.subr.bf16.mxu1 %v4403_v21  ;;  %v3673_v21 = vld [vmem:[%s4895_s0 + $0x100] ss:$52 sps:$4 sm:$0xff]  }
  0xe5   :  { %2495 = vmatprep.mubr.bf16.mxu0 %v3687_v3 }
  0xe7   :  { %3038 = vmatpush1.bf16.msra.mxu1 %v4417_v25  ;;  %v3677_v25 = vld [vmem:[%s4895_s0 + $0x1cc] ss:$52 sps:$4 sm:$0xff]  }
  0xe8   :  { %3023 = vmatprep.subr.bf16.mxu1 %v4427_v27  ;;  %v3674_v27 = vld [vmem:[%s4895_s0 + $0x168] ss:$52 sps:$4 sm:$0xff]  }
  0xea   :  { %2124 = vmatmul.mubr.bf16.gmra.mrb[20].mxu1 %v3668_v9 }
  0xeb   :  { %2496 = vmatmul.mubr.bf16.gmra.mrb[4].mxu0 %v3669_v13  ;;  %3039 = vmatpush1.bf16.msra.mxu1 %v4438_v30  ;;  %v3675_v30 = vld [vmem:[%s4895_s0 + $0x1c8] ss:$52 sps:$4 sm:$0xff]  }
  0xec   :  { %2133 = vmatprep.mubr.bf16.mxu1 %v3670_v15  ;;  %3024 = vmatprep.subr.bf16.mxu1 %v4451_v34  ;;  %v3678_v34 = vld [vmem:[%s4895_s0 + $0x1d0] ss:$52 sps:$4 sm:$0xff]  }
  0xed   :  { %2505 = vmatprep.mubr.bf16.mxu0 %v3687_v3 }
  0xef   :  { %3040 = vmatpush1.bf16.msra.mxu1 %v4466_v40  ;;  %v3679_v40 = vld [vmem:[%s4895_s0 + $0x234] ss:$52 sps:$4 sm:$0xff]  }
  0xf0   :  { %3025 = vmatprep.subr.bf16.mxu1 %v4475_v44  ;;  %v3681_v44 = vld [vmem:[%s4895_s0 + $0x230] ss:$52 sps:$4 sm:$0xff]  }
  0xf2   :  { %2134 = vmatmul.mubr.bf16.gmra.mrb[24].mxu1 %v3672_v18 }
  0xf3   :  { %2506 = vmatmul.mubr.bf16.gmra.mrb[8].mxu0 %v3673_v21  ;;  %3041 = vmatpush1.bf16.msra.mxu1 %v4486_v48  ;;  %v3685_v48 = vld [vmem:[%s4895_s0 + $0x298] ss:$52 sps:$4 sm:$0xff]  }
  0xf4   :  { %2515 = vmatprep.mubr.bf16.mxu0 %v3687_v3  ;;  %3026 = vmatprep.subr.bf16.mxu1 %v4499_v52 }
  0xf5   :  { %2422 = vmatprep.mubr.bf16.mxu1 %v3677_v25 }
  0xf7   :  { %3042 = vmatpush1.bf16.msra.mxu1 %v4513_v58 }
  0xf8   :  { %3027 = vmatprep.subr.bf16.mxu1 %v4523_v62 }
  0xfb   :  { %2516 = vmatmul.mubr.bf16.gmra.mrb[12].mxu0 %v3674_v27  ;;  %3043 = vmatpush1.bf16.msra.mxu1 %v4531_v0 }
  0xfc   :  { %2525 = vmatprep.mubr.bf16.mxu0 %v3687_v3  ;;  %3028 = vmatprep.subr.bf16.mxu1 %v4541_v4 }
  0xff   :  { %3044 = vmatpush1.bf16.msra.mxu1 %v4550_v6 }
 0x102   :  { %2423 = vmatmul.mubr.bf16.vlgmr.msra.gmra.mrb[28].mxu1 %v3675_v30 }
 0x103   :  { %2526 = vmatmul.mubr.bf16.gmra.mrb[28].mxu0 %v3678_v34  ;;  %2432 = vmatprep.mubr.bf16.mxu1 %v3679_v40 }
 0x104   :  { %2535 = vmatprep.mubr.bf16.mxu0 %v3687_v3 }
 0x10a   :  { %2433 = vmatmul.mubr.bf16.gmra.mrb[32].mxu1 %v3681_v44 }
 0x10b   :  { %2536 = vmatmul.mubr.bf16.gmra.mrb[32].mxu0 %v3682_v45  ;;  %2442 = vmatprep.mubr.bf16.mxu1 %v3683_v46 }
 0x10c   :  { %2545 = vmatprep.mubr.bf16.mxu0 %v3687_v3 }
 0x112   :  { %2443 = vmatmul.mubr.bf16.gmra.mrb[36].mxu1 %v3685_v48 }
 0x113   :  { %2546 = vmatmul.mubr.bf16.gmra.mrb[36].mxu0 %v3686_v50 }
 0x176   :  { %v2321_v51 = vpop.f32.mrb[16].mxu0 }
 0x177   :  { %v2323_v52 = vpop.f32.mrb[17].mxu0 }
 0x178   :  { %v2325_v54 = vpop.f32.mrb[18].mxu0 }
 0x179   :  { %v2327_v56 = vpop.f32.mrb[19].mxu0 }
 0x17e   :  { %v4733_v57 = vpop.f32.mrb[20].mxu0 }
 0x17f   :  { %v4735_v58 = vpop.f32.mrb[21].mxu0 }
 0x180   :  { %v4737_v60 = vpop.f32.mrb[22].mxu0 }
 0x181   :  { %v4739_v62 = vpop.f32.mrb[23].mxu0 }
 0x186   :  { %v4741_v63 = vpop.f32.mrb[24].mxu0 }
 0x187   :  { %v4743_v0 = vpop.f32.mrb[25].mxu0 }
 0x188   :  { %v4745_v2 = vpop.f32.mrb[26].mxu0 }
 0x189   :  { %v4747_v4 = vpop.f32.mrb[27].mxu0 }
 0x195   :  { %v2075_v5 = vpop.f32.mrb[0].mxu1 }
 0x196   :  { %v2077_v6 = vpop.f32.mrb[1].mxu1  ;;  %v3045_v29 = vadd.f32 %v2075_v5, %v4766_v47 }
 0x197   :  { %v2079_v8 = vpop.f32.mrb[2].mxu1  ;;  %v3047_v53 = vadd.f32 %v2077_v6, %v4770_v28 }
 0x198   :  { %v2081_v10 = vpop.f32.mrb[3].mxu1  ;;  %v3049_v33 = vadd.f32 %v2079_v8, %v4766_v47 }
 0x199   :  { %v3051_v1 = vadd.f32 %v2081_v10, %v4770_v28 }
 0x19d   :  { %v2085_v11 = vpop.f32.mrb[4].mxu1 }
 0x19e   :  { %v2087_v12 = vpop.f32.mrb[5].mxu1  ;;  %v3053_v5 = vadd.f32 %v2085_v11, %v4766_v47 }
 0x19f   :  { %v2089_v14 = vpop.f32.mrb[6].mxu1  ;;  %v3055_v6 = vadd.f32 %v2087_v12, %v4770_v28 }
 0x1a0   :  { %v2091_v16 = vpop.f32.mrb[7].mxu1 }
 0x1a5   :  { %v4749_v19 = vpop.f32.mrb[8].mxu1 }
 0x1a6   :  { %v4751_v31 = vpop.f32.mrb[9].mxu1 }
 0x1a7   :  { %v4753_v20 = vpop.f32.mrb[10].mxu1 }
 0x1a8   :  { %v4755_v37 = vpop.f32.mrb[11].mxu1 }
 0x1ad   :  { %v4760_v43 = vpop.f32.mrb[12].mxu1 }
 0x1ae   :  { %v4762_v24 = vpop.f32.mrb[13].mxu1 }
 0x1af   :  { %v4764_v26 = vpop.f32.mrb[14].mxu1 }
 0x1b0   :  { %v4768_v49 = vpop.f32.mrb[15].mxu1 }
 0x1b5   :  { %v2115_v55 = vpop.f32.mrb[16].mxu1 }
 0x1b6   :  { %v2487_v32 = vpop.f32.mrb[0].mxu0  ;;  %v3077_v59 = vadd.f32 %v2115_v55, %v4766_v47  ;;  %v2117_v36 = vpop.f32.mrb[17].mxu1 }
 0x1b7   :  { %v3046_v61 = vadd.f32 %v3045_v29, %v2487_v32  ;;  %v2489_v38 = vpop.f32.mrb[1].mxu0  ;;  %v3081_v3 = vadd.f32 %v2117_v36, %v4770_v28  ;;  %v2119_v42 = vpop.f32.mrb[18].mxu1 }
 0x1b8   :  { %v3048_v39 = vadd.f32 %v3047_v53, %v2489_v38  ;;  %v2491_v7 = vpop.f32.mrb[2].mxu0  ;;  %v3085_v13 = vadd.f32 %v2119_v42, %v4766_v47  ;;  %v2121_v18 = vpop.f32.mrb[19].mxu1  ;;  %v4779_v25 = vadd.f32 %v3077_v59, %v2321_v51 }
 0x1b9   :  { %v2556_v9 = vmax.f32 %v3046_v61, 0.0  ;;  %v3050_v15 = vadd.f32 %v3049_v33, %v2491_v7  ;;  %v2493_v21 = vpop.f32.mrb[3].mxu0  ;;  %v3089_v30 = vadd.f32 %v2121_v18, %v4770_v28  ;;  %v4782_v40 = vadd.f32 %v3081_v3, %v2323_v52 }
 0x1ba   :  { %v2557_v27 = vmax.f32 %v3048_v39, 0.0  ;;  %v3052_v34 = vadd.f32 %v3051_v1, %v2493_v21  ;;  %v4784_v45 = vadd.f32 %v3085_v13, %v2325_v54  ;;  %v3057_v52 = vadd.f32 %v2089_v14, %v4766_v47 }
 0x1bb   :  { %v2558_v44 = vmax.f32 %v3050_v15, 0.0  ;;  %v4786_v50 = vadd.f32 %v3089_v30, %v2327_v56  ;;  %v3059_v56 = vadd.f32 %v2091_v16, %v4770_v28  ;;  %v3063_v7 = vadd.f32 %v4751_v31, %v4770_v28 }
 0x1bc   :  { %v2999_v46 = vpack.c.bf16 %v2557_v27, %v2556_v9  ;;  %v2559_v48 = vmax.f32 %v3052_v34, 0.0 }
 0x1bd   :  { %v2125_v8 = vpop.f32.mrb[20].mxu1 }
 0x1be   :  { %2668 = vst [vmem:[%s4897_s3] sm:$0xff] %v2999_v46  ;;  %v3000_v51 = vpack.c.bf16 %v2559_v48, %v2558_v44  ;;  %v2497_v10 = vpop.f32.mrb[4].mxu0  ;;  %v3093_v54 = vadd.f32 %v2125_v8, %v4766_v47  ;;  %v2127_v35 = vpop.f32.mrb[21].mxu1 }
 0x1bf   :  { %v3054_v17 = vadd.f32 %v3053_v5, %v2497_v10  ;;  %v2499_v22 = vpop.f32.mrb[5].mxu0  ;;  %v3097_v11 = vadd.f32 %v2127_v35, %v4770_v28  ;;  %v2129_v23 = vpop.f32.mrb[22].mxu1 }
 0x1c0   :  { %2669 = vst [vmem:[%s4897_s3 + $0x8] sm:$0xff] %v3000_v51  ;;  %v3056_v12 = vadd.f32 %v3055_v6, %v2499_v22  ;;  %v2501_v41 = vpop.f32.mrb[6].mxu0  ;;  %v3101_v53 = vadd.f32 %v2129_v23, %v4766_v47  ;;  %v2131_v55 = vpop.f32.mrb[23].mxu1  ;;  %v4802_v33 = vadd.f32 %v3093_v54, %v4733_v57  ;;  %v3061_v57 = vadd.f32 %v4749_v19, %v4766_v47 }
 0x1c1   :  { %v2560_v29 = vmax.f32 %v3054_v17, 0.0  ;;  %v3058_v14 = vadd.f32 %v3057_v52, %v2501_v41  ;;  %v2503_v32 = vpop.f32.mrb[7].mxu0  ;;  %v3105_v16 = vadd.f32 %v2131_v55, %v4770_v28  ;;  %v4806_v36 = vadd.f32 %v3097_v11, %v4735_v58 }
 0x1c2   :  { %v2561_v59 = vmax.f32 %v3056_v12, 0.0  ;;  %v3060_v61 = vadd.f32 %v3059_v56, %v2503_v32  ;;  %v4809_v1 = vadd.f32 %v3101_v53, %v4737_v60  ;;  %v3065_v60 = vadd.f32 %v4753_v20, %v4766_v47 }
 0x1c3   :  { %v2562_v38 = vmax.f32 %v3058_v14, 0.0  ;;  %v4812_v42 = vadd.f32 %v3105_v16, %v4739_v62  ;;  %v3067_v19 = vadd.f32 %v4755_v37, %v4770_v28  ;;  %v3071_v56 = vadd.f32 %v4762_v24, %v4770_v28 }
 0x1c4   :  { %v3001_v3 = vpack.c.bf16 %v2561_v59, %v2560_v29  ;;  %v2563_v39 = vmax.f32 %v3060_v61, 0.0 }
 0x1c5   :  { %v2135_v9 = vpop.f32.mrb[24].mxu1 }
 0x1c6   :  { %2670 = vst [vmem:[%s4897_s3 + $0x10] sm:$0xff] %v3001_v3  ;;  %v3002_v58 = vpack.c.bf16 %v2563_v39, %v2562_v38  ;;  %v2507_v13 = vpop.f32.mrb[8].mxu0  ;;  %v3109_v15 = vadd.f32 %v2135_v9, %v4766_v47  ;;  %v2137_v18 = vpop.f32.mrb[25].mxu1 }
 0x1c7   :  { %v3062_v62 = vadd.f32 %v3061_v57, %v2507_v13  ;;  %v2509_v21 = vpop.f32.mrb[9].mxu0  ;;  %v3113_v31 = vadd.f32 %v2137_v18, %v4770_v28  ;;  %v2139_v30 = vpop.f32.mrb[26].mxu1 }
 0x1c8   :  { %2671 = vst [vmem:[%s4897_s3 + $0x18] sm:$0xff] %v3002_v58  ;;  %v3064_v27 = vadd.f32 %v3063_v7, %v2509_v21  ;;  %v2511_v34 = vpop.f32.mrb[10].mxu0  ;;  %v3117_v20 = vadd.f32 %v2139_v30, %v4766_v47  ;;  %v2141_v48 = vpop.f32.mrb[27].mxu1  ;;  %v4832_v6 = vadd.f32 %v3109_v15, %v4741_v63  ;;  %v3069_v63 = vadd.f32 %v4760_v43, %v4766_v47 }
 0x1c9   :  { %v2564_v44 = vmax.f32 %v3062_v62, 0.0  ;;  %v3066_v46 = vadd.f32 %v3065_v60, %v2511_v34  ;;  %v2513_v5 = vpop.f32.mrb[11].mxu0  ;;  %v3121_v37 = vadd.f32 %v2141_v48, %v4770_v28  ;;  %v4836_v10 = vadd.f32 %v3113_v31, %v4743_v0 }
 0x1ca   :  { %v2565_v51 = vmax.f32 %v3064_v27, 0.0  ;;  %v3068_v8 = vadd.f32 %v3067_v19, %v2513_v5  ;;  %v4839_v54 = vadd.f32 %v3117_v20, %v4745_v2  ;;  %v3073_v2 = vadd.f32 %v4764_v26, %v4766_v47 }
 0x1cb   :  { %v2566_v52 = vmax.f32 %v3066_v46, 0.0  ;;  %v4842_v22 = vadd.f32 %v3121_v37, %v4747_v4  ;;  %v3075_v4 = vadd.f32 %v4768_v49, %v4770_v28 }
 0x1cc   :  { %v3003_v17 = vpack.c.bf16 %v2565_v51, %v2564_v44  ;;  %v2567_v35 = vmax.f32 %v3068_v8, 0.0 }
 0x1ce   :  { %2672 = vst [vmem:[%s4897_s3 + $0x20] sm:$0xff] %v3003_v17  ;;  %v3004_v0 = vpack.c.bf16 %v2567_v35, %v2566_v52  ;;  %v2517_v11 = vpop.f32.mrb[12].mxu0 }
 0x1cf   :  { %v3070_v12 = vadd.f32 %v3069_v63, %v2517_v11  ;;  %v2519_v23 = vpop.f32.mrb[13].mxu0 }
 0x1d0   :  { %2673 = vst [vmem:[%s4897_s3 + $0x28] sm:$0xff] %v3004_v0  ;;  %v3072_v43 = vadd.f32 %v3071_v56, %v2519_v23  ;;  %v2521_v24 = vpop.f32.mrb[14].mxu0 }
 0x1d1   :  { %v2568_v41 = vmax.f32 %v3070_v12, 0.0  ;;  %v3074_v29 = vadd.f32 %v3073_v2, %v2521_v24  ;;  %v2523_v53 = vpop.f32.mrb[15].mxu0 }
 0x1d2   :  { %v2569_v14 = vmax.f32 %v3072_v43, 0.0  ;;  %v3076_v55 = vadd.f32 %v3075_v4, %v2523_v53 }
 0x1d3   :  { %v2570_v32 = vmax.f32 %v3074_v29, 0.0 }
 0x1d4   :  { %v3005_v59 = vpack.c.bf16 %v2569_v14, %v2568_v41  ;;  %v2571_v16 = vmax.f32 %v3076_v55, 0.0 }
 0x1d5   :  { %v2424_v47 = vpop.f32.mrb[28].mxu1 }
 0x1d6   :  { %2674 = vst [vmem:[%s4897_s3 + $0x30] sm:$0xff] %v3005_v59  ;;  %v3006_v26 = vpack.c.bf16 %v2571_v16, %v2570_v32  ;;  %v2527_v49 = vpop.f32.mrb[28].mxu0  ;;  %v3079_v28 = vadd.f32 %v4779_v25, %v2424_v47  ;;  %v2426_v61 = vpop.f32.mrb[29].mxu1 }
 0x1d7   :  { %v2529_v38 = vpop.f32.mrb[29].mxu0  ;;  %v3083_v3 = vadd.f32 %v4782_v40, %v2426_v61  ;;  %v2428_v39 = vpop.f32.mrb[30].mxu1 }
 0x1d8   :  { %2675 = vst [vmem:[%s4897_s3 + $0x38] sm:$0xff] %v3006_v26  ;;  %v2531_v57 = vpop.f32.mrb[30].mxu0  ;;  %v3080_v7 = vadd.f32 %v3079_v28, %v2527_v49  ;;  %v3087_v58 = vadd.f32 %v4784_v45, %v2428_v39  ;;  %v2430_v9 = vpop.f32.mrb[31].mxu1 }
 0x1d9   :  { %v2533_v13 = vpop.f32.mrb[31].mxu0  ;;  %v3084_v60 = vadd.f32 %v3083_v3, %v2529_v38  ;;  %v3091_v15 = vadd.f32 %v4786_v50, %v2430_v9 }
 0x1da   :  { %v2572_v62 = vmax.f32 %v3080_v7, 0.0  ;;  %v3088_v25 = vadd.f32 %v3087_v58, %v2531_v57 }
 0x1db   :  { %v2573_v18 = vmax.f32 %v3084_v60, 0.0  ;;  %v3092_v21 = vadd.f32 %v3091_v15, %v2533_v13 }
 0x1dc   :  { %v2574_v19 = vmax.f32 %v3088_v25, 0.0 }
 0x1dd   :  { %v3007_v31 = vpack.c.bf16 %v2573_v18, %v2572_v62  ;;  %v2575_v27 = vmax.f32 %v3092_v21, 0.0  ;;  %v2434_v30 = vpop.f32.mrb[32].mxu1 }
 0x1de   :  { %v2537_v34 = vpop.f32.mrb[32].mxu0  ;;  %v3095_v40 = vadd.f32 %v4802_v33, %v2434_v30  ;;  %v2436_v44 = vpop.f32.mrb[33].mxu1 }
 0x1df   :  { %v2539_v20 = vpop.f32.mrb[33].mxu0  ;;  %2676 = vst [vmem:[%s4897_s3 + $0x40] sm:$0xff] %v3007_v31  ;;  %v3008_v45 = vpack.c.bf16 %v2575_v27, %v2574_v19  ;;  %v3099_v50 = vadd.f32 %v4806_v36, %v2436_v44  ;;  %v2438_v46 = vpop.f32.mrb[34].mxu1 }
 0x1e0   :  { %v2541_v48 = vpop.f32.mrb[34].mxu0  ;;  %v3096_v5 = vadd.f32 %v3095_v40, %v2537_v34  ;;  %v3103_v51 = vadd.f32 %v4809_v1, %v2438_v46  ;;  %v2440_v37 = vpop.f32.mrb[35].mxu1 }
 0x1e1   :  { %v2543_v8 = vpop.f32.mrb[35].mxu0  ;;  %2677 = vst [vmem:[%s4897_s3 + $0x48] sm:$0xff] %v3008_v45  ;;  %v3100_v33 = vadd.f32 %v3099_v50, %v2539_v20  ;;  %v3107_v52 = vadd.f32 %v4812_v42, %v2440_v37 }
 0x1e2   :  { %v2576_v17 = vmax.f32 %v3096_v5, 0.0  ;;  %v3104_v35 = vadd.f32 %v3103_v51, %v2541_v48 }
 0x1e3   :  { %v2577_v63 = vmax.f32 %v3100_v33, 0.0  ;;  %v3108_v56 = vadd.f32 %v3107_v52, %v2543_v8 }
 0x1e4   :  { %v2578_v0 = vmax.f32 %v3104_v35, 0.0 }
 0x1e5   :  { %v3009_v36 = vpack.c.bf16 %v2577_v63, %v2576_v17  ;;  %v2579_v11 = vmax.f32 %v3108_v56, 0.0  ;;  %v2444_v2 = vpop.f32.mrb[36].mxu1 }
 0x1e6   :  { %v2547_v12 = vpop.f32.mrb[36].mxu0  ;;  %v3111_v1 = vadd.f32 %v4832_v6, %v2444_v2  ;;  %v2446_v23 = vpop.f32.mrb[37].mxu1 }
 0x1e7   :  { %v2549_v4 = vpop.f32.mrb[37].mxu0  ;;  %2678 = vst [vmem:[%s4897_s3 + $0x50] sm:$0xff] %v3009_v36  ;;  %v3010_v43 = vpack.c.bf16 %v2579_v11, %v2578_v0  ;;  %v3115_v42 = vadd.f32 %v4836_v10, %v2446_v23  ;;  %v2448_v24 = vpop.f32.mrb[38].mxu1 }
 0x1e8   :  { %v2551_v41 = vpop.f32.mrb[38].mxu0  ;;  %v3112_v29 = vadd.f32 %v3111_v1, %v2547_v12  ;;  %v3119_v53 = vadd.f32 %v4839_v54, %v2448_v24  ;;  %v2450_v14 = vpop.f32.mrb[39].mxu1 }
 0x1e9   :  { %v2553_v55 = vpop.f32.mrb[39].mxu0  ;;  %2679 = vst [vmem:[%s4897_s3 + $0x58] sm:$0xff] %v3010_v43  ;;  %v3116_v6 = vadd.f32 %v3115_v42, %v2549_v4  ;;  %v3123_v32 = vadd.f32 %v4842_v22, %v2450_v14 }
 0x1ea   :  { %v2580_v59 = vmax.f32 %v3112_v29, 0.0  ;;  %v3120_v16 = vadd.f32 %v3119_v53, %v2551_v41 }
 0x1eb   :  { %v2581_v26 = vmax.f32 %v3116_v6, 0.0  ;;  %v3124_v47 = vadd.f32 %v3123_v32, %v2553_v55 }
 0x1ec   :  { %v2582_v49 = vmax.f32 %v3120_v16, 0.0 }
 0x1ed   :  { %v3011_v10 = vpack.c.bf16 %v2581_v26, %v2580_v59  ;;  %v2583_v28 = vmax.f32 %v3124_v47, 0.0 }
 0x1ef   :  { %2680 = vst [vmem:[%s4897_s3 + $0x60] sm:$0xff] %v3011_v10  ;;  %v3012_v54 = vpack.c.bf16 %v2583_v28, %v2582_v49 }
 0x1f1   :  { %2681 = vst [vmem:[%s4897_s3 + $0x68] sm:$0xff] %v3012_v54 }

// kernel: net_forward.8
= control target key start
LH: loop header
LB: loop body
LE: loop exit
PB: predicated region body
PF: predicated region fallthrough
CT: control target
= control target key end

     0   :  { %s5633_s1 = inlined_call_operand.vmem [shape: bf16[1792,384], index: 1, kind: input, shape index: {}]   ;;  %s5634_s0 = inlined_call_operand.vmem [shape: bf16[32,1792], index: 0, kind: input, shape index: {}]   ;;  %s5635_s2 = inlined_call_operand.vmem [shape: f32[1,384], index: 2, kind: input, shape index: {}]   ;;  %s5636_s3 = inlined_call_operand.vmem [shape: bf16[32,384], index: 3, kind: output, shape index: {}]  }
   0x1   :  { %v3866_v0 = vld [vmem:[%s5633_s1 + $0x4] ss:$12 sps:$4 sm:$0xff]   ;;  %v3870_v2 = vld [vmem:[%s5633_s1] ss:$12 sps:$4 sm:$0xff]   ;;  %v3872_v4 = vld [vmem:[%s5633_s1 + $0x1c] ss:$12 sps:$4 sm:$0xff]  }
   0x2   :  { %v3868_v1 = vld [vmem:[%s5633_s1 + $0x304] ss:$12 sps:$4 sm:$0xff]   ;;  %2440 = vmatprep.subr.bf16.mxu1 %v3866_v0  ;;  %v3871_v3 = vld [vmem:[%s5633_s1 + $0x300] ss:$12 sps:$4 sm:$0xff]   ;;  %v3874_v5 = vld [vmem:[%s5633_s1 + $0x31c] ss:$12 sps:$4 sm:$0xff]  }
   0x3   :  { %2546 = vmatprep.subr.bf16.mxu0 %v3868_v1  ;;  %2441 = vmatpush1.bf16.msra.mxu1 %v3870_v2  ;;  %v3876_v6 = vld [vmem:[%s5633_s1 + $0x18] ss:$12 sps:$4 sm:$0xff]   ;;  %v3878_v8 = vld [vmem:[%s5633_s1 + $0x34] ss:$12 sps:$4 sm:$0xff]   ;;  %v3882_v10 = vld [vmem:[%s5633_s1 + $0x30] ss:$12 sps:$4 sm:$0xff]  }
   0x4   :  { %2547 = vmatpush1.bf16.msra.mxu0 %v3871_v3  ;;  %2442 = vmatprep.subr.bf16.mxu1 %v3872_v4  ;;  %v3877_v7 = vld [vmem:[%s5633_s1 + $0x318] ss:$12 sps:$4 sm:$0xff]   ;;  %v3880_v9 = vld [vmem:[%s5633_s1 + $0x334] ss:$12 sps:$4 sm:$0xff]   ;;  %v3883_v11 = vld [vmem:[%s5633_s1 + $0x330] ss:$12 sps:$4 sm:$0xff]  }
   0x5   :  { %2548 = vmatprep.subr.bf16.mxu0 %v3874_v5  ;;  %v3884_v12 = vld [vmem:[%s5633_s1 + $0x4c] ss:$12 sps:$4 sm:$0xff]   ;;  %v3888_v14 = vld [vmem:[%s5633_s1 + $0x48] ss:$12 sps:$4 sm:$0xff]   ;;  %v3890_v16 = vld [vmem:[%s5633_s1 + $0x64] ss:$12 sps:$4 sm:$0xff]  }
   0x6   :  { %v3886_v13 = vld [vmem:[%s5633_s1 + $0x34c] ss:$12 sps:$4 sm:$0xff]   ;;  %v3889_v15 = vld [vmem:[%s5633_s1 + $0x348] ss:$12 sps:$4 sm:$0xff]   ;;  %v3892_v17 = vld [vmem:[%s5633_s1 + $0x364] ss:$12 sps:$4 sm:$0xff]  }
   0x7   :  { %2443 = vmatpush1.bf16.msra.mxu1 %v3876_v6  ;;  %v3894_v18 = vld [vmem:[%s5633_s1 + $0x60] ss:$12 sps:$4 sm:$0xff]   ;;  %v3896_v20 = vld [vmem:[%s5633_s1 + $0x7c] ss:$12 sps:$4 sm:$0xff]   ;;  %v3900_v22 = vld [vmem:[%s5633_s1 + $0x78] ss:$12 sps:$4 sm:$0xff]  }
   0x8   :  { %2549 = vmatpush1.bf16.msra.mxu0 %v3877_v7  ;;  %2444 = vmatprep.subr.bf16.mxu1 %v3878_v8  ;;  %v3895_v19 = vld [vmem:[%s5633_s1 + $0x360] ss:$12 sps:$4 sm:$0xff]   ;;  %v3898_v21 = vld [vmem:[%s5633_s1 + $0x37c] ss:$12 sps:$4 sm:$0xff]   ;;  %v3901_v23 = vld [vmem:[%s5633_s1 + $0x378] ss:$12 sps:$4 sm:$0xff]  }
   0x9   :  { %2550 = vmatprep.subr.bf16.mxu0 %v3880_v9  ;;  %v3902_v24 = vld [vmem:[%s5633_s1 + $0x94] ss:$12 sps:$4 sm:$0xff]   ;;  %v3906_v26 = vld [vmem:[%s5633_s1 + $0x90] ss:$12 sps:$4 sm:$0xff]   ;;  %v3908_v28 = vld [vmem:[%s5633_s1 + $0xac] ss:$12 sps:$4 sm:$0xff]  }
   0xa   :  { %v3904_v25 = vld [vmem:[%s5633_s1 + $0x394] ss:$12 sps:$4 sm:$0xff]   ;;  %v3907_v27 = vld [vmem:[%s5633_s1 + $0x390] ss:$12 sps:$4 sm:$0xff]   ;;  %v3910_v29 = vld [vmem:[%s5633_s1 + $0x3ac] ss:$12 sps:$4 sm:$0xff]  }
   0xb   :  { %2445 = vmatpush1.bf16.msra.mxu1 %v3882_v10  ;;  %v3912_v30 = vld [vmem:[%s5633_s1 + $0xa8] ss:$12 sps:$4 sm:$0xff]   ;;  %v3914_v32 = vld [vmem:[%s5633_s1 + $0xc4] ss:$12 sps:$4 sm:$0xff]   ;;  %v3918_v34 = vld [vmem:[%s5633_s1 + $0xc0] ss:$12 sps:$4 sm:$0xff]  }
   0xc   :  { %2551 = vmatpush1.bf16.msra.mxu0 %v3883_v11  ;;  %2446 = vmatprep.subr.bf16.mxu1 %v3884_v12  ;;  %v3913_v31 = vld [vmem:[%s5633_s1 + $0x3a8] ss:$12 sps:$4 sm:$0xff]   ;;  %v3916_v33 = vld [vmem:[%s5633_s1 + $0x3c4] ss:$12 sps:$4 sm:$0xff]   ;;  %v3919_v35 = vld [vmem:[%s5633_s1 + $0x3c0] ss:$12 sps:$4 sm:$0xff]  }
   0xd   :  { %2552 = vmatprep.subr.bf16.mxu0 %v3886_v13  ;;  %v3920_v36 = vld [vmem:[%s5633_s1 + $0xdc] ss:$12 sps:$4 sm:$0xff]   ;;  %v3924_v38 = vld [vmem:[%s5633_s1 + $0xd8] ss:$12 sps:$4 sm:$0xff]   ;;  %v3926_v40 = vld [vmem:[%s5633_s1 + $0xf4] ss:$12 sps:$4 sm:$0xff]  }
   0xe   :  { %v3922_v37 = vld [vmem:[%s5633_s1 + $0x3dc] ss:$12 sps:$4 sm:$0xff]   ;;  %v3925_v39 = vld [vmem:[%s5633_s1 + $0x3d8] ss:$12 sps:$4 sm:$0xff]   ;;  %v3928_v41 = vld [vmem:[%s5633_s1 + $0x3f4] ss:$12 sps:$4 sm:$0xff]  }
   0xf   :  { %2447 = vmatpush1.bf16.msra.mxu1 %v3888_v14  ;;  %v3930_v42 = vld [vmem:[%s5633_s1 + $0xf0] ss:$12 sps:$4 sm:$0xff]   ;;  %v3932_v44 = vld [vmem:[%s5633_s1 + $0x10c] ss:$12 sps:$4 sm:$0xff]   ;;  %v3936_v46 = vld [vmem:[%s5633_s1 + $0x108] ss:$12 sps:$4 sm:$0xff]  }
  0x10   :  { %2553 = vmatpush1.bf16.msra.mxu0 %v3889_v15  ;;  %2448 = vmatprep.subr.bf16.mxu1 %v3890_v16  ;;  %v3931_v43 = vld [vmem:[%s5633_s1 + $0x3f0] ss:$12 sps:$4 sm:$0xff]   ;;  %v3934_v45 = vld [vmem:[%s5633_s1 + $0x40c] ss:$12 sps:$4 sm:$0xff]   ;;  %v3937_v47 = vld [vmem:[%s5633_s1 + $0x408] ss:$12 sps:$4 sm:$0xff]  }
  0x11   :  { %2554 = vmatprep.subr.bf16.mxu0 %v3892_v17  ;;  %v4529_v48 = vld [vmem:[%s5634_s0 + $0x4] ss:$56 sps:$4 sm:$0xff]   ;;  %v3970_v51 = vld [vmem:[%s5634_s0 + $0x14] ss:$56 sps:$4 sm:$0xff]   ;;  %v4592_v4 = vld [vmem:[%s5634_s0] ss:$56 sps:$4 sm:$0xff]  }
  0x12   :  { %v3938_v49 = vld [vmem:[%s5633_s1 + $0x124] ss:$12 sps:$4 sm:$0xff]   ;;  %2472 = vmatprep.mubr.bf16.mxu1 %v4529_v48  ;;  %v3942_v52 = vld [vmem:[%s5633_s1 + $0x120] ss:$12 sps:$4 sm:$0xff]   ;;  %v3944_v54 = vld [vmem:[%s5633_s1 + $0x13c] ss:$12 sps:$4 sm:$0xff]   ;;  %2578 = vmatprep.mubr.bf16.mxu0 %v3970_v51 }
  0x13   :  { %2449 = vmatpush1.bf16.msra.mxu1 %v3894_v18  ;;  %v3940_v50 = vld [vmem:[%s5633_s1 + $0x424] ss:$12 sps:$4 sm:$0xff]   ;;  %v3943_v53 = vld [vmem:[%s5633_s1 + $0x420] ss:$12 sps:$4 sm:$0xff]   ;;  %v3946_v55 = vld [vmem:[%s5633_s1 + $0x43c] ss:$12 sps:$4 sm:$0xff]  }
  0x14   :  { %2555 = vmatpush1.bf16.msra.mxu0 %v3895_v19  ;;  %2450 = vmatprep.subr.bf16.mxu1 %v3896_v20  ;;  %v3948_v56 = vld [vmem:[%s5633_s1 + $0x138] ss:$12 sps:$4 sm:$0xff]   ;;  %v3950_v58 = vld [vmem:[%s5633_s1 + $0x154] ss:$12 sps:$4 sm:$0xff]   ;;  %v3954_v60 = vld [vmem:[%s5633_s1 + $0x150] ss:$12 sps:$4 sm:$0xff]  }
  0x15   :  { %2556 = vmatprep.subr.bf16.mxu0 %v3898_v21  ;;  %v3949_v57 = vld [vmem:[%s5633_s1 + $0x438] ss:$12 sps:$4 sm:$0xff]   ;;  %v3952_v59 = vld [vmem:[%s5633_s1 + $0x454] ss:$12 sps:$4 sm:$0xff]   ;;  %v3955_v61 = vld [vmem:[%s5633_s1 + $0x450] ss:$12 sps:$4 sm:$0xff]  }
  0x16   :  { %v3956_v62 = vld [vmem:[%s5633_s1 + $0x16c] ss:$12 sps:$4 sm:$0xff]   ;;  %v3960_v0 = vld [vmem:[%s5633_s1 + $0x168] ss:$12 sps:$4 sm:$0xff]   ;;  %v3967_v2 = vld [vmem:[%s5633_s1 + $0x184] ss:$12 sps:$4 sm:$0xff]  }
  0x17   :  { %2451 = vmatpush1.bf16.msra.mxu1 %v3900_v22  ;;  %v3958_v63 = vld [vmem:[%s5633_s1 + $0x46c] ss:$12 sps:$4 sm:$0xff]   ;;  %v3961_v1 = vld [vmem:[%s5633_s1 + $0x468] ss:$12 sps:$4 sm:$0xff]   ;;  %v3973_v3 = vld [vmem:[%s5633_s1 + $0x484] ss:$12 sps:$4 sm:$0xff]  }
  0x18   :  { %2557 = vmatpush1.bf16.msra.mxu0 %v3901_v23  ;;  %2452 = vmatprep.subr.bf16.mxu1 %v3902_v24  ;;  %v3965_v5 = vld [vmem:[%s5633_s1 + $0x180] ss:$12 sps:$4 sm:$0xff]   ;;  %v3968_v6 = vld [vmem:[%s5634_s0 + $0x10] ss:$56 sps:$4 sm:$0xff]   ;;  %v3974_v10 = vld [vmem:[%s5633_s1 + $0x198] ss:$12 sps:$4 sm:$0xff]  }
  0x19   :  { %2558 = vmatprep.subr.bf16.mxu0 %v3904_v25  ;;  %v3971_v7 = vld [vmem:[%s5633_s1 + $0x480] ss:$12 sps:$4 sm:$0xff]   ;;  %v3976_v8 = vld [vmem:[%s5633_s1 + $0x19c] ss:$12 sps:$4 sm:$0xff]   ;;  %v3977_v11 = vld [vmem:[%s5633_s1 + $0x498] ss:$12 sps:$4 sm:$0xff]  }
  0x1a   :  { %v3979_v9 = vld [vmem:[%s5633_s1 + $0x49c] ss:$12 sps:$4 sm:$0xff]   ;;  %v3982_v12 = vld [vmem:[%s5633_s1 + $0x1b4] ss:$12 sps:$4 sm:$0xff]   ;;  %v3988_v16 = vld [vmem:[%s5633_s1 + $0x1cc] ss:$12 sps:$4 sm:$0xff]  }
  0x1b   :  { %2453 = vmatpush1.bf16.msra.mxu1 %v3906_v26  ;;  %v3985_v13 = vld [vmem:[%s5633_s1 + $0x4b4] ss:$12 sps:$4 sm:$0xff]   ;;  %v3980_v14 = vld [vmem:[%s5633_s1 + $0x1b0] ss:$12 sps:$4 sm:$0xff]   ;;  %v3991_v17 = vld [vmem:[%s5633_s1 + $0x4cc] ss:$12 sps:$4 sm:$0xff]  }
  0x1c   :  { %2559 = vmatpush1.bf16.msra.mxu0 %v3907_v27  ;;  %2454 = vmatprep.subr.bf16.mxu1 %v3908_v28  ;;  %v3983_v15 = vld [vmem:[%s5633_s1 + $0x4b0] ss:$12 sps:$4 sm:$0xff]   ;;  %v3986_v18 = vld [vmem:[%s5633_s1 + $0x1c8] ss:$12 sps:$4 sm:$0xff]   ;;  %v3992_v22 = vld [vmem:[%s5633_s1 + $0x1e0] ss:$12 sps:$4 sm:$0xff]  }
  0x1d   :  { %2560 = vmatprep.subr.bf16.mxu0 %v3910_v29  ;;  %v3989_v19 = vld [vmem:[%s5633_s1 + $0x4c8] ss:$12 sps:$4 sm:$0xff]   ;;  %v3994_v20 = vld [vmem:[%s5633_s1 + $0x1e4] ss:$12 sps:$4 sm:$0xff]   ;;  %v3995_v23 = vld [vmem:[%s5633_s1 + $0x4e0] ss:$12 sps:$4 sm:$0xff]  }
  0x1e   :  { %v3997_v21 = vld [vmem:[%s5633_s1 + $0x4e4] ss:$12 sps:$4 sm:$0xff]   ;;  %v4000_v24 = vld [vmem:[%s5633_s1 + $0x1fc] ss:$12 sps:$4 sm:$0xff]   ;;  %v4667_v28 = vld [vmem:[%s5634_s0 + $0x74] ss:$56 sps:$4 sm:$0xff]  }
  0x1f   :  { %2455 = vmatpush1.bf16.msra.mxu1 %v3912_v30  ;;  %v4003_v25 = vld [vmem:[%s5633_s1 + $0x4fc] ss:$12 sps:$4 sm:$0xff]   ;;  %v3998_v26 = vld [vmem:[%s5633_s1 + $0x1f8] ss:$12 sps:$4 sm:$0xff]   ;;  %v4006_v30 = vld [vmem:[%s5633_s1 + $0x214] ss:$12 sps:$4 sm:$0xff]  }
  0x20   :  { %2561 = vmatpush1.bf16.msra.mxu0 %v3913_v31  ;;  %2456 = vmatprep.subr.bf16.mxu1 %v3914_v32  ;;  %v4001_v27 = vld [vmem:[%s5633_s1 + $0x4f8] ss:$12 sps:$4 sm:$0xff]   ;;  %v4672_v29 = vld [vmem:[%s5634_s0 + $0x70] ss:$56 sps:$4 sm:$0xff]   ;;  %v4009_v31 = vld [vmem:[%s5633_s1 + $0x514] ss:$12 sps:$4 sm:$0xff]  }
  0x21   :  { %2562 = vmatprep.subr.bf16.mxu0 %v3916_v33  ;;  %v4058_v32 = vld [vmem:[%s5634_s0 + $0x84] ss:$56 sps:$4 sm:$0xff]   ;;  %v4030_v51 = vld [vmem:[%s5633_s1 + $0x274] ss:$12 sps:$4 sm:$0xff]  }
  0x22   :  { %v4004_v33 = vld [vmem:[%s5633_s1 + $0x210] ss:$12 sps:$4 sm:$0xff]  }
  0x23   :  { %2457 = vmatpush1.bf16.msra.mxu1 %v3918_v34  ;;  %v4007_v34 = vld [vmem:[%s5633_s1 + $0x510] ss:$12 sps:$4 sm:$0xff]  }
  0x24   :  { %2563 = vmatpush1.bf16.msra.mxu0 %v3919_v35  ;;  %2458 = vmatprep.subr.bf16.mxu1 %v3920_v36  ;;  %v4063_v35 = vld [vmem:[%s5634_s0 + $0x80] ss:$56 sps:$4 sm:$0xff]  }
  0x25   :  { %2564 = vmatprep.subr.bf16.mxu0 %v3922_v37  ;;  %v4012_v36 = vld [vmem:[%s5633_s1 + $0x22c] ss:$12 sps:$4 sm:$0xff]  }
  0x26   :  { %v4015_v37 = vld [vmem:[%s5633_s1 + $0x52c] ss:$12 sps:$4 sm:$0xff]  }
  0x27   :  { %2459 = vmatpush1.bf16.msra.mxu1 %v3924_v38  ;;  %v4010_v38 = vld [vmem:[%s5633_s1 + $0x228] ss:$12 sps:$4 sm:$0xff]  }
  0x28   :  { %2565 = vmatpush1.bf16.msra.mxu0 %v3925_v39  ;;  %2460 = vmatprep.subr.bf16.mxu1 %v3926_v40  ;;  %v4013_v39 = vld [vmem:[%s5633_s1 + $0x528] ss:$12 sps:$4 sm:$0xff]   ;;  %v4018_v40 = vld [vmem:[%s5633_s1 + $0x244] ss:$12 sps:$4 sm:$0xff]  }
  0x29   :  { %2566 = vmatprep.subr.bf16.mxu0 %v3928_v41  ;;  %v4712_v41 = vld [vmem:[%s5634_s0 + $0xc] ss:$56 sps:$4 sm:$0xff]  }
  0x2b   :  { %2461 = vmatpush1.bf16.msra.mxu1 %v3930_v42  ;;  %v4021_v42 = vld [vmem:[%s5633_s1 + $0x544] ss:$12 sps:$4 sm:$0xff]  }
  0x2c   :  { %2567 = vmatpush1.bf16.msra.mxu0 %v3931_v43  ;;  %2462 = vmatprep.subr.bf16.mxu1 %v3932_v44  ;;  %v4075_v43 = vld [vmem:[%s5634_s0 + $0x1c] ss:$56 sps:$4 sm:$0xff]   ;;  %v4016_v44 = vld [vmem:[%s5633_s1 + $0x240] ss:$12 sps:$4 sm:$0xff]  }
  0x2d   :  { %2568 = vmatprep.subr.bf16.mxu0 %v3934_v45  ;;  %v4019_v45 = vld [vmem:[%s5633_s1 + $0x540] ss:$12 sps:$4 sm:$0xff]  }
  0x2f   :  { %2463 = vmatpush1.bf16.msra.mxu1 %v3936_v46  ;;  %v4024_v46 = vld [vmem:[%s5633_s1 + $0x25c] ss:$12 sps:$4 sm:$0xff]  }
  0x30   :  { %2569 = vmatpush1.bf16.msra.mxu0 %v3937_v47  ;;  %2464 = vmatprep.subr.bf16.mxu1 %v3938_v49  ;;  %v4027_v47 = vld [vmem:[%s5633_s1 + $0x55c] ss:$12 sps:$4 sm:$0xff]   ;;  %v4022_v49 = vld [vmem:[%s5633_s1 + $0x258] ss:$12 sps:$4 sm:$0xff]  }
  0x31   :  { %2570 = vmatprep.subr.bf16.mxu0 %v3940_v50  ;;  %v4025_v50 = vld [vmem:[%s5633_s1 + $0x558] ss:$12 sps:$4 sm:$0xff]  }
  0x33   :  { %2465 = vmatpush1.bf16.msra.mxu1 %v3942_v52  ;;  %v4033_v52 = vld [vmem:[%s5633_s1 + $0x574] ss:$12 sps:$4 sm:$0xff]  }
  0x34   :  { %2571 = vmatpush1.bf16.msra.mxu0 %v3943_v53  ;;  %2466 = vmatprep.subr.bf16.mxu1 %v3944_v54  ;;  %v4028_v53 = vld [vmem:[%s5633_s1 + $0x270] ss:$12 sps:$4 sm:$0xff]  }
  0x35   :  { %2572 = vmatprep.subr.bf16.mxu0 %v3946_v55  ;;  %v4031_v54 = vld [vmem:[%s5633_s1 + $0x570] ss:$12 sps:$4 sm:$0xff]   ;;  %v4036_v55 = vld [vmem:[%s5633_s1 + $0x28c] ss:$12 sps:$4 sm:$0xff]  }
  0x37   :  { %2467 = vmatpush1.bf16.msra.mxu1 %v3948_v56  ;;  %v4039_v56 = vld [vmem:[%s5633_s1 + $0x58c] ss:$12 sps:$4 sm:$0xff]  }
  0x38   :  { %2573 = vmatpush1.bf16.msra.mxu0 %v3949_v57  ;;  %2468 = vmatprep.subr.bf16.mxu1 %v3950_v58  ;;  %v4034_v57 = vld [vmem:[%s5633_s1 + $0x288] ss:$12 sps:$4 sm:$0xff]  }
  0x39   :  { %2574 = vmatprep.subr.bf16.mxu0 %v3952_v59  ;;  %v4037_v58 = vld [vmem:[%s5633_s1 + $0x588] ss:$12 sps:$4 sm:$0xff]   ;;  %v4042_v59 = vld [vmem:[%s5633_s1 + $0x2a4] ss:$12 sps:$4 sm:$0xff]  }
  0x3b   :  { %2469 = vmatpush1.bf16.msra.mxu1 %v3954_v60  ;;  %v4045_v60 = vld [vmem:[%s5633_s1 + $0x5a4] ss:$12 sps:$4 sm:$0xff]  }
  0x3c   :  { %2575 = vmatpush1.bf16.msra.mxu0 %v3955_v61  ;;  %2470 = vmatprep.subr.bf16.mxu1 %v3956_v62  ;;  %v4040_v61 = vld [vmem:[%s5633_s1 + $0x2a0] ss:$12 sps:$4 sm:$0xff]  }
  0x3d   :  { %2576 = vmatprep.subr.bf16.mxu0 %v3958_v63  ;;  %v4043_v62 = vld [vmem:[%s5633_s1 + $0x5a0] ss:$12 sps:$4 sm:$0xff]   ;;  %v4048_v63 = vld [vmem:[%s5633_s1 + $0x2bc] ss:$12 sps:$4 sm:$0xff]  }
  0x3f   :  { %2471 = vmatpush1.bf16.msra.mxu1 %v3960_v0  ;;  %v4051_v0 = vld [vmem:[%s5633_s1 + $0x5bc] ss:$12 sps:$4 sm:$0xff]  }
  0x40   :  { %2577 = vmatpush1.bf16.msra.mxu0 %v3961_v1  ;;  %2493 = vmatprep.subr.bf16.mxu1 %v3967_v2  ;;  %v4046_v1 = vld [vmem:[%s5633_s1 + $0x2b8] ss:$12 sps:$4 sm:$0xff]  }
  0x41   :  { %2599 = vmatprep.subr.bf16.mxu0 %v3973_v3  ;;  %v4049_v2 = vld [vmem:[%s5633_s1 + $0x5b8] ss:$12 sps:$4 sm:$0xff]   ;;  %v4057_v3 = vld [vmem:[%s5633_s1 + $0x2d4] ss:$12 sps:$4 sm:$0xff]  }
  0x42   :  { %2473 = vmatmul.mubr.bf16.vlgmr.msra.gmra.mrb[0].mxu1 %v4592_v4 }
  0x43   :  { %2579 = vmatmul.mubr.bf16.vlgmr.msra.gmra.mrb[0].mxu0 %v3968_v6  ;;  %2494 = vmatpush1.bf16.msra.mxu1 %v3965_v5  ;;  %v4062_v5 = vld [vmem:[%s5633_s1 + $0x5d4] ss:$12 sps:$4 sm:$0xff]   ;;  %v4055_v6 = vld [vmem:[%s5633_s1 + $0x2d0] ss:$12 sps:$4 sm:$0xff]  }
  0x44   :  { %2600 = vmatpush1.bf16.msra.mxu0 %v3971_v7  ;;  %2495 = vmatprep.subr.bf16.mxu1 %v3976_v8  ;;  %v4060_v7 = vld [vmem:[%s5633_s1 + $0x5d0] ss:$12 sps:$4 sm:$0xff]   ;;  %v4066_v8 = vld [vmem:[%s5633_s1 + $0x2ec] ss:$12 sps:$4 sm:$0xff]  }
  0x45   :  { %2601 = vmatprep.subr.bf16.mxu0 %v3979_v9  ;;  %2482 = vmatprep.mubr.bf16.mxu1 %v4667_v28  ;;  %v4069_v9 = vld [vmem:[%s5633_s1 + $0x5ec] ss:$12 sps:$4 sm:$0xff]  }
  0x46   :  { %2588 = vmatprep.mubr.bf16.mxu0 %v4058_v32  ;;  %v4094_v32 = vld [vmem:[%s5633_s1 + $0x648] ss:$12 sps:$4 sm:$0xff]  }
  0x47   :  { %2496 = vmatpush1.bf16.msra.mxu1 %v3974_v10  ;;  %v4064_v10 = vld [vmem:[%s5633_s1 + $0x2e8] ss:$12 sps:$4 sm:$0xff]  }
  0x48   :  { %2602 = vmatpush1.bf16.msra.mxu0 %v3977_v11  ;;  %2497 = vmatprep.subr.bf16.mxu1 %v3982_v12  ;;  %v4067_v11 = vld [vmem:[%s5633_s1 + $0x5e8] ss:$12 sps:$4 sm:$0xff]  }
  0x49   :  { %2603 = vmatprep.subr.bf16.mxu0 %v3985_v13  ;;  %v4814_v12 = vld [vmem:[%s5634_s0 + $0x8] ss:$56 sps:$4 sm:$0xff]   ;;  %v4073_v13 = vld [vmem:[%s5634_s0 + $0x18] ss:$56 sps:$4 sm:$0xff]  }
  0x4a   :  { %2483 = vmatmul.mubr.bf16.gmra.mrb[4].mxu1 %v4672_v29 }
  0x4b   :  { %2498 = vmatpush1.bf16.msra.mxu1 %v3980_v14  ;;  %2589 = vmatmul.mubr.bf16.gmra.mrb[4].mxu0 %v4063_v35  ;;  %v4078_v14 = vld [vmem:[%s5633_s1 + $0x604] ss:$12 sps:$4 sm:$0xff]   ;;  %v4102_v35 = vld [vmem:[%s5633_s1 + $0x128] ss:$12 sps:$4 sm:$0xff]  }
  0x4c   :  { %2604 = vmatpush1.bf16.msra.mxu0 %v3983_v15  ;;  %2499 = vmatprep.subr.bf16.mxu1 %v3988_v16  ;;  %v4079_v15 = vld [vmem:[%s5633_s1 + $0xc8] ss:$12 sps:$4 sm:$0xff]   ;;  %v4076_v16 = vld [vmem:[%s5633_s1 + $0x600] ss:$12 sps:$4 sm:$0xff]  }
  0x4d   :  { %2605 = vmatprep.subr.bf16.mxu0 %v3991_v17  ;;  %2525 = vmatprep.mubr.bf16.mxu1 %v4712_v41  ;;  %v4080_v17 = vld [vmem:[%s5633_s1 + $0x8] ss:$12 sps:$4 sm:$0xff]  }
  0x4e   :  { %2631 = vmatprep.mubr.bf16.mxu0 %v4075_v43  ;;  %v4108_v43 = vld [vmem:[%s5633_s1 + $0x80] ss:$12 sps:$4 sm:$0xff]  }
  0x4f   :  { %2500 = vmatpush1.bf16.msra.mxu1 %v3986_v18  ;;  %v4083_v18 = vld [vmem:[%s5633_s1 + $0x61c] ss:$12 sps:$4 sm:$0xff]  }
  0x50   :  { %2606 = vmatpush1.bf16.msra.mxu0 %v3989_v19  ;;  %2501 = vmatprep.subr.bf16.mxu1 %v3994_v20  ;;  %v4084_v19 = vld [vmem:[%s5633_s1 + $0xe0] ss:$12 sps:$4 sm:$0xff]   ;;  %v4840_v20 = vld [vmem:[%s5634_s0 + $0x7c] ss:$56 sps:$4 sm:$0xff]  }
  0x51   :  { %2607 = vmatprep.subr.bf16.mxu0 %v3997_v21  ;;  %v4081_v21 = vld [vmem:[%s5633_s1 + $0x618] ss:$12 sps:$4 sm:$0xff]  }
  0x53   :  { %2502 = vmatpush1.bf16.msra.mxu1 %v3992_v22  ;;  %v4085_v22 = vld [vmem:[%s5633_s1 + $0x20] ss:$12 sps:$4 sm:$0xff]  }
  0x54   :  { %2608 = vmatpush1.bf16.msra.mxu0 %v3995_v23  ;;  %2503 = vmatprep.subr.bf16.mxu1 %v4000_v24  ;;  %v4091_v23 = vld [vmem:[%s5633_s1 + $0x634] ss:$12 sps:$4 sm:$0xff]   ;;  %v4092_v24 = vld [vmem:[%s5633_s1 + $0xf8] ss:$12 sps:$4 sm:$0xff]  }
  0x55   :  { %2609 = vmatprep.subr.bf16.mxu0 %v4003_v25  ;;  %v4859_v25 = vld [vmem:[%s5634_s0 + $0x78] ss:$56 sps:$4 sm:$0xff]  }
  0x57   :  { %2504 = vmatpush1.bf16.msra.mxu1 %v3998_v26  ;;  %v4089_v26 = vld [vmem:[%s5633_s1 + $0x630] ss:$12 sps:$4 sm:$0xff]  }
  0x58   :  { %2610 = vmatpush1.bf16.msra.mxu0 %v4001_v27  ;;  %2505 = vmatprep.subr.bf16.mxu1 %v4006_v30  ;;  %v4093_v27 = vld [vmem:[%s5633_s1 + $0x38] ss:$12 sps:$4 sm:$0xff]  }
  0x59   :  { %2611 = vmatprep.subr.bf16.mxu0 %v4009_v31  ;;  %v4096_v30 = vld [vmem:[%s5633_s1 + $0x64c] ss:$12 sps:$4 sm:$0xff]   ;;  %v4097_v31 = vld [vmem:[%s5633_s1 + $0x110] ss:$12 sps:$4 sm:$0xff]  }
  0x5b   :  { %2506 = vmatpush1.bf16.msra.mxu1 %v4004_v33  ;;  %v4098_v33 = vld [vmem:[%s5633_s1 + $0x50] ss:$12 sps:$4 sm:$0xff]  }
  0x5c   :  { %2612 = vmatpush1.bf16.msra.mxu0 %v4007_v34  ;;  %2507 = vmatprep.subr.bf16.mxu1 %v4012_v36  ;;  %v4101_v34 = vld [vmem:[%s5633_s1 + $0x664] ss:$12 sps:$4 sm:$0xff]  }
  0x5d   :  { %2613 = vmatprep.subr.bf16.mxu0 %v4015_v37  ;;  %v4890_v36 = vld [vmem:[%s5634_s0 + $0x8c] ss:$56 sps:$4 sm:$0xff]  }
  0x5e   :  { %v4099_v37 = vld [vmem:[%s5633_s1 + $0x660] ss:$12 sps:$4 sm:$0xff]  }
  0x5f   :  { %2508 = vmatpush1.bf16.msra.mxu1 %v4010_v38  ;;  %v4103_v38 = vld [vmem:[%s5633_s1 + $0x68] ss:$12 sps:$4 sm:$0xff]  }
  0x60   :  { %2614 = vmatpush1.bf16.msra.mxu0 %v4013_v39  ;;  %2509 = vmatprep.subr.bf16.mxu1 %v4018_v40  ;;  %v4106_v39 = vld [vmem:[%s5633_s1 + $0x67c] ss:$12 sps:$4 sm:$0xff]   ;;  %v4107_v40 = vld [vmem:[%s5633_s1 + $0x140] ss:$12 sps:$4 sm:$0xff]  }
  0x61   :  { %2615 = vmatprep.subr.bf16.mxu0 %v4021_v42  ;;  %v4104_v42 = vld [vmem:[%s5633_s1 + $0x678] ss:$12 sps:$4 sm:$0xff]  }
  0x63   :  { %2510 = vmatpush1.bf16.msra.mxu1 %v4016_v44  ;;  %v4111_v44 = vld [vmem:[%s5633_s1 + $0x694] ss:$12 sps:$4 sm:$0xff]  }
  0x64   :  { %2616 = vmatpush1.bf16.msra.mxu0 %v4019_v45  ;;  %2511 = vmatprep.subr.bf16.mxu1 %v4024_v46  ;;  %v4112_v45 = vld [vmem:[%s5633_s1 + $0x158] ss:$12 sps:$4 sm:$0xff]  }
  0x65   :  { %2617 = vmatprep.subr.bf16.mxu0 %v4027_v47  ;;  %v4926_v46 = vld [vmem:[%s5634_s0 + $0x24] ss:$56 sps:$4 sm:$0xff]  }
  0x66   :  { %v4109_v47 = vld [vmem:[%s5633_s1 + $0x690] ss:$12 sps:$4 sm:$0xff]  }
  0x67   :  { %2512 = vmatpush1.bf16.msra.mxu1 %v4022_v49  ;;  %v4113_v49 = vld [vmem:[%s5633_s1 + $0x98] ss:$12 sps:$4 sm:$0xff]  }
  0x68   :  { %2618 = vmatpush1.bf16.msra.mxu0 %v4025_v50  ;;  %2513 = vmatprep.subr.bf16.mxu1 %v4030_v51  ;;  %v4116_v50 = vld [vmem:[%s5633_s1 + $0x6ac] ss:$12 sps:$4 sm:$0xff]   ;;  %v4117_v51 = vld [vmem:[%s5633_s1 + $0x170] ss:$12 sps:$4 sm:$0xff]  }
  0x69   :  { %2619 = vmatprep.subr.bf16.mxu0 %v4033_v52  ;;  %v4114_v52 = vld [vmem:[%s5633_s1 + $0x6a8] ss:$12 sps:$4 sm:$0xff]  }
  0x6b   :  { %2514 = vmatpush1.bf16.msra.mxu1 %v4028_v53  ;;  %v4118_v53 = vld [vmem:[%s5633_s1 + $0xb0] ss:$12 sps:$4 sm:$0xff]  }
  0x6c   :  { %2620 = vmatpush1.bf16.msra.mxu0 %v4031_v54  ;;  %2515 = vmatprep.subr.bf16.mxu1 %v4036_v55  ;;  %v4121_v54 = vld [vmem:[%s5633_s1 + $0x6c4] ss:$12 sps:$4 sm:$0xff]   ;;  %v4122_v55 = vld [vmem:[%s5633_s1 + $0x248] ss:$12 sps:$4 sm:$0xff]  }
  0x6d   :  { %2621 = vmatprep.subr.bf16.mxu0 %v4039_v56  ;;  %v4119_v56 = vld [vmem:[%s5633_s1 + $0x6c0] ss:$12 sps:$4 sm:$0xff]  }
  0x6f   :  { %2516 = vmatpush1.bf16.msra.mxu1 %v4034_v57  ;;  %v4123_v57 = vld [vmem:[%s5633_s1 + $0x188] ss:$12 sps:$4 sm:$0xff]  }
  0x70   :  { %2622 = vmatpush1.bf16.msra.mxu0 %v4037_v58  ;;  %2517 = vmatprep.subr.bf16.mxu1 %v4042_v59  ;;  %v4126_v58 = vld [vmem:[%s5633_s1 + $0x6dc] ss:$12 sps:$4 sm:$0xff]   ;;  %v4127_v59 = vld [vmem:[%s5633_s1 + $0x260] ss:$12 sps:$4 sm:$0xff]  }
  0x71   :  { %2623 = vmatprep.subr.bf16.mxu0 %v4045_v60  ;;  %v4124_v60 = vld [vmem:[%s5633_s1 + $0x6d8] ss:$12 sps:$4 sm:$0xff]  }
  0x73   :  { %2518 = vmatpush1.bf16.msra.mxu1 %v4040_v61  ;;  %v4128_v61 = vld [vmem:[%s5633_s1 + $0x1a0] ss:$12 sps:$4 sm:$0xff]  }
  0x74   :  { %2624 = vmatpush1.bf16.msra.mxu0 %v4043_v62  ;;  %2519 = vmatprep.subr.bf16.mxu1 %v4048_v63  ;;  %v4131_v62 = vld [vmem:[%s5633_s1 + $0x6f4] ss:$12 sps:$4 sm:$0xff]   ;;  %v4132_v63 = vld [vmem:[%s5633_s1 + $0x278] ss:$12 sps:$4 sm:$0xff]  }
  0x75   :  { %2625 = vmatprep.subr.bf16.mxu0 %v4051_v0  ;;  %v4133_v0 = vld [vmem:[%s5633_s1 + $0x1b8] ss:$12 sps:$4 sm:$0xff]  }
  0x77   :  { %2520 = vmatpush1.bf16.msra.mxu1 %v4046_v1  ;;  %v4136_v1 = vld [vmem:[%s5633_s1 + $0x70c] ss:$12 sps:$4 sm:$0xff]  }
  0x78   :  { %2626 = vmatpush1.bf16.msra.mxu0 %v4049_v2  ;;  %2521 = vmatprep.subr.bf16.mxu1 %v4057_v3  ;;  %v4134_v2 = vld [vmem:[%s5633_s1 + $0x708] ss:$12 sps:$4 sm:$0xff]   ;;  %v4138_v3 = vld [vmem:[%s5633_s1 + $0x1d0] ss:$12 sps:$4 sm:$0xff]  }
  0x79   :  { %2627 = vmatprep.subr.bf16.mxu0 %v4062_v5  ;;  %v4141_v5 = vld [vmem:[%s5633_s1 + $0x724] ss:$12 sps:$4 sm:$0xff]  }
  0x7b   :  { %2522 = vmatpush1.bf16.msra.mxu1 %v4055_v6  ;;  %v4142_v6 = vld [vmem:[%s5633_s1 + $0x2a8] ss:$12 sps:$4 sm:$0xff]  }
  0x7c   :  { %2628 = vmatpush1.bf16.msra.mxu0 %v4060_v7  ;;  %2523 = vmatprep.subr.bf16.mxu1 %v4066_v8  ;;  %v4139_v7 = vld [vmem:[%s5633_s1 + $0x720] ss:$12 sps:$4 sm:$0xff]   ;;  %v4146_v8 = vld [vmem:[%s5633_s1 + $0x73c] ss:$12 sps:$4 sm:$0xff]  }
  0x7d   :  { %2629 = vmatprep.subr.bf16.mxu0 %v4069_v9  ;;  %v4147_v9 = vld [vmem:[%s5633_s1 + $0x2c0] ss:$12 sps:$4 sm:$0xff]  }
  0x7f   :  { %2524 = vmatpush1.bf16.msra.mxu1 %v4064_v10  ;;  %v4148_v10 = vld [vmem:[%s5633_s1 + $0x200] ss:$12 sps:$4 sm:$0xff]  }
  0x80   :  { %2630 = vmatpush1.bf16.msra.mxu0 %v4067_v11  ;;  %3598 = vmatprep.subr.bf16.mxu1 %v4079_v15  ;;  %v4153_v11 = vld [vmem:[%s5633_s1 + $0x754] ss:$12 sps:$4 sm:$0xff]   ;;  %v4156_v15 = vld [vmem:[%s5633_s1 + $0x218] ss:$12 sps:$4 sm:$0xff]  }
  0x81   :  { %2652 = vmatprep.subr.bf16.mxu0 %v4078_v14  ;;  %v4151_v14 = vld [vmem:[%s5633_s1 + $0x750] ss:$12 sps:$4 sm:$0xff]  }
  0x82   :  { %2526 = vmatmul.mubr.bf16.vlgmr.msra.gmra.mrb[0].mxu1 %v4814_v12 }
  0x83   :  { %2632 = vmatmul.mubr.bf16.vlgmr.msra.gmra.mrb[0].mxu0 %v4073_v13  ;;  %3599 = vmatpush3.bf16.msra.mxu1 %v4080_v17  ;;  %v4154_v13 = vld [vmem:[%s5633_s1 + $0x2d8] ss:$12 sps:$4 sm:$0xff]   ;;  %v4160_v17 = vld [vmem:[%s5633_s1 + $0x2f0] ss:$12 sps:$4 sm:$0xff]  }
  0x84   :  { %2653 = vmatpush1.bf16.msra.mxu0 %v4076_v16  ;;  %3600 = vmatprep.subr.bf16.mxu1 %v4084_v19  ;;  %v4159_v16 = vld [vmem:[%s5633_s1 + $0x76c] ss:$12 sps:$4 sm:$0xff]   ;;  %v4161_v19 = vld [vmem:[%s5633_s1 + $0x230] ss:$12 sps:$4 sm:$0xff]  }
  0x85   :  { %2654 = vmatprep.subr.bf16.mxu0 %v4083_v18  ;;  %2535 = vmatprep.mubr.bf16.mxu1 %v4840_v20  ;;  %v4157_v18 = vld [vmem:[%s5633_s1 + $0x768] ss:$12 sps:$4 sm:$0xff]  }
  0x86   :  { %2641 = vmatprep.mubr.bf16.mxu0 %v4890_v36 }
  0x87   :  { %3601 = vmatpush3.bf16.msra.mxu1 %v4085_v22  ;;  %v4168_v22 = vld [vmem:[%s5633_s1 + $0x3c8] ss:$12 sps:$4 sm:$0xff]  }
  0x88   :  { %2655 = vmatpush1.bf16.msra.mxu0 %v4081_v21  ;;  %3602 = vmatprep.subr.bf16.mxu1 %v4092_v24  ;;  %v4167_v21 = vld [vmem:[%s5633_s1 + $0x784] ss:$12 sps:$4 sm:$0xff]   ;;  %v4165_v24 = vld [vmem:[%s5633_s1 + $0x780] ss:$12 sps:$4 sm:$0xff]  }
  0x89   :  { %2656 = vmatprep.subr.bf16.mxu0 %v4091_v23  ;;  %v5056_v23 = vld [vmem:[%s5634_s0 + $0x20] ss:$56 sps:$4 sm:$0xff]  }
  0x8a   :  { %2536 = vmatmul.mubr.bf16.gmra.mrb[4].mxu1 %v4859_v25 }
  0x8b   :  { %3603 = vmatpush3.bf16.msra.mxu1 %v4093_v27  ;;  %2843 = vmatprep.mubr.bf16.mxu1 %v4529_v48  ;;  %v4904_v48 = vld [vmem:[%s5634_s0 + $0x88] ss:$56 sps:$4 sm:$0xff]  }
  0x8c   :  { %2657 = vmatpush1.bf16.msra.mxu0 %v4089_v26  ;;  %3604 = vmatprep.subr.bf16.mxu1 %v4097_v31  ;;  %v4169_v26 = vld [vmem:[%s5633_s1 + $0x308] ss:$12 sps:$4 sm:$0xff]   ;;  %v4170_v31 = vld [vmem:[%s5633_s1 + $0x798] ss:$12 sps:$4 sm:$0xff]  }
  0x8d   :  { %2658 = vmatprep.subr.bf16.mxu0 %v4096_v30  ;;  %2642 = vmatmul.mubr.bf16.gmra.mrb[4].mxu0 %v4904_v48  ;;  %v4172_v27 = vld [vmem:[%s5633_s1 + $0x79c] ss:$12 sps:$4 sm:$0xff]   ;;  %v4173_v30 = vld [vmem:[%s5633_s1 + $0x3e0] ss:$12 sps:$4 sm:$0xff]  }
  0x8e   :  { %2684 = vmatprep.mubr.bf16.mxu0 %v4926_v46 }
  0x8f   :  { %3605 = vmatpush3.bf16.msra.mxu1 %v4098_v33  ;;  %v4177_v33 = vld [vmem:[%s5633_s1 + $0x7b4] ss:$12 sps:$4 sm:$0xff]  }
  0x90   :  { %2659 = vmatpush1.bf16.msra.mxu0 %v4094_v32  ;;  %3606 = vmatprep.subr.bf16.mxu1 %v4102_v35  ;;  %v4174_v32 = vld [vmem:[%s5633_s1 + $0x320] ss:$12 sps:$4 sm:$0xff]   ;;  %v4175_v35 = vld [vmem:[%s5633_s1 + $0x7b0] ss:$12 sps:$4 sm:$0xff]  }
  0x91   :  { %2660 = vmatprep.subr.bf16.mxu0 %v4101_v34  ;;  %v4178_v34 = vld [vmem:[%s5633_s1 + $0x3f8] ss:$12 sps:$4 sm:$0xff]  }
  0x93   :  { %3607 = vmatpush3.bf16.msra.mxu1 %v4103_v38  ;;  %v4182_v38 = vld [vmem:[%s5633_s1 + $0x7cc] ss:$12 sps:$4 sm:$0xff]  }
  0x94   :  { %2661 = vmatpush1.bf16.msra.mxu0 %v4099_v37  ;;  %3608 = vmatprep.subr.bf16.mxu1 %v4107_v40  ;;  %v4179_v37 = vld [vmem:[%s5633_s1 + $0x338] ss:$12 sps:$4 sm:$0xff]   ;;  %v4180_v40 = vld [vmem:[%s5633_s1 + $0x7c8] ss:$12 sps:$4 sm:$0xff]  }
  0x95   :  { %2662 = vmatprep.subr.bf16.mxu0 %v4106_v39  ;;  %v4183_v39 = vld [vmem:[%s5633_s1 + $0x410] ss:$12 sps:$4 sm:$0xff]  }
  0x97   :  { %3609 = vmatpush3.bf16.msra.mxu1 %v4108_v43  ;;  %v4187_v43 = vld [vmem:[%s5633_s1 + $0x7e4] ss:$12 sps:$4 sm:$0xff]  }
  0x98   :  { %2663 = vmatpush1.bf16.msra.mxu0 %v4104_v42  ;;  %3610 = vmatprep.subr.bf16.mxu1 %v4112_v45  ;;  %v4184_v42 = vld [vmem:[%s5633_s1 + $0x350] ss:$12 sps:$4 sm:$0xff]   ;;  %v5128_v45 = vld [vmem:[%s5634_s0 + $0x2c] ss:$56 sps:$4 sm:$0xff]  }
  0x99   :  { %2664 = vmatprep.subr.bf16.mxu0 %v4111_v44  ;;  %v4188_v44 = vld [vmem:[%s5633_s1 + $0x428] ss:$12 sps:$4 sm:$0xff]  }
  0x9b   :  { %3611 = vmatpush3.bf16.msra.mxu1 %v4113_v49  ;;  %v4189_v49 = vld [vmem:[%s5633_s1 + $0x368] ss:$12 sps:$4 sm:$0xff]  }
  0x9c   :  { %2665 = vmatpush1.bf16.msra.mxu0 %v4109_v47  ;;  %3612 = vmatprep.subr.bf16.mxu1 %v4117_v51  ;;  %v4185_v47 = vld [vmem:[%s5633_s1 + $0x7e0] ss:$12 sps:$4 sm:$0xff]  }
  0x9d   :  { %2666 = vmatprep.subr.bf16.mxu0 %v4116_v50  ;;  %v4192_v50 = vld [vmem:[%s5633_s1 + $0x7fc] ss:$12 sps:$4 sm:$0xff]   ;;  %v4193_v51 = vld [vmem:[%s5633_s1 + $0x440] ss:$12 sps:$4 sm:$0xff]  }
  0x9f   :  { %3613 = vmatpush3.bf16.msra.mxu1 %v4118_v53  ;;  %v4194_v53 = vld [vmem:[%s5633_s1 + $0x380] ss:$12 sps:$4 sm:$0xff]  }
  0xa0   :  { %2667 = vmatpush1.bf16.msra.mxu0 %v4114_v52  ;;  %3626 = vmatprep.subr.bf16.mxu1 %v4122_v55  ;;  %v4190_v52 = vld [vmem:[%s5633_s1 + $0x7f8] ss:$12 sps:$4 sm:$0xff]  }
  0xa1   :  { %2668 = vmatprep.subr.bf16.mxu0 %v4121_v54  ;;  %v4197_v54 = vld [vmem:[%s5633_s1 + $0x814] ss:$12 sps:$4 sm:$0xff]   ;;  %v4198_v55 = vld [vmem:[%s5633_s1 + $0x458] ss:$12 sps:$4 sm:$0xff]  }
  0xa2   :  { %2844 = vmatmul.mubr.bf16.vlgmr.msra.gmra.mrb[8].mxu1 %v4592_v4  ;;  %v4129_v4 = vld [vmem:[%s5633_s1 + $0x6f0] ss:$12 sps:$4 sm:$0xff]  }
  0xa3   :  { %3627 = vmatpush3.bf16.msra.mxu1 %v4123_v57  ;;  %2851 = vmatprep.mubr.bf16.mxu1 %v4667_v28  ;;  %v4137_v28 = vld [vmem:[%s5633_s1 + $0x290] ss:$12 sps:$4 sm:$0xff]   ;;  %v4199_v57 = vld [vmem:[%s5633_s1 + $0x398] ss:$12 sps:$4 sm:$0xff]  }
  0xa4   :  { %2669 = vmatpush1.bf16.msra.mxu0 %v4119_v56  ;;  %3628 = vmatprep.subr.bf16.mxu1 %v4127_v59  ;;  %v4195_v56 = vld [vmem:[%s5633_s1 + $0x810] ss:$12 sps:$4 sm:$0xff]  }
  0xa5   :  { %2670 = vmatprep.subr.bf16.mxu0 %v4126_v58  ;;  %v4202_v58 = vld [vmem:[%s5633_s1 + $0x82c] ss:$12 sps:$4 sm:$0xff]   ;;  %v4203_v59 = vld [vmem:[%s5633_s1 + $0x470] ss:$12 sps:$4 sm:$0xff]  }
  0xa7   :  { %3629 = vmatpush3.bf16.msra.mxu1 %v4128_v61  ;;  %v4204_v61 = vld [vmem:[%s5633_s1 + $0x3b0] ss:$12 sps:$4 sm:$0xff]  }
  0xa8   :  { %2671 = vmatpush1.bf16.msra.mxu0 %v4124_v60  ;;  %3630 = vmatprep.subr.bf16.mxu1 %v4132_v63  ;;  %v4200_v60 = vld [vmem:[%s5633_s1 + $0x828] ss:$12 sps:$4 sm:$0xff]  }
  0xa9   :  { %2672 = vmatprep.subr.bf16.mxu0 %v4131_v62  ;;  %v4207_v62 = vld [vmem:[%s5633_s1 + $0x844] ss:$12 sps:$4 sm:$0xff]   ;;  %v4208_v63 = vld [vmem:[%s5633_s1 + $0x548] ss:$12 sps:$4 sm:$0xff]  }
  0xaa   :  { %2852 = vmatmul.mubr.bf16.gmra.mrb[12].mxu1 %v4672_v29  ;;  %v4143_v29 = vld [vmem:[%s5633_s1 + $0x1e8] ss:$12 sps:$4 sm:$0xff]  }
  0xab   :  { %3631 = vmatpush3.bf16.msra.mxu1 %v4133_v0  ;;  %2892 = vmatprep.mubr.bf16.mxu1 %v4712_v41  ;;  %v4144_v41 = vld [vmem:[%s5633_s1 + $0x738] ss:$12 sps:$4 sm:$0xff]   ;;  %v4209_v0 = vld [vmem:[%s5633_s1 + $0x488] ss:$12 sps:$4 sm:$0xff]  }
  0xac   :  { %2673 = vmatpush1.bf16.msra.mxu0 %v4129_v4  ;;  %3632 = vmatprep.subr.bf16.mxu1 %v4137_v28  ;;  %v4205_v4 = vld [vmem:[%s5633_s1 + $0x840] ss:$12 sps:$4 sm:$0xff]  }
  0xad   :  { %2674 = vmatprep.subr.bf16.mxu0 %v4136_v1  ;;  %v4212_v1 = vld [vmem:[%s5633_s1 + $0x85c] ss:$12 sps:$4 sm:$0xff]   ;;  %v4213_v28 = vld [vmem:[%s5633_s1 + $0x560] ss:$12 sps:$4 sm:$0xff]  }
  0xaf   :  { %3633 = vmatpush3.bf16.msra.mxu1 %v4138_v3  ;;  %v4210_v3 = vld [vmem:[%s5633_s1 + $0x858] ss:$12 sps:$4 sm:$0xff]  }
  0xb0   :  { %2675 = vmatpush1.bf16.msra.mxu0 %v4134_v2  ;;  %3634 = vmatprep.subr.bf16.mxu1 %v4142_v6  ;;  %v4357_v2 = vld [vmem:[%s5634_s0 + $0x10] ss:$56 sps:$4 sm:$0xff]   ;;  %v4217_v6 = vld [vmem:[%s5633_s1 + $0x874] ss:$12 sps:$4 sm:$0xff]  }
  0xb1   :  { %2676 = vmatprep.subr.bf16.mxu0 %v4141_v5  ;;  %v4214_v5 = vld [vmem:[%s5633_s1 + $0x4a0] ss:$12 sps:$4 sm:$0xff]  }
  0xb3   :  { %3635 = vmatpush3.bf16.msra.mxu1 %v4143_v29  ;;  %v4358_v29 = vld [vmem:[%s5634_s0 + $0x84] ss:$56 sps:$4 sm:$0xff]  }
  0xb4   :  { %2677 = vmatpush1.bf16.msra.mxu0 %v4139_v7  ;;  %3636 = vmatprep.subr.bf16.mxu1 %v4147_v9  ;;  %v4218_v7 = vld [vmem:[%s5633_s1 + $0x578] ss:$12 sps:$4 sm:$0xff]  }
  0xb5   :  { %2678 = vmatprep.subr.bf16.mxu0 %v4146_v8  ;;  %v4215_v8 = vld [vmem:[%s5633_s1 + $0x870] ss:$12 sps:$4 sm:$0xff]   ;;  %v4219_v9 = vld [vmem:[%s5633_s1 + $0x4b8] ss:$12 sps:$4 sm:$0xff]  }
  0xb7   :  { %3637 = vmatpush3.bf16.msra.mxu1 %v4148_v10  ;;  %v4223_v10 = vld [vmem:[%s5633_s1 + $0x590] ss:$12 sps:$4 sm:$0xff]  }
  0xb8   :  { %2679 = vmatpush1.bf16.msra.mxu0 %v4144_v41  ;;  %3638 = vmatprep.subr.bf16.mxu1 %v4154_v13  ;;  %v4222_v41 = vld [vmem:[%s5633_s1 + $0x88c] ss:$12 sps:$4 sm:$0xff]   ;;  %v4220_v13 = vld [vmem:[%s5633_s1 + $0x888] ss:$12 sps:$4 sm:$0xff]  }
  0xb9   :  { %2680 = vmatprep.subr.bf16.mxu0 %v4153_v11  ;;  %v4359_v11 = vld [vmem:[%s5634_s0 + $0x80] ss:$56 sps:$4 sm:$0xff]  }
  0xbb   :  { %3639 = vmatpush3.bf16.msra.mxu1 %v4156_v15  ;;  %v4227_v15 = vld [vmem:[%s5633_s1 + $0x8a4] ss:$12 sps:$4 sm:$0xff]  }
  0xbc   :  { %2681 = vmatpush1.bf16.msra.mxu0 %v4151_v14  ;;  %3640 = vmatprep.subr.bf16.mxu1 %v4160_v17  ;;  %v4224_v14 = vld [vmem:[%s5633_s1 + $0x4d0] ss:$12 sps:$4 sm:$0xff]   ;;  %v4225_v17 = vld [vmem:[%s5633_s1 + $0x8a0] ss:$12 sps:$4 sm:$0xff]  }
  0xbd   :  { %2682 = vmatprep.subr.bf16.mxu0 %v4159_v16  ;;  %v4228_v16 = vld [vmem:[%s5633_s1 + $0x5a8] ss:$12 sps:$4 sm:$0xff]  }
  0xbf   :  { %3641 = vmatpush3.bf16.msra.mxu1 %v4161_v19  ;;  %v4229_v19 = vld [vmem:[%s5633_s1 + $0x4e8] ss:$12 sps:$4 sm:$0xff]  }
  0xc0   :  { %2683 = vmatpush1.bf16.msra.mxu0 %v4157_v18  ;;  %3654 = vmatprep.subr.bf16.mxu1 %v4168_v22  ;;  %v4360_v18 = vld [vmem:[%s5634_s0 + $0x1c] ss:$56 sps:$4 sm:$0xff]   ;;  %v4233_v22 = vld [vmem:[%s5633_s1 + $0x5c0] ss:$12 sps:$4 sm:$0xff]  }
  0xc1   :  { %2705 = vmatprep.subr.bf16.mxu0 %v4167_v21  ;;  %v4232_v21 = vld [vmem:[%s5633_s1 + $0x8bc] ss:$12 sps:$4 sm:$0xff]  }
  0xc2   :  { %2893 = vmatmul.mubr.bf16.vlgmr.msra.gmra.mrb[16].mxu1 %v4814_v12  ;;  %v5088_v12 = vld [vmem:[%s5634_s0 + $0x94] ss:$56 sps:$4 sm:$0xff]  }
  0xc3   :  { %2685 = vmatmul.mubr.bf16.vlgmr.msra.gmra.mrb[0].mxu0 %v5056_v23  ;;  %3655 = vmatpush3.bf16.msra.mxu1 %v4169_v26  ;;  %v4234_v26 = vld [vmem:[%s5633_s1 + $0x500] ss:$12 sps:$4 sm:$0xff]  }
  0xc4   :  { %2706 = vmatpush1.bf16.msra.mxu0 %v4165_v24  ;;  %3656 = vmatprep.subr.bf16.mxu1 %v4173_v30  ;;  %v4230_v24 = vld [vmem:[%s5633_s1 + $0x8b8] ss:$12 sps:$4 sm:$0xff]  }
  0xc5   :  { %2707 = vmatprep.subr.bf16.mxu0 %v4172_v27  ;;  %2900 = vmatprep.mubr.bf16.mxu1 %v4840_v20  ;;  %v5102_v20 = vld [vmem:[%s5634_s0 + $0x90] ss:$56 sps:$4 sm:$0xff]   ;;  %v4239_v27 = vld [vmem:[%s5633_s1 + $0x8d4] ss:$12 sps:$4 sm:$0xff]   ;;  %v4240_v30 = vld [vmem:[%s5633_s1 + $0x5d8] ss:$12 sps:$4 sm:$0xff]  }
  0xc6   :  { %2694 = vmatprep.mubr.bf16.mxu0 %v5088_v12 }
  0xc7   :  { %3657 = vmatpush3.bf16.msra.mxu1 %v4174_v32  ;;  %v4242_v32 = vld [vmem:[%s5633_s1 + $0x518] ss:$12 sps:$4 sm:$0xff]  }
  0xc8   :  { %2708 = vmatpush1.bf16.msra.mxu0 %v4170_v31  ;;  %3658 = vmatprep.subr.bf16.mxu1 %v4178_v34  ;;  %v4237_v31 = vld [vmem:[%s5633_s1 + $0x8d0] ss:$12 sps:$4 sm:$0xff]  }
  0xc9   :  { %2709 = vmatprep.subr.bf16.mxu0 %v4177_v33  ;;  %v4245_v33 = vld [vmem:[%s5633_s1 + $0x8ec] ss:$12 sps:$4 sm:$0xff]   ;;  %v4246_v34 = vld [vmem:[%s5633_s1 + $0x5f0] ss:$12 sps:$4 sm:$0xff]  }
  0xca   :  { %2901 = vmatmul.mubr.bf16.gmra.mrb[20].mxu1 %v4859_v25  ;;  %v4356_v25 = vld [vmem:[%s5634_s0 + $0x14] ss:$56 sps:$4 sm:$0xff]  }
  0xcb   :  { %2695 = vmatmul.mubr.bf16.gmra.mrb[4].mxu0 %v5102_v20  ;;  %3659 = vmatpush3.bf16.msra.mxu1 %v4179_v37  ;;  %v4247_v37 = vld [vmem:[%s5633_s1 + $0x530] ss:$12 sps:$4 sm:$0xff]  }
  0xcc   :  { %2710 = vmatpush1.bf16.msra.mxu0 %v4175_v35  ;;  %3660 = vmatprep.subr.bf16.mxu1 %v4183_v39  ;;  %v4243_v35 = vld [vmem:[%s5633_s1 + $0x8e8] ss:$12 sps:$4 sm:$0xff]  }
  0xcd   :  { %2711 = vmatprep.subr.bf16.mxu0 %v4182_v38  ;;  %2941 = vmatprep.mubr.bf16.mxu1 %v4356_v25  ;;  %v4253_v38 = vld [vmem:[%s5633_s1 + $0x904] ss:$12 sps:$4 sm:$0xff]   ;;  %v4254_v39 = vld [vmem:[%s5633_s1 + $0x6c8] ss:$12 sps:$4 sm:$0xff]   ;;  %v4259_v25 = vld [vmem:[%s5633_s1 + $0x6e0] ss:$12 sps:$4 sm:$0xff]  }
  0xce   :  { %2737 = vmatprep.mubr.bf16.mxu0 %v5128_v45 }
  0xcf   :  { %3661 = vmatpush3.bf16.msra.mxu1 %v4184_v42  ;;  %v4251_v42 = vld [vmem:[%s5633_s1 + $0x900] ss:$12 sps:$4 sm:$0xff]  }
  0xd0   :  { %2712 = vmatpush1.bf16.msra.mxu0 %v4180_v40  ;;  %3662 = vmatprep.subr.bf16.mxu1 %v4188_v44  ;;  %v5290_v40 = vld [vmem:[%s5634_s0 + $0x28] ss:$56 sps:$4 sm:$0xff]  }
  0xd1   :  { %2713 = vmatprep.subr.bf16.mxu0 %v4187_v43  ;;  %v4255_v43 = vld [vmem:[%s5633_s1 + $0x608] ss:$12 sps:$4 sm:$0xff]  }
  0xd2   :  { %v4258_v44 = vld [vmem:[%s5633_s1 + $0x91c] ss:$12 sps:$4 sm:$0xff]  }
  0xd3   :  { %3663 = vmatpush3.bf16.msra.mxu1 %v4189_v49  ;;  %v5310_v49 = vld [vmem:[%s5634_s0 + $0x9c] ss:$56 sps:$4 sm:$0xff]  }
  0xd4   :  { %2714 = vmatpush1.bf16.msra.mxu0 %v4185_v47  ;;  %3664 = vmatprep.subr.bf16.mxu1 %v4193_v51  ;;  %v4256_v47 = vld [vmem:[%s5633_s1 + $0x918] ss:$12 sps:$4 sm:$0xff]   ;;  %v4260_v51 = vld [vmem:[%s5633_s1 + $0x620] ss:$12 sps:$4 sm:$0xff]  }
  0xd5   :  { %2715 = vmatprep.subr.bf16.mxu0 %v4192_v50  ;;  %v4361_v50 = vld [vmem:[%s5634_s0 + $0x18] ss:$56 sps:$4 sm:$0xff]  }
  0xd7   :  { %3665 = vmatpush3.bf16.msra.mxu1 %v4194_v53  ;;  %v4264_v53 = vld [vmem:[%s5633_s1 + $0x6f8] ss:$12 sps:$4 sm:$0xff]  }
  0xd8   :  { %2716 = vmatpush1.bf16.msra.mxu0 %v4190_v52  ;;  %3666 = vmatprep.subr.bf16.mxu1 %v4198_v55  ;;  %v4263_v52 = vld [vmem:[%s5633_s1 + $0x934] ss:$12 sps:$4 sm:$0xff]   ;;  %v4265_v55 = vld [vmem:[%s5633_s1 + $0x638] ss:$12 sps:$4 sm:$0xff]  }
  0xd9   :  { %2717 = vmatprep.subr.bf16.mxu0 %v4197_v54  ;;  %v4261_v54 = vld [vmem:[%s5633_s1 + $0x930] ss:$12 sps:$4 sm:$0xff]  }
  0xdb   :  { %3667 = vmatpush3.bf16.msra.mxu1 %v4199_v57  ;;  %v4269_v57 = vld [vmem:[%s5633_s1 + $0x710] ss:$12 sps:$4 sm:$0xff]  }
  0xdc   :  { %2718 = vmatpush1.bf16.msra.mxu0 %v4195_v56  ;;  %3668 = vmatprep.subr.bf16.mxu1 %v4203_v59  ;;  %v5336_v56 = vld [vmem:[%s5634_s0 + $0x98] ss:$56 sps:$4 sm:$0xff]   ;;  %v4266_v59 = vld [vmem:[%s5633_s1 + $0x948] ss:$12 sps:$4 sm:$0xff]  }
  0xdd   :  { %2719 = vmatprep.subr.bf16.mxu0 %v4202_v58  ;;  %v5347_v58 = vld [vmem:[%s5634_s0 + $0x34] ss:$56 sps:$4 sm:$0xff]  }
  0xdf   :  { %3669 = vmatpush3.bf16.msra.mxu1 %v4204_v61  ;;  %v4273_v61 = vld [vmem:[%s5633_s1 + $0x964] ss:$12 sps:$4 sm:$0xff]  }
  0xe0   :  { %2720 = vmatpush1.bf16.msra.mxu0 %v4200_v60  ;;  %3682 = vmatprep.subr.bf16.mxu1 %v4208_v63  ;;  %v4270_v60 = vld [vmem:[%s5633_s1 + $0x650] ss:$12 sps:$4 sm:$0xff]   ;;  %v4275_v63 = vld [vmem:[%s5633_s1 + $0x668] ss:$12 sps:$4 sm:$0xff]  }
  0xe1   :  { %2721 = vmatprep.subr.bf16.mxu0 %v4207_v62  ;;  %v4271_v62 = vld [vmem:[%s5633_s1 + $0x960] ss:$12 sps:$4 sm:$0xff]  }
  0xe2   :  { %2942 = vmatmul.mubr.bf16.vlgmr.msra.gmra.mrb[24].mxu1 %v4357_v2  ;;  %v4284_v2 = vld [vmem:[%s5633_s1 + $0x758] ss:$12 sps:$4 sm:$0xff]  }
  0xe3   :  { %3683 = vmatpush3.bf16.msra.mxu1 %v4209_v0  ;;  %2949 = vmatprep.mubr.bf16.mxu1 %v4358_v29  ;;  %v4279_v0 = vld [vmem:[%s5633_s1 + $0x740] ss:$12 sps:$4 sm:$0xff]   ;;  %v4286_v29 = vld [vmem:[%s5633_s1 + $0x9a8] ss:$12 sps:$4 sm:$0xff]  }
  0xe4   :  { %2722 = vmatpush1.bf16.msra.mxu0 %v4205_v4  ;;  %3684 = vmatprep.subr.bf16.mxu1 %v4213_v28  ;;  %v4278_v4 = vld [vmem:[%s5633_s1 + $0x97c] ss:$12 sps:$4 sm:$0xff]   ;;  %v4283_v28 = vld [vmem:[%s5633_s1 + $0x994] ss:$12 sps:$4 sm:$0xff]  }
  0xe5   :  { %2723 = vmatprep.subr.bf16.mxu0 %v4212_v1  ;;  %v4280_v1 = vld [vmem:[%s5633_s1 + $0x680] ss:$12 sps:$4 sm:$0xff]  }
  0xe7   :  { %3685 = vmatpush3.bf16.msra.mxu1 %v4214_v5  ;;  %v4285_v5 = vld [vmem:[%s5633_s1 + $0x698] ss:$12 sps:$4 sm:$0xff]  }
  0xe8   :  { %2724 = vmatpush1.bf16.msra.mxu0 %v4210_v3  ;;  %3686 = vmatprep.subr.bf16.mxu1 %v4218_v7  ;;  %v4281_v3 = vld [vmem:[%s5633_s1 + $0x990] ss:$12 sps:$4 sm:$0xff]  }
  0xe9   :  { %2725 = vmatprep.subr.bf16.mxu0 %v4217_v6  ;;  %v4288_v6 = vld [vmem:[%s5633_s1 + $0x9ac] ss:$12 sps:$4 sm:$0xff]   ;;  %v4289_v7 = vld [vmem:[%s5633_s1 + $0x770] ss:$12 sps:$4 sm:$0xff]  }
  0xea   :  { %2950 = vmatmul.mubr.bf16.gmra.mrb[28].mxu1 %v4359_v11  ;;  %v4295_v11 = vld [vmem:[%s5633_s1 + $0x788] ss:$12 sps:$4 sm:$0xff]  }
  0xeb   :  { %3687 = vmatpush3.bf16.msra.mxu1 %v4219_v9  ;;  %2990 = vmatprep.mubr.bf16.mxu1 %v4360_v18  ;;  %v4293_v9 = vld [vmem:[%s5633_s1 + $0x9c4] ss:$12 sps:$4 sm:$0xff]  }
  0xec   :  { %2726 = vmatpush1.bf16.msra.mxu0 %v4215_v8  ;;  %3688 = vmatprep.subr.bf16.mxu1 %v4223_v10  ;;  %v4290_v8 = vld [vmem:[%s5633_s1 + $0x6b0] ss:$12 sps:$4 sm:$0xff]   ;;  %v4291_v10 = vld [vmem:[%s5633_s1 + $0x9c0] ss:$12 sps:$4 sm:$0xff]  }
  0xed   :  { %2727 = vmatprep.subr.bf16.mxu0 %v4222_v41  ;;  %v4294_v41 = vld [vmem:[%s5633_s1 + $0x848] ss:$12 sps:$4 sm:$0xff]   ;;  %v4301_v18 = vld [vmem:[%s5633_s1 + $0x9f0] ss:$12 sps:$4 sm:$0xff]  }
  0xef   :  { %3689 = vmatpush3.bf16.msra.mxu1 %v4224_v14  ;;  %v4299_v14 = vld [vmem:[%s5633_s1 + $0x860] ss:$12 sps:$4 sm:$0xff]  }
  0xf0   :  { %2728 = vmatpush1.bf16.msra.mxu0 %v4220_v13  ;;  %3690 = vmatprep.subr.bf16.mxu1 %v4228_v16  ;;  %v4298_v13 = vld [vmem:[%s5633_s1 + $0x9dc] ss:$12 sps:$4 sm:$0xff]   ;;  %v4300_v16 = vld [vmem:[%s5633_s1 + $0x7a0] ss:$12 sps:$4 sm:$0xff]  }
  0xf1   :  { %2729 = vmatprep.subr.bf16.mxu0 %v4227_v15  ;;  %v4296_v15 = vld [vmem:[%s5633_s1 + $0x9d8] ss:$12 sps:$4 sm:$0xff]  }
  0xf3   :  { %3691 = vmatpush3.bf16.msra.mxu1 %v4229_v19  ;;  %v4305_v19 = vld [vmem:[%s5633_s1 + $0x7b8] ss:$12 sps:$4 sm:$0xff]  }
  0xf4   :  { %2730 = vmatpush1.bf16.msra.mxu0 %v4225_v17  ;;  %3692 = vmatprep.subr.bf16.mxu1 %v4233_v22  ;;  %v4303_v17 = vld [vmem:[%s5633_s1 + $0x9f4] ss:$12 sps:$4 sm:$0xff]  }
  0xf5   :  { %2731 = vmatprep.subr.bf16.mxu0 %v4232_v21  ;;  %v4308_v21 = vld [vmem:[%s5633_s1 + $0xa0c] ss:$12 sps:$4 sm:$0xff]   ;;  %v4306_v22 = vld [vmem:[%s5633_s1 + $0xa08] ss:$12 sps:$4 sm:$0xff]  }
  0xf7   :  { %3693 = vmatpush3.bf16.msra.mxu1 %v4234_v26  ;;  %v4313_v26 = vld [vmem:[%s5633_s1 + $0xa24] ss:$12 sps:$4 sm:$0xff]  }
  0xf8   :  { %2732 = vmatpush1.bf16.msra.mxu0 %v4230_v24  ;;  %3694 = vmatprep.subr.bf16.mxu1 %v4240_v30  ;;  %v4310_v24 = vld [vmem:[%s5633_s1 + $0x7d0] ss:$12 sps:$4 sm:$0xff]   ;;  %v4315_v30 = vld [vmem:[%s5633_s1 + $0x7e8] ss:$12 sps:$4 sm:$0xff]  }
  0xf9   :  { %2733 = vmatprep.subr.bf16.mxu0 %v4239_v27  ;;  %v4311_v27 = vld [vmem:[%s5633_s1 + $0xa20] ss:$12 sps:$4 sm:$0xff]  }
  0xfb   :  { %3695 = vmatpush3.bf16.msra.mxu1 %v4242_v32  ;;  %v4316_v32 = vld [vmem:[%s5633_s1 + $0xa38] ss:$12 sps:$4 sm:$0xff]  }
  0xfc   :  { %2734 = vmatpush1.bf16.msra.mxu0 %v4237_v31  ;;  %3696 = vmatprep.subr.bf16.mxu1 %v4246_v34  ;;  %v4318_v31 = vld [vmem:[%s5633_s1 + $0xa3c] ss:$12 sps:$4 sm:$0xff]   ;;  %v4326_v34 = vld [vmem:[%s5633_s1 + $0xa54] ss:$12 sps:$4 sm:$0xff]  }
  0xfd   :  { %2735 = vmatprep.subr.bf16.mxu0 %v4245_v33  ;;  %v4320_v33 = vld [vmem:[%s5633_s1 + $0x800] ss:$12 sps:$4 sm:$0xff]  }
  0xff   :  { %3697 = vmatpush3.bf16.msra.mxu1 %v4247_v37  ;;  %v4324_v37 = vld [vmem:[%s5633_s1 + $0xa50] ss:$12 sps:$4 sm:$0xff]  }
 0x100   :  { %2736 = vmatpush1.bf16.msra.mxu0 %v4243_v35  ;;  %3710 = vmatprep.subr.bf16.mxu1 %v4254_v39  ;;  %v4327_v35 = vld [vmem:[%s5633_s1 + $0x8d8] ss:$12 sps:$4 sm:$0xff]  }
 0x101   :  { %2758 = vmatprep.subr.bf16.mxu0 %v4253_v38  ;;  %v4328_v38 = vld [vmem:[%s5633_s1 + $0x818] ss:$12 sps:$4 sm:$0xff]  }
 0x102   :  { %2991 = vmatmul.mubr.bf16.vlgmr.msra.gmra.mrb[32].mxu1 %v4361_v50  ;;  %v4331_v39 = vld [vmem:[%s5633_s1 + $0xa6c] ss:$12 sps:$4 sm:$0xff]   ;;  %v4338_v50 = vld [vmem:[%s5633_s1 + $0x908] ss:$12 sps:$4 sm:$0xff]  }
 0x103   :  { %2738 = vmatmul.mubr.bf16.vlgmr.msra.gmra.mrb[0].mxu0 %v5290_v40  ;;  %3711 = vmatpush3.bf16.msra.mxu1 %v4255_v43  ;;  %v4329_v43 = vld [vmem:[%s5633_s1 + $0xa68] ss:$12 sps:$4 sm:$0xff]  }
 0x104   :  { %2759 = vmatpush1.bf16.msra.mxu0 %v4251_v42  ;;  %3712 = vmatprep.subr.bf16.mxu1 %v4259_v25  ;;  %v4332_v42 = vld [vmem:[%s5633_s1 + $0x8f0] ss:$12 sps:$4 sm:$0xff]   ;;  %v4337_v25 = vld [vmem:[%s5633_s1 + $0x9c8] ss:$12 sps:$4 sm:$0xff]  }
 0x105   :  { %2760 = vmatprep.subr.bf16.mxu0 %v4258_v44  ;;  %2998 = vmatprep.mubr.bf16.mxu1 %v4890_v36  ;;  %v4268_v36 = vld [vmem:[%s5633_s1 + $0x94c] ss:$12 sps:$4 sm:$0xff]   ;;  %v4333_v44 = vld [vmem:[%s5633_s1 + $0x830] ss:$12 sps:$4 sm:$0xff]  }
 0x106   :  { %2747 = vmatprep.mubr.bf16.mxu0 %v5310_v49 }
 0x107   :  { %3713 = vmatpush3.bf16.msra.mxu1 %v4260_v51  ;;  %v4339_v51 = vld [vmem:[%s5633_s1 + $0x9e0] ss:$12 sps:$4 sm:$0xff]  }
 0x108   :  { %2761 = vmatpush1.bf16.msra.mxu0 %v4256_v47  ;;  %3714 = vmatprep.subr.bf16.mxu1 %v4264_v53  ;;  %v5513_v47 = vld [vmem:[%s5634_s0 + $0x30] ss:$56 sps:$4 sm:$0xff]   ;;  %v4340_v53 = vld [vmem:[%s5633_s1 + $0x920] ss:$12 sps:$4 sm:$0xff]  }
 0x109   :  { %2762 = vmatprep.subr.bf16.mxu0 %v4263_v52  ;;  %v4341_v52 = vld [vmem:[%s5634_s0 + $0xa4] ss:$56 sps:$4 sm:$0xff]  }
 0x10a   :  { %2999 = vmatmul.mubr.bf16.gmra.mrb[36].mxu1 %v4904_v48  ;;  %v4274_v48 = vld [vmem:[%s5633_s1 + $0x728] ss:$12 sps:$4 sm:$0xff]  }
 0x10b   :  { %2748 = vmatmul.mubr.bf16.gmra.mrb[4].mxu0 %v5336_v56  ;;  %3715 = vmatpush3.bf16.msra.mxu1 %v4265_v55  ;;  %v4343_v55 = vld [vmem:[%s5634_s0 + $0xa0] ss:$56 sps:$4 sm:$0xff]  }
 0x10c   :  { %2763 = vmatpush1.bf16.msra.mxu0 %v4261_v54  ;;  %3716 = vmatprep.subr.bf16.mxu1 %v4269_v57  ;;  %v4344_v54 = vld [vmem:[%s5633_s1 + $0x9f8] ss:$12 sps:$4 sm:$0xff]   ;;  %v4348_v57 = vld [vmem:[%s5633_s1 + $0xa28] ss:$12 sps:$4 sm:$0xff]  }
 0x10d   :  { %2764 = vmatprep.subr.bf16.mxu0 %v4268_v36  ;;  %3039 = vmatprep.mubr.bf16.mxu1 %v4926_v46  ;;  %v4276_v46 = vld [vmem:[%s5633_s1 + $0x978] ss:$12 sps:$4 sm:$0xff]   ;;  %v4346_v36 = vld [vmem:[%s5633_s1 + $0xa10] ss:$12 sps:$4 sm:$0xff]  }
 0x10e   :  { %2790 = vmatprep.mubr.bf16.mxu0 %v5347_v58 }
 0x10f   :  { %3717 = vmatpush3.bf16.msra.mxu1 %v4270_v60  ;;  %v4351_v60 = vld [vmem:[%s5633_s1 + $0x980] ss:$12 sps:$4 sm:$0xff]  }
 0x110   :  { %2765 = vmatpush1.bf16.msra.mxu0 %v4266_v59  ;;  %3718 = vmatprep.subr.bf16.mxu1 %v4274_v48  ;;  %v4350_v59 = vld [vmem:[%s5633_s1 + $0xa40] ss:$12 sps:$4 sm:$0xff]  }
 0x111   :  { %2766 = vmatprep.subr.bf16.mxu0 %v4273_v61 }
 0x113   :  { %3719 = vmatpush3.bf16.msra.mxu1 %v4275_v63  ;;  %v4353_v63 = vld [vmem:[%s5633_s1 + $0x998] ss:$12 sps:$4 sm:$0xff]  }
 0x114   :  { %2767 = vmatpush1.bf16.msra.mxu0 %v4271_v62  ;;  %3720 = vmatprep.subr.bf16.mxu1 %v4279_v0  ;;  %v4354_v0 = vld [vmem:[%s5633_s1 + $0xa70] ss:$12 sps:$4 sm:$0xff]  }
 0x115   :  { %2768 = vmatprep.subr.bf16.mxu0 %v4278_v4 }
 0x117   :  { %3721 = vmatpush3.bf16.msra.mxu1 %v4280_v1 }
 0x118   :  { %2769 = vmatpush1.bf16.msra.mxu0 %v4276_v46  ;;  %3722 = vmatprep.subr.bf16.mxu1 %v4284_v2  ;;  %v4355_v46 = vld [vmem:[%s5633_s1 + $0x9b0] ss:$12 sps:$4 sm:$0xff]  }
 0x119   :  { %2770 = vmatprep.subr.bf16.mxu0 %v4283_v28 }
 0x11b   :  { %3723 = vmatpush3.bf16.msra.mxu1 %v4285_v5 }
 0x11c   :  { %2771 = vmatpush1.bf16.msra.mxu0 %v4281_v3  ;;  %3724 = vmatprep.subr.bf16.mxu1 %v4289_v7 }
 0x11d   :  { %2772 = vmatprep.subr.bf16.mxu0 %v4288_v6 }
 0x11f   :  { %3725 = vmatpush3.bf16.msra.mxu1 %v4290_v8 }
 0x120   :  { %2773 = vmatpush1.bf16.msra.mxu0 %v4286_v29  ;;  %3738 = vmatprep.subr.bf16.mxu1 %v4294_v41 }
 0x121   :  { %2774 = vmatprep.subr.bf16.mxu0 %v4293_v9 }
 0x122   :  { %3040 = vmatmul.mubr.bf16.vlgmr.msra.gmra.mrb[40].mxu1 %v5056_v23  ;;  %v4304_v23 = vld [vmem:[%s5633_s1 + $0x878] ss:$12 sps:$4 sm:$0xff]  }
 0x123   :  { %3739 = vmatpush3.bf16.msra.mxu1 %v4295_v11  ;;  %3047 = vmatprep.mubr.bf16.mxu1 %v5088_v12  ;;  %v4309_v12 = vld [vmem:[%s5633_s1 + $0x890] ss:$12 sps:$4 sm:$0xff]  }
 0x124   :  { %2775 = vmatpush1.bf16.msra.mxu0 %v4291_v10  ;;  %3740 = vmatprep.subr.bf16.mxu1 %v4299_v14 }
 0x125   :  { %2776 = vmatprep.subr.bf16.mxu0 %v4298_v13 }
 0x127   :  { %3741 = vmatpush3.bf16.msra.mxu1 %v4300_v16  ;;  %v493_v16 = vlaneseq }
 0x128   :  { %2777 = vmatpush1.bf16.msra.mxu0 %v4296_v15  ;;  %3742 = vmatprep.subr.bf16.mxu1 %v4304_v23 }
 0x129   :  { %2778 = vmatprep.subr.bf16.mxu0 %v4303_v17  ;;  %v5588_v17 = vshrl.u32 %v493_v16, 7 }
 0x12a   :  { %3048 = vmatmul.mubr.bf16.gmra.mrb[44].mxu1 %v5102_v20  ;;  %v4314_v20 = vld [vmem:[%s5633_s1 + $0x8a8] ss:$12 sps:$4 sm:$0xff]  }
 0x12b   :  { %3743 = vmatpush3.bf16.msra.mxu1 %v4305_v19  ;;  %3088 = vmatprep.mubr.bf16.mxu1 %v5128_v45  ;;  %v4319_v45 = vld [vmem:[%s5633_s1 + $0x8c0] ss:$12 sps:$4 sm:$0xff]   ;;  %v503_v23 = vsub.s32 2, %v5588_v17 }
 0x12c   :  { %2779 = vmatpush1.bf16.msra.mxu0 %v4301_v18  ;;  %3744 = vmatprep.subr.bf16.mxu1 %v4309_v12  ;;  %v5594_v18 = vld [vmem:[%s5635_s2] sm:$0x7] }
 0x12d   :  { %2780 = vmatprep.subr.bf16.mxu0 %v4308_v21  ;;  %v504_v19 = vrot.slane %v5594_v18, %v503_v23 }
 0x12f   :  { %3745 = vmatpush3.bf16.msra.mxu1 %v4310_v24 }
 0x130   :  { %2781 = vmatpush1.bf16.msra.mxu0 %v4306_v22  ;;  %3746 = vmatprep.subr.bf16.mxu1 %v4314_v20 }
 0x131   :  { %2782 = vmatprep.subr.bf16.mxu0 %v4313_v26 }
 0x133   :  { %3747 = vmatpush3.bf16.msra.mxu1 %v4315_v30 }
 0x134   :  { %2783 = vmatpush1.bf16.msra.mxu0 %v4311_v27  ;;  %3748 = vmatprep.subr.bf16.mxu1 %v4319_v45 }
 0x135   :  { %2784 = vmatprep.subr.bf16.mxu0 %v4318_v31 }
 0x137   :  { %3749 = vmatpush3.bf16.msra.mxu1 %v4320_v33 }
 0x138   :  { %2785 = vmatpush1.bf16.msra.mxu0 %v4316_v32  ;;  %3750 = vmatprep.subr.bf16.mxu1 %v4327_v35 }
 0x139   :  { %2786 = vmatprep.subr.bf16.mxu0 %v4326_v34 }
 0x13b   :  { %3751 = vmatpush3.bf16.msra.mxu1 %v4328_v38 }
 0x13c   :  { %2787 = vmatpush1.bf16.msra.mxu0 %v4324_v37  ;;  %3752 = vmatprep.subr.bf16.mxu1 %v4332_v42 }
 0x13d   :  { %2788 = vmatprep.subr.bf16.mxu0 %v4331_v39 }
 0x13f   :  { %3753 = vmatpush3.bf16.msra.mxu1 %v4333_v44 }
 0x140   :  { %2789 = vmatpush1.bf16.msra.mxu0 %v4329_v43  ;;  %3794 = vmatprep.subr.bf16.mxu1 %v4337_v25 }
 0x141   :  { %3766 = vmatprep.subr.bf16.mxu0 %v4337_v25 }
 0x142   :  { %3089 = vmatmul.mubr.bf16.vlgmr.msra.gmra.mrb[48].mxu1 %v5290_v40  ;;  %v4345_v40 = vld [vmem:[%s5633_s1 + $0x938] ss:$12 sps:$4 sm:$0xff]  }
 0x143   :  { %2791 = vmatmul.mubr.bf16.vlgmr.msra.gmra.mrb[0].mxu0 %v5513_v47  ;;  %3802 = vmatpush3.bf16.msra.mxu1 %v4338_v50 }
 0x144   :  { %3767 = vmatpush3.bf16.msra.mxu0 %v4338_v50  ;;  %3795 = vmatprep.subr.bf16.mxu1 %v4339_v51 }
 0x145   :  { %3768 = vmatprep.subr.bf16.mxu0 %v4339_v51  ;;  %2800 = vmatprep.mubr.bf16.mxu0 %v4341_v52 }
 0x146   :  { %3096 = vmatprep.mubr.bf16.mxu1 %v5310_v49  ;;  %v4347_v49 = vld [vmem:[%s5633_s1 + $0x950] ss:$12 sps:$4 sm:$0xff]  }
 0x147   :  { %3803 = vmatpush3.bf16.msra.mxu1 %v4340_v53 }
 0x148   :  { %3769 = vmatpush3.bf16.msra.mxu0 %v4340_v53  ;;  %3796 = vmatprep.subr.bf16.mxu1 %v4344_v54 }
 0x149   :  { %3770 = vmatprep.subr.bf16.mxu0 %v4344_v54 }
 0x14a   :  { %3097 = vmatmul.mubr.bf16.gmra.mrb[52].mxu1 %v5336_v56  ;;  %v4349_v56 = vld [vmem:[%s5633_s1 + $0x968] ss:$12 sps:$4 sm:$0xff]  }
 0x14b   :  { %2801 = vmatmul.mubr.bf16.gmra.mrb[4].mxu0 %v4343_v55  ;;  %3804 = vmatpush3.bf16.msra.mxu1 %v4345_v40 }
 0x14c   :  { %3771 = vmatpush3.bf16.msra.mxu0 %v4345_v40  ;;  %3797 = vmatprep.subr.bf16.mxu1 %v4346_v36 }
 0x14d   :  { %3772 = vmatprep.subr.bf16.mxu0 %v4346_v36  ;;  %3137 = vmatprep.mubr.bf16.mxu0 %v5347_v58  ;;  %v4352_v58 = vld [vmem:[%s5633_s1 + $0xa58] ss:$12 sps:$4 sm:$0xff]  }
 0x14e   :  { %3145 = vmatprep.mubr.bf16.mxu1 %v4341_v52 }
 0x14f   :  { %3805 = vmatpush3.bf16.msra.mxu1 %v4347_v49 }
 0x150   :  { %3773 = vmatpush3.bf16.msra.mxu0 %v4347_v49  ;;  %3798 = vmatprep.subr.bf16.mxu1 %v4348_v57 }
 0x151   :  { %3774 = vmatprep.subr.bf16.mxu0 %v4348_v57 }
 0x153   :  { %3806 = vmatpush3.bf16.msra.mxu1 %v4349_v56 }
 0x154   :  { %3775 = vmatpush3.bf16.msra.mxu0 %v4349_v56  ;;  %3799 = vmatprep.subr.bf16.mxu1 %v4350_v59 }
 0x155   :  { %3776 = vmatprep.subr.bf16.mxu0 %v4350_v59  ;;  %v5562_v61 = vpop.f32.mrb[0].mxu1 }
 0x156   :  { %v5564_v48 = vpop.f32.mrb[1].mxu1 }
 0x157   :  { %v5566_v62 = vpop.f32.mrb[2].mxu1  ;;  %3807 = vmatpush3.bf16.msra.mxu1 %v4351_v60 }
 0x158   :  { %3777 = vmatpush3.bf16.msra.mxu0 %v4351_v60  ;;  %v5571_v4 = vpop.f32.mrb[3].mxu1  ;;  %3800 = vmatprep.subr.bf16.mxu1 %v4352_v58 }
 0x159   :  { %3778 = vmatprep.subr.bf16.mxu0 %v4352_v58 }
 0x15b   :  { %3808 = vmatpush3.bf16.msra.mxu1 %v4353_v63 }
 0x15c   :  { %3779 = vmatpush3.bf16.msra.mxu0 %v4353_v63  ;;  %3801 = vmatprep.subr.bf16.mxu1 %v4354_v0 }
 0x15d   :  { %3780 = vmatprep.subr.bf16.mxu0 %v4354_v0  ;;  %v5579_v1 = vpop.f32.mrb[4].mxu1 }
 0x15e   :  { %v5581_v28 = vpop.f32.mrb[5].mxu1 }
 0x15f   :  { %v5583_v2 = vpop.f32.mrb[6].mxu1  ;;  %3809 = vmatpush3.bf16.msra.mxu1 %v4355_v46 }
 0x160   :  { %3781 = vmatpush3.bf16.msra.mxu0 %v4355_v46  ;;  %v5585_v3 = vpop.f32.mrb[7].mxu1 }
 0x162   :  { %3146 = vmatmul.mubr.bf16.vlgmr.msra.gmra.mrb[56].mxu1 %v4343_v55 }
 0x163   :  { %3138 = vmatmul.mubr.bf16.vlgmr.msra.gmra.mrb[8].mxu0 %v5513_v47 }
 0x175   :  { %v3614_v5 = vpop.f32.mrb[8].mxu1 }
 0x176   :  { %v3615_v6 = vpop.f32.mrb[9].mxu1 }
 0x177   :  { %v3616_v7 = vadd.f32 %v3615_v6, %v3614_v5  ;;  %v3617_v29 = vpop.f32.mrb[10].mxu1 }
 0x178   :  { %v3618_v8 = vpop.f32.mrb[11].mxu1 }
 0x179   :  { %v3619_v9 = vadd.f32 %v3618_v8, %v3617_v29  ;;  %v2846_v22 = vadd.f32 %v3616_v7, %v504_v19 }
 0x17b   :  { %v2849_v27 = vadd.f32 %v3619_v9, %v504_v19 }
 0x17d   :  { %v3620_v41 = vpop.f32.mrb[12].mxu1 }
 0x17e   :  { %v3621_v10 = vpop.f32.mrb[13].mxu1 }
 0x17f   :  { %v3622_v11 = vadd.f32 %v3621_v10, %v3620_v41  ;;  %v3623_v13 = vpop.f32.mrb[14].mxu1 }
 0x180   :  { %v3624_v14 = vpop.f32.mrb[15].mxu1 }
 0x181   :  { %v3625_v15 = vadd.f32 %v3624_v14, %v3623_v13  ;;  %v2854_v34 = vadd.f32 %v3622_v11, %v504_v19 }
 0x183   :  { %v2857_v39 = vadd.f32 %v3625_v15, %v504_v19 }
 0x195   :  { %v3642_v21 = vpop.f32.mrb[16].mxu1 }
 0x196   :  { %v3643_v12 = vpop.f32.mrb[17].mxu1 }
 0x197   :  { %v3644_v24 = vadd.f32 %v3643_v12, %v3642_v21  ;;  %v3645_v26 = vpop.f32.mrb[18].mxu1 }
 0x198   :  { %v3646_v20 = vpop.f32.mrb[19].mxu1 }
 0x199   :  { %v2895_v30 = vadd.f32 %v3644_v24, %v2846_v22  ;;  %v3647_v31 = vadd.f32 %v3646_v20, %v3645_v26 }
 0x19b   :  { %v2898_v45 = vadd.f32 %v3647_v31, %v2849_v27 }
 0x19d   :  { %v3648_v32 = vpop.f32.mrb[20].mxu1 }
 0x19e   :  { %v3649_v33 = vpop.f32.mrb[21].mxu1 }
 0x19f   :  { %v3650_v35 = vadd.f32 %v3649_v33, %v3648_v32  ;;  %v3651_v37 = vpop.f32.mrb[22].mxu1 }
 0x1a0   :  { %v3652_v38 = vpop.f32.mrb[23].mxu1 }
 0x1a1   :  { %v2903_v42 = vadd.f32 %v3650_v35, %v2854_v34  ;;  %v3653_v43 = vadd.f32 %v3652_v38, %v3651_v37  ;;  %v495_v37 = vsub.s32 0, %v5588_v17  ;;  %v499_v38 = vsub.s32 1, %v5588_v17 }
 0x1a3   :  { %v2906_v44 = vadd.f32 %v3653_v43, %v2857_v39  ;;  %v496_v39 = vrot.slane %v5594_v18, %v495_v37 }
 0x1a5   :  { %v3810_v43 = vadd.f32 %v5562_v61, %v496_v39 }
 0x1b5   :  { %v3670_v25 = vpop.f32.mrb[24].mxu1 }
 0x1b6   :  { %v3671_v47 = vpop.f32.mrb[25].mxu1 }
 0x1b7   :  { %v3672_v50 = vadd.f32 %v3671_v47, %v3670_v25  ;;  %v3673_v51 = vpop.f32.mrb[26].mxu1 }
 0x1b8   :  { %v3674_v52 = vpop.f32.mrb[27].mxu1 }
 0x1b9   :  { %v2944_v53 = vadd.f32 %v3672_v50, %v2895_v30  ;;  %v3675_v54 = vadd.f32 %v3674_v52, %v3673_v51  ;;  %v3814_v50 = vadd.f32 %v5566_v62, %v496_v39 }
 0x1bb   :  { %v2947_v55 = vadd.f32 %v3675_v54, %v2898_v45 }
 0x1bd   :  { %v3676_v40 = vpop.f32.mrb[28].mxu1 }
 0x1be   :  { %v3677_v36 = vpop.f32.mrb[29].mxu1 }
 0x1bf   :  { %v3678_v49 = vadd.f32 %v3677_v36, %v3676_v40  ;;  %v3679_v57 = vpop.f32.mrb[30].mxu1 }
 0x1c0   :  { %v3680_v56 = vpop.f32.mrb[31].mxu1 }
 0x1c1   :  { %v2952_v59 = vadd.f32 %v3678_v49, %v2903_v42  ;;  %v3681_v60 = vadd.f32 %v3680_v56, %v3679_v57  ;;  %v500_v42 = vrot.slane %v5594_v18, %v499_v38 }
 0x1c3   :  { %v2955_v58 = vadd.f32 %v3681_v60, %v2906_v44  ;;  %v3812_v44 = vadd.f32 %v5564_v48, %v500_v42  ;;  %v3816_v54 = vadd.f32 %v5571_v4, %v500_v42  ;;  %v3820_v4 = vadd.f32 %v5581_v28, %v500_v42 }
 0x1d5   :  { %v3698_v63 = vpop.f32.mrb[32].mxu1 }
 0x1d6   :  { %v3699_v0 = vpop.f32.mrb[33].mxu1 }
 0x1d7   :  { %v3700_v46 = vadd.f32 %v3699_v0, %v3698_v63  ;;  %v3701_v5 = vpop.f32.mrb[34].mxu1 }
 0x1d8   :  { %v3702_v6 = vpop.f32.mrb[35].mxu1 }
 0x1d9   :  { %v2993_v7 = vadd.f32 %v3700_v46, %v2944_v53  ;;  %v3703_v29 = vadd.f32 %v3702_v6, %v3701_v5  ;;  %v3818_v46 = vadd.f32 %v5579_v1, %v496_v39 }
 0x1db   :  { %v2996_v8 = vadd.f32 %v3703_v29, %v2947_v55  ;;  %v3822_v29 = vadd.f32 %v5583_v2, %v496_v39 }
 0x1dd   :  { %v3704_v9 = vpop.f32.mrb[36].mxu1 }
 0x1de   :  { %v3705_v41 = vpop.f32.mrb[37].mxu1 }
 0x1df   :  { %v3706_v10 = vadd.f32 %v3705_v41, %v3704_v9  ;;  %v3707_v11 = vpop.f32.mrb[38].mxu1 }
 0x1e0   :  { %v3708_v13 = vpop.f32.mrb[39].mxu1 }
 0x1e1   :  { %v3001_v14 = vadd.f32 %v3706_v10, %v2952_v59  ;;  %v3709_v15 = vadd.f32 %v3708_v13, %v3707_v11  ;;  %v3824_v10 = vadd.f32 %v5585_v3, %v500_v42 }
 0x1e3   :  { %v3004_v16 = vadd.f32 %v3709_v15, %v2955_v58 }
 0x1f5   :  { %v3726_v23 = vpop.f32.mrb[40].mxu1 }
 0x1f6   :  { %v3727_v19 = vpop.f32.mrb[41].mxu1 }
 0x1f7   :  { %v3728_v21 = vadd.f32 %v3727_v19, %v3726_v23  ;;  %v3729_v12 = vpop.f32.mrb[42].mxu1 }
 0x1f8   :  { %v3730_v22 = vpop.f32.mrb[43].mxu1 }
 0x1f9   :  { %v3042_v24 = vadd.f32 %v3728_v21, %v2993_v7  ;;  %v3731_v26 = vadd.f32 %v3730_v22, %v3729_v12 }
 0x1fb   :  { %v3045_v20 = vadd.f32 %v3731_v26, %v2996_v8 }
 0x1fd   :  { %v3732_v27 = vpop.f32.mrb[44].mxu1 }
 0x1fe   :  { %v3733_v30 = vpop.f32.mrb[45].mxu1 }
 0x1ff   :  { %v3734_v31 = vadd.f32 %v3733_v30, %v3732_v27  ;;  %v3735_v45 = vpop.f32.mrb[46].mxu1 }
 0x200   :  { %v3736_v32 = vpop.f32.mrb[47].mxu1 }
 0x201   :  { %v3050_v33 = vadd.f32 %v3734_v31, %v3001_v14  ;;  %v3737_v34 = vadd.f32 %v3736_v32, %v3735_v45 }
 0x203   :  { %v3053_v35 = vadd.f32 %v3737_v34, %v3004_v16 }
 0x215   :  { %v3754_v47 = vpop.f32.mrb[48].mxu1 }
 0x216   :  { %v2792_v25 = vpop.f32.mrb[0].mxu0  ;;  %v3755_v53 = vpop.f32.mrb[49].mxu1 }
 0x217   :  { %v3811_v51 = vadd.f32 %v3810_v43, %v2792_v25  ;;  %v2794_v52 = vpop.f32.mrb[1].mxu0  ;;  %v3756_v40 = vadd.f32 %v3755_v53, %v3754_v47  ;;  %v3757_v36 = vpop.f32.mrb[50].mxu1 }
 0x218   :  { %v3813_v55 = vadd.f32 %v3812_v44, %v2794_v52  ;;  %v2796_v17 = vpop.f32.mrb[2].mxu0  ;;  %v3758_v56 = vpop.f32.mrb[51].mxu1 }
 0x219   :  { %v3154_v49 = vmax.f32 %v3811_v51, 0.0  ;;  %v3815_v57 = vadd.f32 %v3814_v50, %v2796_v17  ;;  %v2798_v18 = vpop.f32.mrb[3].mxu0  ;;  %v3091_v59 = vadd.f32 %v3756_v40, %v3042_v24  ;;  %v3759_v60 = vadd.f32 %v3758_v56, %v3757_v36 }
 0x21a   :  { %v3155_v61 = vmax.f32 %v3813_v55, 0.0  ;;  %v3817_v48 = vadd.f32 %v3816_v54, %v2798_v18 }
 0x21b   :  { %v3157_v58 = vmax.f32 %v3815_v57, 0.0  ;;  %v3094_v0 = vadd.f32 %v3759_v60, %v3045_v20 }
 0x21c   :  { %v3590_v63 = vpack.c.bf16 %v3155_v61, %v3154_v49  ;;  %v3158_v62 = vmax.f32 %v3817_v48, 0.0 }
 0x21d   :  { %v3760_v7 = vpop.f32.mrb[52].mxu1 }
 0x21e   :  { %3206 = vst [vmem:[%s5636_s3] sm:$0xff] %v3590_v63  ;;  %v3592_v5 = vpack.c.bf16 %v3158_v62, %v3157_v58  ;;  %v2802_v6 = vpop.f32.mrb[4].mxu0  ;;  %v3761_v41 = vpop.f32.mrb[53].mxu1 }
 0x21f   :  { %v3819_v8 = vadd.f32 %v3818_v46, %v2802_v6  ;;  %v2804_v9 = vpop.f32.mrb[5].mxu0  ;;  %v3762_v28 = vadd.f32 %v3761_v41, %v3760_v7  ;;  %v3763_v13 = vpop.f32.mrb[54].mxu1 }
 0x220   :  { %3208 = vst [vmem:[%s5636_s3 + $0xc] sm:$0xff] %v3592_v5  ;;  %v3821_v1 = vadd.f32 %v3820_v4, %v2804_v9  ;;  %v2806_v11 = vpop.f32.mrb[6].mxu0  ;;  %v3764_v23 = vpop.f32.mrb[55].mxu1 }
 0x221   :  { %v3160_v14 = vmax.f32 %v3819_v8, 0.0  ;;  %v3823_v15 = vadd.f32 %v3822_v29, %v2806_v11  ;;  %v2808_v16 = vpop.f32.mrb[7].mxu0  ;;  %v3099_v21 = vadd.f32 %v3762_v28, %v3050_v33  ;;  %v3765_v12 = vadd.f32 %v3764_v23, %v3763_v13 }
 0x222   :  { %v3161_v19 = vmax.f32 %v3821_v1, 0.0  ;;  %v3825_v2 = vadd.f32 %v3824_v10, %v2808_v16 }
 0x223   :  { %v3163_v22 = vmax.f32 %v3823_v15, 0.0  ;;  %v3102_v3 = vadd.f32 %v3765_v12, %v3053_v35 }
 0x224   :  { %v3594_v24 = vpack.c.bf16 %v3161_v19, %v3160_v14  ;;  %v3164_v26 = vmax.f32 %v3825_v2, 0.0 }
 0x226   :  { %3210 = vst [vmem:[%s5636_s3 + $0x18] sm:$0xff] %v3594_v24  ;;  %v3596_v20 = vpack.c.bf16 %v3164_v26, %v3163_v22 }
 0x228   :  { %3212 = vst [vmem:[%s5636_s3 + $0x24] sm:$0xff] %v3596_v20 }
 0x235   :  { %v3788_v30 = vpop.f32.mrb[56].mxu1 }
 0x236   :  { %v3782_v27 = vpop.f32.mrb[8].mxu0  ;;  %v3789_v45 = vpop.f32.mrb[57].mxu1 }
 0x237   :  { %v3783_v31 = vpop.f32.mrb[9].mxu0  ;;  %v3790_v33 = vadd.f32 %v3789_v45, %v3788_v30  ;;  %v3791_v37 = vpop.f32.mrb[58].mxu1 }
 0x238   :  { %v3784_v32 = vadd.f32 %v3783_v31, %v3782_v27  ;;  %v3785_v34 = vpop.f32.mrb[10].mxu0  ;;  %v3792_v39 = vpop.f32.mrb[59].mxu1 }
 0x239   :  { %v3786_v38 = vpop.f32.mrb[11].mxu0  ;;  %v3148_v42 = vadd.f32 %v3790_v33, %v3099_v21  ;;  %v3793_v44 = vadd.f32 %v3792_v39, %v3791_v37 }
 0x23a   :  { %v3140_v35 = vadd.f32 %v3784_v32, %v3091_v59  ;;  %v3787_v43 = vadd.f32 %v3786_v38, %v3785_v34 }
 0x23b   :  { %v3162_v47 = vmax.f32 %v3148_v42, 0.0  ;;  %v3151_v51 = vadd.f32 %v3793_v44, %v3102_v3 }
 0x23c   :  { %v3156_v25 = vmax.f32 %v3140_v35, 0.0  ;;  %v3143_v50 = vadd.f32 %v3787_v43, %v3094_v0 }
 0x23d   :  { %v3595_v53 = vpack.c.bf16 %v3162_v47, %v3162_v47  ;;  %v3165_v55 = vmax.f32 %v3151_v51, 0.0 }
 0x23e   :  { %v3591_v52 = vpack.c.bf16 %v3156_v25, %v3156_v25  ;;  %v3159_v54 = vmax.f32 %v3143_v50, 0.0 }
 0x23f   :  { %3211 = vst [vmem:[%s5636_s3 + $0x20] sm:$0xf] %v3595_v53  ;;  %v3597_v17 = vpack.c.bf16 %v3165_v55, %v3165_v55 }
 0x240   :  { %3207 = vst [vmem:[%s5636_s3 + $0x8] sm:$0xf] %v3591_v52  ;;  %v3593_v40 = vpack.c.bf16 %v3159_v54, %v3159_v54 }
 0x241   :  { %3213 = vst [vmem:[%s5636_s3 + $0x2c] sm:$0xf] %v3597_v17 }
 0x242   :  { %3209 = vst [vmem:[%s5636_s3 + $0x14] sm:$0xf] %v3593_v40 }

// kernel: net_forward.9
= control target key start
LH: loop header
LB: loop body
LE: loop exit
PB: predicated region body
PF: predicated region fallthrough
CT: control target
= control target key end

     0   :  { %s6558_s1 = inlined_call_operand.vmem [shape: bf16[3456,256], index: 1, kind: input, shape index: {}]   ;;  %s6559_s0 = inlined_call_operand.vmem [shape: bf16[32,3456], index: 0, kind: input, shape index: {}]   ;;  %s6560_s2 = inlined_call_operand.vmem [shape: f32[1,256], index: 2, kind: input, shape index: {}]   ;;  %s6561_s3 = inlined_call_operand.vmem [shape: bf16[32,256], index: 3, kind: output, shape index: {}]  }
   0x1   :  { %v4336_v0 = vld [vmem:[%s6558_s1 + $0x4] ss:$8 sps:$4 sm:$0xff]   ;;  %v4340_v2 = vld [vmem:[%s6558_s1] ss:$8 sps:$4 sm:$0xff]   ;;  %v4342_v4 = vld [vmem:[%s6558_s1 + $0x14] ss:$8 sps:$4 sm:$0xff]  }
   0x2   :  { %v4338_v1 = vld [vmem:[%s6558_s1 + $0x704] ss:$8 sps:$4 sm:$0xff]   ;;  %2947 = vmatprep.subr.bf16.mxu1 %v4336_v0  ;;  %v4341_v3 = vld [vmem:[%s6558_s1 + $0x700] ss:$8 sps:$4 sm:$0xff]   ;;  %v4344_v5 = vld [vmem:[%s6558_s1 + $0x714] ss:$8 sps:$4 sm:$0xff]  }
   0x3   :  { %3318 = vmatprep.subr.bf16.mxu0 %v4338_v1  ;;  %2948 = vmatpush1.bf16.msra.mxu1 %v4340_v2  ;;  %v4346_v6 = vld [vmem:[%s6558_s1 + $0x10] ss:$8 sps:$4 sm:$0xff]   ;;  %v4348_v8 = vld [vmem:[%s6558_s1 + $0x24] ss:$8 sps:$4 sm:$0xff]   ;;  %v4352_v10 = vld [vmem:[%s6558_s1 + $0x20] ss:$8 sps:$4 sm:$0xff]  }
   0x4   :  { %3319 = vmatpush1.bf16.msra.mxu0 %v4341_v3  ;;  %2949 = vmatprep.subr.bf16.mxu1 %v4342_v4  ;;  %v4347_v7 = vld [vmem:[%s6558_s1 + $0x710] ss:$8 sps:$4 sm:$0xff]   ;;  %v4350_v9 = vld [vmem:[%s6558_s1 + $0x724] ss:$8 sps:$4 sm:$0xff]   ;;  %v4353_v11 = vld [vmem:[%s6558_s1 + $0x720] ss:$8 sps:$4 sm:$0xff]  }
   0x5   :  { %3320 = vmatprep.subr.bf16.mxu0 %v4344_v5  ;;  %v4354_v12 = vld [vmem:[%s6558_s1 + $0x34] ss:$8 sps:$4 sm:$0xff]   ;;  %v4358_v14 = vld [vmem:[%s6558_s1 + $0x30] ss:$8 sps:$4 sm:$0xff]   ;;  %v4360_v16 = vld [vmem:[%s6558_s1 + $0x44] ss:$8 sps:$4 sm:$0xff]  }
   0x6   :  { %v4356_v13 = vld [vmem:[%s6558_s1 + $0x734] ss:$8 sps:$4 sm:$0xff]   ;;  %v4359_v15 = vld [vmem:[%s6558_s1 + $0x730] ss:$8 sps:$4 sm:$0xff]   ;;  %v4362_v17 = vld [vmem:[%s6558_s1 + $0x744] ss:$8 sps:$4 sm:$0xff]  }
   0x7   :  { %2950 = vmatpush1.bf16.msra.mxu1 %v4346_v6  ;;  %v4364_v18 = vld [vmem:[%s6558_s1 + $0x40] ss:$8 sps:$4 sm:$0xff]   ;;  %v4366_v20 = vld [vmem:[%s6558_s1 + $0x54] ss:$8 sps:$4 sm:$0xff]   ;;  %v4370_v22 = vld [vmem:[%s6558_s1 + $0x50] ss:$8 sps:$4 sm:$0xff]  }
   0x8   :  { %3321 = vmatpush1.bf16.msra.mxu0 %v4347_v7  ;;  %2951 = vmatprep.subr.bf16.mxu1 %v4348_v8  ;;  %v4365_v19 = vld [vmem:[%s6558_s1 + $0x740] ss:$8 sps:$4 sm:$0xff]   ;;  %v4368_v21 = vld [vmem:[%s6558_s1 + $0x754] ss:$8 sps:$4 sm:$0xff]   ;;  %v4371_v23 = vld [vmem:[%s6558_s1 + $0x750] ss:$8 sps:$4 sm:$0xff]  }
   0x9   :  { %3322 = vmatprep.subr.bf16.mxu0 %v4350_v9  ;;  %v4372_v24 = vld [vmem:[%s6558_s1 + $0x64] ss:$8 sps:$4 sm:$0xff]   ;;  %v4376_v26 = vld [vmem:[%s6558_s1 + $0x60] ss:$8 sps:$4 sm:$0xff]   ;;  %v4378_v28 = vld [vmem:[%s6558_s1 + $0x74] ss:$8 sps:$4 sm:$0xff]  }
   0xa   :  { %v4374_v25 = vld [vmem:[%s6558_s1 + $0x764] ss:$8 sps:$4 sm:$0xff]   ;;  %v4377_v27 = vld [vmem:[%s6558_s1 + $0x760] ss:$8 sps:$4 sm:$0xff]   ;;  %v4380_v29 = vld [vmem:[%s6558_s1 + $0x774] ss:$8 sps:$4 sm:$0xff]  }
   0xb   :  { %2952 = vmatpush1.bf16.msra.mxu1 %v4352_v10  ;;  %v4382_v30 = vld [vmem:[%s6558_s1 + $0x70] ss:$8 sps:$4 sm:$0xff]   ;;  %v4384_v32 = vld [vmem:[%s6558_s1 + $0x84] ss:$8 sps:$4 sm:$0xff]   ;;  %v4388_v34 = vld [vmem:[%s6558_s1 + $0x80] ss:$8 sps:$4 sm:$0xff]  }
   0xc   :  { %3323 = vmatpush1.bf16.msra.mxu0 %v4353_v11  ;;  %2953 = vmatprep.subr.bf16.mxu1 %v4354_v12  ;;  %v4383_v31 = vld [vmem:[%s6558_s1 + $0x770] ss:$8 sps:$4 sm:$0xff]   ;;  %v4386_v33 = vld [vmem:[%s6558_s1 + $0x784] ss:$8 sps:$4 sm:$0xff]   ;;  %v4389_v35 = vld [vmem:[%s6558_s1 + $0x780] ss:$8 sps:$4 sm:$0xff]  }
   0xd   :  { %3324 = vmatprep.subr.bf16.mxu0 %v4356_v13  ;;  %v4390_v36 = vld [vmem:[%s6558_s1 + $0x94] ss:$8 sps:$4 sm:$0xff]   ;;  %v4394_v38 = vld [vmem:[%s6558_s1 + $0x90] ss:$8 sps:$4 sm:$0xff]   ;;  %v4396_v40 = vld [vmem:[%s6558_s1 + $0xa4] ss:$8 sps:$4 sm:$0xff]  }
   0xe   :  { %v4392_v37 = vld [vmem:[%s6558_s1 + $0x794] ss:$8 sps:$4 sm:$0xff]   ;;  %v4395_v39 = vld [vmem:[%s6558_s1 + $0x790] ss:$8 sps:$4 sm:$0xff]   ;;  %v4398_v41 = vld [vmem:[%s6558_s1 + $0x7a4] ss:$8 sps:$4 sm:$0xff]  }
   0xf   :  { %2954 = vmatpush1.bf16.msra.mxu1 %v4358_v14  ;;  %v4400_v42 = vld [vmem:[%s6558_s1 + $0xa0] ss:$8 sps:$4 sm:$0xff]   ;;  %v4402_v44 = vld [vmem:[%s6558_s1 + $0xb4] ss:$8 sps:$4 sm:$0xff]   ;;  %v4406_v46 = vld [vmem:[%s6558_s1 + $0xb0] ss:$8 sps:$4 sm:$0xff]  }
  0x10   :  { %3325 = vmatpush1.bf16.msra.mxu0 %v4359_v15  ;;  %2955 = vmatprep.subr.bf16.mxu1 %v4360_v16  ;;  %v4401_v43 = vld [vmem:[%s6558_s1 + $0x7a0] ss:$8 sps:$4 sm:$0xff]   ;;  %v4404_v45 = vld [vmem:[%s6558_s1 + $0x7b4] ss:$8 sps:$4 sm:$0xff]   ;;  %v4407_v47 = vld [vmem:[%s6558_s1 + $0x7b0] ss:$8 sps:$4 sm:$0xff]  }
  0x11   :  { %3326 = vmatprep.subr.bf16.mxu0 %v4362_v17  ;;  %v4434_v48 = vld [vmem:[%s6559_s0 + $0x4] ss:$108 sps:$4 sm:$0xff]   ;;  %v4440_v51 = vld [vmem:[%s6559_s0 + $0x3c] ss:$108 sps:$4 sm:$0xff]   ;;  %v4432_v4 = vld [vmem:[%s6559_s0] ss:$108 sps:$4 sm:$0xff]  }
  0x12   :  { %v4408_v49 = vld [vmem:[%s6558_s1 + $0xc4] ss:$8 sps:$4 sm:$0xff]   ;;  %2979 = vmatprep.mubr.bf16.mxu1 %v4434_v48  ;;  %v4412_v52 = vld [vmem:[%s6558_s1 + $0xc0] ss:$8 sps:$4 sm:$0xff]   ;;  %v4414_v54 = vld [vmem:[%s6558_s1 + $0xd4] ss:$8 sps:$4 sm:$0xff]   ;;  %3350 = vmatprep.mubr.bf16.mxu0 %v4440_v51 }
  0x13   :  { %2956 = vmatpush1.bf16.msra.mxu1 %v4364_v18  ;;  %v4410_v50 = vld [vmem:[%s6558_s1 + $0x7c4] ss:$8 sps:$4 sm:$0xff]   ;;  %v4413_v53 = vld [vmem:[%s6558_s1 + $0x7c0] ss:$8 sps:$4 sm:$0xff]   ;;  %v4416_v55 = vld [vmem:[%s6558_s1 + $0x7d4] ss:$8 sps:$4 sm:$0xff]  }
  0x14   :  { %3327 = vmatpush1.bf16.msra.mxu0 %v4365_v19  ;;  %2957 = vmatprep.subr.bf16.mxu1 %v4366_v20  ;;  %v4418_v56 = vld [vmem:[%s6558_s1 + $0xd0] ss:$8 sps:$4 sm:$0xff]   ;;  %v4420_v58 = vld [vmem:[%s6558_s1 + $0xe4] ss:$8 sps:$4 sm:$0xff]   ;;  %v4424_v60 = vld [vmem:[%s6558_s1 + $0xe0] ss:$8 sps:$4 sm:$0xff]  }
  0x15   :  { %3328 = vmatprep.subr.bf16.mxu0 %v4368_v21  ;;  %v4419_v57 = vld [vmem:[%s6558_s1 + $0x7d0] ss:$8 sps:$4 sm:$0xff]   ;;  %v4422_v59 = vld [vmem:[%s6558_s1 + $0x7e4] ss:$8 sps:$4 sm:$0xff]   ;;  %v4425_v61 = vld [vmem:[%s6558_s1 + $0x7e0] ss:$8 sps:$4 sm:$0xff]  }
  0x16   :  { %v4426_v62 = vld [vmem:[%s6558_s1 + $0xf4] ss:$8 sps:$4 sm:$0xff]   ;;  %v4430_v0 = vld [vmem:[%s6558_s1 + $0xf0] ss:$8 sps:$4 sm:$0xff]   ;;  %v4437_v2 = vld [vmem:[%s6558_s1 + $0x104] ss:$8 sps:$4 sm:$0xff]  }
  0x17   :  { %2958 = vmatpush1.bf16.msra.mxu1 %v4370_v22  ;;  %v4428_v63 = vld [vmem:[%s6558_s1 + $0x7f4] ss:$8 sps:$4 sm:$0xff]   ;;  %v4431_v1 = vld [vmem:[%s6558_s1 + $0x7f0] ss:$8 sps:$4 sm:$0xff]   ;;  %v4443_v3 = vld [vmem:[%s6558_s1 + $0x804] ss:$8 sps:$4 sm:$0xff]  }
  0x18   :  { %3329 = vmatpush1.bf16.msra.mxu0 %v4371_v23  ;;  %2959 = vmatprep.subr.bf16.mxu1 %v4372_v24  ;;  %v4435_v5 = vld [vmem:[%s6558_s1 + $0x100] ss:$8 sps:$4 sm:$0xff]   ;;  %v4438_v6 = vld [vmem:[%s6559_s0 + $0x38] ss:$108 sps:$4 sm:$0xff]   ;;  %v4446_v8 = vld [vmem:[%s6558_s1 + $0x114] ss:$8 sps:$4 sm:$0xff]  }
  0x19   :  { %3330 = vmatprep.subr.bf16.mxu0 %v4374_v25  ;;  %v4441_v7 = vld [vmem:[%s6558_s1 + $0x800] ss:$8 sps:$4 sm:$0xff]   ;;  %v4449_v9 = vld [vmem:[%s6558_s1 + $0x814] ss:$8 sps:$4 sm:$0xff]   ;;  %v4444_v10 = vld [vmem:[%s6558_s1 + $0x110] ss:$8 sps:$4 sm:$0xff]  }
  0x1a   :  { %v4447_v11 = vld [vmem:[%s6558_s1 + $0x810] ss:$8 sps:$4 sm:$0xff]   ;;  %v4452_v12 = vld [vmem:[%s6558_s1 + $0x124] ss:$8 sps:$4 sm:$0xff]   ;;  %v4450_v14 = vld [vmem:[%s6558_s1 + $0x120] ss:$8 sps:$4 sm:$0xff]  }
  0x1b   :  { %2960 = vmatpush1.bf16.msra.mxu1 %v4376_v26  ;;  %v4455_v13 = vld [vmem:[%s6558_s1 + $0x824] ss:$8 sps:$4 sm:$0xff]   ;;  %v4453_v15 = vld [vmem:[%s6558_s1 + $0x820] ss:$8 sps:$4 sm:$0xff]   ;;  %v4458_v16 = vld [vmem:[%s6558_s1 + $0x134] ss:$8 sps:$4 sm:$0xff]  }
  0x1c   :  { %3331 = vmatpush1.bf16.msra.mxu0 %v4377_v27  ;;  %2961 = vmatprep.subr.bf16.mxu1 %v4378_v28  ;;  %v4461_v17 = vld [vmem:[%s6558_s1 + $0x834] ss:$8 sps:$4 sm:$0xff]   ;;  %v4456_v18 = vld [vmem:[%s6558_s1 + $0x130] ss:$8 sps:$4 sm:$0xff]   ;;  %v4464_v20 = vld [vmem:[%s6558_s1 + $0x144] ss:$8 sps:$4 sm:$0xff]  }
  0x1d   :  { %3332 = vmatprep.subr.bf16.mxu0 %v4380_v29  ;;  %v4459_v19 = vld [vmem:[%s6558_s1 + $0x830] ss:$8 sps:$4 sm:$0xff]   ;;  %v4467_v21 = vld [vmem:[%s6558_s1 + $0x844] ss:$8 sps:$4 sm:$0xff]   ;;  %v4462_v22 = vld [vmem:[%s6558_s1 + $0x140] ss:$8 sps:$4 sm:$0xff]  }
  0x1e   :  { %v4465_v23 = vld [vmem:[%s6558_s1 + $0x840] ss:$8 sps:$4 sm:$0xff]   ;;  %v4470_v24 = vld [vmem:[%s6558_s1 + $0x154] ss:$8 sps:$4 sm:$0xff]   ;;  %v4468_v26 = vld [vmem:[%s6558_s1 + $0x150] ss:$8 sps:$4 sm:$0xff]  }
  0x1f   :  { %2962 = vmatpush1.bf16.msra.mxu1 %v4382_v30  ;;  %v4473_v25 = vld [vmem:[%s6558_s1 + $0x854] ss:$8 sps:$4 sm:$0xff]   ;;  %v4471_v27 = vld [vmem:[%s6558_s1 + $0x850] ss:$8 sps:$4 sm:$0xff]   ;;  %v4476_v29 = vld [vmem:[%s6558_s1 + $0x164] ss:$8 sps:$4 sm:$0xff]  }
  0x20   :  { %3333 = vmatpush1.bf16.msra.mxu0 %v4383_v31  ;;  %2963 = vmatprep.subr.bf16.mxu1 %v4384_v32  ;;  %v4522_v28 = vld [vmem:[%s6559_s0 + $0xdc] ss:$108 sps:$4 sm:$0xff]   ;;  %v4479_v30 = vld [vmem:[%s6558_s1 + $0x864] ss:$8 sps:$4 sm:$0xff]   ;;  %v4527_v31 = vld [vmem:[%s6559_s0 + $0x114] ss:$108 sps:$4 sm:$0xff]  }
  0x21   :  { %3334 = vmatprep.subr.bf16.mxu0 %v4386_v33  ;;  %v4474_v32 = vld [vmem:[%s6558_s1 + $0x160] ss:$8 sps:$4 sm:$0xff]   ;;  %v4492_v48 = vld [vmem:[%s6558_s1 + $0x190] ss:$8 sps:$4 sm:$0xff]   ;;  %v4503_v51 = vld [vmem:[%s6558_s1 + $0x8a4] ss:$8 sps:$4 sm:$0xff]  }
  0x22   :  { %v4477_v33 = vld [vmem:[%s6558_s1 + $0x860] ss:$8 sps:$4 sm:$0xff]  }
  0x23   :  { %2964 = vmatpush1.bf16.msra.mxu1 %v4388_v34  ;;  %v4532_v34 = vld [vmem:[%s6559_s0 + $0xd8] ss:$108 sps:$4 sm:$0xff]  }
  0x24   :  { %3335 = vmatpush1.bf16.msra.mxu0 %v4389_v35  ;;  %2965 = vmatprep.subr.bf16.mxu1 %v4390_v36  ;;  %v4533_v35 = vld [vmem:[%s6559_s0 + $0x110] ss:$108 sps:$4 sm:$0xff]  }
  0x25   :  { %3336 = vmatprep.subr.bf16.mxu0 %v4392_v37  ;;  %v4482_v36 = vld [vmem:[%s6558_s1 + $0x174] ss:$8 sps:$4 sm:$0xff]  }
  0x26   :  { %v4485_v37 = vld [vmem:[%s6558_s1 + $0x874] ss:$8 sps:$4 sm:$0xff]  }
  0x27   :  { %2966 = vmatpush1.bf16.msra.mxu1 %v4394_v38  ;;  %v4480_v38 = vld [vmem:[%s6558_s1 + $0x170] ss:$8 sps:$4 sm:$0xff]  }
  0x28   :  { %3337 = vmatpush1.bf16.msra.mxu0 %v4395_v39  ;;  %2967 = vmatprep.subr.bf16.mxu1 %v4396_v40  ;;  %v4483_v39 = vld [vmem:[%s6558_s1 + $0x870] ss:$8 sps:$4 sm:$0xff]  }
  0x29   :  { %3338 = vmatprep.subr.bf16.mxu0 %v4398_v41  ;;  %v4542_v40 = vld [vmem:[%s6559_s0 + $0xc] ss:$108 sps:$4 sm:$0xff]  }
  0x2a   :  { %v4488_v41 = vld [vmem:[%s6558_s1 + $0x184] ss:$8 sps:$4 sm:$0xff]  }
  0x2b   :  { %2968 = vmatpush1.bf16.msra.mxu1 %v4400_v42  ;;  %v4491_v42 = vld [vmem:[%s6558_s1 + $0x884] ss:$8 sps:$4 sm:$0xff]  }
  0x2c   :  { %3339 = vmatpush1.bf16.msra.mxu0 %v4401_v43  ;;  %2969 = vmatprep.subr.bf16.mxu1 %v4402_v44  ;;  %v4548_v43 = vld [vmem:[%s6559_s0 + $0x44] ss:$108 sps:$4 sm:$0xff]   ;;  %v4486_v44 = vld [vmem:[%s6558_s1 + $0x180] ss:$8 sps:$4 sm:$0xff]  }
  0x2d   :  { %3340 = vmatprep.subr.bf16.mxu0 %v4404_v45  ;;  %v4489_v45 = vld [vmem:[%s6558_s1 + $0x880] ss:$8 sps:$4 sm:$0xff]  }
  0x2f   :  { %2970 = vmatpush1.bf16.msra.mxu1 %v4406_v46  ;;  %v4494_v46 = vld [vmem:[%s6558_s1 + $0x194] ss:$8 sps:$4 sm:$0xff]  }
  0x30   :  { %3341 = vmatpush1.bf16.msra.mxu0 %v4407_v47  ;;  %2971 = vmatprep.subr.bf16.mxu1 %v4408_v49  ;;  %v4497_v47 = vld [vmem:[%s6558_s1 + $0x894] ss:$8 sps:$4 sm:$0xff]   ;;  %v4495_v49 = vld [vmem:[%s6558_s1 + $0x890] ss:$8 sps:$4 sm:$0xff]  }
  0x31   :  { %3342 = vmatprep.subr.bf16.mxu0 %v4410_v50  ;;  %v4500_v50 = vld [vmem:[%s6558_s1 + $0x1a4] ss:$8 sps:$4 sm:$0xff]  }
  0x33   :  { %2972 = vmatpush1.bf16.msra.mxu1 %v4412_v52  ;;  %v4498_v52 = vld [vmem:[%s6558_s1 + $0x1a0] ss:$8 sps:$4 sm:$0xff]  }
  0x34   :  { %3343 = vmatpush1.bf16.msra.mxu0 %v4413_v53  ;;  %2973 = vmatprep.subr.bf16.mxu1 %v4414_v54  ;;  %v4501_v53 = vld [vmem:[%s6558_s1 + $0x8a0] ss:$8 sps:$4 sm:$0xff]   ;;  %v4506_v54 = vld [vmem:[%s6558_s1 + $0x1b4] ss:$8 sps:$4 sm:$0xff]  }
  0x35   :  { %3344 = vmatprep.subr.bf16.mxu0 %v4416_v55  ;;  %v4509_v55 = vld [vmem:[%s6558_s1 + $0x8b4] ss:$8 sps:$4 sm:$0xff]  }
  0x37   :  { %2974 = vmatpush1.bf16.msra.mxu1 %v4418_v56  ;;  %v4504_v56 = vld [vmem:[%s6558_s1 + $0x1b0] ss:$8 sps:$4 sm:$0xff]  }
  0x38   :  { %3345 = vmatpush1.bf16.msra.mxu0 %v4419_v57  ;;  %2975 = vmatprep.subr.bf16.mxu1 %v4420_v58  ;;  %v4507_v57 = vld [vmem:[%s6558_s1 + $0x8b0] ss:$8 sps:$4 sm:$0xff]   ;;  %v4512_v58 = vld [vmem:[%s6558_s1 + $0x1c4] ss:$8 sps:$4 sm:$0xff]  }
  0x39   :  { %3346 = vmatprep.subr.bf16.mxu0 %v4422_v59  ;;  %v4515_v59 = vld [vmem:[%s6558_s1 + $0x8c4] ss:$8 sps:$4 sm:$0xff]  }
  0x3b   :  { %2976 = vmatpush1.bf16.msra.mxu1 %v4424_v60  ;;  %v4510_v60 = vld [vmem:[%s6558_s1 + $0x1c0] ss:$8 sps:$4 sm:$0xff]  }
  0x3c   :  { %3347 = vmatpush1.bf16.msra.mxu0 %v4425_v61  ;;  %2977 = vmatprep.subr.bf16.mxu1 %v4426_v62  ;;  %v4513_v61 = vld [vmem:[%s6558_s1 + $0x8c0] ss:$8 sps:$4 sm:$0xff]   ;;  %v4518_v62 = vld [vmem:[%s6558_s1 + $0x1d4] ss:$8 sps:$4 sm:$0xff]  }
  0x3d   :  { %3348 = vmatprep.subr.bf16.mxu0 %v4428_v63  ;;  %v4521_v63 = vld [vmem:[%s6558_s1 + $0x8d4] ss:$8 sps:$4 sm:$0xff]  }
  0x3f   :  { %2978 = vmatpush1.bf16.msra.mxu1 %v4430_v0  ;;  %v4516_v0 = vld [vmem:[%s6558_s1 + $0x1d0] ss:$8 sps:$4 sm:$0xff]  }
  0x40   :  { %3349 = vmatpush1.bf16.msra.mxu0 %v4431_v1  ;;  %3000 = vmatprep.subr.bf16.mxu1 %v4437_v2  ;;  %v4519_v1 = vld [vmem:[%s6558_s1 + $0x8d0] ss:$8 sps:$4 sm:$0xff]   ;;  %v4526_v2 = vld [vmem:[%s6558_s1 + $0x1e4] ss:$8 sps:$4 sm:$0xff]  }
  0x41   :  { %3371 = vmatprep.subr.bf16.mxu0 %v4443_v3  ;;  %v4531_v3 = vld [vmem:[%s6558_s1 + $0x8e4] ss:$8 sps:$4 sm:$0xff]  }
  0x42   :  { %2980 = vmatmul.mubr.bf16.vlgmr.msra.gmra.mrb[0].mxu1 %v4432_v4  ;;  %v4524_v4 = vld [vmem:[%s6558_s1 + $0x1e0] ss:$8 sps:$4 sm:$0xff]  }
  0x43   :  { %3351 = vmatmul.mubr.bf16.vlgmr.msra.gmra.mrb[0].mxu0 %v4438_v6  ;;  %3001 = vmatpush1.bf16.msra.mxu1 %v4435_v5  ;;  %v4529_v5 = vld [vmem:[%s6558_s1 + $0x8e0] ss:$8 sps:$4 sm:$0xff]   ;;  %v4536_v6 = vld [vmem:[%s6558_s1 + $0x1f4] ss:$8 sps:$4 sm:$0xff]  }
  0x44   :  { %3372 = vmatpush1.bf16.msra.mxu0 %v4441_v7  ;;  %3002 = vmatprep.subr.bf16.mxu1 %v4446_v8  ;;  %v4539_v7 = vld [vmem:[%s6558_s1 + $0x8f4] ss:$8 sps:$4 sm:$0xff]   ;;  %v4534_v8 = vld [vmem:[%s6558_s1 + $0x1f0] ss:$8 sps:$4 sm:$0xff]  }
  0x45   :  { %3373 = vmatprep.subr.bf16.mxu0 %v4449_v9  ;;  %2989 = vmatprep.mubr.bf16.mxu1 %v4522_v28  ;;  %v4537_v9 = vld [vmem:[%s6558_s1 + $0x8f0] ss:$8 sps:$4 sm:$0xff]   ;;  %v4566_v28 = vld [vmem:[%s6558_s1 + $0x234] ss:$8 sps:$4 sm:$0xff]  }
  0x46   :  { %3360 = vmatprep.mubr.bf16.mxu0 %v4527_v31  ;;  %v4567_v31 = vld [vmem:[%s6558_s1 + $0x930] ss:$8 sps:$4 sm:$0xff]  }
  0x47   :  { %3003 = vmatpush1.bf16.msra.mxu1 %v4444_v10  ;;  %v4545_v10 = vld [vmem:[%s6558_s1 + $0x204] ss:$8 sps:$4 sm:$0xff]  }
  0x48   :  { %3374 = vmatpush1.bf16.msra.mxu0 %v4447_v11  ;;  %3004 = vmatprep.subr.bf16.mxu1 %v4452_v12  ;;  %v4551_v11 = vld [vmem:[%s6558_s1 + $0x904] ss:$8 sps:$4 sm:$0xff]   ;;  %v4540_v12 = vld [vmem:[%s6559_s0 + $0x8] ss:$108 sps:$4 sm:$0xff]  }
  0x49   :  { %3375 = vmatprep.subr.bf16.mxu0 %v4455_v13  ;;  %v4543_v13 = vld [vmem:[%s6558_s1 + $0x200] ss:$8 sps:$4 sm:$0xff]  }
  0x4a   :  { %2990 = vmatmul.mubr.bf16.gmra.mrb[4].mxu1 %v4532_v34  ;;  %v4575_v34 = vld [vmem:[%s6558_s1 + $0x944] ss:$8 sps:$4 sm:$0xff]  }
  0x4b   :  { %3005 = vmatpush1.bf16.msra.mxu1 %v4450_v14  ;;  %3361 = vmatmul.mubr.bf16.gmra.mrb[4].mxu0 %v4533_v35  ;;  %v4546_v14 = vld [vmem:[%s6559_s0 + $0x40] ss:$108 sps:$4 sm:$0xff]  }
  0x4c   :  { %3376 = vmatpush1.bf16.msra.mxu0 %v4453_v15  ;;  %3006 = vmatprep.subr.bf16.mxu1 %v4458_v16  ;;  %v4549_v15 = vld [vmem:[%s6558_s1 + $0x900] ss:$8 sps:$4 sm:$0xff]   ;;  %v4554_v16 = vld [vmem:[%s6558_s1 + $0x214] ss:$8 sps:$4 sm:$0xff]   ;;  %v4656_v35 = vld [vmem:[%s6559_s0 + $0x4c] ss:$108 sps:$4 sm:$0xff]  }
  0x4d   :  { %3377 = vmatprep.subr.bf16.mxu0 %v4461_v17  ;;  %3032 = vmatprep.mubr.bf16.mxu1 %v4542_v40  ;;  %v4557_v17 = vld [vmem:[%s6558_s1 + $0x914] ss:$8 sps:$4 sm:$0xff]   ;;  %v4576_v40 = vld [vmem:[%s6558_s1 + $0x250] ss:$8 sps:$4 sm:$0xff]  }
  0x4e   :  { %3403 = vmatprep.mubr.bf16.mxu0 %v4548_v43  ;;  %v4587_v43 = vld [vmem:[%s6558_s1 + $0x964] ss:$8 sps:$4 sm:$0xff]  }
  0x4f   :  { %3007 = vmatpush1.bf16.msra.mxu1 %v4456_v18  ;;  %v4552_v18 = vld [vmem:[%s6558_s1 + $0x210] ss:$8 sps:$4 sm:$0xff]  }
  0x50   :  { %3378 = vmatpush1.bf16.msra.mxu0 %v4459_v19  ;;  %3008 = vmatprep.subr.bf16.mxu1 %v4464_v20  ;;  %v4555_v19 = vld [vmem:[%s6558_s1 + $0x910] ss:$8 sps:$4 sm:$0xff]  }
  0x51   :  { %3379 = vmatprep.subr.bf16.mxu0 %v4467_v21  ;;  %v4630_v20 = vld [vmem:[%s6559_s0 + $0xe4] ss:$108 sps:$4 sm:$0xff]  }
  0x52   :  { %v4560_v21 = vld [vmem:[%s6558_s1 + $0x224] ss:$8 sps:$4 sm:$0xff]  }
  0x53   :  { %3009 = vmatpush1.bf16.msra.mxu1 %v4462_v22  ;;  %v4563_v22 = vld [vmem:[%s6558_s1 + $0x924] ss:$8 sps:$4 sm:$0xff]  }
  0x54   :  { %3380 = vmatpush1.bf16.msra.mxu0 %v4465_v23  ;;  %3010 = vmatprep.subr.bf16.mxu1 %v4470_v24  ;;  %v4635_v23 = vld [vmem:[%s6559_s0 + $0x11c] ss:$108 sps:$4 sm:$0xff]  }
  0x55   :  { %3381 = vmatprep.subr.bf16.mxu0 %v4473_v25  ;;  %v4558_v24 = vld [vmem:[%s6558_s1 + $0x220] ss:$8 sps:$4 sm:$0xff]  }
  0x56   :  { %v4561_v25 = vld [vmem:[%s6558_s1 + $0x920] ss:$8 sps:$4 sm:$0xff]  }
  0x57   :  { %3011 = vmatpush1.bf16.msra.mxu1 %v4468_v26  ;;  %v4640_v26 = vld [vmem:[%s6559_s0 + $0xe0] ss:$108 sps:$4 sm:$0xff]  }
  0x58   :  { %3382 = vmatpush1.bf16.msra.mxu0 %v4471_v27  ;;  %3012 = vmatprep.subr.bf16.mxu1 %v4476_v29  ;;  %v4641_v27 = vld [vmem:[%s6559_s0 + $0x118] ss:$108 sps:$4 sm:$0xff]   ;;  %v4569_v29 = vld [vmem:[%s6558_s1 + $0x934] ss:$8 sps:$4 sm:$0xff]  }
  0x59   :  { %3383 = vmatprep.subr.bf16.mxu0 %v4479_v30  ;;  %v4564_v30 = vld [vmem:[%s6558_s1 + $0x230] ss:$8 sps:$4 sm:$0xff]  }
  0x5b   :  { %3013 = vmatpush1.bf16.msra.mxu1 %v4474_v32  ;;  %v4650_v32 = vld [vmem:[%s6559_s0 + $0x14] ss:$108 sps:$4 sm:$0xff]  }
  0x5c   :  { %3384 = vmatpush1.bf16.msra.mxu0 %v4477_v33  ;;  %3014 = vmatprep.subr.bf16.mxu1 %v4482_v36  ;;  %v4572_v33 = vld [vmem:[%s6558_s1 + $0x244] ss:$8 sps:$4 sm:$0xff]   ;;  %v4570_v36 = vld [vmem:[%s6558_s1 + $0x240] ss:$8 sps:$4 sm:$0xff]  }
  0x5d   :  { %3385 = vmatprep.subr.bf16.mxu0 %v4485_v37  ;;  %v4573_v37 = vld [vmem:[%s6558_s1 + $0x940] ss:$8 sps:$4 sm:$0xff]  }
  0x5f   :  { %3015 = vmatpush1.bf16.msra.mxu1 %v4480_v38  ;;  %v4578_v38 = vld [vmem:[%s6558_s1 + $0x254] ss:$8 sps:$4 sm:$0xff]  }
  0x60   :  { %3386 = vmatpush1.bf16.msra.mxu0 %v4483_v39  ;;  %3016 = vmatprep.subr.bf16.mxu1 %v4488_v41  ;;  %v4581_v39 = vld [vmem:[%s6558_s1 + $0x954] ss:$8 sps:$4 sm:$0xff]   ;;  %v4579_v41 = vld [vmem:[%s6558_s1 + $0x950] ss:$8 sps:$4 sm:$0xff]  }
  0x61   :  { %3387 = vmatprep.subr.bf16.mxu0 %v4491_v42  ;;  %v4584_v42 = vld [vmem:[%s6558_s1 + $0x264] ss:$8 sps:$4 sm:$0xff]  }
  0x63   :  { %3017 = vmatpush1.bf16.msra.mxu1 %v4486_v44  ;;  %v4582_v44 = vld [vmem:[%s6558_s1 + $0x260] ss:$8 sps:$4 sm:$0xff]  }
  0x64   :  { %3388 = vmatpush1.bf16.msra.mxu0 %v4489_v45  ;;  %3018 = vmatprep.subr.bf16.mxu1 %v4494_v46  ;;  %v4585_v45 = vld [vmem:[%s6558_s1 + $0x960] ss:$8 sps:$4 sm:$0xff]   ;;  %v4590_v46 = vld [vmem:[%s6558_s1 + $0x274] ss:$8 sps:$4 sm:$0xff]  }
  0x65   :  { %3389 = vmatprep.subr.bf16.mxu0 %v4497_v47  ;;  %v4593_v47 = vld [vmem:[%s6558_s1 + $0x974] ss:$8 sps:$4 sm:$0xff]  }
  0x67   :  { %3019 = vmatpush1.bf16.msra.mxu1 %v4492_v48  ;;  %v4588_v48 = vld [vmem:[%s6558_s1 + $0x270] ss:$8 sps:$4 sm:$0xff]  }
  0x68   :  { %3390 = vmatpush1.bf16.msra.mxu0 %v4495_v49  ;;  %3020 = vmatprep.subr.bf16.mxu1 %v4500_v50  ;;  %v4591_v49 = vld [vmem:[%s6558_s1 + $0x970] ss:$8 sps:$4 sm:$0xff]   ;;  %v4596_v50 = vld [vmem:[%s6558_s1 + $0x284] ss:$8 sps:$4 sm:$0xff]  }
  0x69   :  { %3391 = vmatprep.subr.bf16.mxu0 %v4503_v51  ;;  %v4599_v51 = vld [vmem:[%s6558_s1 + $0x984] ss:$8 sps:$4 sm:$0xff]  }
  0x6b   :  { %3021 = vmatpush1.bf16.msra.mxu1 %v4498_v52  ;;  %v4594_v52 = vld [vmem:[%s6558_s1 + $0x280] ss:$8 sps:$4 sm:$0xff]  }
  0x6c   :  { %3392 = vmatpush1.bf16.msra.mxu0 %v4501_v53  ;;  %3022 = vmatprep.subr.bf16.mxu1 %v4506_v54  ;;  %v4597_v53 = vld [vmem:[%s6558_s1 + $0x980] ss:$8 sps:$4 sm:$0xff]   ;;  %v4602_v54 = vld [vmem:[%s6558_s1 + $0x294] ss:$8 sps:$4 sm:$0xff]  }
  0x6d   :  { %3393 = vmatprep.subr.bf16.mxu0 %v4509_v55  ;;  %v4605_v55 = vld [vmem:[%s6558_s1 + $0x994] ss:$8 sps:$4 sm:$0xff]  }
  0x6f   :  { %3023 = vmatpush1.bf16.msra.mxu1 %v4504_v56  ;;  %v4600_v56 = vld [vmem:[%s6558_s1 + $0x290] ss:$8 sps:$4 sm:$0xff]  }
  0x70   :  { %3394 = vmatpush1.bf16.msra.mxu0 %v4507_v57  ;;  %3024 = vmatprep.subr.bf16.mxu1 %v4512_v58  ;;  %v4603_v57 = vld [vmem:[%s6558_s1 + $0x990] ss:$8 sps:$4 sm:$0xff]   ;;  %v4608_v58 = vld [vmem:[%s6558_s1 + $0x2a4] ss:$8 sps:$4 sm:$0xff]  }
  0x71   :  { %3395 = vmatprep.subr.bf16.mxu0 %v4515_v59  ;;  %v4611_v59 = vld [vmem:[%s6558_s1 + $0x9a4] ss:$8 sps:$4 sm:$0xff]  }
  0x73   :  { %3025 = vmatpush1.bf16.msra.mxu1 %v4510_v60  ;;  %v4606_v60 = vld [vmem:[%s6558_s1 + $0x2a0] ss:$8 sps:$4 sm:$0xff]  }
  0x74   :  { %3396 = vmatpush1.bf16.msra.mxu0 %v4513_v61  ;;  %3026 = vmatprep.subr.bf16.mxu1 %v4518_v62  ;;  %v4609_v61 = vld [vmem:[%s6558_s1 + $0x9a0] ss:$8 sps:$4 sm:$0xff]   ;;  %v4614_v62 = vld [vmem:[%s6558_s1 + $0x2b4] ss:$8 sps:$4 sm:$0xff]  }
  0x75   :  { %3397 = vmatprep.subr.bf16.mxu0 %v4521_v63  ;;  %v4617_v63 = vld [vmem:[%s6558_s1 + $0x9b4] ss:$8 sps:$4 sm:$0xff]  }
  0x77   :  { %3027 = vmatpush1.bf16.msra.mxu1 %v4516_v0  ;;  %v4612_v0 = vld [vmem:[%s6558_s1 + $0x2b0] ss:$8 sps:$4 sm:$0xff]  }
  0x78   :  { %3398 = vmatpush1.bf16.msra.mxu0 %v4519_v1  ;;  %3028 = vmatprep.subr.bf16.mxu1 %v4526_v2  ;;  %v4615_v1 = vld [vmem:[%s6558_s1 + $0x9b0] ss:$8 sps:$4 sm:$0xff]   ;;  %v4620_v2 = vld [vmem:[%s6558_s1 + $0x2c4] ss:$8 sps:$4 sm:$0xff]  }
  0x79   :  { %3399 = vmatprep.subr.bf16.mxu0 %v4531_v3  ;;  %v4623_v3 = vld [vmem:[%s6558_s1 + $0x9c4] ss:$8 sps:$4 sm:$0xff]  }
  0x7b   :  { %3029 = vmatpush1.bf16.msra.mxu1 %v4524_v4  ;;  %v4618_v4 = vld [vmem:[%s6558_s1 + $0x2c0] ss:$8 sps:$4 sm:$0xff]  }
  0x7c   :  { %3400 = vmatpush1.bf16.msra.mxu0 %v4529_v5  ;;  %3030 = vmatprep.subr.bf16.mxu1 %v4536_v6  ;;  %v4621_v5 = vld [vmem:[%s6558_s1 + $0x9c0] ss:$8 sps:$4 sm:$0xff]   ;;  %v4626_v6 = vld [vmem:[%s6558_s1 + $0x2d4] ss:$8 sps:$4 sm:$0xff]  }
  0x7d   :  { %3401 = vmatprep.subr.bf16.mxu0 %v4539_v7  ;;  %v4629_v7 = vld [vmem:[%s6558_s1 + $0x9d4] ss:$8 sps:$4 sm:$0xff]  }
  0x7f   :  { %3031 = vmatpush1.bf16.msra.mxu1 %v4534_v8  ;;  %v4624_v8 = vld [vmem:[%s6558_s1 + $0x2d0] ss:$8 sps:$4 sm:$0xff]  }
  0x80   :  { %3402 = vmatpush1.bf16.msra.mxu0 %v4537_v9  ;;  %3053 = vmatprep.subr.bf16.mxu1 %v4545_v10  ;;  %v4627_v9 = vld [vmem:[%s6558_s1 + $0x9d0] ss:$8 sps:$4 sm:$0xff]   ;;  %v4634_v10 = vld [vmem:[%s6558_s1 + $0x2e4] ss:$8 sps:$4 sm:$0xff]  }
  0x81   :  { %3424 = vmatprep.subr.bf16.mxu0 %v4551_v11  ;;  %v4639_v11 = vld [vmem:[%s6558_s1 + $0x9e4] ss:$8 sps:$4 sm:$0xff]  }
  0x82   :  { %3033 = vmatmul.mubr.bf16.vlgmr.msra.gmra.mrb[0].mxu1 %v4540_v12  ;;  %v4632_v12 = vld [vmem:[%s6558_s1 + $0x2e0] ss:$8 sps:$4 sm:$0xff]  }
  0x83   :  { %3404 = vmatmul.mubr.bf16.vlgmr.msra.gmra.mrb[0].mxu0 %v4546_v14  ;;  %3054 = vmatpush1.bf16.msra.mxu1 %v4543_v13  ;;  %v4637_v13 = vld [vmem:[%s6558_s1 + $0x9e0] ss:$8 sps:$4 sm:$0xff]   ;;  %v4644_v14 = vld [vmem:[%s6558_s1 + $0x2f4] ss:$8 sps:$4 sm:$0xff]  }
  0x84   :  { %3425 = vmatpush1.bf16.msra.mxu0 %v4549_v15  ;;  %3055 = vmatprep.subr.bf16.mxu1 %v4554_v16  ;;  %v4647_v15 = vld [vmem:[%s6558_s1 + $0x9f4] ss:$8 sps:$4 sm:$0xff]   ;;  %v4642_v16 = vld [vmem:[%s6558_s1 + $0x2f0] ss:$8 sps:$4 sm:$0xff]  }
  0x85   :  { %3426 = vmatprep.subr.bf16.mxu0 %v4557_v17  ;;  %3042 = vmatprep.mubr.bf16.mxu1 %v4630_v20  ;;  %v4645_v17 = vld [vmem:[%s6558_s1 + $0x9f0] ss:$8 sps:$4 sm:$0xff]  }
  0x86   :  { %3413 = vmatprep.mubr.bf16.mxu0 %v4635_v23  ;;  %v4648_v20 = vld [vmem:[%s6559_s0 + $0x10] ss:$108 sps:$4 sm:$0xff]   ;;  %v4657_v23 = vld [vmem:[%s6558_s1 + $0xa00] ss:$8 sps:$4 sm:$0xff]  }
  0x87   :  { %3056 = vmatpush1.bf16.msra.mxu1 %v4552_v18  ;;  %v4653_v18 = vld [vmem:[%s6558_s1 + $0x304] ss:$8 sps:$4 sm:$0xff]  }
  0x88   :  { %3427 = vmatpush1.bf16.msra.mxu0 %v4555_v19  ;;  %3057 = vmatprep.subr.bf16.mxu1 %v4560_v21  ;;  %v4659_v19 = vld [vmem:[%s6558_s1 + $0xa04] ss:$8 sps:$4 sm:$0xff]   ;;  %v4651_v21 = vld [vmem:[%s6558_s1 + $0x300] ss:$8 sps:$4 sm:$0xff]  }
  0x89   :  { %3428 = vmatprep.subr.bf16.mxu0 %v4563_v22  ;;  %v4654_v22 = vld [vmem:[%s6559_s0 + $0x48] ss:$108 sps:$4 sm:$0xff]  }
  0x8a   :  { %3043 = vmatmul.mubr.bf16.gmra.mrb[4].mxu1 %v4640_v26  ;;  %v4738_v26 = vld [vmem:[%s6559_s0 + $0xec] ss:$108 sps:$4 sm:$0xff]  }
  0x8b   :  { %3414 = vmatmul.mubr.bf16.gmra.mrb[4].mxu0 %v4641_v27  ;;  %3058 = vmatpush1.bf16.msra.mxu1 %v4558_v24  ;;  %v4662_v24 = vld [vmem:[%s6558_s1 + $0x314] ss:$8 sps:$4 sm:$0xff]   ;;  %v4743_v27 = vld [vmem:[%s6559_s0 + $0x124] ss:$108 sps:$4 sm:$0xff]  }
  0x8c   :  { %3429 = vmatpush1.bf16.msra.mxu0 %v4561_v25  ;;  %3059 = vmatprep.subr.bf16.mxu1 %v4566_v28  ;;  %v4665_v25 = vld [vmem:[%s6558_s1 + $0xa14] ss:$8 sps:$4 sm:$0xff]   ;;  %v4660_v28 = vld [vmem:[%s6558_s1 + $0x310] ss:$8 sps:$4 sm:$0xff]  }
  0x8d   :  { %3430 = vmatprep.subr.bf16.mxu0 %v4569_v29  ;;  %3085 = vmatprep.mubr.bf16.mxu1 %v4650_v32  ;;  %v4663_v29 = vld [vmem:[%s6558_s1 + $0xa10] ss:$8 sps:$4 sm:$0xff]   ;;  %v4666_v32 = vld [vmem:[%s6558_s1 + $0x320] ss:$8 sps:$4 sm:$0xff]  }
  0x8e   :  { %3456 = vmatprep.mubr.bf16.mxu0 %v4656_v35  ;;  %v4749_v35 = vld [vmem:[%s6559_s0 + $0x120] ss:$108 sps:$4 sm:$0xff]  }
  0x8f   :  { %3060 = vmatpush1.bf16.msra.mxu1 %v4564_v30  ;;  %v4668_v30 = vld [vmem:[%s6558_s1 + $0x324] ss:$8 sps:$4 sm:$0xff]  }
  0x90   :  { %3431 = vmatpush1.bf16.msra.mxu0 %v4567_v31  ;;  %3061 = vmatprep.subr.bf16.mxu1 %v4572_v33  ;;  %v4671_v31 = vld [vmem:[%s6558_s1 + $0xa24] ss:$8 sps:$4 sm:$0xff]   ;;  %v4669_v33 = vld [vmem:[%s6558_s1 + $0xa20] ss:$8 sps:$4 sm:$0xff]  }
  0x91   :  { %3432 = vmatprep.subr.bf16.mxu0 %v4575_v34  ;;  %v4748_v34 = vld [vmem:[%s6559_s0 + $0xe8] ss:$108 sps:$4 sm:$0xff]  }
  0x93   :  { %3062 = vmatpush1.bf16.msra.mxu1 %v4570_v36  ;;  %v4674_v36 = vld [vmem:[%s6558_s1 + $0x334] ss:$8 sps:$4 sm:$0xff]  }
  0x94   :  { %3433 = vmatpush1.bf16.msra.mxu0 %v4573_v37  ;;  %3063 = vmatprep.subr.bf16.mxu1 %v4578_v38  ;;  %v4677_v37 = vld [vmem:[%s6558_s1 + $0xa34] ss:$8 sps:$4 sm:$0xff]  }
  0x95   :  { %3434 = vmatprep.subr.bf16.mxu0 %v4581_v39  ;;  %v4758_v38 = vld [vmem:[%s6559_s0 + $0x1c] ss:$108 sps:$4 sm:$0xff]   ;;  %v4764_v39 = vld [vmem:[%s6559_s0 + $0x54] ss:$108 sps:$4 sm:$0xff]  }
  0x97   :  { %3064 = vmatpush1.bf16.msra.mxu1 %v4576_v40  ;;  %v4672_v40 = vld [vmem:[%s6558_s1 + $0x330] ss:$8 sps:$4 sm:$0xff]  }
  0x98   :  { %3435 = vmatpush1.bf16.msra.mxu0 %v4579_v41  ;;  %3065 = vmatprep.subr.bf16.mxu1 %v4584_v42  ;;  %v4675_v41 = vld [vmem:[%s6558_s1 + $0xa30] ss:$8 sps:$4 sm:$0xff]   ;;  %v4680_v42 = vld [vmem:[%s6558_s1 + $0x344] ss:$8 sps:$4 sm:$0xff]  }
  0x99   :  { %3436 = vmatprep.subr.bf16.mxu0 %v4587_v43  ;;  %v4683_v43 = vld [vmem:[%s6558_s1 + $0xa44] ss:$8 sps:$4 sm:$0xff]  }
  0x9b   :  { %3066 = vmatpush1.bf16.msra.mxu1 %v4582_v44  ;;  %v4678_v44 = vld [vmem:[%s6558_s1 + $0x340] ss:$8 sps:$4 sm:$0xff]  }
  0x9c   :  { %3437 = vmatpush1.bf16.msra.mxu0 %v4585_v45  ;;  %3067 = vmatprep.subr.bf16.mxu1 %v4590_v46  ;;  %v4681_v45 = vld [vmem:[%s6558_s1 + $0xa40] ss:$8 sps:$4 sm:$0xff]   ;;  %v4686_v46 = vld [vmem:[%s6558_s1 + $0x354] ss:$8 sps:$4 sm:$0xff]  }
  0x9d   :  { %3438 = vmatprep.subr.bf16.mxu0 %v4593_v47  ;;  %v4689_v47 = vld [vmem:[%s6558_s1 + $0xa54] ss:$8 sps:$4 sm:$0xff]  }
  0x9f   :  { %3068 = vmatpush1.bf16.msra.mxu1 %v4588_v48  ;;  %v4684_v48 = vld [vmem:[%s6558_s1 + $0x350] ss:$8 sps:$4 sm:$0xff]  }
  0xa0   :  { %3439 = vmatpush1.bf16.msra.mxu0 %v4591_v49  ;;  %3069 = vmatprep.subr.bf16.mxu1 %v4596_v50  ;;  %v4687_v49 = vld [vmem:[%s6558_s1 + $0xa50] ss:$8 sps:$4 sm:$0xff]   ;;  %v4692_v50 = vld [vmem:[%s6558_s1 + $0x364] ss:$8 sps:$4 sm:$0xff]  }
  0xa1   :  { %3440 = vmatprep.subr.bf16.mxu0 %v4599_v51  ;;  %v4695_v51 = vld [vmem:[%s6558_s1 + $0xa64] ss:$8 sps:$4 sm:$0xff]  }
  0xa3   :  { %3070 = vmatpush1.bf16.msra.mxu1 %v4594_v52  ;;  %v4690_v52 = vld [vmem:[%s6558_s1 + $0x360] ss:$8 sps:$4 sm:$0xff]  }
  0xa4   :  { %3441 = vmatpush1.bf16.msra.mxu0 %v4597_v53  ;;  %3071 = vmatprep.subr.bf16.mxu1 %v4602_v54  ;;  %v4693_v53 = vld [vmem:[%s6558_s1 + $0xa60] ss:$8 sps:$4 sm:$0xff]   ;;  %v4698_v54 = vld [vmem:[%s6558_s1 + $0x374] ss:$8 sps:$4 sm:$0xff]  }
  0xa5   :  { %3442 = vmatprep.subr.bf16.mxu0 %v4605_v55  ;;  %v4701_v55 = vld [vmem:[%s6558_s1 + $0xa74] ss:$8 sps:$4 sm:$0xff]  }
  0xa7   :  { %3072 = vmatpush1.bf16.msra.mxu1 %v4600_v56  ;;  %v4696_v56 = vld [vmem:[%s6558_s1 + $0x370] ss:$8 sps:$4 sm:$0xff]  }
  0xa8   :  { %3443 = vmatpush1.bf16.msra.mxu0 %v4603_v57  ;;  %3073 = vmatprep.subr.bf16.mxu1 %v4608_v58  ;;  %v4699_v57 = vld [vmem:[%s6558_s1 + $0xa70] ss:$8 sps:$4 sm:$0xff]   ;;  %v4704_v58 = vld [vmem:[%s6558_s1 + $0x384] ss:$8 sps:$4 sm:$0xff]  }
  0xa9   :  { %3444 = vmatprep.subr.bf16.mxu0 %v4611_v59  ;;  %v4707_v59 = vld [vmem:[%s6558_s1 + $0xa84] ss:$8 sps:$4 sm:$0xff]  }
  0xab   :  { %3074 = vmatpush1.bf16.msra.mxu1 %v4606_v60  ;;  %v4702_v60 = vld [vmem:[%s6558_s1 + $0x380] ss:$8 sps:$4 sm:$0xff]  }
  0xac   :  { %3445 = vmatpush1.bf16.msra.mxu0 %v4609_v61  ;;  %3075 = vmatprep.subr.bf16.mxu1 %v4614_v62  ;;  %v4705_v61 = vld [vmem:[%s6558_s1 + $0xa80] ss:$8 sps:$4 sm:$0xff]   ;;  %v4710_v62 = vld [vmem:[%s6558_s1 + $0x394] ss:$8 sps:$4 sm:$0xff]  }
  0xad   :  { %3446 = vmatprep.subr.bf16.mxu0 %v4617_v63  ;;  %v4713_v63 = vld [vmem:[%s6558_s1 + $0xa94] ss:$8 sps:$4 sm:$0xff]  }
  0xaf   :  { %3076 = vmatpush1.bf16.msra.mxu1 %v4612_v0  ;;  %v4708_v0 = vld [vmem:[%s6558_s1 + $0x390] ss:$8 sps:$4 sm:$0xff]  }
  0xb0   :  { %3447 = vmatpush1.bf16.msra.mxu0 %v4615_v1  ;;  %3077 = vmatprep.subr.bf16.mxu1 %v4620_v2  ;;  %v4711_v1 = vld [vmem:[%s6558_s1 + $0xa90] ss:$8 sps:$4 sm:$0xff]   ;;  %v4716_v2 = vld [vmem:[%s6558_s1 + $0x3a4] ss:$8 sps:$4 sm:$0xff]  }
  0xb1   :  { %3448 = vmatprep.subr.bf16.mxu0 %v4623_v3  ;;  %v4719_v3 = vld [vmem:[%s6558_s1 + $0xaa4] ss:$8 sps:$4 sm:$0xff]  }
  0xb3   :  { %3078 = vmatpush1.bf16.msra.mxu1 %v4618_v4  ;;  %v4714_v4 = vld [vmem:[%s6558_s1 + $0x3a0] ss:$8 sps:$4 sm:$0xff]  }
  0xb4   :  { %3449 = vmatpush1.bf16.msra.mxu0 %v4621_v5  ;;  %3079 = vmatprep.subr.bf16.mxu1 %v4626_v6  ;;  %v4717_v5 = vld [vmem:[%s6558_s1 + $0xaa0] ss:$8 sps:$4 sm:$0xff]   ;;  %v4722_v6 = vld [vmem:[%s6558_s1 + $0x3b4] ss:$8 sps:$4 sm:$0xff]  }
  0xb5   :  { %3450 = vmatprep.subr.bf16.mxu0 %v4629_v7  ;;  %v4725_v7 = vld [vmem:[%s6558_s1 + $0xab4] ss:$8 sps:$4 sm:$0xff]  }
  0xb7   :  { %3080 = vmatpush1.bf16.msra.mxu1 %v4624_v8  ;;  %v4720_v8 = vld [vmem:[%s6558_s1 + $0x3b0] ss:$8 sps:$4 sm:$0xff]  }
  0xb8   :  { %3451 = vmatpush1.bf16.msra.mxu0 %v4627_v9  ;;  %3081 = vmatprep.subr.bf16.mxu1 %v4634_v10  ;;  %v4723_v9 = vld [vmem:[%s6558_s1 + $0xab0] ss:$8 sps:$4 sm:$0xff]   ;;  %v4728_v10 = vld [vmem:[%s6558_s1 + $0x3c4] ss:$8 sps:$4 sm:$0xff]  }
  0xb9   :  { %3452 = vmatprep.subr.bf16.mxu0 %v4639_v11  ;;  %v4731_v11 = vld [vmem:[%s6558_s1 + $0xac4] ss:$8 sps:$4 sm:$0xff]  }
  0xbb   :  { %3082 = vmatpush1.bf16.msra.mxu1 %v4632_v12  ;;  %v4726_v12 = vld [vmem:[%s6558_s1 + $0x3c0] ss:$8 sps:$4 sm:$0xff]  }
  0xbc   :  { %3453 = vmatpush1.bf16.msra.mxu0 %v4637_v13  ;;  %3083 = vmatprep.subr.bf16.mxu1 %v4644_v14  ;;  %v4729_v13 = vld [vmem:[%s6558_s1 + $0xac0] ss:$8 sps:$4 sm:$0xff]   ;;  %v4734_v14 = vld [vmem:[%s6558_s1 + $0x3d4] ss:$8 sps:$4 sm:$0xff]  }
  0xbd   :  { %3454 = vmatprep.subr.bf16.mxu0 %v4647_v15  ;;  %v4737_v15 = vld [vmem:[%s6558_s1 + $0xad4] ss:$8 sps:$4 sm:$0xff]  }
  0xbf   :  { %3084 = vmatpush1.bf16.msra.mxu1 %v4642_v16  ;;  %v4732_v16 = vld [vmem:[%s6558_s1 + $0x3d0] ss:$8 sps:$4 sm:$0xff]  }
  0xc0   :  { %3455 = vmatpush1.bf16.msra.mxu0 %v4645_v17  ;;  %3106 = vmatprep.subr.bf16.mxu1 %v4653_v18  ;;  %v4735_v17 = vld [vmem:[%s6558_s1 + $0xad0] ss:$8 sps:$4 sm:$0xff]   ;;  %v4742_v18 = vld [vmem:[%s6558_s1 + $0x3e4] ss:$8 sps:$4 sm:$0xff]  }
  0xc1   :  { %3477 = vmatprep.subr.bf16.mxu0 %v4659_v19  ;;  %v4747_v19 = vld [vmem:[%s6558_s1 + $0xae4] ss:$8 sps:$4 sm:$0xff]  }
  0xc2   :  { %3086 = vmatmul.mubr.bf16.vlgmr.msra.gmra.mrb[0].mxu1 %v4648_v20  ;;  %v4740_v20 = vld [vmem:[%s6558_s1 + $0x3e0] ss:$8 sps:$4 sm:$0xff]  }
  0xc3   :  { %3457 = vmatmul.mubr.bf16.vlgmr.msra.gmra.mrb[0].mxu0 %v4654_v22  ;;  %3107 = vmatpush1.bf16.msra.mxu1 %v4651_v21  ;;  %v4745_v21 = vld [vmem:[%s6558_s1 + $0xae0] ss:$8 sps:$4 sm:$0xff]   ;;  %v4752_v22 = vld [vmem:[%s6558_s1 + $0x3f4] ss:$8 sps:$4 sm:$0xff]  }
  0xc4   :  { %3478 = vmatpush1.bf16.msra.mxu0 %v4657_v23  ;;  %3108 = vmatprep.subr.bf16.mxu1 %v4662_v24  ;;  %v4755_v23 = vld [vmem:[%s6558_s1 + $0xaf4] ss:$8 sps:$4 sm:$0xff]   ;;  %v4750_v24 = vld [vmem:[%s6558_s1 + $0x3f0] ss:$8 sps:$4 sm:$0xff]  }
  0xc5   :  { %3479 = vmatprep.subr.bf16.mxu0 %v4665_v25  ;;  %3095 = vmatprep.mubr.bf16.mxu1 %v4738_v26  ;;  %v4753_v25 = vld [vmem:[%s6558_s1 + $0xaf0] ss:$8 sps:$4 sm:$0xff]   ;;  %v4761_v26 = vld [vmem:[%s6558_s1 + $0x404] ss:$8 sps:$4 sm:$0xff]  }
  0xc6   :  { %3466 = vmatprep.mubr.bf16.mxu0 %v4743_v27  ;;  %v4767_v27 = vld [vmem:[%s6558_s1 + $0xb04] ss:$8 sps:$4 sm:$0xff]  }
  0xc7   :  { %3109 = vmatpush1.bf16.msra.mxu1 %v4660_v28  ;;  %v4756_v28 = vld [vmem:[%s6559_s0 + $0x18] ss:$108 sps:$4 sm:$0xff]  }
  0xc8   :  { %3480 = vmatpush1.bf16.msra.mxu0 %v4663_v29  ;;  %3110 = vmatprep.subr.bf16.mxu1 %v4668_v30  ;;  %v4759_v29 = vld [vmem:[%s6558_s1 + $0x400] ss:$8 sps:$4 sm:$0xff]   ;;  %v4762_v30 = vld [vmem:[%s6559_s0 + $0x50] ss:$108 sps:$4 sm:$0xff]  }
  0xc9   :  { %3481 = vmatprep.subr.bf16.mxu0 %v4671_v31  ;;  %v4765_v31 = vld [vmem:[%s6558_s1 + $0xb00] ss:$8 sps:$4 sm:$0xff]  }
  0xca   :  { %3096 = vmatmul.mubr.bf16.gmra.mrb[4].mxu1 %v4748_v34  ;;  %v4846_v34 = vld [vmem:[%s6559_s0 + $0xf4] ss:$108 sps:$4 sm:$0xff]  }
  0xcb   :  { %3467 = vmatmul.mubr.bf16.gmra.mrb[4].mxu0 %v4749_v35  ;;  %3111 = vmatpush1.bf16.msra.mxu1 %v4666_v32  ;;  %v4770_v32 = vld [vmem:[%s6558_s1 + $0x414] ss:$8 sps:$4 sm:$0xff]   ;;  %v4851_v35 = vld [vmem:[%s6559_s0 + $0x12c] ss:$108 sps:$4 sm:$0xff]  }
  0xcc   :  { %3482 = vmatpush1.bf16.msra.mxu0 %v4669_v33  ;;  %3112 = vmatprep.subr.bf16.mxu1 %v4674_v36  ;;  %v4773_v33 = vld [vmem:[%s6558_s1 + $0xb14] ss:$8 sps:$4 sm:$0xff]   ;;  %v4768_v36 = vld [vmem:[%s6558_s1 + $0x410] ss:$8 sps:$4 sm:$0xff]  }
  0xcd   :  { %3483 = vmatprep.subr.bf16.mxu0 %v4677_v37  ;;  %3138 = vmatprep.mubr.bf16.mxu1 %v4758_v38  ;;  %v4771_v37 = vld [vmem:[%s6558_s1 + $0xb10] ss:$8 sps:$4 sm:$0xff]   ;;  %v4776_v38 = vld [vmem:[%s6558_s1 + $0x424] ss:$8 sps:$4 sm:$0xff]  }
  0xce   :  { %3509 = vmatprep.mubr.bf16.mxu0 %v4764_v39  ;;  %v4779_v39 = vld [vmem:[%s6558_s1 + $0xb24] ss:$8 sps:$4 sm:$0xff]  }
  0xcf   :  { %3113 = vmatpush1.bf16.msra.mxu1 %v4672_v40  ;;  %v4774_v40 = vld [vmem:[%s6558_s1 + $0x420] ss:$8 sps:$4 sm:$0xff]  }
  0xd0   :  { %3484 = vmatpush1.bf16.msra.mxu0 %v4675_v41  ;;  %3114 = vmatprep.subr.bf16.mxu1 %v4680_v42  ;;  %v4777_v41 = vld [vmem:[%s6558_s1 + $0xb20] ss:$8 sps:$4 sm:$0xff]   ;;  %v4856_v42 = vld [vmem:[%s6559_s0 + $0xf0] ss:$108 sps:$4 sm:$0xff]  }
  0xd1   :  { %3485 = vmatprep.subr.bf16.mxu0 %v4683_v43  ;;  %v4857_v43 = vld [vmem:[%s6559_s0 + $0x128] ss:$108 sps:$4 sm:$0xff]  }
  0xd3   :  { %3115 = vmatpush1.bf16.msra.mxu1 %v4678_v44  ;;  %v4782_v44 = vld [vmem:[%s6558_s1 + $0x434] ss:$8 sps:$4 sm:$0xff]  }
  0xd4   :  { %3486 = vmatpush1.bf16.msra.mxu0 %v4681_v45  ;;  %3116 = vmatprep.subr.bf16.mxu1 %v4686_v46  ;;  %v4785_v45 = vld [vmem:[%s6558_s1 + $0xb34] ss:$8 sps:$4 sm:$0xff]   ;;  %v4866_v46 = vld [vmem:[%s6559_s0 + $0x24] ss:$108 sps:$4 sm:$0xff]  }
  0xd5   :  { %3487 = vmatprep.subr.bf16.mxu0 %v4689_v47  ;;  %v4872_v47 = vld [vmem:[%s6559_s0 + $0x5c] ss:$108 sps:$4 sm:$0xff]  }
  0xd7   :  { %3117 = vmatpush1.bf16.msra.mxu1 %v4684_v48  ;;  %v4780_v48 = vld [vmem:[%s6558_s1 + $0x430] ss:$8 sps:$4 sm:$0xff]  }
  0xd8   :  { %3488 = vmatpush1.bf16.msra.mxu0 %v4687_v49  ;;  %3118 = vmatprep.subr.bf16.mxu1 %v4692_v50  ;;  %v4783_v49 = vld [vmem:[%s6558_s1 + $0xb30] ss:$8 sps:$4 sm:$0xff]   ;;  %v4788_v50 = vld [vmem:[%s6558_s1 + $0x444] ss:$8 sps:$4 sm:$0xff]  }
  0xd9   :  { %3489 = vmatprep.subr.bf16.mxu0 %v4695_v51  ;;  %v4791_v51 = vld [vmem:[%s6558_s1 + $0xb44] ss:$8 sps:$4 sm:$0xff]  }
  0xdb   :  { %3119 = vmatpush1.bf16.msra.mxu1 %v4690_v52  ;;  %v4786_v52 = vld [vmem:[%s6558_s1 + $0x440] ss:$8 sps:$4 sm:$0xff]  }
  0xdc   :  { %3490 = vmatpush1.bf16.msra.mxu0 %v4693_v53  ;;  %3120 = vmatprep.subr.bf16.mxu1 %v4698_v54  ;;  %v4789_v53 = vld [vmem:[%s6558_s1 + $0xb40] ss:$8 sps:$4 sm:$0xff]   ;;  %v4794_v54 = vld [vmem:[%s6558_s1 + $0x454] ss:$8 sps:$4 sm:$0xff]  }
  0xdd   :  { %3491 = vmatprep.subr.bf16.mxu0 %v4701_v55  ;;  %v4797_v55 = vld [vmem:[%s6558_s1 + $0xb54] ss:$8 sps:$4 sm:$0xff]  }
  0xdf   :  { %3121 = vmatpush1.bf16.msra.mxu1 %v4696_v56  ;;  %v4792_v56 = vld [vmem:[%s6558_s1 + $0x450] ss:$8 sps:$4 sm:$0xff]  }
  0xe0   :  { %3492 = vmatpush1.bf16.msra.mxu0 %v4699_v57  ;;  %3122 = vmatprep.subr.bf16.mxu1 %v4704_v58  ;;  %v4795_v57 = vld [vmem:[%s6558_s1 + $0xb50] ss:$8 sps:$4 sm:$0xff]   ;;  %v4800_v58 = vld [vmem:[%s6558_s1 + $0x464] ss:$8 sps:$4 sm:$0xff]  }
  0xe1   :  { %3493 = vmatprep.subr.bf16.mxu0 %v4707_v59  ;;  %v4803_v59 = vld [vmem:[%s6558_s1 + $0xb64] ss:$8 sps:$4 sm:$0xff]  }
  0xe3   :  { %3123 = vmatpush1.bf16.msra.mxu1 %v4702_v60  ;;  %v4798_v60 = vld [vmem:[%s6558_s1 + $0x460] ss:$8 sps:$4 sm:$0xff]  }
  0xe4   :  { %3494 = vmatpush1.bf16.msra.mxu0 %v4705_v61  ;;  %3124 = vmatprep.subr.bf16.mxu1 %v4710_v62  ;;  %v4801_v61 = vld [vmem:[%s6558_s1 + $0xb60] ss:$8 sps:$4 sm:$0xff]   ;;  %v4806_v62 = vld [vmem:[%s6558_s1 + $0x474] ss:$8 sps:$4 sm:$0xff]  }
  0xe5   :  { %3495 = vmatprep.subr.bf16.mxu0 %v4713_v63  ;;  %v4809_v63 = vld [vmem:[%s6558_s1 + $0xb74] ss:$8 sps:$4 sm:$0xff]  }
  0xe7   :  { %3125 = vmatpush1.bf16.msra.mxu1 %v4708_v0  ;;  %v4804_v0 = vld [vmem:[%s6558_s1 + $0x470] ss:$8 sps:$4 sm:$0xff]  }
  0xe8   :  { %3496 = vmatpush1.bf16.msra.mxu0 %v4711_v1  ;;  %3126 = vmatprep.subr.bf16.mxu1 %v4716_v2  ;;  %v4807_v1 = vld [vmem:[%s6558_s1 + $0xb70] ss:$8 sps:$4 sm:$0xff]   ;;  %v4812_v2 = vld [vmem:[%s6558_s1 + $0x484] ss:$8 sps:$4 sm:$0xff]  }
  0xe9   :  { %3497 = vmatprep.subr.bf16.mxu0 %v4719_v3  ;;  %v4815_v3 = vld [vmem:[%s6558_s1 + $0xb84] ss:$8 sps:$4 sm:$0xff]  }
  0xeb   :  { %3127 = vmatpush1.bf16.msra.mxu1 %v4714_v4  ;;  %v4810_v4 = vld [vmem:[%s6558_s1 + $0x480] ss:$8 sps:$4 sm:$0xff]  }
  0xec   :  { %3498 = vmatpush1.bf16.msra.mxu0 %v4717_v5  ;;  %3128 = vmatprep.subr.bf16.mxu1 %v4722_v6  ;;  %v4813_v5 = vld [vmem:[%s6558_s1 + $0xb80] ss:$8 sps:$4 sm:$0xff]   ;;  %v4818_v6 = vld [vmem:[%s6558_s1 + $0x494] ss:$8 sps:$4 sm:$0xff]  }
  0xed   :  { %3499 = vmatprep.subr.bf16.mxu0 %v4725_v7  ;;  %v4821_v7 = vld [vmem:[%s6558_s1 + $0xb94] ss:$8 sps:$4 sm:$0xff]  }
  0xef   :  { %3129 = vmatpush1.bf16.msra.mxu1 %v4720_v8  ;;  %v4816_v8 = vld [vmem:[%s6558_s1 + $0x490] ss:$8 sps:$4 sm:$0xff]  }
  0xf0   :  { %3500 = vmatpush1.bf16.msra.mxu0 %v4723_v9  ;;  %3130 = vmatprep.subr.bf16.mxu1 %v4728_v10  ;;  %v4819_v9 = vld [vmem:[%s6558_s1 + $0xb90] ss:$8 sps:$4 sm:$0xff]   ;;  %v4824_v10 = vld [vmem:[%s6558_s1 + $0x4a4] ss:$8 sps:$4 sm:$0xff]  }
  0xf1   :  { %3501 = vmatprep.subr.bf16.mxu0 %v4731_v11  ;;  %v4827_v11 = vld [vmem:[%s6558_s1 + $0xba4] ss:$8 sps:$4 sm:$0xff]  }
  0xf3   :  { %3131 = vmatpush1.bf16.msra.mxu1 %v4726_v12  ;;  %v4822_v12 = vld [vmem:[%s6558_s1 + $0x4a0] ss:$8 sps:$4 sm:$0xff]  }
  0xf4   :  { %3502 = vmatpush1.bf16.msra.mxu0 %v4729_v13  ;;  %3132 = vmatprep.subr.bf16.mxu1 %v4734_v14  ;;  %v4825_v13 = vld [vmem:[%s6558_s1 + $0xba0] ss:$8 sps:$4 sm:$0xff]   ;;  %v4830_v14 = vld [vmem:[%s6558_s1 + $0x4b4] ss:$8 sps:$4 sm:$0xff]  }
  0xf5   :  { %3503 = vmatprep.subr.bf16.mxu0 %v4737_v15  ;;  %v4833_v15 = vld [vmem:[%s6558_s1 + $0xbb4] ss:$8 sps:$4 sm:$0xff]  }
  0xf7   :  { %3133 = vmatpush1.bf16.msra.mxu1 %v4732_v16  ;;  %v4828_v16 = vld [vmem:[%s6558_s1 + $0x4b0] ss:$8 sps:$4 sm:$0xff]  }
  0xf8   :  { %3504 = vmatpush1.bf16.msra.mxu0 %v4735_v17  ;;  %3134 = vmatprep.subr.bf16.mxu1 %v4742_v18  ;;  %v4831_v17 = vld [vmem:[%s6558_s1 + $0xbb0] ss:$8 sps:$4 sm:$0xff]   ;;  %v4836_v18 = vld [vmem:[%s6558_s1 + $0x4c4] ss:$8 sps:$4 sm:$0xff]  }
  0xf9   :  { %3505 = vmatprep.subr.bf16.mxu0 %v4747_v19  ;;  %v4839_v19 = vld [vmem:[%s6558_s1 + $0xbc4] ss:$8 sps:$4 sm:$0xff]  }
  0xfb   :  { %3135 = vmatpush1.bf16.msra.mxu1 %v4740_v20  ;;  %v4834_v20 = vld [vmem:[%s6558_s1 + $0x4c0] ss:$8 sps:$4 sm:$0xff]  }
  0xfc   :  { %3506 = vmatpush1.bf16.msra.mxu0 %v4745_v21  ;;  %3136 = vmatprep.subr.bf16.mxu1 %v4752_v22  ;;  %v4837_v21 = vld [vmem:[%s6558_s1 + $0xbc0] ss:$8 sps:$4 sm:$0xff]   ;;  %v4842_v22 = vld [vmem:[%s6558_s1 + $0x4d4] ss:$8 sps:$4 sm:$0xff]  }
  0xfd   :  { %3507 = vmatprep.subr.bf16.mxu0 %v4755_v23  ;;  %v4845_v23 = vld [vmem:[%s6558_s1 + $0xbd4] ss:$8 sps:$4 sm:$0xff]  }
  0xff   :  { %3137 = vmatpush1.bf16.msra.mxu1 %v4750_v24  ;;  %v4840_v24 = vld [vmem:[%s6558_s1 + $0x4d0] ss:$8 sps:$4 sm:$0xff]  }
 0x100   :  { %3508 = vmatpush1.bf16.msra.mxu0 %v4753_v25  ;;  %3159 = vmatprep.subr.bf16.mxu1 %v4761_v26  ;;  %v4843_v25 = vld [vmem:[%s6558_s1 + $0xbd0] ss:$8 sps:$4 sm:$0xff]   ;;  %v4850_v26 = vld [vmem:[%s6558_s1 + $0x4e4] ss:$8 sps:$4 sm:$0xff]  }
 0x101   :  { %3530 = vmatprep.subr.bf16.mxu0 %v4767_v27  ;;  %v4855_v27 = vld [vmem:[%s6558_s1 + $0xbe4] ss:$8 sps:$4 sm:$0xff]  }
 0x102   :  { %3139 = vmatmul.mubr.bf16.vlgmr.msra.gmra.mrb[0].mxu1 %v4756_v28  ;;  %v4848_v28 = vld [vmem:[%s6558_s1 + $0x4e0] ss:$8 sps:$4 sm:$0xff]  }
 0x103   :  { %3510 = vmatmul.mubr.bf16.vlgmr.msra.gmra.mrb[0].mxu0 %v4762_v30  ;;  %3160 = vmatpush1.bf16.msra.mxu1 %v4759_v29  ;;  %v4853_v29 = vld [vmem:[%s6558_s1 + $0xbe0] ss:$8 sps:$4 sm:$0xff]   ;;  %v4860_v30 = vld [vmem:[%s6558_s1 + $0x4f4] ss:$8 sps:$4 sm:$0xff]  }
 0x104   :  { %3531 = vmatpush1.bf16.msra.mxu0 %v4765_v31  ;;  %3161 = vmatprep.subr.bf16.mxu1 %v4770_v32  ;;  %v4863_v31 = vld [vmem:[%s6558_s1 + $0xbf4] ss:$8 sps:$4 sm:$0xff]   ;;  %v4858_v32 = vld [vmem:[%s6558_s1 + $0x4f0] ss:$8 sps:$4 sm:$0xff]  }
 0x105   :  { %3532 = vmatprep.subr.bf16.mxu0 %v4773_v33  ;;  %3148 = vmatprep.mubr.bf16.mxu1 %v4846_v34  ;;  %v4861_v33 = vld [vmem:[%s6558_s1 + $0xbf0] ss:$8 sps:$4 sm:$0xff]   ;;  %v4864_v34 = vld [vmem:[%s6559_s0 + $0x20] ss:$108 sps:$4 sm:$0xff]  }
 0x106   :  { %3519 = vmatprep.mubr.bf16.mxu0 %v4851_v35  ;;  %v4869_v35 = vld [vmem:[%s6558_s1 + $0x504] ss:$8 sps:$4 sm:$0xff]  }
 0x107   :  { %3162 = vmatpush1.bf16.msra.mxu1 %v4768_v36  ;;  %v4875_v36 = vld [vmem:[%s6558_s1 + $0xc04] ss:$8 sps:$4 sm:$0xff]  }
 0x108   :  { %3533 = vmatpush1.bf16.msra.mxu0 %v4771_v37  ;;  %3163 = vmatprep.subr.bf16.mxu1 %v4776_v38  ;;  %v4867_v37 = vld [vmem:[%s6558_s1 + $0x500] ss:$8 sps:$4 sm:$0xff]   ;;  %v4870_v38 = vld [vmem:[%s6559_s0 + $0x58] ss:$108 sps:$4 sm:$0xff]  }
 0x109   :  { %3534 = vmatprep.subr.bf16.mxu0 %v4779_v39  ;;  %v4873_v39 = vld [vmem:[%s6558_s1 + $0xc00] ss:$8 sps:$4 sm:$0xff]  }
 0x10a   :  { %3149 = vmatmul.mubr.bf16.gmra.mrb[4].mxu1 %v4856_v42  ;;  %v4954_v42 = vld [vmem:[%s6559_s0 + $0xfc] ss:$108 sps:$4 sm:$0xff]  }
 0x10b   :  { %3520 = vmatmul.mubr.bf16.gmra.mrb[4].mxu0 %v4857_v43  ;;  %3164 = vmatpush1.bf16.msra.mxu1 %v4774_v40  ;;  %v4878_v40 = vld [vmem:[%s6558_s1 + $0x514] ss:$8 sps:$4 sm:$0xff]  }
 0x10c   :  { %3535 = vmatpush1.bf16.msra.mxu0 %v4777_v41  ;;  %3165 = vmatprep.subr.bf16.mxu1 %v4782_v44  ;;  %v4881_v41 = vld [vmem:[%s6558_s1 + $0xc14] ss:$8 sps:$4 sm:$0xff]   ;;  %v4876_v44 = vld [vmem:[%s6558_s1 + $0x510] ss:$8 sps:$4 sm:$0xff]  }
 0x10d   :  { %3536 = vmatprep.subr.bf16.mxu0 %v4785_v45  ;;  %3191 = vmatprep.mubr.bf16.mxu1 %v4866_v46  ;;  %v4959_v43 = vld [vmem:[%s6559_s0 + $0x134] ss:$108 sps:$4 sm:$0xff]   ;;  %v4879_v45 = vld [vmem:[%s6558_s1 + $0xc10] ss:$8 sps:$4 sm:$0xff]   ;;  %v4884_v46 = vld [vmem:[%s6558_s1 + $0x524] ss:$8 sps:$4 sm:$0xff]  }
 0x10e   :  { %3562 = vmatprep.mubr.bf16.mxu0 %v4872_v47  ;;  %v4887_v47 = vld [vmem:[%s6558_s1 + $0xc24] ss:$8 sps:$4 sm:$0xff]  }
 0x10f   :  { %3166 = vmatpush1.bf16.msra.mxu1 %v4780_v48  ;;  %v4964_v48 = vld [vmem:[%s6559_s0 + $0xf8] ss:$108 sps:$4 sm:$0xff]  }
 0x110   :  { %3537 = vmatpush1.bf16.msra.mxu0 %v4783_v49  ;;  %3167 = vmatprep.subr.bf16.mxu1 %v4788_v50  ;;  %v4965_v49 = vld [vmem:[%s6559_s0 + $0x130] ss:$108 sps:$4 sm:$0xff]   ;;  %v4882_v50 = vld [vmem:[%s6558_s1 + $0x520] ss:$8 sps:$4 sm:$0xff]  }
 0x111   :  { %3538 = vmatprep.subr.bf16.mxu0 %v4791_v51  ;;  %v4885_v51 = vld [vmem:[%s6558_s1 + $0xc20] ss:$8 sps:$4 sm:$0xff]  }
 0x113   :  { %3168 = vmatpush1.bf16.msra.mxu1 %v4786_v52  ;;  %v4890_v52 = vld [vmem:[%s6558_s1 + $0x534] ss:$8 sps:$4 sm:$0xff]  }
 0x114   :  { %3539 = vmatpush1.bf16.msra.mxu0 %v4789_v53  ;;  %3169 = vmatprep.subr.bf16.mxu1 %v4794_v54  ;;  %v4893_v53 = vld [vmem:[%s6558_s1 + $0xc34] ss:$8 sps:$4 sm:$0xff]   ;;  %v4974_v54 = vld [vmem:[%s6559_s0 + $0x2c] ss:$108 sps:$4 sm:$0xff]  }
 0x115   :  { %3540 = vmatprep.subr.bf16.mxu0 %v4797_v55  ;;  %v4980_v55 = vld [vmem:[%s6559_s0 + $0x64] ss:$108 sps:$4 sm:$0xff]  }
 0x117   :  { %3170 = vmatpush1.bf16.msra.mxu1 %v4792_v56  ;;  %v4888_v56 = vld [vmem:[%s6558_s1 + $0x530] ss:$8 sps:$4 sm:$0xff]  }
 0x118   :  { %3541 = vmatpush1.bf16.msra.mxu0 %v4795_v57  ;;  %3171 = vmatprep.subr.bf16.mxu1 %v4800_v58  ;;  %v4891_v57 = vld [vmem:[%s6558_s1 + $0xc30] ss:$8 sps:$4 sm:$0xff]   ;;  %v4896_v58 = vld [vmem:[%s6558_s1 + $0x544] ss:$8 sps:$4 sm:$0xff]  }
 0x119   :  { %3542 = vmatprep.subr.bf16.mxu0 %v4803_v59  ;;  %v4899_v59 = vld [vmem:[%s6558_s1 + $0xc44] ss:$8 sps:$4 sm:$0xff]  }
 0x11b   :  { %3172 = vmatpush1.bf16.msra.mxu1 %v4798_v60  ;;  %v4894_v60 = vld [vmem:[%s6558_s1 + $0x540] ss:$8 sps:$4 sm:$0xff]  }
 0x11c   :  { %3543 = vmatpush1.bf16.msra.mxu0 %v4801_v61  ;;  %3173 = vmatprep.subr.bf16.mxu1 %v4806_v62  ;;  %v4897_v61 = vld [vmem:[%s6558_s1 + $0xc40] ss:$8 sps:$4 sm:$0xff]   ;;  %v4902_v62 = vld [vmem:[%s6558_s1 + $0x554] ss:$8 sps:$4 sm:$0xff]  }
 0x11d   :  { %3544 = vmatprep.subr.bf16.mxu0 %v4809_v63  ;;  %v4905_v63 = vld [vmem:[%s6558_s1 + $0xc54] ss:$8 sps:$4 sm:$0xff]  }
 0x11f   :  { %3174 = vmatpush1.bf16.msra.mxu1 %v4804_v0  ;;  %v4900_v0 = vld [vmem:[%s6558_s1 + $0x550] ss:$8 sps:$4 sm:$0xff]  }
 0x120   :  { %3545 = vmatpush1.bf16.msra.mxu0 %v4807_v1  ;;  %3175 = vmatprep.subr.bf16.mxu1 %v4812_v2  ;;  %v4903_v1 = vld [vmem:[%s6558_s1 + $0xc50] ss:$8 sps:$4 sm:$0xff]   ;;  %v4908_v2 = vld [vmem:[%s6558_s1 + $0x564] ss:$8 sps:$4 sm:$0xff]  }
 0x121   :  { %3546 = vmatprep.subr.bf16.mxu0 %v4815_v3  ;;  %v4911_v3 = vld [vmem:[%s6558_s1 + $0xc64] ss:$8 sps:$4 sm:$0xff]  }
 0x123   :  { %3176 = vmatpush1.bf16.msra.mxu1 %v4810_v4  ;;  %v4906_v4 = vld [vmem:[%s6558_s1 + $0x560] ss:$8 sps:$4 sm:$0xff]  }
 0x124   :  { %3547 = vmatpush1.bf16.msra.mxu0 %v4813_v5  ;;  %3177 = vmatprep.subr.bf16.mxu1 %v4818_v6  ;;  %v4909_v5 = vld [vmem:[%s6558_s1 + $0xc60] ss:$8 sps:$4 sm:$0xff]   ;;  %v4914_v6 = vld [vmem:[%s6558_s1 + $0x574] ss:$8 sps:$4 sm:$0xff]  }
 0x125   :  { %3548 = vmatprep.subr.bf16.mxu0 %v4821_v7  ;;  %v4917_v7 = vld [vmem:[%s6558_s1 + $0xc74] ss:$8 sps:$4 sm:$0xff]  }
 0x127   :  { %3178 = vmatpush1.bf16.msra.mxu1 %v4816_v8  ;;  %v4912_v8 = vld [vmem:[%s6558_s1 + $0x570] ss:$8 sps:$4 sm:$0xff]  }
 0x128   :  { %3549 = vmatpush1.bf16.msra.mxu0 %v4819_v9  ;;  %3179 = vmatprep.subr.bf16.mxu1 %v4824_v10  ;;  %v4915_v9 = vld [vmem:[%s6558_s1 + $0xc70] ss:$8 sps:$4 sm:$0xff]   ;;  %v4920_v10 = vld [vmem:[%s6558_s1 + $0x584] ss:$8 sps:$4 sm:$0xff]  }
 0x129   :  { %3550 = vmatprep.subr.bf16.mxu0 %v4827_v11  ;;  %v4923_v11 = vld [vmem:[%s6558_s1 + $0xc84] ss:$8 sps:$4 sm:$0xff]  }
 0x12b   :  { %3180 = vmatpush1.bf16.msra.mxu1 %v4822_v12  ;;  %v4918_v12 = vld [vmem:[%s6558_s1 + $0x580] ss:$8 sps:$4 sm:$0xff]  }
 0x12c   :  { %3551 = vmatpush1.bf16.msra.mxu0 %v4825_v13  ;;  %3181 = vmatprep.subr.bf16.mxu1 %v4830_v14  ;;  %v4921_v13 = vld [vmem:[%s6558_s1 + $0xc80] ss:$8 sps:$4 sm:$0xff]   ;;  %v4926_v14 = vld [vmem:[%s6558_s1 + $0x594] ss:$8 sps:$4 sm:$0xff]  }
 0x12d   :  { %3552 = vmatprep.subr.bf16.mxu0 %v4833_v15  ;;  %v4929_v15 = vld [vmem:[%s6558_s1 + $0xc94] ss:$8 sps:$4 sm:$0xff]  }
 0x12f   :  { %3182 = vmatpush1.bf16.msra.mxu1 %v4828_v16  ;;  %v4924_v16 = vld [vmem:[%s6558_s1 + $0x590] ss:$8 sps:$4 sm:$0xff]  }
 0x130   :  { %3553 = vmatpush1.bf16.msra.mxu0 %v4831_v17  ;;  %3183 = vmatprep.subr.bf16.mxu1 %v4836_v18  ;;  %v4927_v17 = vld [vmem:[%s6558_s1 + $0xc90] ss:$8 sps:$4 sm:$0xff]   ;;  %v4932_v18 = vld [vmem:[%s6558_s1 + $0x5a4] ss:$8 sps:$4 sm:$0xff]  }
 0x131   :  { %3554 = vmatprep.subr.bf16.mxu0 %v4839_v19  ;;  %v4935_v19 = vld [vmem:[%s6558_s1 + $0xca4] ss:$8 sps:$4 sm:$0xff]  }
 0x133   :  { %3184 = vmatpush1.bf16.msra.mxu1 %v4834_v20  ;;  %v4930_v20 = vld [vmem:[%s6558_s1 + $0x5a0] ss:$8 sps:$4 sm:$0xff]  }
 0x134   :  { %3555 = vmatpush1.bf16.msra.mxu0 %v4837_v21  ;;  %3185 = vmatprep.subr.bf16.mxu1 %v4842_v22  ;;  %v4933_v21 = vld [vmem:[%s6558_s1 + $0xca0] ss:$8 sps:$4 sm:$0xff]   ;;  %v4938_v22 = vld [vmem:[%s6558_s1 + $0x5b4] ss:$8 sps:$4 sm:$0xff]  }
 0x135   :  { %3556 = vmatprep.subr.bf16.mxu0 %v4845_v23  ;;  %v4941_v23 = vld [vmem:[%s6558_s1 + $0xcb4] ss:$8 sps:$4 sm:$0xff]  }
 0x137   :  { %3186 = vmatpush1.bf16.msra.mxu1 %v4840_v24  ;;  %v4936_v24 = vld [vmem:[%s6558_s1 + $0x5b0] ss:$8 sps:$4 sm:$0xff]  }
 0x138   :  { %3557 = vmatpush1.bf16.msra.mxu0 %v4843_v25  ;;  %3187 = vmatprep.subr.bf16.mxu1 %v4850_v26  ;;  %v4939_v25 = vld [vmem:[%s6558_s1 + $0xcb0] ss:$8 sps:$4 sm:$0xff]   ;;  %v4944_v26 = vld [vmem:[%s6558_s1 + $0x5c4] ss:$8 sps:$4 sm:$0xff]  }
 0x139   :  { %3558 = vmatprep.subr.bf16.mxu0 %v4855_v27  ;;  %v4947_v27 = vld [vmem:[%s6558_s1 + $0xcc4] ss:$8 sps:$4 sm:$0xff]  }
 0x13b   :  { %3188 = vmatpush1.bf16.msra.mxu1 %v4848_v28  ;;  %v4942_v28 = vld [vmem:[%s6558_s1 + $0x5c0] ss:$8 sps:$4 sm:$0xff]  }
 0x13c   :  { %3559 = vmatpush1.bf16.msra.mxu0 %v4853_v29  ;;  %3189 = vmatprep.subr.bf16.mxu1 %v4860_v30  ;;  %v4945_v29 = vld [vmem:[%s6558_s1 + $0xcc0] ss:$8 sps:$4 sm:$0xff]   ;;  %v4950_v30 = vld [vmem:[%s6558_s1 + $0x5d4] ss:$8 sps:$4 sm:$0xff]  }
 0x13d   :  { %3560 = vmatprep.subr.bf16.mxu0 %v4863_v31  ;;  %v4953_v31 = vld [vmem:[%s6558_s1 + $0xcd4] ss:$8 sps:$4 sm:$0xff]  }
 0x13f   :  { %3190 = vmatpush1.bf16.msra.mxu1 %v4858_v32  ;;  %v4948_v32 = vld [vmem:[%s6558_s1 + $0x5d0] ss:$8 sps:$4 sm:$0xff]  }
 0x140   :  { %3561 = vmatpush1.bf16.msra.mxu0 %v4861_v33  ;;  %3212 = vmatprep.subr.bf16.mxu1 %v4869_v35  ;;  %v4951_v33 = vld [vmem:[%s6558_s1 + $0xcd0] ss:$8 sps:$4 sm:$0xff]   ;;  %v4963_v35 = vld [vmem:[%s6558_s1 + $0xce4] ss:$8 sps:$4 sm:$0xff]  }
 0x141   :  { %3583 = vmatprep.subr.bf16.mxu0 %v4875_v36  ;;  %v4956_v36 = vld [vmem:[%s6558_s1 + $0x5e0] ss:$8 sps:$4 sm:$0xff]  }
 0x142   :  { %3192 = vmatmul.mubr.bf16.vlgmr.msra.gmra.mrb[0].mxu1 %v4864_v34  ;;  %v4958_v34 = vld [vmem:[%s6558_s1 + $0x5e4] ss:$8 sps:$4 sm:$0xff]  }
 0x143   :  { %3563 = vmatmul.mubr.bf16.vlgmr.msra.gmra.mrb[0].mxu0 %v4870_v38  ;;  %3213 = vmatpush1.bf16.msra.mxu1 %v4867_v37  ;;  %v4961_v37 = vld [vmem:[%s6558_s1 + $0xce0] ss:$8 sps:$4 sm:$0xff]   ;;  %v4968_v38 = vld [vmem:[%s6558_s1 + $0x5f4] ss:$8 sps:$4 sm:$0xff]  }
 0x144   :  { %3584 = vmatpush1.bf16.msra.mxu0 %v4873_v39  ;;  %3214 = vmatprep.subr.bf16.mxu1 %v4878_v40  ;;  %v4971_v39 = vld [vmem:[%s6558_s1 + $0xcf4] ss:$8 sps:$4 sm:$0xff]   ;;  %v4966_v40 = vld [vmem:[%s6558_s1 + $0x5f0] ss:$8 sps:$4 sm:$0xff]  }
 0x145   :  { %3585 = vmatprep.subr.bf16.mxu0 %v4881_v41  ;;  %3201 = vmatprep.mubr.bf16.mxu1 %v4954_v42  ;;  %v4969_v41 = vld [vmem:[%s6558_s1 + $0xcf0] ss:$8 sps:$4 sm:$0xff]   ;;  %v4977_v42 = vld [vmem:[%s6558_s1 + $0x604] ss:$8 sps:$4 sm:$0xff]  }
 0x146   :  { %3572 = vmatprep.mubr.bf16.mxu0 %v4959_v43  ;;  %v4983_v43 = vld [vmem:[%s6558_s1 + $0xd04] ss:$8 sps:$4 sm:$0xff]  }
 0x147   :  { %3215 = vmatpush1.bf16.msra.mxu1 %v4876_v44  ;;  %v4972_v44 = vld [vmem:[%s6559_s0 + $0x28] ss:$108 sps:$4 sm:$0xff]  }
 0x148   :  { %3586 = vmatpush1.bf16.msra.mxu0 %v4879_v45  ;;  %3216 = vmatprep.subr.bf16.mxu1 %v4884_v46  ;;  %v4978_v45 = vld [vmem:[%s6559_s0 + $0x60] ss:$108 sps:$4 sm:$0xff]  }
 0x149   :  { %3587 = vmatprep.subr.bf16.mxu0 %v4887_v47  ;;  %v4975_v46 = vld [vmem:[%s6558_s1 + $0x600] ss:$8 sps:$4 sm:$0xff]  }
 0x14a   :  { %3202 = vmatmul.mubr.bf16.gmra.mrb[4].mxu1 %v4964_v48  ;;  %v4981_v47 = vld [vmem:[%s6558_s1 + $0xd00] ss:$8 sps:$4 sm:$0xff]   ;;  %v4986_v48 = vld [vmem:[%s6558_s1 + $0x614] ss:$8 sps:$4 sm:$0xff]  }
 0x14b   :  { %3573 = vmatmul.mubr.bf16.gmra.mrb[4].mxu0 %v4965_v49  ;;  %3217 = vmatpush1.bf16.msra.mxu1 %v4882_v50  ;;  %v4989_v49 = vld [vmem:[%s6558_s1 + $0xd14] ss:$8 sps:$4 sm:$0xff]  }
 0x14c   :  { %3588 = vmatpush1.bf16.msra.mxu0 %v4885_v51  ;;  %3218 = vmatprep.subr.bf16.mxu1 %v4890_v52  ;;  %v5014_v50 = vld [vmem:[%s6559_s0 + $0x13c] ss:$108 sps:$4 sm:$0xff]   ;;  %v5049_v51 = vld [vmem:[%s6559_s0 + $0x104] ss:$108 sps:$4 sm:$0xff]  }
 0x14d   :  { %3589 = vmatprep.subr.bf16.mxu0 %v4893_v53  ;;  %3244 = vmatprep.mubr.bf16.mxu1 %v4974_v54  ;;  %v4984_v52 = vld [vmem:[%s6558_s1 + $0x610] ss:$8 sps:$4 sm:$0xff]   ;;  %v4992_v54 = vld [vmem:[%s6558_s1 + $0x624] ss:$8 sps:$4 sm:$0xff]  }
 0x14e   :  { %3615 = vmatprep.mubr.bf16.mxu0 %v4980_v55  ;;  %v4987_v53 = vld [vmem:[%s6558_s1 + $0xd10] ss:$8 sps:$4 sm:$0xff]   ;;  %v4995_v55 = vld [vmem:[%s6558_s1 + $0xd24] ss:$8 sps:$4 sm:$0xff]  }
 0x14f   :  { %3219 = vmatpush1.bf16.msra.mxu1 %v4888_v56  ;;  %v5019_v56 = vld [vmem:[%s6559_s0 + $0x138] ss:$108 sps:$4 sm:$0xff]  }
 0x150   :  { %3590 = vmatpush1.bf16.msra.mxu0 %v4891_v57  ;;  %3220 = vmatprep.subr.bf16.mxu1 %v4896_v58  ;;  %v5051_v57 = vld [vmem:[%s6559_s0 + $0x100] ss:$108 sps:$4 sm:$0xff]  }
 0x151   :  { %3591 = vmatprep.subr.bf16.mxu0 %v4899_v59  ;;  %v4990_v58 = vld [vmem:[%s6558_s1 + $0x620] ss:$8 sps:$4 sm:$0xff]  }
 0x152   :  { %v4993_v59 = vld [vmem:[%s6558_s1 + $0xd20] ss:$8 sps:$4 sm:$0xff]  }
 0x153   :  { %3221 = vmatpush1.bf16.msra.mxu1 %v4894_v60  ;;  %v4998_v60 = vld [vmem:[%s6558_s1 + $0x634] ss:$8 sps:$4 sm:$0xff]  }
 0x154   :  { %3592 = vmatpush1.bf16.msra.mxu0 %v4897_v61  ;;  %3222 = vmatprep.subr.bf16.mxu1 %v4902_v62  ;;  %v5001_v61 = vld [vmem:[%s6558_s1 + $0xd34] ss:$8 sps:$4 sm:$0xff]  }
 0x155   :  { %3593 = vmatprep.subr.bf16.mxu0 %v4905_v63  ;;  %v5060_v62 = vld [vmem:[%s6559_s0 + $0x34] ss:$108 sps:$4 sm:$0xff]   ;;  %v4996_v63 = vld [vmem:[%s6558_s1 + $0x630] ss:$8 sps:$4 sm:$0xff]  }
 0x157   :  { %3223 = vmatpush1.bf16.msra.mxu1 %v4900_v0  ;;  %v4999_v0 = vld [vmem:[%s6558_s1 + $0xd30] ss:$8 sps:$4 sm:$0xff]  }
 0x158   :  { %3594 = vmatpush1.bf16.msra.mxu0 %v4903_v1  ;;  %3224 = vmatprep.subr.bf16.mxu1 %v4908_v2  ;;  %v5004_v1 = vld [vmem:[%s6558_s1 + $0x644] ss:$8 sps:$4 sm:$0xff]  }
 0x159   :  { %3595 = vmatprep.subr.bf16.mxu0 %v4911_v3  ;;  %v5007_v2 = vld [vmem:[%s6558_s1 + $0xd44] ss:$8 sps:$4 sm:$0xff]   ;;  %v5064_v3 = vmov 0  }
 0x15b   :  { %3225 = vmatpush1.bf16.msra.mxu1 %v4906_v4  ;;  %v5002_v4 = vld [vmem:[%s6558_s1 + $0x640] ss:$8 sps:$4 sm:$0xff]  }
 0x15c   :  { %3596 = vmatpush1.bf16.msra.mxu0 %v4909_v5  ;;  %3226 = vmatprep.subr.bf16.mxu1 %v4914_v6  ;;  %v5005_v5 = vld [vmem:[%s6558_s1 + $0xd40] ss:$8 sps:$4 sm:$0xff]   ;;  %v5010_v6 = vld [vmem:[%s6558_s1 + $0x654] ss:$8 sps:$4 sm:$0xff]  }
 0x15d   :  { %3597 = vmatprep.subr.bf16.mxu0 %v4917_v7  ;;  %v5013_v7 = vld [vmem:[%s6558_s1 + $0xd54] ss:$8 sps:$4 sm:$0xff]  }
 0x15f   :  { %3227 = vmatpush1.bf16.msra.mxu1 %v4912_v8  ;;  %v5008_v8 = vld [vmem:[%s6558_s1 + $0x650] ss:$8 sps:$4 sm:$0xff]  }
 0x160   :  { %3598 = vmatpush1.bf16.msra.mxu0 %v4915_v9  ;;  %3228 = vmatprep.subr.bf16.mxu1 %v4920_v10  ;;  %v5011_v9 = vld [vmem:[%s6558_s1 + $0xd50] ss:$8 sps:$4 sm:$0xff]   ;;  %v5018_v10 = vld [vmem:[%s6558_s1 + $0x664] ss:$8 sps:$4 sm:$0xff]  }
 0x161   :  { %3599 = vmatprep.subr.bf16.mxu0 %v4923_v11  ;;  %v5022_v11 = vld [vmem:[%s6558_s1 + $0xd64] ss:$8 sps:$4 sm:$0xff]  }
 0x163   :  { %3229 = vmatpush1.bf16.msra.mxu1 %v4918_v12  ;;  %v5016_v12 = vld [vmem:[%s6558_s1 + $0x660] ss:$8 sps:$4 sm:$0xff]  }
 0x164   :  { %3600 = vmatpush1.bf16.msra.mxu0 %v4921_v13  ;;  %3230 = vmatprep.subr.bf16.mxu1 %v4926_v14  ;;  %v5020_v13 = vld [vmem:[%s6558_s1 + $0xd60] ss:$8 sps:$4 sm:$0xff]   ;;  %v5025_v14 = vld [vmem:[%s6558_s1 + $0x674] ss:$8 sps:$4 sm:$0xff]  }
 0x165   :  { %3601 = vmatprep.subr.bf16.mxu0 %v4929_v15  ;;  %v5028_v15 = vld [vmem:[%s6558_s1 + $0xd74] ss:$8 sps:$4 sm:$0xff]  }
 0x167   :  { %3231 = vmatpush1.bf16.msra.mxu1 %v4924_v16  ;;  %v5023_v16 = vld [vmem:[%s6558_s1 + $0x670] ss:$8 sps:$4 sm:$0xff]  }
 0x168   :  { %3602 = vmatpush1.bf16.msra.mxu0 %v4927_v17  ;;  %3232 = vmatprep.subr.bf16.mxu1 %v4932_v18  ;;  %v5026_v17 = vld [vmem:[%s6558_s1 + $0xd70] ss:$8 sps:$4 sm:$0xff]   ;;  %v5031_v18 = vld [vmem:[%s6558_s1 + $0x684] ss:$8 sps:$4 sm:$0xff]  }
 0x169   :  { %3603 = vmatprep.subr.bf16.mxu0 %v4935_v19  ;;  %v5032_v19 = vld [vmem:[%s6559_s0 + $0x68] ss:$108 sps:$4 sm:$0xff]  }
 0x16b   :  { %3233 = vmatpush1.bf16.msra.mxu1 %v4930_v20  ;;  %v5029_v20 = vld [vmem:[%s6558_s1 + $0x680] ss:$8 sps:$4 sm:$0xff]  }
 0x16c   :  { %3604 = vmatpush1.bf16.msra.mxu0 %v4933_v21  ;;  %3234 = vmatprep.subr.bf16.mxu1 %v4938_v22  ;;  %v5035_v21 = vld [vmem:[%s6558_s1 + $0x694] ss:$8 sps:$4 sm:$0xff]   ;;  %v5033_v22 = vld [vmem:[%s6558_s1 + $0x690] ss:$8 sps:$4 sm:$0xff]  }
 0x16d   :  { %3605 = vmatprep.subr.bf16.mxu0 %v4941_v23  ;;  %v5038_v23 = vld [vmem:[%s6558_s1 + $0x6a4] ss:$8 sps:$4 sm:$0xff]  }
 0x16f   :  { %3235 = vmatpush1.bf16.msra.mxu1 %v4936_v24  ;;  %v5039_v24 = vld [vmem:[%s6559_s0 + $0x140] ss:$108 sps:$4 sm:$0xff]  }
 0x170   :  { %3606 = vmatpush1.bf16.msra.mxu0 %v4939_v25  ;;  %3236 = vmatprep.subr.bf16.mxu1 %v4944_v26  ;;  %v5036_v25 = vld [vmem:[%s6558_s1 + $0x6a0] ss:$8 sps:$4 sm:$0xff]   ;;  %v5042_v26 = vld [vmem:[%s6558_s1 + $0x6b4] ss:$8 sps:$4 sm:$0xff]  }
 0x171   :  { %3607 = vmatprep.subr.bf16.mxu0 %v4947_v27  ;;  %v5040_v27 = vld [vmem:[%s6558_s1 + $0x6b0] ss:$8 sps:$4 sm:$0xff]  }
 0x173   :  { %3237 = vmatpush1.bf16.msra.mxu1 %v4942_v28  ;;  %v5045_v28 = vld [vmem:[%s6558_s1 + $0x6c4] ss:$8 sps:$4 sm:$0xff]  }
 0x174   :  { %3608 = vmatpush1.bf16.msra.mxu0 %v4945_v29  ;;  %3238 = vmatprep.subr.bf16.mxu1 %v4950_v30  ;;  %v5043_v29 = vld [vmem:[%s6558_s1 + $0x6c0] ss:$8 sps:$4 sm:$0xff]   ;;  %v5048_v30 = vld [vmem:[%s6558_s1 + $0x6d4] ss:$8 sps:$4 sm:$0xff]  }
 0x175   :  { %3609 = vmatprep.subr.bf16.mxu0 %v4953_v31  ;;  %v5046_v31 = vld [vmem:[%s6558_s1 + $0x6d0] ss:$8 sps:$4 sm:$0xff]  }
 0x177   :  { %3239 = vmatpush1.bf16.msra.mxu1 %v4948_v32  ;;  %v5054_v32 = vld [vmem:[%s6558_s1 + $0x6e4] ss:$8 sps:$4 sm:$0xff]  }
 0x178   :  { %3610 = vmatpush1.bf16.msra.mxu0 %v4951_v33  ;;  %3240 = vmatprep.subr.bf16.mxu1 %v4958_v34  ;;  %v5052_v33 = vld [vmem:[%s6558_s1 + $0x6e0] ss:$8 sps:$4 sm:$0xff]   ;;  %v5057_v34 = vld [vmem:[%s6558_s1 + $0x6f4] ss:$8 sps:$4 sm:$0xff]  }
 0x179   :  { %3611 = vmatprep.subr.bf16.mxu0 %v4963_v35  ;;  %v5055_v35 = vld [vmem:[%s6558_s1 + $0x6f0] ss:$8 sps:$4 sm:$0xff]  }
 0x17b   :  { %3241 = vmatpush1.bf16.msra.mxu1 %v4956_v36  ;;  %v5058_v36 = vld [vmem:[%s6559_s0 + $0x30] ss:$108 sps:$4 sm:$0xff]  }
 0x17c   :  { %3612 = vmatpush1.bf16.msra.mxu0 %v4961_v37  ;;  %3242 = vmatprep.subr.bf16.mxu1 %v4968_v38  ;;  %v5061_v37 = vld [vmem:[%s6559_s0 + $0x10c] ss:$108 sps:$4 sm:$0xff]   ;;  %v5063_v38 = vld [vmem:[%s6559_s0 + $0x108] ss:$108 sps:$4 sm:$0xff]  }
 0x17d   :  { %3613 = vmatprep.subr.bf16.mxu0 %v4971_v39 }
 0x17f   :  { %3243 = vmatpush1.bf16.msra.mxu1 %v4966_v40 }
 0x180   :  { %3614 = vmatpush1.bf16.msra.mxu0 %v4969_v41  ;;  %3265 = vmatprep.subr.bf16.mxu1 %v4977_v42 }
 0x181   :  { %3636 = vmatprep.subr.bf16.mxu0 %v4983_v43 }
 0x182   :  { %3245 = vmatmul.mubr.bf16.vlgmr.msra.gmra.mrb[0].mxu1 %v4972_v44 }
 0x183   :  { %3616 = vmatmul.mubr.bf16.vlgmr.msra.gmra.mrb[0].mxu0 %v4978_v45  ;;  %3266 = vmatpush1.bf16.msra.mxu1 %v4975_v46 }
 0x184   :  { %3637 = vmatpush1.bf16.msra.mxu0 %v4981_v47  ;;  %3267 = vmatprep.subr.bf16.mxu1 %v4986_v48  ;;  %v505_v47 = vlaneseq }
 0x185   :  { %3638 = vmatprep.subr.bf16.mxu0 %v4989_v49  ;;  %3625 = vmatprep.mubr.bf16.mxu0 %v5014_v50  ;;  %v503_v50 = vld [vmem:[%s6560_s2] sm:$0x3] }
 0x186   :  { %3254 = vmatprep.mubr.bf16.mxu1 %v5049_v51  ;;  %v506_v48 = vshrl.u32 %v505_v47, 7 }
 0x187   :  { %3268 = vmatpush1.bf16.msra.mxu1 %v4984_v52 }
 0x188   :  { %3639 = vmatpush1.bf16.msra.mxu0 %v4987_v53  ;;  %3269 = vmatprep.subr.bf16.mxu1 %v4992_v54  ;;  %v507_v49 = vsub.s32 0, %v506_v48  ;;  %v511_v51 = vsub.s32 1, %v506_v48 }
 0x189   :  { %3640 = vmatprep.subr.bf16.mxu0 %v4995_v55 }
 0x18a   :  { %3255 = vmatmul.mubr.bf16.gmra.mrb[4].mxu1 %v5051_v57  ;;  %v508_v52 = vrot.slane %v503_v50, %v507_v49  ;;  %v512_v53 = vrot.slane %v503_v50, %v511_v51 }
 0x18b   :  { %3626 = vmatmul.mubr.bf16.gmra.mrb[4].mxu0 %v5019_v56  ;;  %3270 = vmatpush1.bf16.msra.mxu1 %v4990_v58 }
 0x18c   :  { %3641 = vmatpush1.bf16.msra.mxu0 %v4993_v59  ;;  %3271 = vmatprep.subr.bf16.mxu1 %v4998_v60 }
 0x18d   :  { %3642 = vmatprep.subr.bf16.mxu0 %v5001_v61  ;;  %3668 = vmatprep.mubr.bf16.mxu0 %v5064_v3 }
 0x18e   :  { %3297 = vmatprep.mubr.bf16.mxu1 %v5060_v62 }
 0x18f   :  { %3272 = vmatpush1.bf16.msra.mxu1 %v4996_v63 }
 0x190   :  { %3643 = vmatpush1.bf16.msra.mxu0 %v4999_v0  ;;  %3273 = vmatprep.subr.bf16.mxu1 %v5004_v1 }
 0x191   :  { %3644 = vmatprep.subr.bf16.mxu0 %v5007_v2 }
 0x193   :  { %3274 = vmatpush1.bf16.msra.mxu1 %v5002_v4 }
 0x194   :  { %3645 = vmatpush1.bf16.msra.mxu0 %v5005_v5  ;;  %3275 = vmatprep.subr.bf16.mxu1 %v5010_v6 }
 0x195   :  { %3646 = vmatprep.subr.bf16.mxu0 %v5013_v7 }
 0x197   :  { %3276 = vmatpush1.bf16.msra.mxu1 %v5008_v8 }
 0x198   :  { %3647 = vmatpush1.bf16.msra.mxu0 %v5011_v9  ;;  %3277 = vmatprep.subr.bf16.mxu1 %v5018_v10 }
 0x199   :  { %3648 = vmatprep.subr.bf16.mxu0 %v5022_v11 }
 0x19b   :  { %3278 = vmatpush1.bf16.msra.mxu1 %v5016_v12 }
 0x19c   :  { %3649 = vmatpush1.bf16.msra.mxu0 %v5020_v13  ;;  %3279 = vmatprep.subr.bf16.mxu1 %v5025_v14 }
 0x19d   :  { %3650 = vmatprep.subr.bf16.mxu0 %v5028_v15 }
 0x19f   :  { %3280 = vmatpush1.bf16.msra.mxu1 %v5023_v16 }
 0x1a0   :  { %3651 = vmatpush1.bf16.msra.mxu0 %v5026_v17  ;;  %3281 = vmatprep.subr.bf16.mxu1 %v5031_v18 }
 0x1a3   :  { %3669 = vmatmul.mubr.bf16.vlgmr.msra.gmra.mrb[0].mxu0 %v5032_v19  ;;  %3282 = vmatpush1.bf16.msra.mxu1 %v5029_v20 }
 0x1a4   :  { %3678 = vmatprep.mubr.bf16.mxu0 %v5064_v3  ;;  %3283 = vmatprep.subr.bf16.mxu1 %v5035_v21 }
 0x1a7   :  { %3284 = vmatpush1.bf16.msra.mxu1 %v5033_v22 }
 0x1a8   :  { %3285 = vmatprep.subr.bf16.mxu1 %v5038_v23 }
 0x1ab   :  { %3679 = vmatmul.mubr.bf16.gmra.mrb[4].mxu0 %v5039_v24  ;;  %3286 = vmatpush1.bf16.msra.mxu1 %v5036_v25 }
 0x1ac   :  { %3287 = vmatprep.subr.bf16.mxu1 %v5042_v26 }
 0x1af   :  { %3288 = vmatpush1.bf16.msra.mxu1 %v5040_v27 }
 0x1b0   :  { %3289 = vmatprep.subr.bf16.mxu1 %v5045_v28 }
 0x1b3   :  { %3290 = vmatpush1.bf16.msra.mxu1 %v5043_v29 }
 0x1b4   :  { %3291 = vmatprep.subr.bf16.mxu1 %v5048_v30 }
 0x1b7   :  { %3292 = vmatpush1.bf16.msra.mxu1 %v5046_v31 }
 0x1b8   :  { %3293 = vmatprep.subr.bf16.mxu1 %v5054_v32 }
 0x1bb   :  { %3294 = vmatpush1.bf16.msra.mxu1 %v5052_v33 }
 0x1bc   :  { %3295 = vmatprep.subr.bf16.mxu1 %v5057_v34 }
 0x1bf   :  { %3296 = vmatpush1.bf16.msra.mxu1 %v5055_v35 }
 0x1c2   :  { %3298 = vmatmul.mubr.bf16.vlgmr.msra.gmra.mrb[0].mxu1 %v5058_v36 }
 0x1c3   :  { %3307 = vmatprep.mubr.bf16.mxu1 %v5061_v37 }
 0x1ca   :  { %3308 = vmatmul.mubr.bf16.gmra.mrb[4].mxu1 %v5063_v38 }
 0x276   :  { %v3670_v39 = vpop.f32.mrb[0].mxu0 }
 0x277   :  { %v3672_v40 = vpop.f32.mrb[1].mxu0 }
 0x278   :  { %v3674_v41 = vpop.f32.mrb[2].mxu0 }
 0x279   :  { %v3676_v42 = vpop.f32.mrb[3].mxu0 }
 0x27e   :  { %v3680_v43 = vpop.f32.mrb[4].mxu0 }
 0x27f   :  { %v3682_v44 = vpop.f32.mrb[5].mxu0 }
 0x280   :  { %v3684_v45 = vpop.f32.mrb[6].mxu0 }
 0x281   :  { %v3686_v46 = vpop.f32.mrb[7].mxu0 }
 0x295   :  { %v3299_v54 = vpop.f32.mrb[0].mxu1 }
 0x296   :  { %v4223_v55 = vadd.f32 %v3299_v54, %v508_v52  ;;  %v3301_v56 = vpop.f32.mrb[1].mxu1 }
 0x297   :  { %v4225_v57 = vadd.f32 %v3301_v56, %v512_v53  ;;  %v3303_v58 = vpop.f32.mrb[2].mxu1 }
 0x298   :  { %v4224_v59 = vadd.f32 %v4223_v55, %v3670_v39  ;;  %v4227_v60 = vadd.f32 %v3303_v58, %v508_v52  ;;  %v3305_v61 = vpop.f32.mrb[3].mxu1 }
 0x299   :  { %v4226_v62 = vadd.f32 %v4225_v57, %v3672_v40  ;;  %v4229_v63 = vadd.f32 %v3305_v61, %v512_v53 }
 0x29a   :  { %v3689_v0 = vmax.f32 %v4224_v59, 0.0  ;;  %v4228_v1 = vadd.f32 %v4227_v60, %v3674_v41 }
 0x29b   :  { %v3690_v2 = vmax.f32 %v4226_v62, 0.0  ;;  %v4230_v3 = vadd.f32 %v4229_v63, %v3676_v42 }
 0x29c   :  { %v3691_v4 = vmax.f32 %v4228_v1, 0.0 }
 0x29d   :  { %v4219_v5 = vpack.c.bf16 %v3690_v2, %v3689_v0  ;;  %v3692_v6 = vmax.f32 %v4230_v3, 0.0  ;;  %v3309_v7 = vpop.f32.mrb[4].mxu1 }
 0x29e   :  { %v4231_v8 = vadd.f32 %v3309_v7, %v508_v52  ;;  %v3311_v9 = vpop.f32.mrb[5].mxu1 }
 0x29f   :  { %3721 = vst [vmem:[%s6561_s3] sm:$0xff] %v4219_v5  ;;  %v4220_v10 = vpack.c.bf16 %v3692_v6, %v3691_v4  ;;  %v4233_v11 = vadd.f32 %v3311_v9, %v512_v53  ;;  %v3313_v12 = vpop.f32.mrb[6].mxu1 }
 0x2a0   :  { %v4232_v13 = vadd.f32 %v4231_v8, %v3680_v43  ;;  %v4235_v14 = vadd.f32 %v3313_v12, %v508_v52  ;;  %v3315_v15 = vpop.f32.mrb[7].mxu1 }
 0x2a1   :  { %3722 = vst [vmem:[%s6561_s3 + $0x8] sm:$0xff] %v4220_v10  ;;  %v4234_v16 = vadd.f32 %v4233_v11, %v3682_v44  ;;  %v4237_v17 = vadd.f32 %v3315_v15, %v512_v53 }
 0x2a2   :  { %v3693_v18 = vmax.f32 %v4232_v13, 0.0  ;;  %v4236_v19 = vadd.f32 %v4235_v14, %v3684_v45 }
 0x2a3   :  { %v3694_v20 = vmax.f32 %v4234_v16, 0.0  ;;  %v4238_v21 = vadd.f32 %v4237_v17, %v3686_v46 }
 0x2a4   :  { %v3695_v22 = vmax.f32 %v4236_v19, 0.0 }
 0x2a5   :  { %v4221_v23 = vpack.c.bf16 %v3694_v20, %v3693_v18  ;;  %v3696_v24 = vmax.f32 %v4238_v21, 0.0 }
 0x2a7   :  { %3723 = vst [vmem:[%s6561_s3 + $0x10] sm:$0xff] %v4221_v23  ;;  %v4222_v25 = vpack.c.bf16 %v3696_v24, %v3695_v22 }
 0x2a9   :  { %3724 = vst [vmem:[%s6561_s3 + $0x18] sm:$0xff] %v4222_v25 }

// kernel: net_forward.10
= control target key start
LH: loop header
LB: loop body
LE: loop exit
PB: predicated region body
PF: predicated region fallthrough
CT: control target
= control target key end

     0   :  { %s4416_s1 = inlined_call_operand.vmem [shape: bf16[2304,256], index: 1, kind: input, shape index: {}]   ;;  %s4417_s0 = inlined_call_operand.vmem [shape: bf16[32,2304], index: 0, kind: input, shape index: {}]   ;;  %s4418_s2 = inlined_call_operand.vmem [shape: f32[1,256], index: 2, kind: input, shape index: {}]   ;;  %s4419_s3 = inlined_call_operand.vmem [shape: bf16[32,256], index: 3, kind: output, shape index: {}]  }
   0x1   :  { %v2923_v0 = vld [vmem:[%s4416_s1 + $0x4] ss:$8 sps:$4 sm:$0xff]   ;;  %v2927_v2 = vld [vmem:[%s4416_s1] ss:$8 sps:$4 sm:$0xff]   ;;  %v2929_v4 = vld [vmem:[%s4416_s1 + $0x14] ss:$8 sps:$4 sm:$0xff]  }
   0x2   :  { %v2925_v1 = vld [vmem:[%s4416_s1 + $0x404] ss:$8 sps:$4 sm:$0xff]   ;;  %1970 = vmatprep.subr.bf16.mxu1 %v2923_v0  ;;  %v2928_v3 = vld [vmem:[%s4416_s1 + $0x400] ss:$8 sps:$4 sm:$0xff]   ;;  %v2931_v5 = vld [vmem:[%s4416_s1 + $0x414] ss:$8 sps:$4 sm:$0xff]  }
   0x3   :  { %2182 = vmatprep.subr.bf16.mxu0 %v2925_v1  ;;  %1971 = vmatpush1.bf16.msra.mxu1 %v2927_v2  ;;  %v2933_v6 = vld [vmem:[%s4416_s1 + $0x10] ss:$8 sps:$4 sm:$0xff]   ;;  %v2935_v8 = vld [vmem:[%s4416_s1 + $0x24] ss:$8 sps:$4 sm:$0xff]   ;;  %v2939_v10 = vld [vmem:[%s4416_s1 + $0x20] ss:$8 sps:$4 sm:$0xff]  }
   0x4   :  { %2183 = vmatpush1.bf16.msra.mxu0 %v2928_v3  ;;  %1972 = vmatprep.subr.bf16.mxu1 %v2929_v4  ;;  %v2934_v7 = vld [vmem:[%s4416_s1 + $0x410] ss:$8 sps:$4 sm:$0xff]   ;;  %v2937_v9 = vld [vmem:[%s4416_s1 + $0x424] ss:$8 sps:$4 sm:$0xff]   ;;  %v2940_v11 = vld [vmem:[%s4416_s1 + $0x420] ss:$8 sps:$4 sm:$0xff]  }
   0x5   :  { %2184 = vmatprep.subr.bf16.mxu0 %v2931_v5  ;;  %v2941_v12 = vld [vmem:[%s4416_s1 + $0x34] ss:$8 sps:$4 sm:$0xff]   ;;  %v2945_v14 = vld [vmem:[%s4416_s1 + $0x30] ss:$8 sps:$4 sm:$0xff]   ;;  %v2947_v16 = vld [vmem:[%s4416_s1 + $0x44] ss:$8 sps:$4 sm:$0xff]  }
   0x6   :  { %v2943_v13 = vld [vmem:[%s4416_s1 + $0x434] ss:$8 sps:$4 sm:$0xff]   ;;  %v2946_v15 = vld [vmem:[%s4416_s1 + $0x430] ss:$8 sps:$4 sm:$0xff]   ;;  %v2949_v17 = vld [vmem:[%s4416_s1 + $0x444] ss:$8 sps:$4 sm:$0xff]  }
   0x7   :  { %1973 = vmatpush1.bf16.msra.mxu1 %v2933_v6  ;;  %v2951_v18 = vld [vmem:[%s4416_s1 + $0x40] ss:$8 sps:$4 sm:$0xff]   ;;  %v2953_v20 = vld [vmem:[%s4416_s1 + $0x54] ss:$8 sps:$4 sm:$0xff]   ;;  %v2957_v22 = vld [vmem:[%s4416_s1 + $0x50] ss:$8 sps:$4 sm:$0xff]  }
   0x8   :  { %2185 = vmatpush1.bf16.msra.mxu0 %v2934_v7  ;;  %1974 = vmatprep.subr.bf16.mxu1 %v2935_v8  ;;  %v2952_v19 = vld [vmem:[%s4416_s1 + $0x440] ss:$8 sps:$4 sm:$0xff]   ;;  %v2955_v21 = vld [vmem:[%s4416_s1 + $0x454] ss:$8 sps:$4 sm:$0xff]   ;;  %v2958_v23 = vld [vmem:[%s4416_s1 + $0x450] ss:$8 sps:$4 sm:$0xff]  }
   0x9   :  { %2186 = vmatprep.subr.bf16.mxu0 %v2937_v9  ;;  %v2959_v24 = vld [vmem:[%s4416_s1 + $0x64] ss:$8 sps:$4 sm:$0xff]   ;;  %v2963_v26 = vld [vmem:[%s4416_s1 + $0x60] ss:$8 sps:$4 sm:$0xff]   ;;  %v2965_v28 = vld [vmem:[%s4416_s1 + $0x74] ss:$8 sps:$4 sm:$0xff]  }
   0xa   :  { %v2961_v25 = vld [vmem:[%s4416_s1 + $0x464] ss:$8 sps:$4 sm:$0xff]   ;;  %v2964_v27 = vld [vmem:[%s4416_s1 + $0x460] ss:$8 sps:$4 sm:$0xff]   ;;  %v2967_v29 = vld [vmem:[%s4416_s1 + $0x474] ss:$8 sps:$4 sm:$0xff]  }
   0xb   :  { %1975 = vmatpush1.bf16.msra.mxu1 %v2939_v10  ;;  %v2969_v30 = vld [vmem:[%s4416_s1 + $0x70] ss:$8 sps:$4 sm:$0xff]   ;;  %v2971_v32 = vld [vmem:[%s4416_s1 + $0x84] ss:$8 sps:$4 sm:$0xff]   ;;  %v2975_v34 = vld [vmem:[%s4416_s1 + $0x80] ss:$8 sps:$4 sm:$0xff]  }
   0xc   :  { %2187 = vmatpush1.bf16.msra.mxu0 %v2940_v11  ;;  %1976 = vmatprep.subr.bf16.mxu1 %v2941_v12  ;;  %v2970_v31 = vld [vmem:[%s4416_s1 + $0x470] ss:$8 sps:$4 sm:$0xff]   ;;  %v2973_v33 = vld [vmem:[%s4416_s1 + $0x484] ss:$8 sps:$4 sm:$0xff]   ;;  %v2976_v35 = vld [vmem:[%s4416_s1 + $0x480] ss:$8 sps:$4 sm:$0xff]  }
   0xd   :  { %2188 = vmatprep.subr.bf16.mxu0 %v2943_v13  ;;  %v2977_v36 = vld [vmem:[%s4416_s1 + $0x94] ss:$8 sps:$4 sm:$0xff]   ;;  %v2981_v38 = vld [vmem:[%s4416_s1 + $0x90] ss:$8 sps:$4 sm:$0xff]   ;;  %v2983_v40 = vld [vmem:[%s4416_s1 + $0xa4] ss:$8 sps:$4 sm:$0xff]  }
   0xe   :  { %v2979_v37 = vld [vmem:[%s4416_s1 + $0x494] ss:$8 sps:$4 sm:$0xff]   ;;  %v2982_v39 = vld [vmem:[%s4416_s1 + $0x490] ss:$8 sps:$4 sm:$0xff]   ;;  %v2985_v41 = vld [vmem:[%s4416_s1 + $0x4a4] ss:$8 sps:$4 sm:$0xff]  }
   0xf   :  { %1977 = vmatpush1.bf16.msra.mxu1 %v2945_v14  ;;  %v2987_v42 = vld [vmem:[%s4416_s1 + $0xa0] ss:$8 sps:$4 sm:$0xff]   ;;  %v2989_v44 = vld [vmem:[%s4416_s1 + $0xb4] ss:$8 sps:$4 sm:$0xff]   ;;  %v2993_v46 = vld [vmem:[%s4416_s1 + $0xb0] ss:$8 sps:$4 sm:$0xff]  }
  0x10   :  { %2189 = vmatpush1.bf16.msra.mxu0 %v2946_v15  ;;  %1978 = vmatprep.subr.bf16.mxu1 %v2947_v16  ;;  %v2988_v43 = vld [vmem:[%s4416_s1 + $0x4a0] ss:$8 sps:$4 sm:$0xff]   ;;  %v2991_v45 = vld [vmem:[%s4416_s1 + $0x4b4] ss:$8 sps:$4 sm:$0xff]   ;;  %v2994_v47 = vld [vmem:[%s4416_s1 + $0x4b0] ss:$8 sps:$4 sm:$0xff]  }
  0x11   :  { %2190 = vmatprep.subr.bf16.mxu0 %v2949_v17  ;;  %v3021_v48 = vld [vmem:[%s4417_s0 + $0x4] ss:$72 sps:$4 sm:$0xff]   ;;  %v2999_v52 = vld [vmem:[%s4416_s1 + $0xc0] ss:$8 sps:$4 sm:$0xff]   ;;  %v3001_v54 = vld [vmem:[%s4416_s1 + $0xd4] ss:$8 sps:$4 sm:$0xff]  }
  0x12   :  { %v2995_v49 = vld [vmem:[%s4416_s1 + $0xc4] ss:$8 sps:$4 sm:$0xff]   ;;  %2002 = vmatprep.mubr.bf16.mxu1 %v3021_v48  ;;  %v3000_v53 = vld [vmem:[%s4416_s1 + $0x4c0] ss:$8 sps:$4 sm:$0xff]   ;;  %v3003_v55 = vld [vmem:[%s4416_s1 + $0x4d4] ss:$8 sps:$4 sm:$0xff]  }
  0x13   :  { %1979 = vmatpush1.bf16.msra.mxu1 %v2951_v18  ;;  %v2997_v50 = vld [vmem:[%s4416_s1 + $0x4c4] ss:$8 sps:$4 sm:$0xff]   ;;  %v3005_v56 = vld [vmem:[%s4416_s1 + $0xd0] ss:$8 sps:$4 sm:$0xff]   ;;  %v3011_v60 = vld [vmem:[%s4416_s1 + $0xe0] ss:$8 sps:$4 sm:$0xff]  }
  0x14   :  { %2191 = vmatpush1.bf16.msra.mxu0 %v2952_v19  ;;  %1980 = vmatprep.subr.bf16.mxu1 %v2953_v20  ;;  %v3027_v51 = vld [vmem:[%s4417_s0 + $0x24] ss:$72 sps:$4 sm:$0xff]   ;;  %v3006_v57 = vld [vmem:[%s4416_s1 + $0x4d0] ss:$8 sps:$4 sm:$0xff]   ;;  %v3012_v61 = vld [vmem:[%s4416_s1 + $0x4e0] ss:$8 sps:$4 sm:$0xff]  }
  0x15   :  { %2192 = vmatprep.subr.bf16.mxu0 %v2955_v21  ;;  %2214 = vmatprep.mubr.bf16.mxu0 %v3027_v51  ;;  %v3007_v58 = vld [vmem:[%s4416_s1 + $0xe4] ss:$8 sps:$4 sm:$0xff]   ;;  %v3013_v62 = vld [vmem:[%s4416_s1 + $0xf4] ss:$8 sps:$4 sm:$0xff]   ;;  %v3017_v0 = vld [vmem:[%s4416_s1 + $0xf0] ss:$8 sps:$4 sm:$0xff]  }
  0x16   :  { %v3009_v59 = vld [vmem:[%s4416_s1 + $0x4e4] ss:$8 sps:$4 sm:$0xff]   ;;  %v3015_v63 = vld [vmem:[%s4416_s1 + $0x4f4] ss:$8 sps:$4 sm:$0xff]   ;;  %v3018_v1 = vld [vmem:[%s4416_s1 + $0x4f0] ss:$8 sps:$4 sm:$0xff]  }
  0x17   :  { %1981 = vmatpush1.bf16.msra.mxu1 %v2957_v22  ;;  %v3024_v2 = vld [vmem:[%s4416_s1 + $0x104] ss:$8 sps:$4 sm:$0xff]   ;;  %v3019_v4 = vld [vmem:[%s4417_s0] ss:$72 sps:$4 sm:$0xff]   ;;  %v3033_v8 = vld [vmem:[%s4416_s1 + $0x114] ss:$8 sps:$4 sm:$0xff]  }
  0x18   :  { %2193 = vmatpush1.bf16.msra.mxu0 %v2958_v23  ;;  %1982 = vmatprep.subr.bf16.mxu1 %v2959_v24  ;;  %v3030_v3 = vld [vmem:[%s4416_s1 + $0x504] ss:$8 sps:$4 sm:$0xff]   ;;  %v3022_v5 = vld [vmem:[%s4416_s1 + $0x100] ss:$8 sps:$4 sm:$0xff]   ;;  %v3036_v9 = vld [vmem:[%s4416_s1 + $0x514] ss:$8 sps:$4 sm:$0xff]  }
  0x19   :  { %2194 = vmatprep.subr.bf16.mxu0 %v2961_v25  ;;  %v3025_v6 = vld [vmem:[%s4417_s0 + $0x20] ss:$72 sps:$4 sm:$0xff]   ;;  %v3031_v10 = vld [vmem:[%s4416_s1 + $0x110] ss:$8 sps:$4 sm:$0xff]   ;;  %v3039_v12 = vld [vmem:[%s4416_s1 + $0x124] ss:$8 sps:$4 sm:$0xff]  }
  0x1a   :  { %v3028_v7 = vld [vmem:[%s4416_s1 + $0x500] ss:$8 sps:$4 sm:$0xff]   ;;  %v3034_v11 = vld [vmem:[%s4416_s1 + $0x510] ss:$8 sps:$4 sm:$0xff]   ;;  %v3042_v13 = vld [vmem:[%s4416_s1 + $0x524] ss:$8 sps:$4 sm:$0xff]  }
  0x1b   :  { %1983 = vmatpush1.bf16.msra.mxu1 %v2963_v26  ;;  %v3037_v14 = vld [vmem:[%s4416_s1 + $0x120] ss:$8 sps:$4 sm:$0xff]   ;;  %v3045_v16 = vld [vmem:[%s4416_s1 + $0x134] ss:$8 sps:$4 sm:$0xff]   ;;  %v3043_v18 = vld [vmem:[%s4416_s1 + $0x130] ss:$8 sps:$4 sm:$0xff]  }
  0x1c   :  { %2195 = vmatpush1.bf16.msra.mxu0 %v2964_v27  ;;  %1984 = vmatprep.subr.bf16.mxu1 %v2965_v28  ;;  %v3040_v15 = vld [vmem:[%s4416_s1 + $0x520] ss:$8 sps:$4 sm:$0xff]   ;;  %v3048_v17 = vld [vmem:[%s4416_s1 + $0x534] ss:$8 sps:$4 sm:$0xff]   ;;  %v3046_v19 = vld [vmem:[%s4416_s1 + $0x530] ss:$8 sps:$4 sm:$0xff]  }
  0x1d   :  { %2196 = vmatprep.subr.bf16.mxu0 %v2967_v29  ;;  %v3051_v20 = vld [vmem:[%s4416_s1 + $0x144] ss:$8 sps:$4 sm:$0xff]   ;;  %v3049_v22 = vld [vmem:[%s4416_s1 + $0x140] ss:$8 sps:$4 sm:$0xff]   ;;  %v3057_v24 = vld [vmem:[%s4416_s1 + $0x154] ss:$8 sps:$4 sm:$0xff]  }
  0x1e   :  { %v3054_v21 = vld [vmem:[%s4416_s1 + $0x544] ss:$8 sps:$4 sm:$0xff]   ;;  %v3052_v23 = vld [vmem:[%s4416_s1 + $0x540] ss:$8 sps:$4 sm:$0xff]   ;;  %v3060_v25 = vld [vmem:[%s4416_s1 + $0x554] ss:$8 sps:$4 sm:$0xff]  }
  0x1f   :  { %1985 = vmatpush1.bf16.msra.mxu1 %v2969_v30  ;;  %v3055_v26 = vld [vmem:[%s4416_s1 + $0x150] ss:$8 sps:$4 sm:$0xff]   ;;  %v3109_v28 = vld [vmem:[%s4417_s0 + $0x94] ss:$72 sps:$4 sm:$0xff]   ;;  %v3063_v29 = vld [vmem:[%s4416_s1 + $0x164] ss:$8 sps:$4 sm:$0xff]  }
  0x20   :  { %2197 = vmatpush1.bf16.msra.mxu0 %v2970_v31  ;;  %1986 = vmatprep.subr.bf16.mxu1 %v2971_v32  ;;  %v3058_v27 = vld [vmem:[%s4416_s1 + $0x550] ss:$8 sps:$4 sm:$0xff]   ;;  %v3066_v30 = vld [vmem:[%s4416_s1 + $0x564] ss:$8 sps:$4 sm:$0xff]   ;;  %v3114_v31 = vld [vmem:[%s4417_s0 + $0xb4] ss:$72 sps:$4 sm:$0xff]  }
  0x21   :  { %2198 = vmatprep.subr.bf16.mxu0 %v2973_v33  ;;  %v3061_v32 = vld [vmem:[%s4416_s1 + $0x160] ss:$8 sps:$4 sm:$0xff]   ;;  %v3079_v48 = vld [vmem:[%s4416_s1 + $0x190] ss:$8 sps:$4 sm:$0xff]   ;;  %v3090_v51 = vld [vmem:[%s4416_s1 + $0x5a4] ss:$8 sps:$4 sm:$0xff]  }
  0x22   :  { %v3064_v33 = vld [vmem:[%s4416_s1 + $0x560] ss:$8 sps:$4 sm:$0xff]  }
  0x23   :  { %1987 = vmatpush1.bf16.msra.mxu1 %v2975_v34  ;;  %v3119_v34 = vld [vmem:[%s4417_s0 + $0x90] ss:$72 sps:$4 sm:$0xff]  }
  0x24   :  { %2199 = vmatpush1.bf16.msra.mxu0 %v2976_v35  ;;  %1988 = vmatprep.subr.bf16.mxu1 %v2977_v36  ;;  %v3120_v35 = vld [vmem:[%s4417_s0 + $0xb0] ss:$72 sps:$4 sm:$0xff]   ;;  %v3069_v36 = vld [vmem:[%s4416_s1 + $0x174] ss:$8 sps:$4 sm:$0xff]  }
  0x25   :  { %2200 = vmatprep.subr.bf16.mxu0 %v2979_v37  ;;  %v3072_v37 = vld [vmem:[%s4416_s1 + $0x574] ss:$8 sps:$4 sm:$0xff]  }
  0x27   :  { %1989 = vmatpush1.bf16.msra.mxu1 %v2981_v38  ;;  %v3067_v38 = vld [vmem:[%s4416_s1 + $0x170] ss:$8 sps:$4 sm:$0xff]  }
  0x28   :  { %2201 = vmatpush1.bf16.msra.mxu0 %v2982_v39  ;;  %1990 = vmatprep.subr.bf16.mxu1 %v2983_v40  ;;  %v3070_v39 = vld [vmem:[%s4416_s1 + $0x570] ss:$8 sps:$4 sm:$0xff]   ;;  %v3129_v40 = vld [vmem:[%s4417_s0 + $0xc] ss:$72 sps:$4 sm:$0xff]  }
  0x29   :  { %2202 = vmatprep.subr.bf16.mxu0 %v2985_v41  ;;  %v3075_v41 = vld [vmem:[%s4416_s1 + $0x184] ss:$8 sps:$4 sm:$0xff]  }
  0x2b   :  { %1991 = vmatpush1.bf16.msra.mxu1 %v2987_v42  ;;  %v3078_v42 = vld [vmem:[%s4416_s1 + $0x584] ss:$8 sps:$4 sm:$0xff]  }
  0x2c   :  { %2203 = vmatpush1.bf16.msra.mxu0 %v2988_v43  ;;  %1992 = vmatprep.subr.bf16.mxu1 %v2989_v44  ;;  %v3135_v43 = vld [vmem:[%s4417_s0 + $0x2c] ss:$72 sps:$4 sm:$0xff]   ;;  %v3073_v44 = vld [vmem:[%s4416_s1 + $0x180] ss:$8 sps:$4 sm:$0xff]  }
  0x2d   :  { %2204 = vmatprep.subr.bf16.mxu0 %v2991_v45  ;;  %v3076_v45 = vld [vmem:[%s4416_s1 + $0x580] ss:$8 sps:$4 sm:$0xff]  }
  0x2f   :  { %1993 = vmatpush1.bf16.msra.mxu1 %v2993_v46  ;;  %v3081_v46 = vld [vmem:[%s4416_s1 + $0x194] ss:$8 sps:$4 sm:$0xff]  }
  0x30   :  { %2205 = vmatpush1.bf16.msra.mxu0 %v2994_v47  ;;  %1994 = vmatprep.subr.bf16.mxu1 %v2995_v49  ;;  %v3084_v47 = vld [vmem:[%s4416_s1 + $0x594] ss:$8 sps:$4 sm:$0xff]   ;;  %v3082_v49 = vld [vmem:[%s4416_s1 + $0x590] ss:$8 sps:$4 sm:$0xff]  }
  0x31   :  { %2206 = vmatprep.subr.bf16.mxu0 %v2997_v50  ;;  %v3087_v50 = vld [vmem:[%s4416_s1 + $0x1a4] ss:$8 sps:$4 sm:$0xff]  }
  0x33   :  { %1995 = vmatpush1.bf16.msra.mxu1 %v2999_v52  ;;  %v3085_v52 = vld [vmem:[%s4416_s1 + $0x1a0] ss:$8 sps:$4 sm:$0xff]  }
  0x34   :  { %2207 = vmatpush1.bf16.msra.mxu0 %v3000_v53  ;;  %1996 = vmatprep.subr.bf16.mxu1 %v3001_v54  ;;  %v3088_v53 = vld [vmem:[%s4416_s1 + $0x5a0] ss:$8 sps:$4 sm:$0xff]   ;;  %v3093_v54 = vld [vmem:[%s4416_s1 + $0x1b4] ss:$8 sps:$4 sm:$0xff]  }
  0x35   :  { %2208 = vmatprep.subr.bf16.mxu0 %v3003_v55  ;;  %v3096_v55 = vld [vmem:[%s4416_s1 + $0x5b4] ss:$8 sps:$4 sm:$0xff]  }
  0x37   :  { %1997 = vmatpush1.bf16.msra.mxu1 %v3005_v56  ;;  %v3091_v56 = vld [vmem:[%s4416_s1 + $0x1b0] ss:$8 sps:$4 sm:$0xff]  }
  0x38   :  { %2209 = vmatpush1.bf16.msra.mxu0 %v3006_v57  ;;  %1998 = vmatprep.subr.bf16.mxu1 %v3007_v58  ;;  %v3094_v57 = vld [vmem:[%s4416_s1 + $0x5b0] ss:$8 sps:$4 sm:$0xff]   ;;  %v3099_v58 = vld [vmem:[%s4416_s1 + $0x1c4] ss:$8 sps:$4 sm:$0xff]  }
  0x39   :  { %2210 = vmatprep.subr.bf16.mxu0 %v3009_v59  ;;  %v3102_v59 = vld [vmem:[%s4416_s1 + $0x5c4] ss:$8 sps:$4 sm:$0xff]  }
  0x3b   :  { %1999 = vmatpush1.bf16.msra.mxu1 %v3011_v60  ;;  %v3097_v60 = vld [vmem:[%s4416_s1 + $0x1c0] ss:$8 sps:$4 sm:$0xff]  }
  0x3c   :  { %2211 = vmatpush1.bf16.msra.mxu0 %v3012_v61  ;;  %2000 = vmatprep.subr.bf16.mxu1 %v3013_v62  ;;  %v3100_v61 = vld [vmem:[%s4416_s1 + $0x5c0] ss:$8 sps:$4 sm:$0xff]   ;;  %v3105_v62 = vld [vmem:[%s4416_s1 + $0x1d4] ss:$8 sps:$4 sm:$0xff]  }
  0x3d   :  { %2212 = vmatprep.subr.bf16.mxu0 %v3015_v63  ;;  %v3108_v63 = vld [vmem:[%s4416_s1 + $0x5d4] ss:$8 sps:$4 sm:$0xff]  }
  0x3f   :  { %2001 = vmatpush1.bf16.msra.mxu1 %v3017_v0  ;;  %v3103_v0 = vld [vmem:[%s4416_s1 + $0x1d0] ss:$8 sps:$4 sm:$0xff]  }
  0x40   :  { %2213 = vmatpush1.bf16.msra.mxu0 %v3018_v1  ;;  %2023 = vmatprep.subr.bf16.mxu1 %v3024_v2  ;;  %v3106_v1 = vld [vmem:[%s4416_s1 + $0x5d0] ss:$8 sps:$4 sm:$0xff]   ;;  %v3113_v2 = vld [vmem:[%s4416_s1 + $0x1e4] ss:$8 sps:$4 sm:$0xff]  }
  0x41   :  { %2235 = vmatprep.subr.bf16.mxu0 %v3030_v3  ;;  %v3118_v3 = vld [vmem:[%s4416_s1 + $0x5e4] ss:$8 sps:$4 sm:$0xff]  }
  0x42   :  { %2003 = vmatmul.mubr.bf16.vlgmr.msra.gmra.mrb[0].mxu1 %v3019_v4  ;;  %v3111_v4 = vld [vmem:[%s4416_s1 + $0x1e0] ss:$8 sps:$4 sm:$0xff]  }
  0x43   :  { %2215 = vmatmul.mubr.bf16.vlgmr.msra.gmra.mrb[0].mxu0 %v3025_v6  ;;  %2024 = vmatpush1.bf16.msra.mxu1 %v3022_v5  ;;  %v3116_v5 = vld [vmem:[%s4416_s1 + $0x5e0] ss:$8 sps:$4 sm:$0xff]   ;;  %v3123_v6 = vld [vmem:[%s4416_s1 + $0x1f4] ss:$8 sps:$4 sm:$0xff]  }
  0x44   :  { %2236 = vmatpush1.bf16.msra.mxu0 %v3028_v7  ;;  %2025 = vmatprep.subr.bf16.mxu1 %v3033_v8  ;;  %v3126_v7 = vld [vmem:[%s4416_s1 + $0x5f4] ss:$8 sps:$4 sm:$0xff]   ;;  %v3121_v8 = vld [vmem:[%s4416_s1 + $0x1f0] ss:$8 sps:$4 sm:$0xff]  }
  0x45   :  { %2237 = vmatprep.subr.bf16.mxu0 %v3036_v9  ;;  %2012 = vmatprep.mubr.bf16.mxu1 %v3109_v28  ;;  %v3124_v9 = vld [vmem:[%s4416_s1 + $0x5f0] ss:$8 sps:$4 sm:$0xff]   ;;  %v3153_v28 = vld [vmem:[%s4416_s1 + $0x234] ss:$8 sps:$4 sm:$0xff]  }
  0x46   :  { %2224 = vmatprep.mubr.bf16.mxu0 %v3114_v31  ;;  %v3154_v31 = vld [vmem:[%s4416_s1 + $0x630] ss:$8 sps:$4 sm:$0xff]  }
  0x47   :  { %2026 = vmatpush1.bf16.msra.mxu1 %v3031_v10  ;;  %v3132_v10 = vld [vmem:[%s4416_s1 + $0x204] ss:$8 sps:$4 sm:$0xff]  }
  0x48   :  { %2238 = vmatpush1.bf16.msra.mxu0 %v3034_v11  ;;  %2027 = vmatprep.subr.bf16.mxu1 %v3039_v12  ;;  %v3138_v11 = vld [vmem:[%s4416_s1 + $0x604] ss:$8 sps:$4 sm:$0xff]   ;;  %v3127_v12 = vld [vmem:[%s4417_s0 + $0x8] ss:$72 sps:$4 sm:$0xff]  }
  0x49   :  { %2239 = vmatprep.subr.bf16.mxu0 %v3042_v13  ;;  %v3130_v13 = vld [vmem:[%s4416_s1 + $0x200] ss:$8 sps:$4 sm:$0xff]  }
  0x4a   :  { %2013 = vmatmul.mubr.bf16.gmra.mrb[4].mxu1 %v3119_v34  ;;  %v3162_v34 = vld [vmem:[%s4416_s1 + $0x644] ss:$8 sps:$4 sm:$0xff]  }
  0x4b   :  { %2028 = vmatpush1.bf16.msra.mxu1 %v3037_v14  ;;  %2225 = vmatmul.mubr.bf16.gmra.mrb[4].mxu0 %v3120_v35  ;;  %v3133_v14 = vld [vmem:[%s4417_s0 + $0x28] ss:$72 sps:$4 sm:$0xff]   ;;  %v3243_v35 = vld [vmem:[%s4417_s0 + $0x34] ss:$72 sps:$4 sm:$0xff]  }
  0x4c   :  { %2240 = vmatpush1.bf16.msra.mxu0 %v3040_v15  ;;  %2029 = vmatprep.subr.bf16.mxu1 %v3045_v16  ;;  %v3136_v15 = vld [vmem:[%s4416_s1 + $0x600] ss:$8 sps:$4 sm:$0xff]   ;;  %v3141_v16 = vld [vmem:[%s4416_s1 + $0x214] ss:$8 sps:$4 sm:$0xff]  }
  0x4d   :  { %2241 = vmatprep.subr.bf16.mxu0 %v3048_v17  ;;  %2055 = vmatprep.mubr.bf16.mxu1 %v3129_v40  ;;  %v3144_v17 = vld [vmem:[%s4416_s1 + $0x614] ss:$8 sps:$4 sm:$0xff]   ;;  %v3163_v40 = vld [vmem:[%s4416_s1 + $0x250] ss:$8 sps:$4 sm:$0xff]  }
  0x4e   :  { %2267 = vmatprep.mubr.bf16.mxu0 %v3135_v43  ;;  %v3174_v43 = vld [vmem:[%s4416_s1 + $0x664] ss:$8 sps:$4 sm:$0xff]  }
  0x4f   :  { %2030 = vmatpush1.bf16.msra.mxu1 %v3043_v18  ;;  %v3139_v18 = vld [vmem:[%s4416_s1 + $0x210] ss:$8 sps:$4 sm:$0xff]  }
  0x50   :  { %2242 = vmatpush1.bf16.msra.mxu0 %v3046_v19  ;;  %2031 = vmatprep.subr.bf16.mxu1 %v3051_v20  ;;  %v3142_v19 = vld [vmem:[%s4416_s1 + $0x610] ss:$8 sps:$4 sm:$0xff]   ;;  %v3217_v20 = vld [vmem:[%s4417_s0 + $0x9c] ss:$72 sps:$4 sm:$0xff]  }
  0x51   :  { %2243 = vmatprep.subr.bf16.mxu0 %v3054_v21  ;;  %v3147_v21 = vld [vmem:[%s4416_s1 + $0x224] ss:$8 sps:$4 sm:$0xff]  }
  0x53   :  { %2032 = vmatpush1.bf16.msra.mxu1 %v3049_v22  ;;  %v3150_v22 = vld [vmem:[%s4416_s1 + $0x624] ss:$8 sps:$4 sm:$0xff]  }
  0x54   :  { %2244 = vmatpush1.bf16.msra.mxu0 %v3052_v23  ;;  %2033 = vmatprep.subr.bf16.mxu1 %v3057_v24  ;;  %v3222_v23 = vld [vmem:[%s4417_s0 + $0xbc] ss:$72 sps:$4 sm:$0xff]   ;;  %v3145_v24 = vld [vmem:[%s4416_s1 + $0x220] ss:$8 sps:$4 sm:$0xff]  }
  0x55   :  { %2245 = vmatprep.subr.bf16.mxu0 %v3060_v25  ;;  %v3148_v25 = vld [vmem:[%s4416_s1 + $0x620] ss:$8 sps:$4 sm:$0xff]  }
  0x57   :  { %2034 = vmatpush1.bf16.msra.mxu1 %v3055_v26  ;;  %v3227_v26 = vld [vmem:[%s4417_s0 + $0x98] ss:$72 sps:$4 sm:$0xff]  }
  0x58   :  { %2246 = vmatpush1.bf16.msra.mxu0 %v3058_v27  ;;  %2035 = vmatprep.subr.bf16.mxu1 %v3063_v29  ;;  %v3228_v27 = vld [vmem:[%s4417_s0 + $0xb8] ss:$72 sps:$4 sm:$0xff]   ;;  %v3156_v29 = vld [vmem:[%s4416_s1 + $0x634] ss:$8 sps:$4 sm:$0xff]  }
  0x59   :  { %2247 = vmatprep.subr.bf16.mxu0 %v3066_v30  ;;  %v3151_v30 = vld [vmem:[%s4416_s1 + $0x230] ss:$8 sps:$4 sm:$0xff]  }
  0x5b   :  { %2036 = vmatpush1.bf16.msra.mxu1 %v3061_v32  ;;  %v3237_v32 = vld [vmem:[%s4417_s0 + $0x14] ss:$72 sps:$4 sm:$0xff]  }
  0x5c   :  { %2248 = vmatpush1.bf16.msra.mxu0 %v3064_v33  ;;  %2037 = vmatprep.subr.bf16.mxu1 %v3069_v36  ;;  %v3159_v33 = vld [vmem:[%s4416_s1 + $0x244] ss:$8 sps:$4 sm:$0xff]   ;;  %v3157_v36 = vld [vmem:[%s4416_s1 + $0x240] ss:$8 sps:$4 sm:$0xff]  }
  0x5d   :  { %2249 = vmatprep.subr.bf16.mxu0 %v3072_v37  ;;  %v3160_v37 = vld [vmem:[%s4416_s1 + $0x640] ss:$8 sps:$4 sm:$0xff]  }
  0x5f   :  { %2038 = vmatpush1.bf16.msra.mxu1 %v3067_v38  ;;  %v3165_v38 = vld [vmem:[%s4416_s1 + $0x254] ss:$8 sps:$4 sm:$0xff]  }
  0x60   :  { %2250 = vmatpush1.bf16.msra.mxu0 %v3070_v39  ;;  %2039 = vmatprep.subr.bf16.mxu1 %v3075_v41  ;;  %v3168_v39 = vld [vmem:[%s4416_s1 + $0x654] ss:$8 sps:$4 sm:$0xff]   ;;  %v3166_v41 = vld [vmem:[%s4416_s1 + $0x650] ss:$8 sps:$4 sm:$0xff]  }
  0x61   :  { %2251 = vmatprep.subr.bf16.mxu0 %v3078_v42  ;;  %v3171_v42 = vld [vmem:[%s4416_s1 + $0x264] ss:$8 sps:$4 sm:$0xff]  }
  0x63   :  { %2040 = vmatpush1.bf16.msra.mxu1 %v3073_v44  ;;  %v3169_v44 = vld [vmem:[%s4416_s1 + $0x260] ss:$8 sps:$4 sm:$0xff]  }
  0x64   :  { %2252 = vmatpush1.bf16.msra.mxu0 %v3076_v45  ;;  %2041 = vmatprep.subr.bf16.mxu1 %v3081_v46  ;;  %v3172_v45 = vld [vmem:[%s4416_s1 + $0x660] ss:$8 sps:$4 sm:$0xff]   ;;  %v3177_v46 = vld [vmem:[%s4416_s1 + $0x274] ss:$8 sps:$4 sm:$0xff]  }
  0x65   :  { %2253 = vmatprep.subr.bf16.mxu0 %v3084_v47  ;;  %v3180_v47 = vld [vmem:[%s4416_s1 + $0x674] ss:$8 sps:$4 sm:$0xff]  }
  0x67   :  { %2042 = vmatpush1.bf16.msra.mxu1 %v3079_v48  ;;  %v3175_v48 = vld [vmem:[%s4416_s1 + $0x270] ss:$8 sps:$4 sm:$0xff]  }
  0x68   :  { %2254 = vmatpush1.bf16.msra.mxu0 %v3082_v49  ;;  %2043 = vmatprep.subr.bf16.mxu1 %v3087_v50  ;;  %v3178_v49 = vld [vmem:[%s4416_s1 + $0x670] ss:$8 sps:$4 sm:$0xff]   ;;  %v3183_v50 = vld [vmem:[%s4416_s1 + $0x284] ss:$8 sps:$4 sm:$0xff]  }
  0x69   :  { %2255 = vmatprep.subr.bf16.mxu0 %v3090_v51  ;;  %v3186_v51 = vld [vmem:[%s4416_s1 + $0x684] ss:$8 sps:$4 sm:$0xff]  }
  0x6b   :  { %2044 = vmatpush1.bf16.msra.mxu1 %v3085_v52  ;;  %v3181_v52 = vld [vmem:[%s4416_s1 + $0x280] ss:$8 sps:$4 sm:$0xff]  }
  0x6c   :  { %2256 = vmatpush1.bf16.msra.mxu0 %v3088_v53  ;;  %2045 = vmatprep.subr.bf16.mxu1 %v3093_v54  ;;  %v3184_v53 = vld [vmem:[%s4416_s1 + $0x680] ss:$8 sps:$4 sm:$0xff]   ;;  %v3189_v54 = vld [vmem:[%s4416_s1 + $0x294] ss:$8 sps:$4 sm:$0xff]  }
  0x6d   :  { %2257 = vmatprep.subr.bf16.mxu0 %v3096_v55  ;;  %v3192_v55 = vld [vmem:[%s4416_s1 + $0x694] ss:$8 sps:$4 sm:$0xff]  }
  0x6f   :  { %2046 = vmatpush1.bf16.msra.mxu1 %v3091_v56  ;;  %v3187_v56 = vld [vmem:[%s4416_s1 + $0x290] ss:$8 sps:$4 sm:$0xff]  }
  0x70   :  { %2258 = vmatpush1.bf16.msra.mxu0 %v3094_v57  ;;  %2047 = vmatprep.subr.bf16.mxu1 %v3099_v58  ;;  %v3190_v57 = vld [vmem:[%s4416_s1 + $0x690] ss:$8 sps:$4 sm:$0xff]   ;;  %v3195_v58 = vld [vmem:[%s4416_s1 + $0x2a4] ss:$8 sps:$4 sm:$0xff]  }
  0x71   :  { %2259 = vmatprep.subr.bf16.mxu0 %v3102_v59  ;;  %v3198_v59 = vld [vmem:[%s4416_s1 + $0x6a4] ss:$8 sps:$4 sm:$0xff]  }
  0x73   :  { %2048 = vmatpush1.bf16.msra.mxu1 %v3097_v60  ;;  %v3193_v60 = vld [vmem:[%s4416_s1 + $0x2a0] ss:$8 sps:$4 sm:$0xff]  }
  0x74   :  { %2260 = vmatpush1.bf16.msra.mxu0 %v3100_v61  ;;  %2049 = vmatprep.subr.bf16.mxu1 %v3105_v62  ;;  %v3196_v61 = vld [vmem:[%s4416_s1 + $0x6a0] ss:$8 sps:$4 sm:$0xff]   ;;  %v3201_v62 = vld [vmem:[%s4416_s1 + $0x2b4] ss:$8 sps:$4 sm:$0xff]  }
  0x75   :  { %2261 = vmatprep.subr.bf16.mxu0 %v3108_v63  ;;  %v3204_v63 = vld [vmem:[%s4416_s1 + $0x6b4] ss:$8 sps:$4 sm:$0xff]  }
  0x77   :  { %2050 = vmatpush1.bf16.msra.mxu1 %v3103_v0  ;;  %v3199_v0 = vld [vmem:[%s4416_s1 + $0x2b0] ss:$8 sps:$4 sm:$0xff]  }
  0x78   :  { %2262 = vmatpush1.bf16.msra.mxu0 %v3106_v1  ;;  %2051 = vmatprep.subr.bf16.mxu1 %v3113_v2  ;;  %v3202_v1 = vld [vmem:[%s4416_s1 + $0x6b0] ss:$8 sps:$4 sm:$0xff]   ;;  %v3207_v2 = vld [vmem:[%s4416_s1 + $0x2c4] ss:$8 sps:$4 sm:$0xff]  }
  0x79   :  { %2263 = vmatprep.subr.bf16.mxu0 %v3118_v3  ;;  %v3210_v3 = vld [vmem:[%s4416_s1 + $0x6c4] ss:$8 sps:$4 sm:$0xff]  }
  0x7b   :  { %2052 = vmatpush1.bf16.msra.mxu1 %v3111_v4  ;;  %v3205_v4 = vld [vmem:[%s4416_s1 + $0x2c0] ss:$8 sps:$4 sm:$0xff]  }
  0x7c   :  { %2264 = vmatpush1.bf16.msra.mxu0 %v3116_v5  ;;  %2053 = vmatprep.subr.bf16.mxu1 %v3123_v6  ;;  %v3208_v5 = vld [vmem:[%s4416_s1 + $0x6c0] ss:$8 sps:$4 sm:$0xff]   ;;  %v3213_v6 = vld [vmem:[%s4416_s1 + $0x2d4] ss:$8 sps:$4 sm:$0xff]  }
  0x7d   :  { %2265 = vmatprep.subr.bf16.mxu0 %v3126_v7  ;;  %v3216_v7 = vld [vmem:[%s4416_s1 + $0x6d4] ss:$8 sps:$4 sm:$0xff]  }
  0x7f   :  { %2054 = vmatpush1.bf16.msra.mxu1 %v3121_v8  ;;  %v3211_v8 = vld [vmem:[%s4416_s1 + $0x2d0] ss:$8 sps:$4 sm:$0xff]  }
  0x80   :  { %2266 = vmatpush1.bf16.msra.mxu0 %v3124_v9  ;;  %2076 = vmatprep.subr.bf16.mxu1 %v3132_v10  ;;  %v3214_v9 = vld [vmem:[%s4416_s1 + $0x6d0] ss:$8 sps:$4 sm:$0xff]   ;;  %v3221_v10 = vld [vmem:[%s4416_s1 + $0x2e4] ss:$8 sps:$4 sm:$0xff]  }
  0x81   :  { %2288 = vmatprep.subr.bf16.mxu0 %v3138_v11  ;;  %v3226_v11 = vld [vmem:[%s4416_s1 + $0x6e4] ss:$8 sps:$4 sm:$0xff]  }
  0x82   :  { %2056 = vmatmul.mubr.bf16.vlgmr.msra.gmra.mrb[0].mxu1 %v3127_v12  ;;  %v3219_v12 = vld [vmem:[%s4416_s1 + $0x2e0] ss:$8 sps:$4 sm:$0xff]  }
  0x83   :  { %2268 = vmatmul.mubr.bf16.vlgmr.msra.gmra.mrb[0].mxu0 %v3133_v14  ;;  %2077 = vmatpush1.bf16.msra.mxu1 %v3130_v13  ;;  %v3224_v13 = vld [vmem:[%s4416_s1 + $0x6e0] ss:$8 sps:$4 sm:$0xff]   ;;  %v3231_v14 = vld [vmem:[%s4416_s1 + $0x2f4] ss:$8 sps:$4 sm:$0xff]  }
  0x84   :  { %2289 = vmatpush1.bf16.msra.mxu0 %v3136_v15  ;;  %2078 = vmatprep.subr.bf16.mxu1 %v3141_v16  ;;  %v3234_v15 = vld [vmem:[%s4416_s1 + $0x6f4] ss:$8 sps:$4 sm:$0xff]   ;;  %v3229_v16 = vld [vmem:[%s4416_s1 + $0x2f0] ss:$8 sps:$4 sm:$0xff]  }
  0x85   :  { %2290 = vmatprep.subr.bf16.mxu0 %v3144_v17  ;;  %2065 = vmatprep.mubr.bf16.mxu1 %v3217_v20  ;;  %v3232_v17 = vld [vmem:[%s4416_s1 + $0x6f0] ss:$8 sps:$4 sm:$0xff]  }
  0x86   :  { %2277 = vmatprep.mubr.bf16.mxu0 %v3222_v23  ;;  %v3235_v20 = vld [vmem:[%s4417_s0 + $0x10] ss:$72 sps:$4 sm:$0xff]   ;;  %v3244_v23 = vld [vmem:[%s4416_s1 + $0x700] ss:$8 sps:$4 sm:$0xff]  }
  0x87   :  { %2079 = vmatpush1.bf16.msra.mxu1 %v3139_v18  ;;  %v3240_v18 = vld [vmem:[%s4416_s1 + $0x304] ss:$8 sps:$4 sm:$0xff]  }
  0x88   :  { %2291 = vmatpush1.bf16.msra.mxu0 %v3142_v19  ;;  %2080 = vmatprep.subr.bf16.mxu1 %v3147_v21  ;;  %v3246_v19 = vld [vmem:[%s4416_s1 + $0x704] ss:$8 sps:$4 sm:$0xff]   ;;  %v3238_v21 = vld [vmem:[%s4416_s1 + $0x300] ss:$8 sps:$4 sm:$0xff]  }
  0x89   :  { %2292 = vmatprep.subr.bf16.mxu0 %v3150_v22  ;;  %v3241_v22 = vld [vmem:[%s4417_s0 + $0x30] ss:$72 sps:$4 sm:$0xff]  }
  0x8a   :  { %2066 = vmatmul.mubr.bf16.gmra.mrb[4].mxu1 %v3227_v26  ;;  %v3325_v26 = vld [vmem:[%s4417_s0 + $0xa4] ss:$72 sps:$4 sm:$0xff]  }
  0x8b   :  { %2278 = vmatmul.mubr.bf16.gmra.mrb[4].mxu0 %v3228_v27  ;;  %2081 = vmatpush1.bf16.msra.mxu1 %v3145_v24  ;;  %v3249_v24 = vld [vmem:[%s4416_s1 + $0x314] ss:$8 sps:$4 sm:$0xff]   ;;  %v3327_v27 = vld [vmem:[%s4417_s0 + $0xc4] ss:$72 sps:$4 sm:$0xff]  }
  0x8c   :  { %2293 = vmatpush1.bf16.msra.mxu0 %v3148_v25  ;;  %2082 = vmatprep.subr.bf16.mxu1 %v3153_v28  ;;  %v3252_v25 = vld [vmem:[%s4416_s1 + $0x714] ss:$8 sps:$4 sm:$0xff]   ;;  %v3247_v28 = vld [vmem:[%s4416_s1 + $0x310] ss:$8 sps:$4 sm:$0xff]  }
  0x8d   :  { %2294 = vmatprep.subr.bf16.mxu0 %v3156_v29  ;;  %2108 = vmatprep.mubr.bf16.mxu1 %v3237_v32  ;;  %v3250_v29 = vld [vmem:[%s4416_s1 + $0x710] ss:$8 sps:$4 sm:$0xff]   ;;  %v3253_v32 = vld [vmem:[%s4416_s1 + $0x320] ss:$8 sps:$4 sm:$0xff]  }
  0x8e   :  { %2320 = vmatprep.mubr.bf16.mxu0 %v3243_v35  ;;  %v3333_v35 = vld [vmem:[%s4417_s0 + $0xc0] ss:$72 sps:$4 sm:$0xff]  }
  0x8f   :  { %2083 = vmatpush1.bf16.msra.mxu1 %v3151_v30  ;;  %v3255_v30 = vld [vmem:[%s4416_s1 + $0x324] ss:$8 sps:$4 sm:$0xff]  }
  0x90   :  { %2295 = vmatpush1.bf16.msra.mxu0 %v3154_v31  ;;  %2084 = vmatprep.subr.bf16.mxu1 %v3159_v33  ;;  %v3258_v31 = vld [vmem:[%s4416_s1 + $0x724] ss:$8 sps:$4 sm:$0xff]   ;;  %v3256_v33 = vld [vmem:[%s4416_s1 + $0x720] ss:$8 sps:$4 sm:$0xff]  }
  0x91   :  { %2296 = vmatprep.subr.bf16.mxu0 %v3162_v34  ;;  %v3329_v34 = vld [vmem:[%s4417_s0 + $0xa0] ss:$72 sps:$4 sm:$0xff]  }
  0x93   :  { %2085 = vmatpush1.bf16.msra.mxu1 %v3157_v36  ;;  %v3261_v36 = vld [vmem:[%s4416_s1 + $0x334] ss:$8 sps:$4 sm:$0xff]  }
  0x94   :  { %2297 = vmatpush1.bf16.msra.mxu0 %v3160_v37  ;;  %2086 = vmatprep.subr.bf16.mxu1 %v3165_v38  ;;  %v3264_v37 = vld [vmem:[%s4416_s1 + $0x734] ss:$8 sps:$4 sm:$0xff]  }
  0x95   :  { %2298 = vmatprep.subr.bf16.mxu0 %v3168_v39  ;;  %v3345_v38 = vld [vmem:[%s4417_s0 + $0x1c] ss:$72 sps:$4 sm:$0xff]  }
  0x96   :  { %v3348_v39 = vld [vmem:[%s4417_s0 + $0x3c] ss:$72 sps:$4 sm:$0xff]  }
  0x97   :  { %2087 = vmatpush1.bf16.msra.mxu1 %v3163_v40  ;;  %v3259_v40 = vld [vmem:[%s4416_s1 + $0x330] ss:$8 sps:$4 sm:$0xff]  }
  0x98   :  { %2299 = vmatpush1.bf16.msra.mxu0 %v3166_v41  ;;  %2088 = vmatprep.subr.bf16.mxu1 %v3171_v42  ;;  %v3262_v41 = vld [vmem:[%s4416_s1 + $0x730] ss:$8 sps:$4 sm:$0xff]   ;;  %v3267_v42 = vld [vmem:[%s4416_s1 + $0x344] ss:$8 sps:$4 sm:$0xff]  }
  0x99   :  { %2300 = vmatprep.subr.bf16.mxu0 %v3174_v43  ;;  %v3270_v43 = vld [vmem:[%s4416_s1 + $0x744] ss:$8 sps:$4 sm:$0xff]  }
  0x9b   :  { %2089 = vmatpush1.bf16.msra.mxu1 %v3169_v44  ;;  %v3265_v44 = vld [vmem:[%s4416_s1 + $0x340] ss:$8 sps:$4 sm:$0xff]  }
  0x9c   :  { %2301 = vmatpush1.bf16.msra.mxu0 %v3172_v45  ;;  %2090 = vmatprep.subr.bf16.mxu1 %v3177_v46  ;;  %v3268_v45 = vld [vmem:[%s4416_s1 + $0x740] ss:$8 sps:$4 sm:$0xff]   ;;  %v3273_v46 = vld [vmem:[%s4416_s1 + $0x354] ss:$8 sps:$4 sm:$0xff]  }
  0x9d   :  { %2302 = vmatprep.subr.bf16.mxu0 %v3180_v47  ;;  %v3276_v47 = vld [vmem:[%s4416_s1 + $0x754] ss:$8 sps:$4 sm:$0xff]  }
  0x9f   :  { %2091 = vmatpush1.bf16.msra.mxu1 %v3175_v48  ;;  %v3271_v48 = vld [vmem:[%s4416_s1 + $0x350] ss:$8 sps:$4 sm:$0xff]  }
  0xa0   :  { %2303 = vmatpush1.bf16.msra.mxu0 %v3178_v49  ;;  %2092 = vmatprep.subr.bf16.mxu1 %v3183_v50  ;;  %v3274_v49 = vld [vmem:[%s4416_s1 + $0x750] ss:$8 sps:$4 sm:$0xff]   ;;  %v3279_v50 = vld [vmem:[%s4416_s1 + $0x364] ss:$8 sps:$4 sm:$0xff]  }
  0xa1   :  { %2304 = vmatprep.subr.bf16.mxu0 %v3186_v51  ;;  %v3282_v51 = vld [vmem:[%s4416_s1 + $0x764] ss:$8 sps:$4 sm:$0xff]  }
  0xa3   :  { %2093 = vmatpush1.bf16.msra.mxu1 %v3181_v52  ;;  %v3277_v52 = vld [vmem:[%s4416_s1 + $0x360] ss:$8 sps:$4 sm:$0xff]  }
  0xa4   :  { %2305 = vmatpush1.bf16.msra.mxu0 %v3184_v53  ;;  %2094 = vmatprep.subr.bf16.mxu1 %v3189_v54  ;;  %v3280_v53 = vld [vmem:[%s4416_s1 + $0x760] ss:$8 sps:$4 sm:$0xff]   ;;  %v3285_v54 = vld [vmem:[%s4416_s1 + $0x374] ss:$8 sps:$4 sm:$0xff]  }
  0xa5   :  { %2306 = vmatprep.subr.bf16.mxu0 %v3192_v55  ;;  %v3288_v55 = vld [vmem:[%s4416_s1 + $0x774] ss:$8 sps:$4 sm:$0xff]  }
  0xa7   :  { %2095 = vmatpush1.bf16.msra.mxu1 %v3187_v56  ;;  %v3283_v56 = vld [vmem:[%s4416_s1 + $0x370] ss:$8 sps:$4 sm:$0xff]  }
  0xa8   :  { %2307 = vmatpush1.bf16.msra.mxu0 %v3190_v57  ;;  %2096 = vmatprep.subr.bf16.mxu1 %v3195_v58  ;;  %v3286_v57 = vld [vmem:[%s4416_s1 + $0x770] ss:$8 sps:$4 sm:$0xff]   ;;  %v3291_v58 = vld [vmem:[%s4416_s1 + $0x384] ss:$8 sps:$4 sm:$0xff]  }
  0xa9   :  { %2308 = vmatprep.subr.bf16.mxu0 %v3198_v59  ;;  %v3294_v59 = vld [vmem:[%s4416_s1 + $0x784] ss:$8 sps:$4 sm:$0xff]  }
  0xab   :  { %2097 = vmatpush1.bf16.msra.mxu1 %v3193_v60  ;;  %v3289_v60 = vld [vmem:[%s4416_s1 + $0x380] ss:$8 sps:$4 sm:$0xff]  }
  0xac   :  { %2309 = vmatpush1.bf16.msra.mxu0 %v3196_v61  ;;  %2098 = vmatprep.subr.bf16.mxu1 %v3201_v62  ;;  %v3292_v61 = vld [vmem:[%s4416_s1 + $0x780] ss:$8 sps:$4 sm:$0xff]   ;;  %v3297_v62 = vld [vmem:[%s4416_s1 + $0x394] ss:$8 sps:$4 sm:$0xff]  }
  0xad   :  { %2310 = vmatprep.subr.bf16.mxu0 %v3204_v63  ;;  %v3300_v63 = vld [vmem:[%s4416_s1 + $0x794] ss:$8 sps:$4 sm:$0xff]  }
  0xaf   :  { %2099 = vmatpush1.bf16.msra.mxu1 %v3199_v0  ;;  %v3295_v0 = vld [vmem:[%s4416_s1 + $0x390] ss:$8 sps:$4 sm:$0xff]  }
  0xb0   :  { %2311 = vmatpush1.bf16.msra.mxu0 %v3202_v1  ;;  %2100 = vmatprep.subr.bf16.mxu1 %v3207_v2  ;;  %v3298_v1 = vld [vmem:[%s4416_s1 + $0x790] ss:$8 sps:$4 sm:$0xff]   ;;  %v3303_v2 = vld [vmem:[%s4416_s1 + $0x3a4] ss:$8 sps:$4 sm:$0xff]  }
  0xb1   :  { %2312 = vmatprep.subr.bf16.mxu0 %v3210_v3  ;;  %v3306_v3 = vld [vmem:[%s4416_s1 + $0x7a4] ss:$8 sps:$4 sm:$0xff]  }
  0xb3   :  { %2101 = vmatpush1.bf16.msra.mxu1 %v3205_v4  ;;  %v3301_v4 = vld [vmem:[%s4416_s1 + $0x3a0] ss:$8 sps:$4 sm:$0xff]  }
  0xb4   :  { %2313 = vmatpush1.bf16.msra.mxu0 %v3208_v5  ;;  %2102 = vmatprep.subr.bf16.mxu1 %v3213_v6  ;;  %v3304_v5 = vld [vmem:[%s4416_s1 + $0x7a0] ss:$8 sps:$4 sm:$0xff]   ;;  %v3309_v6 = vld [vmem:[%s4416_s1 + $0x3b4] ss:$8 sps:$4 sm:$0xff]  }
  0xb5   :  { %2314 = vmatprep.subr.bf16.mxu0 %v3216_v7  ;;  %v3312_v7 = vld [vmem:[%s4416_s1 + $0x7b4] ss:$8 sps:$4 sm:$0xff]  }
  0xb7   :  { %2103 = vmatpush1.bf16.msra.mxu1 %v3211_v8  ;;  %v3307_v8 = vld [vmem:[%s4416_s1 + $0x3b0] ss:$8 sps:$4 sm:$0xff]  }
  0xb8   :  { %2315 = vmatpush1.bf16.msra.mxu0 %v3214_v9  ;;  %2104 = vmatprep.subr.bf16.mxu1 %v3221_v10  ;;  %v3310_v9 = vld [vmem:[%s4416_s1 + $0x7b0] ss:$8 sps:$4 sm:$0xff]   ;;  %v3315_v10 = vld [vmem:[%s4416_s1 + $0x3c4] ss:$8 sps:$4 sm:$0xff]  }
  0xb9   :  { %2316 = vmatprep.subr.bf16.mxu0 %v3226_v11  ;;  %v3318_v11 = vld [vmem:[%s4416_s1 + $0x7c4] ss:$8 sps:$4 sm:$0xff]  }
  0xbb   :  { %2105 = vmatpush1.bf16.msra.mxu1 %v3219_v12  ;;  %v3313_v12 = vld [vmem:[%s4416_s1 + $0x3c0] ss:$8 sps:$4 sm:$0xff]  }
  0xbc   :  { %2317 = vmatpush1.bf16.msra.mxu0 %v3224_v13  ;;  %2106 = vmatprep.subr.bf16.mxu1 %v3231_v14  ;;  %v3316_v13 = vld [vmem:[%s4416_s1 + $0x7c0] ss:$8 sps:$4 sm:$0xff]   ;;  %v3321_v14 = vld [vmem:[%s4416_s1 + $0x3d4] ss:$8 sps:$4 sm:$0xff]  }
  0xbd   :  { %2318 = vmatprep.subr.bf16.mxu0 %v3234_v15  ;;  %v3324_v15 = vld [vmem:[%s4416_s1 + $0x7d4] ss:$8 sps:$4 sm:$0xff]  }
  0xbf   :  { %2107 = vmatpush1.bf16.msra.mxu1 %v3229_v16  ;;  %v3319_v16 = vld [vmem:[%s4416_s1 + $0x3d0] ss:$8 sps:$4 sm:$0xff]  }
  0xc0   :  { %2319 = vmatpush1.bf16.msra.mxu0 %v3232_v17  ;;  %2129 = vmatprep.subr.bf16.mxu1 %v3240_v18  ;;  %v3322_v17 = vld [vmem:[%s4416_s1 + $0x7d0] ss:$8 sps:$4 sm:$0xff]   ;;  %v3332_v18 = vld [vmem:[%s4416_s1 + $0x3e4] ss:$8 sps:$4 sm:$0xff]  }
  0xc1   :  { %2341 = vmatprep.subr.bf16.mxu0 %v3246_v19  ;;  %v3336_v19 = vld [vmem:[%s4416_s1 + $0x7e4] ss:$8 sps:$4 sm:$0xff]  }
  0xc2   :  { %2109 = vmatmul.mubr.bf16.vlgmr.msra.gmra.mrb[0].mxu1 %v3235_v20  ;;  %v3330_v20 = vld [vmem:[%s4416_s1 + $0x3e0] ss:$8 sps:$4 sm:$0xff]  }
  0xc3   :  { %2321 = vmatmul.mubr.bf16.vlgmr.msra.gmra.mrb[0].mxu0 %v3241_v22  ;;  %2130 = vmatpush1.bf16.msra.mxu1 %v3238_v21  ;;  %v3334_v21 = vld [vmem:[%s4416_s1 + $0x7e0] ss:$8 sps:$4 sm:$0xff]   ;;  %v3339_v22 = vld [vmem:[%s4416_s1 + $0x3f4] ss:$8 sps:$4 sm:$0xff]  }
  0xc4   :  { %2342 = vmatpush1.bf16.msra.mxu0 %v3244_v23  ;;  %2131 = vmatprep.subr.bf16.mxu1 %v3249_v24  ;;  %v3342_v23 = vld [vmem:[%s4416_s1 + $0x7f4] ss:$8 sps:$4 sm:$0xff]   ;;  %v3337_v24 = vld [vmem:[%s4416_s1 + $0x3f0] ss:$8 sps:$4 sm:$0xff]  }
  0xc5   :  { %2343 = vmatprep.subr.bf16.mxu0 %v3252_v25  ;;  %2118 = vmatprep.mubr.bf16.mxu1 %v3325_v26  ;;  %v3340_v25 = vld [vmem:[%s4416_s1 + $0x7f0] ss:$8 sps:$4 sm:$0xff]   ;;  %v3351_v26 = vld [vmem:[%s4416_s1 + $0x804] ss:$8 sps:$4 sm:$0xff]  }
  0xc6   :  { %2330 = vmatprep.mubr.bf16.mxu0 %v3327_v27  ;;  %v3343_v27 = vld [vmem:[%s4417_s0 + $0x18] ss:$72 sps:$4 sm:$0xff]  }
  0xc7   :  { %2132 = vmatpush1.bf16.msra.mxu1 %v3247_v28  ;;  %v3346_v28 = vld [vmem:[%s4417_s0 + $0x38] ss:$72 sps:$4 sm:$0xff]  }
  0xc8   :  { %2344 = vmatpush1.bf16.msra.mxu0 %v3250_v29  ;;  %2133 = vmatprep.subr.bf16.mxu1 %v3255_v30  ;;  %v3349_v29 = vld [vmem:[%s4416_s1 + $0x800] ss:$8 sps:$4 sm:$0xff]   ;;  %v3354_v30 = vld [vmem:[%s4416_s1 + $0x814] ss:$8 sps:$4 sm:$0xff]  }
  0xc9   :  { %2345 = vmatprep.subr.bf16.mxu0 %v3258_v31  ;;  %v3355_v31 = vld [vmem:[%s4417_s0 + $0xac] ss:$72 sps:$4 sm:$0xff]  }
  0xca   :  { %2119 = vmatmul.mubr.bf16.gmra.mrb[4].mxu1 %v3329_v34  ;;  %v3363_v34 = vld [vmem:[%s4416_s1 + $0x824] ss:$8 sps:$4 sm:$0xff]  }
  0xcb   :  { %2331 = vmatmul.mubr.bf16.gmra.mrb[4].mxu0 %v3333_v35  ;;  %2134 = vmatpush1.bf16.msra.mxu1 %v3253_v32  ;;  %v3357_v32 = vld [vmem:[%s4417_s0 + $0xcc] ss:$72 sps:$4 sm:$0xff]   ;;  %v3359_v35 = vld [vmem:[%s4417_s0 + $0xa8] ss:$72 sps:$4 sm:$0xff]  }
  0xcc   :  { %2346 = vmatpush1.bf16.msra.mxu0 %v3256_v33  ;;  %2135 = vmatprep.subr.bf16.mxu1 %v3261_v36  ;;  %v3352_v33 = vld [vmem:[%s4416_s1 + $0x810] ss:$8 sps:$4 sm:$0xff]  }
  0xcd   :  { %2347 = vmatprep.subr.bf16.mxu0 %v3264_v37  ;;  %2161 = vmatprep.mubr.bf16.mxu1 %v3345_v38  ;;  %v3360_v36 = vld [vmem:[%s4417_s0 + $0xc8] ss:$72 sps:$4 sm:$0xff]   ;;  %v3366_v38 = vld [vmem:[%s4416_s1 + $0x834] ss:$8 sps:$4 sm:$0xff]  }
  0xce   :  { %2373 = vmatprep.mubr.bf16.mxu0 %v3348_v39  ;;  %v3361_v37 = vld [vmem:[%s4416_s1 + $0x820] ss:$8 sps:$4 sm:$0xff]   ;;  %v3405_v39 = vld [vmem:[%s4417_s0 + $0x44] ss:$72 sps:$4 sm:$0xff]  }
  0xcf   :  { %2136 = vmatpush1.bf16.msra.mxu1 %v3259_v40  ;;  %v3408_v40 = vld [vmem:[%s4417_s0 + $0xd4] ss:$72 sps:$4 sm:$0xff]  }
  0xd0   :  { %2348 = vmatpush1.bf16.msra.mxu0 %v3262_v41  ;;  %2137 = vmatprep.subr.bf16.mxu1 %v3267_v42  ;;  %v3364_v41 = vld [vmem:[%s4416_s1 + $0x830] ss:$8 sps:$4 sm:$0xff]   ;;  %v3369_v42 = vld [vmem:[%s4416_s1 + $0x844] ss:$8 sps:$4 sm:$0xff]  }
  0xd1   :  { %2349 = vmatprep.subr.bf16.mxu0 %v3270_v43  ;;  %v3367_v43 = vld [vmem:[%s4416_s1 + $0x840] ss:$8 sps:$4 sm:$0xff]  }
  0xd3   :  { %2138 = vmatpush1.bf16.msra.mxu1 %v3265_v44  ;;  %v3372_v44 = vld [vmem:[%s4416_s1 + $0x854] ss:$8 sps:$4 sm:$0xff]  }
  0xd4   :  { %2350 = vmatpush1.bf16.msra.mxu0 %v3268_v45  ;;  %2139 = vmatprep.subr.bf16.mxu1 %v3273_v46  ;;  %v3370_v45 = vld [vmem:[%s4416_s1 + $0x850] ss:$8 sps:$4 sm:$0xff]   ;;  %v3375_v46 = vld [vmem:[%s4416_s1 + $0x864] ss:$8 sps:$4 sm:$0xff]  }
  0xd5   :  { %2351 = vmatprep.subr.bf16.mxu0 %v3276_v47  ;;  %v3373_v47 = vld [vmem:[%s4416_s1 + $0x860] ss:$8 sps:$4 sm:$0xff]  }
  0xd7   :  { %2140 = vmatpush1.bf16.msra.mxu1 %v3271_v48  ;;  %v3378_v48 = vld [vmem:[%s4416_s1 + $0x874] ss:$8 sps:$4 sm:$0xff]  }
  0xd8   :  { %2352 = vmatpush1.bf16.msra.mxu0 %v3274_v49  ;;  %2141 = vmatprep.subr.bf16.mxu1 %v3279_v50  ;;  %v3376_v49 = vld [vmem:[%s4416_s1 + $0x870] ss:$8 sps:$4 sm:$0xff]   ;;  %v3381_v50 = vld [vmem:[%s4416_s1 + $0x884] ss:$8 sps:$4 sm:$0xff]  }
  0xd9   :  { %2353 = vmatprep.subr.bf16.mxu0 %v3282_v51  ;;  %v3379_v51 = vld [vmem:[%s4416_s1 + $0x880] ss:$8 sps:$4 sm:$0xff]  }
  0xdb   :  { %2142 = vmatpush1.bf16.msra.mxu1 %v3277_v52  ;;  %v3384_v52 = vld [vmem:[%s4416_s1 + $0x894] ss:$8 sps:$4 sm:$0xff]  }
  0xdc   :  { %2354 = vmatpush1.bf16.msra.mxu0 %v3280_v53  ;;  %2143 = vmatprep.subr.bf16.mxu1 %v3285_v54  ;;  %v3382_v53 = vld [vmem:[%s4416_s1 + $0x890] ss:$8 sps:$4 sm:$0xff]   ;;  %v3387_v54 = vld [vmem:[%s4416_s1 + $0x8a4] ss:$8 sps:$4 sm:$0xff]  }
  0xdd   :  { %2355 = vmatprep.subr.bf16.mxu0 %v3288_v55  ;;  %v3385_v55 = vld [vmem:[%s4416_s1 + $0x8a0] ss:$8 sps:$4 sm:$0xff]  }
  0xdf   :  { %2144 = vmatpush1.bf16.msra.mxu1 %v3283_v56  ;;  %v3390_v56 = vld [vmem:[%s4416_s1 + $0x8b4] ss:$8 sps:$4 sm:$0xff]  }
  0xe0   :  { %2356 = vmatpush1.bf16.msra.mxu0 %v3286_v57  ;;  %2145 = vmatprep.subr.bf16.mxu1 %v3291_v58  ;;  %v3388_v57 = vld [vmem:[%s4416_s1 + $0x8b0] ss:$8 sps:$4 sm:$0xff]   ;;  %v3393_v58 = vld [vmem:[%s4416_s1 + $0x8c4] ss:$8 sps:$4 sm:$0xff]  }
  0xe1   :  { %2357 = vmatprep.subr.bf16.mxu0 %v3294_v59  ;;  %v3391_v59 = vld [vmem:[%s4416_s1 + $0x8c0] ss:$8 sps:$4 sm:$0xff]  }
  0xe3   :  { %2146 = vmatpush1.bf16.msra.mxu1 %v3289_v60  ;;  %v3396_v60 = vld [vmem:[%s4416_s1 + $0x8d4] ss:$8 sps:$4 sm:$0xff]  }
  0xe4   :  { %2358 = vmatpush1.bf16.msra.mxu0 %v3292_v61  ;;  %2147 = vmatprep.subr.bf16.mxu1 %v3297_v62  ;;  %v3394_v61 = vld [vmem:[%s4416_s1 + $0x8d0] ss:$8 sps:$4 sm:$0xff]   ;;  %v3399_v62 = vld [vmem:[%s4416_s1 + $0x8e4] ss:$8 sps:$4 sm:$0xff]  }
  0xe5   :  { %2359 = vmatprep.subr.bf16.mxu0 %v3300_v63  ;;  %v3397_v63 = vld [vmem:[%s4416_s1 + $0x8e0] ss:$8 sps:$4 sm:$0xff]  }
  0xe7   :  { %2148 = vmatpush1.bf16.msra.mxu1 %v3295_v0  ;;  %v3402_v0 = vld [vmem:[%s4416_s1 + $0x8f4] ss:$8 sps:$4 sm:$0xff]  }
  0xe8   :  { %2360 = vmatpush1.bf16.msra.mxu0 %v3298_v1  ;;  %2149 = vmatprep.subr.bf16.mxu1 %v3303_v2  ;;  %v3400_v1 = vld [vmem:[%s4416_s1 + $0x8f0] ss:$8 sps:$4 sm:$0xff]   ;;  %v3403_v2 = vld [vmem:[%s4417_s0 + $0x40] ss:$72 sps:$4 sm:$0xff]  }
  0xe9   :  { %2361 = vmatprep.subr.bf16.mxu0 %v3306_v3  ;;  %v3406_v3 = vld [vmem:[%s4417_s0 + $0xd0] ss:$72 sps:$4 sm:$0xff]  }
  0xeb   :  { %2150 = vmatpush1.bf16.msra.mxu1 %v3301_v4  ;;  %v340_v4 = vlaneseq }
  0xec   :  { %2362 = vmatpush1.bf16.msra.mxu0 %v3304_v5  ;;  %2151 = vmatprep.subr.bf16.mxu1 %v3309_v6 }
  0xed   :  { %2363 = vmatprep.subr.bf16.mxu0 %v3312_v7  ;;  %v341_v5 = vshrl.u32 %v340_v4, 7 }
  0xef   :  { %2152 = vmatpush1.bf16.msra.mxu1 %v3307_v8 }
  0xf0   :  { %2364 = vmatpush1.bf16.msra.mxu0 %v3310_v9  ;;  %2153 = vmatprep.subr.bf16.mxu1 %v3315_v10  ;;  %v342_v9 = vsub.s32 0, %v341_v5 }
  0xf1   :  { %2365 = vmatprep.subr.bf16.mxu0 %v3318_v11  ;;  %v338_v11 = vld [vmem:[%s4418_s2] sm:$0x3] }
  0xf3   :  { %2154 = vmatpush1.bf16.msra.mxu1 %v3313_v12  ;;  %v346_v12 = vsub.s32 1, %v341_v5 }
  0xf4   :  { %2366 = vmatpush1.bf16.msra.mxu0 %v3316_v13  ;;  %2155 = vmatprep.subr.bf16.mxu1 %v3321_v14  ;;  %v343_v13 = vrot.slane %v338_v11, %v342_v9 }
  0xf5   :  { %2367 = vmatprep.subr.bf16.mxu0 %v3324_v15  ;;  %v347_v14 = vrot.slane %v338_v11, %v346_v12 }
  0xf7   :  { %2156 = vmatpush1.bf16.msra.mxu1 %v3319_v16 }
  0xf8   :  { %2368 = vmatpush1.bf16.msra.mxu0 %v3322_v17  ;;  %2157 = vmatprep.subr.bf16.mxu1 %v3332_v18 }
  0xf9   :  { %2369 = vmatprep.subr.bf16.mxu0 %v3336_v19 }
  0xfb   :  { %2158 = vmatpush1.bf16.msra.mxu1 %v3330_v20 }
  0xfc   :  { %2370 = vmatpush1.bf16.msra.mxu0 %v3334_v21  ;;  %2159 = vmatprep.subr.bf16.mxu1 %v3339_v22 }
  0xfd   :  { %2371 = vmatprep.subr.bf16.mxu0 %v3342_v23 }
  0xff   :  { %2160 = vmatpush1.bf16.msra.mxu1 %v3337_v24 }
 0x100   :  { %2372 = vmatpush1.bf16.msra.mxu0 %v3340_v25  ;;  %2819 = vmatprep.subr.bf16.mxu1 %v3351_v26 }
 0x101   :  { %2394 = vmatprep.subr.bf16.mxu0 %v3351_v26 }
 0x102   :  { %2162 = vmatmul.mubr.bf16.vlgmr.msra.gmra.mrb[0].mxu1 %v3343_v27 }
 0x103   :  { %2374 = vmatmul.mubr.bf16.vlgmr.msra.gmra.mrb[0].mxu0 %v3346_v28  ;;  %2835 = vmatpush1.bf16.msra.mxu1 %v3349_v29 }
 0x104   :  { %2395 = vmatpush1.bf16.msra.mxu0 %v3349_v29  ;;  %2820 = vmatprep.subr.bf16.mxu1 %v3354_v30 }
 0x105   :  { %2396 = vmatprep.subr.bf16.mxu0 %v3354_v30  ;;  %2171 = vmatprep.mubr.bf16.mxu1 %v3355_v31 }
 0x106   :  { %2383 = vmatprep.mubr.bf16.mxu0 %v3357_v32 }
 0x107   :  { %2836 = vmatpush1.bf16.msra.mxu1 %v3352_v33 }
 0x108   :  { %2397 = vmatpush1.bf16.msra.mxu0 %v3352_v33  ;;  %2821 = vmatprep.subr.bf16.mxu1 %v3363_v34 }
 0x109   :  { %2398 = vmatprep.subr.bf16.mxu0 %v3363_v34 }
 0x10a   :  { %2172 = vmatmul.mubr.bf16.gmra.mrb[4].mxu1 %v3359_v35 }
 0x10b   :  { %2384 = vmatmul.mubr.bf16.gmra.mrb[4].mxu0 %v3360_v36  ;;  %2837 = vmatpush1.bf16.msra.mxu1 %v3361_v37 }
 0x10c   :  { %2399 = vmatpush1.bf16.msra.mxu0 %v3361_v37  ;;  %2822 = vmatprep.subr.bf16.mxu1 %v3366_v38 }
 0x10d   :  { %2400 = vmatprep.subr.bf16.mxu0 %v3366_v38  ;;  %2426 = vmatprep.mubr.bf16.mxu0 %v3405_v39 }
 0x10e   :  { %2436 = vmatprep.mubr.bf16.mxu1 %v3408_v40 }
 0x10f   :  { %2838 = vmatpush1.bf16.msra.mxu1 %v3364_v41 }
 0x110   :  { %2401 = vmatpush1.bf16.msra.mxu0 %v3364_v41  ;;  %2823 = vmatprep.subr.bf16.mxu1 %v3369_v42 }
 0x111   :  { %2402 = vmatprep.subr.bf16.mxu0 %v3369_v42 }
 0x113   :  { %2839 = vmatpush1.bf16.msra.mxu1 %v3367_v43 }
 0x114   :  { %2403 = vmatpush1.bf16.msra.mxu0 %v3367_v43  ;;  %2824 = vmatprep.subr.bf16.mxu1 %v3372_v44 }
 0x115   :  { %2404 = vmatprep.subr.bf16.mxu0 %v3372_v44 }
 0x117   :  { %2840 = vmatpush1.bf16.msra.mxu1 %v3370_v45 }
 0x118   :  { %2405 = vmatpush1.bf16.msra.mxu0 %v3370_v45  ;;  %2825 = vmatprep.subr.bf16.mxu1 %v3375_v46 }
 0x119   :  { %2406 = vmatprep.subr.bf16.mxu0 %v3375_v46 }
 0x11b   :  { %2841 = vmatpush1.bf16.msra.mxu1 %v3373_v47 }
 0x11c   :  { %2407 = vmatpush1.bf16.msra.mxu0 %v3373_v47  ;;  %2826 = vmatprep.subr.bf16.mxu1 %v3378_v48 }
 0x11d   :  { %2408 = vmatprep.subr.bf16.mxu0 %v3378_v48 }
 0x11f   :  { %2842 = vmatpush1.bf16.msra.mxu1 %v3376_v49 }
 0x120   :  { %2409 = vmatpush1.bf16.msra.mxu0 %v3376_v49  ;;  %2827 = vmatprep.subr.bf16.mxu1 %v3381_v50 }
 0x121   :  { %2410 = vmatprep.subr.bf16.mxu0 %v3381_v50 }
 0x123   :  { %2843 = vmatpush1.bf16.msra.mxu1 %v3379_v51 }
 0x124   :  { %2411 = vmatpush1.bf16.msra.mxu0 %v3379_v51  ;;  %2828 = vmatprep.subr.bf16.mxu1 %v3384_v52 }
 0x125   :  { %2412 = vmatprep.subr.bf16.mxu0 %v3384_v52 }
 0x127   :  { %2844 = vmatpush1.bf16.msra.mxu1 %v3382_v53 }
 0x128   :  { %2413 = vmatpush1.bf16.msra.mxu0 %v3382_v53  ;;  %2829 = vmatprep.subr.bf16.mxu1 %v3387_v54 }
 0x129   :  { %2414 = vmatprep.subr.bf16.mxu0 %v3387_v54 }
 0x12b   :  { %2845 = vmatpush1.bf16.msra.mxu1 %v3385_v55 }
 0x12c   :  { %2415 = vmatpush1.bf16.msra.mxu0 %v3385_v55  ;;  %2830 = vmatprep.subr.bf16.mxu1 %v3390_v56 }
 0x12d   :  { %2416 = vmatprep.subr.bf16.mxu0 %v3390_v56 }
 0x12f   :  { %2846 = vmatpush1.bf16.msra.mxu1 %v3388_v57 }
 0x130   :  { %2417 = vmatpush1.bf16.msra.mxu0 %v3388_v57  ;;  %2831 = vmatprep.subr.bf16.mxu1 %v3393_v58 }
 0x131   :  { %2418 = vmatprep.subr.bf16.mxu0 %v3393_v58 }
 0x133   :  { %2847 = vmatpush1.bf16.msra.mxu1 %v3391_v59 }
 0x134   :  { %2419 = vmatpush1.bf16.msra.mxu0 %v3391_v59  ;;  %2832 = vmatprep.subr.bf16.mxu1 %v3396_v60 }
 0x135   :  { %2420 = vmatprep.subr.bf16.mxu0 %v3396_v60 }
 0x137   :  { %2848 = vmatpush1.bf16.msra.mxu1 %v3394_v61 }
 0x138   :  { %2421 = vmatpush1.bf16.msra.mxu0 %v3394_v61  ;;  %2833 = vmatprep.subr.bf16.mxu1 %v3399_v62 }
 0x139   :  { %2422 = vmatprep.subr.bf16.mxu0 %v3399_v62 }
 0x13b   :  { %2849 = vmatpush1.bf16.msra.mxu1 %v3397_v63 }
 0x13c   :  { %2423 = vmatpush1.bf16.msra.mxu0 %v3397_v63  ;;  %2834 = vmatprep.subr.bf16.mxu1 %v3402_v0 }
 0x13d   :  { %2424 = vmatprep.subr.bf16.mxu0 %v3402_v0 }
 0x13f   :  { %2850 = vmatpush1.bf16.msra.mxu1 %v3400_v1 }
 0x140   :  { %2425 = vmatpush1.bf16.msra.mxu0 %v3400_v1 }
 0x142   :  { %2437 = vmatmul.mubr.bf16.vlgmr.msra.gmra.mrb[8].mxu1 %v3406_v3 }
 0x143   :  { %2427 = vmatmul.mubr.bf16.vlgmr.msra.gmra.mrb[0].mxu0 %v3403_v2 }
 0x1d5   :  { %v2163_v6 = vpop.f32.mrb[0].mxu1 }
 0x1d6   :  { %v2165_v7 = vpop.f32.mrb[1].mxu1  ;;  %v2851_v31 = vadd.f32 %v2163_v6, %v343_v13 }
 0x1d7   :  { %v2167_v8 = vpop.f32.mrb[2].mxu1  ;;  %v2853_v32 = vadd.f32 %v2165_v7, %v347_v14 }
 0x1d8   :  { %v2169_v10 = vpop.f32.mrb[3].mxu1  ;;  %v2855_v35 = vadd.f32 %v2167_v8, %v343_v13 }
 0x1d9   :  { %v2857_v40 = vadd.f32 %v2169_v10, %v347_v14 }
 0x1dd   :  { %v2173_v15 = vpop.f32.mrb[4].mxu1 }
 0x1de   :  { %v2385_v16 = vpop.f32.mrb[4].mxu0  ;;  %v2859_v17 = vadd.f32 %v2173_v15, %v343_v13  ;;  %v2175_v18 = vpop.f32.mrb[5].mxu1 }
 0x1df   :  { %v2387_v19 = vpop.f32.mrb[5].mxu0  ;;  %v2862_v20 = vadd.f32 %v2175_v18, %v347_v14  ;;  %v2177_v21 = vpop.f32.mrb[6].mxu1 }
 0x1e0   :  { %v2389_v22 = vpop.f32.mrb[6].mxu0  ;;  %v2860_v23 = vadd.f32 %v2859_v17, %v2385_v16  ;;  %v2865_v24 = vadd.f32 %v2177_v21, %v343_v13  ;;  %v2179_v25 = vpop.f32.mrb[7].mxu1 }
 0x1e1   :  { %v2391_v26 = vpop.f32.mrb[7].mxu0  ;;  %v2863_v27 = vadd.f32 %v2862_v20, %v2387_v19  ;;  %v2868_v28 = vadd.f32 %v2179_v25, %v347_v14 }
 0x1e2   :  { %v2866_v29 = vadd.f32 %v2865_v24, %v2389_v22 }
 0x1e3   :  { %v2869_v30 = vadd.f32 %v2868_v28, %v2391_v26 }
 0x215   :  { %v2438_v34 = vpop.f32.mrb[8].mxu1 }
 0x216   :  { %v2428_v33 = vpop.f32.mrb[0].mxu0  ;;  %v2861_v37 = vadd.f32 %v2860_v23, %v2438_v34  ;;  %v2440_v39 = vpop.f32.mrb[9].mxu1 }
 0x217   :  { %v2852_v36 = vadd.f32 %v2851_v31, %v2428_v33  ;;  %v2430_v38 = vpop.f32.mrb[1].mxu0  ;;  %v2864_v42 = vadd.f32 %v2863_v27, %v2440_v39  ;;  %v2442_v44 = vpop.f32.mrb[10].mxu1 }
 0x218   :  { %v2854_v41 = vadd.f32 %v2853_v32, %v2430_v38  ;;  %v2432_v43 = vpop.f32.mrb[2].mxu0  ;;  %v2451_v46 = vmax.f32 %v2861_v37, 0.0  ;;  %v2867_v48 = vadd.f32 %v2866_v29, %v2442_v44  ;;  %v2444_v50 = vpop.f32.mrb[11].mxu1 }
 0x219   :  { %v2447_v45 = vmax.f32 %v2852_v36, 0.0  ;;  %v2856_v47 = vadd.f32 %v2855_v35, %v2432_v43  ;;  %v2434_v49 = vpop.f32.mrb[3].mxu0  ;;  %v2452_v52 = vmax.f32 %v2864_v42, 0.0  ;;  %v2870_v54 = vadd.f32 %v2869_v30, %v2444_v50 }
 0x21a   :  { %v2448_v51 = vmax.f32 %v2854_v41, 0.0  ;;  %v2858_v53 = vadd.f32 %v2857_v40, %v2434_v49  ;;  %v2453_v56 = vmax.f32 %v2867_v48, 0.0 }
 0x21b   :  { %v2449_v55 = vmax.f32 %v2856_v47, 0.0  ;;  %v2817_v58 = vpack.c.bf16 %v2452_v52, %v2451_v46  ;;  %v2454_v60 = vmax.f32 %v2870_v54, 0.0 }
 0x21c   :  { %v2815_v57 = vpack.c.bf16 %v2448_v51, %v2447_v45  ;;  %v2450_v59 = vmax.f32 %v2858_v53, 0.0 }
 0x21d   :  { %2481 = vst [vmem:[%s4419_s3 + $0x10] sm:$0xff] %v2817_v58  ;;  %v2818_v62 = vpack.c.bf16 %v2454_v60, %v2453_v56 }
 0x21e   :  { %2479 = vst [vmem:[%s4419_s3] sm:$0xff] %v2815_v57  ;;  %v2816_v61 = vpack.c.bf16 %v2450_v59, %v2449_v55 }
 0x21f   :  { %2482 = vst [vmem:[%s4419_s3 + $0x18] sm:$0xff] %v2818_v62 }
 0x220   :  { %2480 = vst [vmem:[%s4419_s3 + $0x8] sm:$0xff] %v2816_v61 }

// kernel: net_forward.11
= control target key start
LH: loop header
LB: loop body
LE: loop exit
PB: predicated region body
PF: predicated region fallthrough
CT: control target
= control target key end

     0   :  { %s5880_s1 = inlined_call_operand.vmem [shape: bf16[256,1024], index: 1, kind: input, shape index: {}]   ;;  %s5881_s0 = inlined_call_operand.vmem [shape: bf16[16,256], index: 0, kind: input, shape index: {}]   ;;  %s5882_s3 = inlined_call_operand.vmem [shape: bf16[1024,512], index: 3, kind: input, shape index: {}]   ;;  %s5883_s2 = inlined_call_operand.vmem [shape: f32[1,1024], index: 2, kind: input, shape index: {}]   ;;  %s5884_s5 = inlined_call_operand.vmem [shape: bf16[512,128], index: 5, kind: input, shape index: {}]   ;;  %s5885_s4 = inlined_call_operand.vmem [shape: f32[1,512], index: 4, kind: input, shape index: {}]   ;;  %s5886_s8 = inlined_call_operand.vmem [shape: f32[16,512], index: 8, kind: output, shape index: {1}]   ;;  %s5887_s6 = inlined_call_operand.vmem [shape: f32[1,128], index: 6, kind: input, shape index: {}]   ;;  %s5888_s7 = inlined_call_operand.vmem [shape: f32[16,128], index: 7, kind: output, shape index: {0}]  }
   0x1   :  { %v31_v0 = vld [vmem:[%s5880_s1] sm:$0xff]  ;;  %v32_v17 = vld [vmem:[%s5880_s1 + $0x8] sm:$0xff] }
   0x2   :  { %v35_v1 = vld [vmem:[%s5880_s1 + $0x20] sm:$0xff]  ;;  %v36_v18 = vld [vmem:[%s5880_s1 + $0x28] sm:$0xff] }
   0x3   :  { %v39_v2 = vld [vmem:[%s5880_s1 + $0x40] sm:$0xff]  ;;  %v3447_v3 = vcombine.high %v31_v0, %v35_v1  ;;  %v3446_v4 = vcombine.low %v31_v0, %v35_v1  ;;  %v3449_v20 = vcombine.high %v32_v17, %v36_v18  ;;  %v3448_v21 = vcombine.low %v32_v17, %v36_v18  ;;  %v40_v23 = vld [vmem:[%s5880_s1 + $0x48] sm:$0xff] }
   0x4   :  { %v43_v5 = vld [vmem:[%s5880_s1 + $0x60] sm:$0xff]  ;;  %v44_v25 = vld [vmem:[%s5880_s1 + $0x68] sm:$0xff] }
   0x5   :  { %v3455_v6 = vcombine.high %v39_v2, %v43_v5  ;;  %v47_v7 = vld [vmem:[%s5880_s1 + $0x80] sm:$0xff]  ;;  %851 = vmatprep.subr.bf16.mxu0 %v3447_v3  ;;  %v3454_v9 = vcombine.low %v39_v2, %v43_v5  ;;  %v48_v26 = vld [vmem:[%s5880_s1 + $0x88] sm:$0xff]  ;;  %894 = vmatprep.subr.bf16.mxu1 %v3449_v20  ;;  %v3457_v30 = vcombine.high %v40_v23, %v44_v25 }
   0x6   :  { %v51_v8 = vld [vmem:[%s5880_s1 + $0xa0] sm:$0xff]  ;;  %852 = vmatpush1.bf16.msra.mxu0 %v3446_v4  ;;  %v52_v27 = vld [vmem:[%s5880_s1 + $0xa8] sm:$0xff]  ;;  %895 = vmatpush1.bf16.msra.mxu1 %v3448_v21  ;;  %v3456_v31 = vcombine.low %v40_v23, %v44_v25 }
   0x7   :  { %853 = vmatprep.subr.bf16.mxu0 %v3455_v6  ;;  %v3463_v10 = vcombine.high %v47_v7, %v51_v8  ;;  %v55_v11 = vld [vmem:[%s5880_s1 + $0xc0] sm:$0xff]  ;;  %v3462_v13 = vcombine.low %v47_v7, %v51_v8  ;;  %896 = vmatprep.subr.bf16.mxu1 %v3457_v30  ;;  %v3465_v33 = vcombine.high %v48_v26, %v52_v27  ;;  %v56_v35 = vld [vmem:[%s5880_s1 + $0xc8] sm:$0xff] }
   0x8   :  { %v59_v12 = vld [vmem:[%s5880_s1 + $0xe0] sm:$0xff]  ;;  %v60_v36 = vld [vmem:[%s5880_s1 + $0xe8] sm:$0xff]  ;;  %v3464_v39 = vcombine.low %v48_v26, %v52_v27 }
   0x9   :  { %v3471_v14 = vcombine.high %v55_v11, %v59_v12  ;;  %v63_v15 = vld [vmem:[%s5880_s1 + $0x100] sm:$0xff]  ;;  %v3470_v19 = vcombine.low %v55_v11, %v59_v12  ;;  %v3473_v41 = vcombine.high %v56_v35, %v60_v36  ;;  %v64_v43 = vld [vmem:[%s5880_s1 + $0x108] sm:$0xff]  ;;  %v3472_v47 = vcombine.low %v56_v35, %v60_v36 }
   0xa   :  { %854 = vmatpush1.bf16.msra.mxu0 %v3454_v9  ;;  %v67_v16 = vld [vmem:[%s5880_s1 + $0x120] sm:$0xff]  ;;  %897 = vmatpush1.bf16.msra.mxu1 %v3456_v31  ;;  %v68_v44 = vld [vmem:[%s5880_s1 + $0x128] sm:$0xff] }
   0xb   :  { %855 = vmatprep.subr.bf16.mxu0 %v3463_v10  ;;  %v4562_v22 = vld [vmem:[%s5881_s0 + $0x4] ss:$8 sps:$4 sm:$0xff]   ;;  %v3479_v24 = vcombine.high %v63_v15, %v67_v16  ;;  %v3478_v32 = vcombine.low %v63_v15, %v67_v16  ;;  %898 = vmatprep.subr.bf16.mxu1 %v3465_v33  ;;  %v3481_v49 = vcombine.high %v64_v43, %v68_v44 }
   0xc   :  { %v71_v28 = vld [vmem:[%s5880_s1 + $0x140] sm:$0xff]  ;;  %883 = vmatprep.mubr.bf16.mxu0 %v4562_v22  ;;  %926 = vmatprep.mubr.bf16.mxu1 %v4562_v22  ;;  %v72_v51 = vld [vmem:[%s5880_s1 + $0x148] sm:$0xff]  ;;  %v3480_v55 = vcombine.low %v64_v43, %v68_v44 }
   0xd   :  { %v75_v29 = vld [vmem:[%s5880_s1 + $0x160] sm:$0xff]  ;;  %v76_v52 = vld [vmem:[%s5880_s1 + $0x168] sm:$0xff] }
   0xe   :  { %856 = vmatpush1.bf16.msra.mxu0 %v3462_v13  ;;  %v3487_v34 = vcombine.high %v71_v28, %v75_v29  ;;  %v79_v37 = vld [vmem:[%s5880_s1 + $0x180] sm:$0xff]  ;;  %v3486_v40 = vcombine.low %v71_v28, %v75_v29  ;;  %899 = vmatpush1.bf16.msra.mxu1 %v3464_v39  ;;  %v3489_v57 = vcombine.high %v72_v51, %v76_v52  ;;  %v80_v59 = vld [vmem:[%s5880_s1 + $0x188] sm:$0xff] }
   0xf   :  { %857 = vmatprep.subr.bf16.mxu0 %v3471_v14  ;;  %v83_v38 = vld [vmem:[%s5880_s1 + $0x1a0] sm:$0xff]  ;;  %900 = vmatprep.subr.bf16.mxu1 %v3473_v41  ;;  %v84_v60 = vld [vmem:[%s5880_s1 + $0x1a8] sm:$0xff]  ;;  %v3488_v63 = vcombine.low %v72_v51, %v76_v52 }
  0x10   :  { %v3495_v42 = vcombine.high %v79_v37, %v83_v38  ;;  %v87_v45 = vld [vmem:[%s5880_s1 + $0x1c0] sm:$0xff]  ;;  %v3494_v48 = vcombine.low %v79_v37, %v83_v38  ;;  %v3497_v1 = vcombine.high %v80_v59, %v84_v60  ;;  %v88_v3 = vld [vmem:[%s5880_s1 + $0x1c8] sm:$0xff]  ;;  %v3496_v7 = vcombine.low %v80_v59, %v84_v60 }
  0x11   :  { %v91_v46 = vld [vmem:[%s5880_s1 + $0x1e0] sm:$0xff]  ;;  %v92_v4 = vld [vmem:[%s5880_s1 + $0x1e8] sm:$0xff] }
  0x12   :  { %858 = vmatpush1.bf16.msra.mxu0 %v3470_v19  ;;  %v3503_v50 = vcombine.high %v87_v45, %v91_v46  ;;  %v95_v53 = vld [vmem:[%s5880_s1 + $0x200] sm:$0xff]  ;;  %901 = vmatpush1.bf16.msra.mxu1 %v3472_v47  ;;  %v3502_v56 = vcombine.low %v87_v45, %v91_v46  ;;  %v3505_v9 = vcombine.high %v88_v3, %v92_v4  ;;  %v96_v11 = vld [vmem:[%s5880_s1 + $0x208] sm:$0xff] }
  0x13   :  { %859 = vmatprep.subr.bf16.mxu0 %v3479_v24  ;;  %v99_v54 = vld [vmem:[%s5880_s1 + $0x220] sm:$0xff]  ;;  %902 = vmatprep.subr.bf16.mxu1 %v3481_v49  ;;  %v100_v12 = vld [vmem:[%s5880_s1 + $0x228] sm:$0xff]  ;;  %v3504_v15 = vcombine.low %v88_v3, %v92_v4 }
  0x14   :  { %v3511_v58 = vcombine.high %v95_v53, %v99_v54  ;;  %v103_v61 = vld [vmem:[%s5880_s1 + $0x240] sm:$0xff]  ;;  %v3510_v0 = vcombine.low %v95_v53, %v99_v54  ;;  %v3513_v17 = vcombine.high %v96_v11, %v100_v12  ;;  %v104_v19 = vld [vmem:[%s5880_s1 + $0x248] sm:$0xff]  ;;  %v3512_v24 = vcombine.low %v96_v11, %v100_v12  ;;  %v33_v54 = vld [vmem:[%s5880_s1 + $0x10] sm:$0xff] }
  0x15   :  { %v107_v62 = vld [vmem:[%s5880_s1 + $0x260] sm:$0xff]  ;;  %v108_v20 = vld [vmem:[%s5880_s1 + $0x268] sm:$0xff]  ;;  %v38_v11 = vld [vmem:[%s5880_s1 + $0x38] sm:$0xff] }
  0x16   :  { %860 = vmatpush1.bf16.msra.mxu0 %v3478_v32  ;;  %903 = vmatpush1.bf16.msra.mxu1 %v3480_v55  ;;  %v3519_v2 = vcombine.high %v103_v61, %v107_v62  ;;  %v111_v5 = vld [vmem:[%s5880_s1 + $0x280] sm:$0xff]  ;;  %v3518_v8 = vcombine.low %v103_v61, %v107_v62  ;;  %v3521_v26 = vcombine.high %v104_v19, %v108_v20  ;;  %v112_v27 = vld [vmem:[%s5880_s1 + $0x288] sm:$0xff]  ;;  %v37_v55 = vld [vmem:[%s5880_s1 + $0x30] sm:$0xff] }
  0x17   :  { %861 = vmatprep.subr.bf16.mxu0 %v3487_v34  ;;  %904 = vmatprep.subr.bf16.mxu1 %v3489_v57  ;;  %v115_v6 = vld [vmem:[%s5880_s1 + $0x2a0] sm:$0xff]  ;;  %v116_v29 = vld [vmem:[%s5880_s1 + $0x2a8] sm:$0xff]  ;;  %v3520_v32 = vcombine.low %v104_v19, %v108_v20  ;;  %v3451_v61 = vcombine.high %v33_v54, %v37_v55  ;;  %v41_v62 = vld [vmem:[%s5880_s1 + $0x50] sm:$0xff] }
  0x18   :  { %v3527_v10 = vcombine.high %v111_v5, %v115_v6  ;;  %v119_v13 = vld [vmem:[%s5880_s1 + $0x2c0] sm:$0xff]  ;;  %v3526_v16 = vcombine.low %v111_v5, %v115_v6  ;;  %v3529_v34 = vcombine.high %v112_v27, %v116_v29  ;;  %v120_v35 = vld [vmem:[%s5880_s1 + $0x2c8] sm:$0xff]  ;;  %v3450_v5 = vcombine.low %v33_v54, %v37_v55  ;;  %v46_v19 = vld [vmem:[%s5880_s1 + $0x78] sm:$0xff] }
  0x19   :  { %v123_v14 = vld [vmem:[%s5880_s1 + $0x2e0] sm:$0xff]  ;;  %v124_v37 = vld [vmem:[%s5880_s1 + $0x2e8] sm:$0xff]  ;;  %v101_v54 = vld [vmem:[%s5880_s1 + $0x230] sm:$0xff] }
  0x1a   :  { %862 = vmatpush1.bf16.msra.mxu0 %v3486_v40  ;;  %905 = vmatpush1.bf16.msra.mxu1 %v3488_v63  ;;  %v3535_v18 = vcombine.high %v119_v13, %v123_v14  ;;  %v127_v21 = vld [vmem:[%s5880_s1 + $0x300] sm:$0xff]  ;;  %v3534_v25 = vcombine.low %v119_v13, %v123_v14  ;;  %v3528_v40 = vcombine.low %v112_v27, %v116_v29  ;;  %v128_v43 = vld [vmem:[%s5880_s1 + $0x308] sm:$0xff]  ;;  %v45_v63 = vld [vmem:[%s5880_s1 + $0x70] sm:$0xff] }
  0x1b   :  { %863 = vmatprep.subr.bf16.mxu0 %v3495_v42  ;;  %906 = vmatprep.subr.bf16.mxu1 %v3497_v1  ;;  %v131_v23 = vld [vmem:[%s5880_s1 + $0x320] sm:$0xff]  ;;  %v3537_v42 = vcombine.high %v120_v35, %v124_v37  ;;  %v132_v45 = vld [vmem:[%s5880_s1 + $0x328] sm:$0xff]  ;;  %v3459_v6 = vcombine.high %v41_v62, %v45_v63  ;;  %v3458_v13 = vcombine.low %v41_v62, %v45_v63  ;;  %v57_v14 = vld [vmem:[%s5880_s1 + $0xd0] sm:$0xff] }
  0x1c   :  { %v3543_v28 = vcombine.high %v127_v21, %v131_v23  ;;  %v135_v30 = vld [vmem:[%s5880_s1 + $0x340] sm:$0xff]  ;;  %v3542_v33 = vcombine.low %v127_v21, %v131_v23  ;;  %v136_v51 = vld [vmem:[%s5880_s1 + $0x348] sm:$0xff]  ;;  %v65_v21 = vld [vmem:[%s5880_s1 + $0x110] sm:$0xff] }
  0x1d   :  { %v139_v31 = vld [vmem:[%s5880_s1 + $0x360] sm:$0xff]  ;;  %v140_v53 = vld [vmem:[%s5880_s1 + $0x368] sm:$0xff]  ;;  %v69_v23 = vld [vmem:[%s5880_s1 + $0x130] sm:$0xff] }
  0x1e   :  { %864 = vmatpush1.bf16.msra.mxu0 %v3494_v48  ;;  %907 = vmatpush1.bf16.msra.mxu1 %v3496_v7  ;;  %v3551_v36 = vcombine.high %v135_v30, %v139_v31  ;;  %v143_v38 = vld [vmem:[%s5880_s1 + $0x380] sm:$0xff]  ;;  %v3550_v41 = vcombine.low %v135_v30, %v139_v31  ;;  %v3536_v48 = vcombine.low %v120_v35, %v124_v37  ;;  %v144_v59 = vld [vmem:[%s5880_s1 + $0x388] sm:$0xff]  ;;  %v49_v7 = vld [vmem:[%s5880_s1 + $0x90] sm:$0xff] }
  0x1f   :  { %865 = vmatprep.subr.bf16.mxu0 %v3503_v50  ;;  %908 = vmatprep.subr.bf16.mxu1 %v3505_v9  ;;  %v147_v39 = vld [vmem:[%s5880_s1 + $0x3a0] sm:$0xff]  ;;  %v3545_v50 = vcombine.high %v128_v43, %v132_v45  ;;  %v148_v60 = vld [vmem:[%s5880_s1 + $0x3a8] sm:$0xff]  ;;  %v3552_v1 = vcombine.low %v136_v51, %v140_v53  ;;  %v50_v27 = vld [vmem:[%s5880_s1 + $0x98] sm:$0xff]  ;;  %v3482_v37 = vcombine.low %v65_v21, %v69_v23 }
  0x20   :  { %v3559_v44 = vcombine.high %v143_v38, %v147_v39  ;;  %v151_v46 = vld [vmem:[%s5880_s1 + $0x3c0] sm:$0xff]  ;;  %v3558_v49 = vcombine.low %v143_v38, %v147_v39  ;;  %v3561_v3 = vcombine.high %v144_v59, %v148_v60  ;;  %v156_v4 = vld [vmem:[%s5880_s1 + $0x3e8] sm:$0xff]  ;;  %v3560_v9 = vcombine.low %v144_v59, %v148_v60  ;;  %v73_v30 = vld [vmem:[%s5880_s1 + $0x150] sm:$0xff] }
  0x21   :  { %v155_v47 = vld [vmem:[%s5880_s1 + $0x3e0] sm:$0xff]  ;;  %v77_v31 = vld [vmem:[%s5880_s1 + $0x170] sm:$0xff]  ;;  %v58_v35 = vld [vmem:[%s5880_s1 + $0xd8] sm:$0xff] }
  0x22   :  { %866 = vmatpush1.bf16.msra.mxu0 %v3502_v56  ;;  %909 = vmatpush1.bf16.msra.mxu1 %v3504_v15  ;;  %v3567_v52 = vcombine.high %v151_v46, %v155_v47  ;;  %v3544_v56 = vcombine.low %v128_v43, %v132_v45  ;;  %v3566_v57 = vcombine.low %v151_v46, %v155_v47  ;;  %v61_v15 = vld [vmem:[%s5880_s1 + $0xf0] sm:$0xff]  ;;  %v70_v43 = vld [vmem:[%s5880_s1 + $0x138] sm:$0xff] }
  0x23   :  { %867 = vmatprep.subr.bf16.mxu0 %v3511_v58  ;;  %910 = vmatprep.subr.bf16.mxu1 %v3513_v17  ;;  %v3553_v58 = vcombine.high %v136_v51, %v140_v53  ;;  %v3474_v29 = vcombine.low %v57_v14, %v61_v15  ;;  %v81_v38 = vld [vmem:[%s5880_s1 + $0x190] sm:$0xff]  ;;  %v78_v51 = vld [vmem:[%s5880_s1 + $0x178] sm:$0xff] }
  0x24   :  { %v85_v39 = vld [vmem:[%s5880_s1 + $0x1b0] sm:$0xff]  ;;  %v86_v59 = vld [vmem:[%s5880_s1 + $0x1b8] sm:$0xff] }
  0x25   :  { %v89_v45 = vld [vmem:[%s5880_s1 + $0x1d0] sm:$0xff] }
  0x26   :  { %868 = vmatpush1.bf16.msra.mxu0 %v3510_v0  ;;  %911 = vmatpush1.bf16.msra.mxu1 %v3512_v24  ;;  %v4731_v0 = vld [vmem:[%s5881_s0] ss:$8 sps:$4 sm:$0xff]   ;;  %v93_v46 = vld [vmem:[%s5880_s1 + $0x1f0] sm:$0xff] }
  0x27   :  { %869 = vmatprep.subr.bf16.mxu0 %v3519_v2  ;;  %912 = vmatprep.subr.bf16.mxu1 %v3521_v26  ;;  %v152_v2 = vld [vmem:[%s5880_s1 + $0x3c8] sm:$0xff]  ;;  %v97_v53 = vld [vmem:[%s5880_s1 + $0x210] sm:$0xff]  ;;  %v3506_v60 = vcombine.low %v89_v45, %v93_v46 }
  0x28   :  { %v3569_v12 = vcombine.high %v152_v2, %v156_v4  ;;  %v3568_v17 = vcombine.low %v152_v2, %v156_v4  ;;  %v109_v62 = vld [vmem:[%s5880_s1 + $0x270] sm:$0xff]  ;;  %v94_v4 = vld [vmem:[%s5880_s1 + $0x1f8] sm:$0xff] }
  0x2a   :  { %870 = vmatpush1.bf16.msra.mxu0 %v3518_v8  ;;  %913 = vmatpush1.bf16.msra.mxu1 %v3520_v32  ;;  %v53_v8 = vld [vmem:[%s5880_s1 + $0xb0] sm:$0xff] }
  0x2b   :  { %871 = vmatprep.subr.bf16.mxu0 %v3527_v10  ;;  %914 = vmatprep.subr.bf16.mxu1 %v3529_v34  ;;  %v34_v10 = vld [vmem:[%s5880_s1 + $0x18] sm:$0xff]  ;;  %v3466_v20 = vcombine.low %v49_v7, %v53_v8 }
  0x2c   :  { %v3453_v24 = vcombine.high %v34_v10, %v38_v11  ;;  %v3452_v26 = vcombine.low %v34_v10, %v38_v11  ;;  %v98_v11 = vld [vmem:[%s5880_s1 + $0x218] sm:$0xff] }
  0x2e   :  { %872 = vmatpush1.bf16.msra.mxu0 %v3526_v16  ;;  %915 = vmatpush1.bf16.msra.mxu1 %v3528_v40  ;;  %v3467_v16 = vcombine.high %v49_v7, %v53_v8  ;;  %v117_v7 = vld [vmem:[%s5880_s1 + $0x2b0] sm:$0xff] }
  0x2f   :  { %873 = vmatprep.subr.bf16.mxu0 %v3535_v18  ;;  %916 = vmatprep.subr.bf16.mxu1 %v3537_v42  ;;  %v42_v18 = vld [vmem:[%s5880_s1 + $0x58] sm:$0xff] }
  0x30   :  { %v3461_v32 = vcombine.high %v42_v18, %v46_v19  ;;  %v3460_v34 = vcombine.low %v42_v18, %v46_v19  ;;  %v106_v19 = vld [vmem:[%s5880_s1 + $0x258] sm:$0xff] }
  0x32   :  { %874 = vmatpush1.bf16.msra.mxu0 %v3534_v25  ;;  %917 = vmatpush1.bf16.msra.mxu1 %v3536_v48  ;;  %v3475_v25 = vcombine.high %v57_v14, %v61_v15  ;;  %v3499_v48 = vcombine.high %v81_v38, %v85_v39  ;;  %v121_v14 = vld [vmem:[%s5880_s1 + $0x2d0] sm:$0xff] }
  0x33   :  { %875 = vmatprep.subr.bf16.mxu0 %v3543_v28  ;;  %918 = vmatprep.subr.bf16.mxu1 %v3545_v50  ;;  %v54_v28 = vld [vmem:[%s5880_s1 + $0xb8] sm:$0xff]  ;;  %v125_v15 = vld [vmem:[%s5880_s1 + $0x2f0] sm:$0xff] }
  0x34   :  { %v3469_v40 = vcombine.high %v50_v27, %v54_v28  ;;  %v3468_v42 = vcombine.low %v50_v27, %v54_v28  ;;  %v74_v50 = vld [vmem:[%s5880_s1 + $0x158] sm:$0xff] }
  0x35   :  { %v3493_v63 = vcombine.high %v74_v50, %v78_v51  ;;  %v3492_v2 = vcombine.low %v74_v50, %v78_v51  ;;  %v114_v28 = vld [vmem:[%s5880_s1 + $0x298] sm:$0xff] }
  0x36   :  { %876 = vmatpush1.bf16.msra.mxu0 %v3542_v33  ;;  %919 = vmatpush1.bf16.msra.mxu1 %v3544_v56  ;;  %v3483_v33 = vcombine.high %v65_v21, %v69_v23  ;;  %v3507_v56 = vcombine.high %v89_v45, %v93_v46  ;;  %v129_v23 = vld [vmem:[%s5880_s1 + $0x310] sm:$0xff]  ;;  %v138_v51 = vld [vmem:[%s5880_s1 + $0x358] sm:$0xff] }
  0x37   :  { %877 = vmatprep.subr.bf16.mxu0 %v3551_v36  ;;  %920 = vmatprep.subr.bf16.mxu1 %v3553_v58  ;;  %v62_v36 = vld [vmem:[%s5880_s1 + $0xf8] sm:$0xff]  ;;  %v153_v46 = vld [vmem:[%s5880_s1 + $0x3d0] sm:$0xff] }
  0x38   :  { %v3477_v47 = vcombine.high %v58_v35, %v62_v36  ;;  %v82_v58 = vld [vmem:[%s5880_s1 + $0x198] sm:$0xff] }
  0x39   :  { %v3501_v8 = vcombine.high %v82_v58, %v86_v59  ;;  %v3500_v10 = vcombine.low %v82_v58, %v86_v59  ;;  %v150_v58 = vld [vmem:[%s5880_s1 + $0x3b8] sm:$0xff]  ;;  %v3968_v59 = vld [vmem:[%s5882_s3 + $0x4] ss:$16 sps:$4 sm:$0xff]  }
  0x3a   :  { %878 = vmatpush1.bf16.msra.mxu0 %v3550_v41  ;;  %921 = vmatpush1.bf16.msra.mxu1 %v3552_v1  ;;  %v3491_v41 = vcombine.high %v73_v30, %v77_v31  ;;  %v3515_v1 = vcombine.high %v97_v53, %v101_v54 }
  0x3b   :  { %879 = vmatprep.subr.bf16.mxu0 %v3559_v44  ;;  %922 = vmatprep.subr.bf16.mxu1 %v3561_v3  ;;  %v3490_v44 = vcombine.low %v73_v30, %v77_v31  ;;  %v90_v3 = vld [vmem:[%s5880_s1 + $0x1d8] sm:$0xff]  ;;  %v3538_v30 = vcombine.low %v121_v14, %v125_v15  ;;  %v137_v31 = vld [vmem:[%s5880_s1 + $0x350] sm:$0xff] }
  0x3c   :  { %v3508_v18 = vcombine.low %v90_v3, %v94_v4 }
  0x3e   :  { %880 = vmatpush1.bf16.msra.mxu0 %v3558_v49  ;;  %923 = vmatpush1.bf16.msra.mxu1 %v3560_v9  ;;  %v3476_v49 = vcombine.low %v58_v35, %v62_v36  ;;  %v122_v36 = vld [vmem:[%s5880_s1 + $0x2d8] sm:$0xff] }
  0x3f   :  { %881 = vmatprep.subr.bf16.mxu0 %v3567_v52  ;;  %924 = vmatprep.subr.bf16.mxu1 %v3569_v12  ;;  %v3498_v52 = vcombine.low %v81_v38, %v85_v39  ;;  %v102_v12 = vld [vmem:[%s5880_s1 + $0x238] sm:$0xff]  ;;  %v145_v39 = vld [vmem:[%s5880_s1 + $0x390] sm:$0xff] }
  0x40   :  { %v3516_v27 = vcombine.low %v98_v11, %v102_v12 }
  0x42   :  { %882 = vmatpush1.bf16.msra.mxu0 %v3566_v57  ;;  %925 = vmatpush1.bf16.msra.mxu1 %v3568_v17 }
  0x43   :  { %937 = vmatprep.subr.bf16.mxu0 %v3451_v61  ;;  %980 = vmatprep.subr.bf16.mxu1 %v3453_v24  ;;  %v105_v61 = vld [vmem:[%s5880_s1 + $0x250] sm:$0xff] }
  0x44   :  { %v3523_v9 = vcombine.high %v105_v61, %v109_v62  ;;  %v133_v24 = vld [vmem:[%s5880_s1 + $0x330] sm:$0xff] }
  0x45   :  { %884 = vmatmul.mubr.bf16.vlgmr.msra.gmra.mrb[0].mxu0 %v4731_v0  ;;  %927 = vmatmul.mubr.bf16.vlgmr.msra.gmra.mrb[0].mxu1 %v4731_v0  ;;  %v3546_v38 = vcombine.low %v129_v23, %v133_v24 }
  0x46   :  { %938 = vmatpush1.bf16.msra.mxu0 %v3450_v5  ;;  %969 = vmatprep.mubr.bf16.mxu0 %v4562_v22  ;;  %v3514_v5 = vcombine.low %v97_v53, %v101_v54 }
  0x47   :  { %939 = vmatprep.subr.bf16.mxu0 %v3459_v6  ;;  %981 = vmatpush1.bf16.msra.mxu1 %v3452_v26  ;;  %v113_v6 = vld [vmem:[%s5880_s1 + $0x290] sm:$0xff]  ;;  %v3539_v26 = vcombine.high %v121_v14, %v125_v15  ;;  %v3977_v14 = vld [vmem:[%s5882_s3 + $0x2c] ss:$16 sps:$4 sm:$0xff]  }
  0x48   :  { %1012 = vmatprep.mubr.bf16.mxu1 %v4562_v22  ;;  %982 = vmatprep.subr.bf16.mxu1 %v3461_v32  ;;  %v66_v22 = vld [vmem:[%s5880_s1 + $0x118] sm:$0xff]  ;;  %v3531_v17 = vcombine.high %v113_v6, %v117_v7  ;;  %v3530_v21 = vcombine.low %v113_v6, %v117_v7  ;;  %v141_v32 = vld [vmem:[%s5880_s1 + $0x370] sm:$0xff] }
  0x49   :  { %v3485_v55 = vcombine.high %v66_v22, %v70_v43  ;;  %v3484_v57 = vcombine.low %v66_v22, %v70_v43  ;;  %v130_v43 = vld [vmem:[%s5880_s1 + $0x318] sm:$0xff]  ;;  %v3554_v45 = vcombine.low %v137_v31, %v141_v32  ;;  %v3980_v7 = vld [vmem:[%s5882_s3 + $0x44] ss:$16 sps:$4 sm:$0xff]   ;;  %v3984_v15 = vld [vmem:[%s5882_s3 + $0x60] ss:$16 sps:$4 sm:$0xff]  }
  0x4a   :  { %940 = vmatpush1.bf16.msra.mxu0 %v3458_v13  ;;  %v3522_v13 = vcombine.low %v105_v61, %v109_v62  ;;  %v3966_v62 = vld [vmem:[%s5882_s3] ss:$16 sps:$4 sm:$0xff]  }
  0x4b   :  { %941 = vmatprep.subr.bf16.mxu0 %v3467_v16  ;;  %983 = vmatpush1.bf16.msra.mxu1 %v3460_v34  ;;  %v3509_v16 = vcombine.high %v90_v3, %v94_v4  ;;  %v3547_v34 = vcombine.high %v129_v23, %v133_v24  ;;  %v3974_v3 = vld [vmem:[%s5882_s3 + $0x24] ss:$16 sps:$4 sm:$0xff]   ;;  %v3996_v23 = vld [vmem:[%s5882_s3 + $0xa0] ss:$16 sps:$4 sm:$0xff]  }
  0x4c   :  { %984 = vmatprep.subr.bf16.mxu1 %v3469_v40  ;;  %v149_v40 = vld [vmem:[%s5880_s1 + $0x3b0] sm:$0xff] }
  0x4d   :  { %v3562_v53 = vcombine.low %v145_v39, %v149_v40  ;;  %v4004_v24 = vld [vmem:[%s5882_s3 + $0xc4] ss:$16 sps:$4 sm:$0xff]  }
  0x4e   :  { %942 = vmatpush1.bf16.msra.mxu0 %v3466_v20  ;;  %v110_v20 = vld [vmem:[%s5880_s1 + $0x278] sm:$0xff] }
  0x4f   :  { %943 = vmatprep.subr.bf16.mxu0 %v3475_v25  ;;  %985 = vmatpush1.bf16.msra.mxu1 %v3468_v42  ;;  %v3517_v25 = vcombine.high %v98_v11, %v102_v12  ;;  %v3524_v35 = vcombine.low %v106_v19, %v110_v20  ;;  %v3555_v42 = vcombine.high %v137_v31, %v141_v32  ;;  %v3986_v12 = vld [vmem:[%s5882_s3 + $0x64] ss:$16 sps:$4 sm:$0xff]   ;;  %v4008_v31 = vld [vmem:[%s5882_s3 + $0xe0] ss:$16 sps:$4 sm:$0xff]  }
  0x50   :  { %986 = vmatprep.subr.bf16.mxu1 %v3477_v47  ;;  %v157_v47 = vld [vmem:[%s5880_s1 + $0x3f0] sm:$0xff] }
  0x51   :  { %v4016_v32 = vld [vmem:[%s5882_s3 + $0x104] ss:$16 sps:$4 sm:$0xff]  }
  0x52   :  { %944 = vmatpush1.bf16.msra.mxu0 %v3474_v29  ;;  %v118_v29 = vld [vmem:[%s5880_s1 + $0x2b8] sm:$0xff] }
  0x53   :  { %945 = vmatprep.subr.bf16.mxu0 %v3483_v33  ;;  %987 = vmatpush1.bf16.msra.mxu1 %v3476_v49  ;;  %v3525_v33 = vcombine.high %v106_v19, %v110_v20  ;;  %v3532_v22 = vcombine.low %v114_v28, %v118_v29  ;;  %v3563_v49 = vcombine.high %v145_v39, %v149_v40  ;;  %v3990_v19 = vld [vmem:[%s5882_s3 + $0x80] ss:$16 sps:$4 sm:$0xff]   ;;  %v3981_v20 = vld [vmem:[%s5882_s3 + $0x48] ss:$16 sps:$4 sm:$0xff]   ;;  %v4028_v40 = vld [vmem:[%s5882_s3 + $0x144] ss:$16 sps:$4 sm:$0xff]  }
  0x54   :  { %988 = vmatprep.subr.bf16.mxu1 %v3485_v55  ;;  %v3571_v55 = vcombine.high %v153_v46, %v157_v47  ;;  %v4020_v39 = vld [vmem:[%s5882_s3 + $0x120] ss:$16 sps:$4 sm:$0xff]  }
  0x56   :  { %946 = vmatpush1.bf16.msra.mxu0 %v3482_v37  ;;  %v126_v37 = vld [vmem:[%s5880_s1 + $0x2f8] sm:$0xff] }
  0x57   :  { %947 = vmatprep.subr.bf16.mxu0 %v3491_v41  ;;  %989 = vmatpush1.bf16.msra.mxu1 %v3484_v57  ;;  %v3533_v41 = vcombine.high %v114_v28, %v118_v29  ;;  %v3540_v50 = vcombine.low %v122_v36, %v126_v37  ;;  %v146_v57 = vld [vmem:[%s5880_s1 + $0x398] sm:$0xff]  ;;  %v4010_v28 = vld [vmem:[%s5882_s3 + $0xe4] ss:$16 sps:$4 sm:$0xff]  }
  0x58   :  { %990 = vmatprep.subr.bf16.mxu1 %v3493_v63  ;;  %v3565_v4 = vcombine.high %v146_v57, %v150_v58  ;;  %v3564_v6 = vcombine.low %v146_v57, %v150_v58  ;;  %v3993_v29 = vld [vmem:[%s5882_s3 + $0x88] ss:$16 sps:$4 sm:$0xff]   ;;  %v4043_v57 = vld [vmem:[%s5882_s3 + $0x18c] ss:$16 sps:$4 sm:$0xff]   ;;  %v4050_v58 = vld [vmem:[%s5882_s3 + $0x1c0] ss:$16 sps:$4 sm:$0xff]  }
  0x5a   :  { %948 = vmatpush1.bf16.msra.mxu0 %v3490_v44  ;;  %v134_v44 = vld [vmem:[%s5880_s1 + $0x338] sm:$0xff] }
  0x5b   :  { %949 = vmatprep.subr.bf16.mxu0 %v3499_v48  ;;  %991 = vmatpush1.bf16.msra.mxu1 %v3492_v2  ;;  %v3541_v48 = vcombine.high %v122_v36, %v126_v37  ;;  %v3549_v54 = vcombine.high %v130_v43, %v134_v44  ;;  %v158_v2 = vld [vmem:[%s5880_s1 + $0x3f8] sm:$0xff]  ;;  %v4022_v36 = vld [vmem:[%s5882_s3 + $0x124] ss:$16 sps:$4 sm:$0xff]  }
  0x5c   :  { %992 = vmatprep.subr.bf16.mxu1 %v3501_v8  ;;  %v4005_v37 = vld [vmem:[%s5882_s3 + $0xc8] ss:$16 sps:$4 sm:$0xff]  }
  0x5e   :  { %950 = vmatpush1.bf16.msra.mxu0 %v3498_v52  ;;  %v142_v52 = vld [vmem:[%s5880_s1 + $0x378] sm:$0xff] }
  0x5f   :  { %951 = vmatprep.subr.bf16.mxu0 %v3507_v56  ;;  %993 = vmatpush1.bf16.msra.mxu1 %v3500_v10  ;;  %v3548_v56 = vcombine.low %v130_v43, %v134_v44  ;;  %v3557_v61 = vcombine.high %v138_v51, %v142_v52  ;;  %v3556_v63 = vcombine.low %v138_v51, %v142_v52  ;;  %v3978_v10 = vld [vmem:[%s5882_s3 + $0x40] ss:$16 sps:$4 sm:$0xff]   ;;  %v4034_v43 = vld [vmem:[%s5882_s3 + $0x164] ss:$16 sps:$4 sm:$0xff]   ;;  %v4017_v44 = vld [vmem:[%s5882_s3 + $0x108] ss:$16 sps:$4 sm:$0xff]  }
  0x60   :  { %994 = vmatprep.subr.bf16.mxu1 %v3509_v16  ;;  %v3992_v16 = vld [vmem:[%s5882_s3 + $0x84] ss:$16 sps:$4 sm:$0xff]   ;;  %v4029_v52 = vld [vmem:[%s5882_s3 + $0x148] ss:$16 sps:$4 sm:$0xff]  }
  0x61   :  { %v4046_v51 = vld [vmem:[%s5882_s3 + $0x1a4] ss:$16 sps:$4 sm:$0xff]  }
  0x62   :  { %952 = vmatpush1.bf16.msra.mxu0 %v3506_v60  ;;  %v3570_v60 = vcombine.low %v153_v46, %v157_v47  ;;  %v4032_v46 = vld [vmem:[%s5882_s3 + $0x160] ss:$16 sps:$4 sm:$0xff]   ;;  %v4040_v47 = vld [vmem:[%s5882_s3 + $0x184] ss:$16 sps:$4 sm:$0xff]  }
  0x63   :  { %953 = vmatprep.subr.bf16.mxu0 %v3515_v1  ;;  %995 = vmatpush1.bf16.msra.mxu1 %v3508_v18  ;;  %v154_v1 = vld [vmem:[%s5880_s1 + $0x3d8] sm:$0xff] }
  0x64   :  { %996 = vmatprep.subr.bf16.mxu1 %v3517_v25  ;;  %v3573_v8 = vcombine.high %v154_v1, %v158_v2  ;;  %v3572_v11 = vcombine.low %v154_v1, %v158_v2  ;;  %v3983_v18 = vld [vmem:[%s5882_s3 + $0x4c] ss:$16 sps:$4 sm:$0xff]   ;;  %v3987_v25 = vld [vmem:[%s5882_s3 + $0x68] ss:$16 sps:$4 sm:$0xff]  }
  0x65   :  { %v4047_v1 = vld [vmem:[%s5882_s3 + $0x1a8] ss:$16 sps:$4 sm:$0xff]   ;;  %v4055_v2 = vld [vmem:[%s5882_s3 + $0x1cc] ss:$16 sps:$4 sm:$0xff]  }
  0x66   :  { %954 = vmatpush1.bf16.msra.mxu0 %v3514_v5  ;;  %v3972_v5 = vld [vmem:[%s5882_s3 + $0x20] ss:$16 sps:$4 sm:$0xff]  }
  0x67   :  { %955 = vmatprep.subr.bf16.mxu0 %v3523_v9  ;;  %997 = vmatpush1.bf16.msra.mxu1 %v3516_v27  ;;  %v3971_v9 = vld [vmem:[%s5882_s3 + $0xc] ss:$16 sps:$4 sm:$0xff]   ;;  %v4002_v27 = vld [vmem:[%s5882_s3 + $0xc0] ss:$16 sps:$4 sm:$0xff]  }
  0x68   :  { %998 = vmatprep.subr.bf16.mxu1 %v3525_v33  ;;  %v3999_v33 = vld [vmem:[%s5882_s3 + $0xa8] ss:$16 sps:$4 sm:$0xff]  }
  0x6a   :  { %956 = vmatpush1.bf16.msra.mxu0 %v3522_v13  ;;  %v3969_v13 = vld [vmem:[%s5882_s3 + $0x8] ss:$16 sps:$4 sm:$0xff]  }
  0x6b   :  { %957 = vmatprep.subr.bf16.mxu0 %v3531_v17  ;;  %999 = vmatpush1.bf16.msra.mxu1 %v3524_v35  ;;  %v3975_v17 = vld [vmem:[%s5882_s3 + $0x28] ss:$16 sps:$4 sm:$0xff]   ;;  %v4014_v35 = vld [vmem:[%s5882_s3 + $0x100] ss:$16 sps:$4 sm:$0xff]  }
  0x6c   :  { %1000 = vmatprep.subr.bf16.mxu1 %v3533_v41  ;;  %v4011_v41 = vld [vmem:[%s5882_s3 + $0xe8] ss:$16 sps:$4 sm:$0xff]  }
  0x6e   :  { %958 = vmatpush1.bf16.msra.mxu0 %v3530_v21  ;;  %v3989_v21 = vld [vmem:[%s5882_s3 + $0x6c] ss:$16 sps:$4 sm:$0xff]  }
  0x6f   :  { %959 = vmatprep.subr.bf16.mxu0 %v3539_v26  ;;  %1001 = vmatpush1.bf16.msra.mxu1 %v3532_v22  ;;  %v3995_v26 = vld [vmem:[%s5882_s3 + $0x8c] ss:$16 sps:$4 sm:$0xff]   ;;  %v4026_v22 = vld [vmem:[%s5882_s3 + $0x140] ss:$16 sps:$4 sm:$0xff]  }
  0x70   :  { %1002 = vmatprep.subr.bf16.mxu1 %v3541_v48  ;;  %v4023_v48 = vld [vmem:[%s5882_s3 + $0x128] ss:$16 sps:$4 sm:$0xff]  }
  0x72   :  { %960 = vmatpush1.bf16.msra.mxu0 %v3538_v30  ;;  %v4001_v30 = vld [vmem:[%s5882_s3 + $0xac] ss:$16 sps:$4 sm:$0xff]  }
  0x73   :  { %961 = vmatprep.subr.bf16.mxu0 %v3547_v34  ;;  %1003 = vmatpush1.bf16.msra.mxu1 %v3540_v50  ;;  %v4007_v34 = vld [vmem:[%s5882_s3 + $0xcc] ss:$16 sps:$4 sm:$0xff]   ;;  %v4038_v50 = vld [vmem:[%s5882_s3 + $0x180] ss:$16 sps:$4 sm:$0xff]  }
  0x74   :  { %1004 = vmatprep.subr.bf16.mxu1 %v3549_v54  ;;  %v4044_v54 = vld [vmem:[%s5882_s3 + $0x1a0] ss:$16 sps:$4 sm:$0xff]  }
  0x76   :  { %962 = vmatpush1.bf16.msra.mxu0 %v3546_v38  ;;  %v4013_v38 = vld [vmem:[%s5882_s3 + $0xec] ss:$16 sps:$4 sm:$0xff]  }
  0x77   :  { %963 = vmatprep.subr.bf16.mxu0 %v3555_v42  ;;  %1005 = vmatpush1.bf16.msra.mxu1 %v3548_v56  ;;  %v4019_v42 = vld [vmem:[%s5882_s3 + $0x10c] ss:$16 sps:$4 sm:$0xff]   ;;  %v4035_v56 = vld [vmem:[%s5882_s3 + $0x168] ss:$16 sps:$4 sm:$0xff]  }
  0x78   :  { %1006 = vmatprep.subr.bf16.mxu1 %v3557_v61  ;;  %v4049_v61 = vld [vmem:[%s5882_s3 + $0x1ac] ss:$16 sps:$4 sm:$0xff]  }
  0x7a   :  { %964 = vmatpush1.bf16.msra.mxu0 %v3554_v45  ;;  %v4025_v45 = vld [vmem:[%s5882_s3 + $0x12c] ss:$16 sps:$4 sm:$0xff]  }
  0x7b   :  { %965 = vmatprep.subr.bf16.mxu0 %v3563_v49  ;;  %1007 = vmatpush1.bf16.msra.mxu1 %v3556_v63  ;;  %v4031_v49 = vld [vmem:[%s5882_s3 + $0x14c] ss:$16 sps:$4 sm:$0xff]   ;;  %v4064_v63 = vld [vmem:[%s5882_s3 + $0x204] ss:$16 sps:$4 sm:$0xff]  }
  0x7c   :  { %1008 = vmatprep.subr.bf16.mxu1 %v3565_v4  ;;  %v4061_v4 = vld [vmem:[%s5882_s3 + $0x1ec] ss:$16 sps:$4 sm:$0xff]  }
  0x7e   :  { %966 = vmatpush1.bf16.msra.mxu0 %v3562_v53  ;;  %v4037_v53 = vld [vmem:[%s5882_s3 + $0x16c] ss:$16 sps:$4 sm:$0xff]  }
  0x7f   :  { %967 = vmatprep.subr.bf16.mxu0 %v3571_v55  ;;  %1009 = vmatpush1.bf16.msra.mxu1 %v3564_v6  ;;  %v4052_v55 = vld [vmem:[%s5882_s3 + $0x1c4] ss:$16 sps:$4 sm:$0xff]   ;;  %v4067_v6 = vld [vmem:[%s5882_s3 + $0x20c] ss:$16 sps:$4 sm:$0xff]  }
  0x80   :  { %1010 = vmatprep.subr.bf16.mxu1 %v3573_v8 }
  0x82   :  { %968 = vmatpush1.bf16.msra.mxu0 %v3570_v60  ;;  %v4041_v60 = vld [vmem:[%s5882_s3 + $0x188] ss:$16 sps:$4 sm:$0xff]  }
  0x83   :  { %2685 = vmatprep.subr.bf16.mxu0 %v3968_v59  ;;  %1011 = vmatpush1.bf16.msra.mxu1 %v3572_v11  ;;  %v4058_v59 = vld [vmem:[%s5882_s3 + $0x1e4] ss:$16 sps:$4 sm:$0xff]  }
  0x84   :  { %2857 = vmatprep.subr.bf16.mxu1 %v3971_v9 }
  0x85   :  { %970 = vmatmul.mubr.bf16.vlgmr.msra.gmra.mrb[4].mxu0 %v4731_v0 }
  0x86   :  { %2686 = vmatpush1.bf16.msra.mxu0 %v3966_v62  ;;  %1013 = vmatmul.mubr.bf16.vlgmr.msra.gmra.mrb[4].mxu1 %v4731_v0  ;;  %v3998_v0 = vld [vmem:[%s5882_s3 + $0xa4] ss:$16 sps:$4 sm:$0xff]   ;;  %v4056_v62 = vld [vmem:[%s5882_s3 + $0x1e0] ss:$16 sps:$4 sm:$0xff]  }
  0x87   :  { %2687 = vmatprep.subr.bf16.mxu0 %v3974_v3  ;;  %2858 = vmatpush1.bf16.msra.mxu1 %v3969_v13  ;;  %v4053_v3 = vld [vmem:[%s5882_s3 + $0x1c8] ss:$16 sps:$4 sm:$0xff]  }
  0x88   :  { %2859 = vmatprep.subr.bf16.mxu1 %v3977_v14 }
  0x8a   :  { %2688 = vmatpush1.bf16.msra.mxu0 %v3972_v5  ;;  %v4059_v5 = vld [vmem:[%s5882_s3 + $0x1e8] ss:$16 sps:$4 sm:$0xff]  }
  0x8b   :  { %2689 = vmatprep.subr.bf16.mxu0 %v3980_v7  ;;  %2860 = vmatpush1.bf16.msra.mxu1 %v3975_v17  ;;  %v161_v7 = vlaneseq }
  0x8c   :  { %2861 = vmatprep.subr.bf16.mxu1 %v3983_v18 }
  0x8d   :  { %v5123_v8 = vshrl.u32 %v161_v7, 7  ;;  %v4079_v7 = vld [vmem:[%s5882_s3 + $0x24c] ss:$16 sps:$4 sm:$0xff]  }
  0x8e   :  { %2690 = vmatpush1.bf16.msra.mxu0 %v3978_v10  ;;  %v5129_v10 = vld [vmem:[%s5883_s2] sm:$0xff] }
  0x8f   :  { %2691 = vmatprep.subr.bf16.mxu0 %v3986_v12  ;;  %2862 = vmatpush1.bf16.msra.mxu1 %v3981_v20  ;;  %v163_v9 = vsub.s32 0, %v5123_v8  ;;  %v167_v11 = vsub.s32 1, %v5123_v8 }
  0x90   :  { %2863 = vmatprep.subr.bf16.mxu1 %v3989_v21 }
  0x91   :  { %v164_v12 = vrot.slane %v5129_v10, %v163_v9  ;;  %v168_v13 = vrot.slane %v5129_v10, %v167_v11 }
  0x92   :  { %2692 = vmatpush1.bf16.msra.mxu0 %v3984_v15 }
  0x93   :  { %2693 = vmatprep.subr.bf16.mxu0 %v3992_v16  ;;  %2864 = vmatpush1.bf16.msra.mxu1 %v3987_v25 }
  0x94   :  { %2865 = vmatprep.subr.bf16.mxu1 %v3995_v26  ;;  %v175_v26 = vsub.s32 3, %v5123_v8 }
  0x96   :  { %2694 = vmatpush1.bf16.msra.mxu0 %v3990_v19 }
  0x97   :  { %2695 = vmatprep.subr.bf16.mxu0 %v3998_v0  ;;  %2866 = vmatpush1.bf16.msra.mxu1 %v3993_v29  ;;  %v176_v29 = vrot.slane %v5129_v10, %v175_v26 }
  0x98   :  { %2867 = vmatprep.subr.bf16.mxu1 %v4001_v30 }
  0x9a   :  { %2696 = vmatpush1.bf16.msra.mxu0 %v3996_v23 }
  0x9b   :  { %2697 = vmatprep.subr.bf16.mxu0 %v4004_v24  ;;  %2868 = vmatpush1.bf16.msra.mxu1 %v3999_v33  ;;  %v171_v24 = vsub.s32 2, %v5123_v8 }
  0x9c   :  { %2869 = vmatprep.subr.bf16.mxu1 %v4007_v34 }
  0x9e   :  { %2698 = vmatpush1.bf16.msra.mxu0 %v4002_v27 }
  0x9f   :  { %2699 = vmatprep.subr.bf16.mxu0 %v4010_v28  ;;  %2870 = vmatpush1.bf16.msra.mxu1 %v4005_v37  ;;  %v172_v28 = vrot.slane %v5129_v10, %v171_v24 }
  0xa0   :  { %2871 = vmatprep.subr.bf16.mxu1 %v4013_v38 }
  0xa2   :  { %2700 = vmatpush1.bf16.msra.mxu0 %v4008_v31 }
  0xa3   :  { %2701 = vmatprep.subr.bf16.mxu0 %v4016_v32  ;;  %2872 = vmatpush1.bf16.msra.mxu1 %v4011_v41 }
  0xa4   :  { %2873 = vmatprep.subr.bf16.mxu1 %v4019_v42 }
  0xa6   :  { %2702 = vmatpush1.bf16.msra.mxu0 %v4014_v35 }
  0xa7   :  { %2703 = vmatprep.subr.bf16.mxu0 %v4022_v36  ;;  %2874 = vmatpush1.bf16.msra.mxu1 %v4017_v44 }
  0xa8   :  { %2875 = vmatprep.subr.bf16.mxu1 %v4025_v45 }
  0xaa   :  { %2704 = vmatpush1.bf16.msra.mxu0 %v4020_v39 }
  0xab   :  { %2705 = vmatprep.subr.bf16.mxu0 %v4028_v40  ;;  %2876 = vmatpush1.bf16.msra.mxu1 %v4023_v48 }
  0xac   :  { %2877 = vmatprep.subr.bf16.mxu1 %v4031_v49 }
  0xae   :  { %2706 = vmatpush1.bf16.msra.mxu0 %v4026_v22 }
  0xaf   :  { %2707 = vmatprep.subr.bf16.mxu0 %v4034_v43  ;;  %2878 = vmatpush1.bf16.msra.mxu1 %v4029_v52 }
  0xb0   :  { %2879 = vmatprep.subr.bf16.mxu1 %v4037_v53 }
  0xb2   :  { %2708 = vmatpush1.bf16.msra.mxu0 %v4032_v46 }
  0xb3   :  { %2709 = vmatprep.subr.bf16.mxu0 %v4040_v47  ;;  %2880 = vmatpush1.bf16.msra.mxu1 %v4035_v56 }
  0xb4   :  { %2881 = vmatprep.subr.bf16.mxu1 %v4043_v57 }
  0xb6   :  { %2710 = vmatpush1.bf16.msra.mxu0 %v4038_v50 }
  0xb7   :  { %2711 = vmatprep.subr.bf16.mxu0 %v4046_v51  ;;  %2882 = vmatpush1.bf16.msra.mxu1 %v4041_v60  ;;  %v4062_v60 = vld [vmem:[%s5882_s3 + $0x200] ss:$16 sps:$4 sm:$0xff]  }
  0xb8   :  { %2883 = vmatprep.subr.bf16.mxu1 %v4049_v61  ;;  %v4065_v61 = vld [vmem:[%s5882_s3 + $0x208] ss:$16 sps:$4 sm:$0xff]  }
  0xba   :  { %2712 = vmatpush1.bf16.msra.mxu0 %v4044_v54 }
  0xbb   :  { %2713 = vmatprep.subr.bf16.mxu0 %v4052_v55  ;;  %2884 = vmatpush1.bf16.msra.mxu1 %v4047_v1  ;;  %v4073_v1 = vld [vmem:[%s5882_s3 + $0x22c] ss:$16 sps:$4 sm:$0xff]  }
  0xbc   :  { %2885 = vmatprep.subr.bf16.mxu1 %v4055_v2 }
  0xbe   :  { %2714 = vmatpush1.bf16.msra.mxu0 %v4050_v58 }
  0xbf   :  { %2715 = vmatprep.subr.bf16.mxu0 %v4058_v59  ;;  %2886 = vmatpush1.bf16.msra.mxu1 %v4053_v3 }
  0xc0   :  { %2887 = vmatprep.subr.bf16.mxu1 %v4061_v4  ;;  %v4068_v4 = vld [vmem:[%s5882_s3 + $0x220] ss:$16 sps:$4 sm:$0xff]  }
  0xc2   :  { %2716 = vmatpush1.bf16.msra.mxu0 %v4056_v62 }
  0xc3   :  { %2728 = vmatprep.subr.bf16.mxu0 %v4064_v63  ;;  %2888 = vmatpush1.bf16.msra.mxu1 %v4059_v5  ;;  %v4070_v63 = vld [vmem:[%s5882_s3 + $0x224] ss:$16 sps:$4 sm:$0xff]   ;;  %v4071_v5 = vld [vmem:[%s5882_s3 + $0x228] ss:$16 sps:$4 sm:$0xff]  }
  0xc4   :  { %2900 = vmatprep.subr.bf16.mxu1 %v4067_v6  ;;  %v4076_v6 = vld [vmem:[%s5882_s3 + $0x244] ss:$16 sps:$4 sm:$0xff]  }
 0x118   :  { %v885_v14 = vpop.f32.mrb[0].mxu0  ;;  %v928_v30 = vpop.f32.mrb[0].mxu1 }
 0x119   :  { %v886_v15 = vadd.f32 %v885_v14, %v164_v12  ;;  %v887_v16 = vpop.f32.mrb[1].mxu0  ;;  %v929_v31 = vadd.f32 %v928_v30, %v172_v28  ;;  %v930_v32 = vpop.f32.mrb[1].mxu1  ;;  %v4082_v14 = vld [vmem:[%s5882_s3 + $0x264] ss:$16 sps:$4 sm:$0xff]  }
 0x11a   :  { %v888_v17 = vadd.f32 %v887_v16, %v168_v13  ;;  %v889_v18 = vpop.f32.mrb[2].mxu0  ;;  %v931_v33 = vadd.f32 %v930_v32, %v176_v29  ;;  %v932_v34 = vpop.f32.mrb[2].mxu1  ;;  %v4094_v30 = vld [vmem:[%s5882_s3 + $0x2a4] ss:$16 sps:$4 sm:$0xff]   ;;  %v4092_v32 = vld [vmem:[%s5882_s3 + $0x2a0] ss:$16 sps:$4 sm:$0xff]  }
 0x11b   :  { %v3574_v19 = vmul.f32 -1.442695, %v886_v15  ;;  %v890_v0 = vadd.f32 %v889_v18, %v164_v12  ;;  %v891_v20 = vpop.f32.mrb[3].mxu0  ;;  %v3576_v35 = vmul.f32 -1.442695, %v929_v31  ;;  %v933_v36 = vadd.f32 %v932_v34, %v172_v28  ;;  %v934_v37 = vpop.f32.mrb[3].mxu1 }
 0x11c   :  { %v3575_v21 = vmul.f32 -1.442695, %v888_v17  ;;  %v892_v23 = vadd.f32 %v891_v20, %v168_v13  ;;  %v3577_v39 = vmul.f32 -1.442695, %v931_v33  ;;  %v935_v40 = vadd.f32 %v934_v37, %v176_v29  ;;  %v4074_v12 = vld [vmem:[%s5882_s3 + $0x240] ss:$16 sps:$4 sm:$0xff]  }
 0x11d   :  { %4382 = vpow2.f32 %v3574_v19  ;;  %v3582_v25 = vmul.f32 -1.442695, %v890_v0  ;;  %v3584_v46 = vmul.f32 -1.442695, %v933_v36  ;;  %v4077_v13 = vld [vmem:[%s5882_s3 + $0x248] ss:$16 sps:$4 sm:$0xff]  }
 0x11e   :  { %4384 = vpow2.f32 %v3575_v21  ;;  %v3583_v27 = vmul.f32 -1.442695, %v892_v23  ;;  %v3585_v48 = vmul.f32 -1.442695, %v935_v40  ;;  %v4085_v15 = vld [vmem:[%s5882_s3 + $0x26c] ss:$16 sps:$4 sm:$0xff]  }
 0x11f   :  { %4386 = vpow2.f32 %v3582_v25  ;;  %v4080_v18 = vld [vmem:[%s5882_s3 + $0x260] ss:$16 sps:$4 sm:$0xff]   ;;  %v4083_v19 = vld [vmem:[%s5882_s3 + $0x268] ss:$16 sps:$4 sm:$0xff]   ;;  %v4088_v20 = vld [vmem:[%s5882_s3 + $0x284] ss:$16 sps:$4 sm:$0xff]  }
 0x120   :  { %4388 = vpow2.f32 %v3583_v27  ;;  %v4091_v21 = vld [vmem:[%s5882_s3 + $0x28c] ss:$16 sps:$4 sm:$0xff]   ;;  %v4086_v28 = vld [vmem:[%s5882_s3 + $0x280] ss:$16 sps:$4 sm:$0xff]   ;;  %v4089_v29 = vld [vmem:[%s5882_s3 + $0x288] ss:$16 sps:$4 sm:$0xff]  }
 0x121   :  { %4390 = vpow2.f32 %v3576_v35  ;;  %v4097_v31 = vld [vmem:[%s5882_s3 + $0x2ac] ss:$16 sps:$4 sm:$0xff]   ;;  %v4095_v33 = vld [vmem:[%s5882_s3 + $0x2a8] ss:$16 sps:$4 sm:$0xff]   ;;  %v4100_v34 = vld [vmem:[%s5882_s3 + $0x2c4] ss:$16 sps:$4 sm:$0xff]  }
 0x122   :  { %4392 = vpow2.f32 %v3577_v39  ;;  %v4103_v35 = vld [vmem:[%s5882_s3 + $0x2cc] ss:$16 sps:$4 sm:$0xff]   ;;  %v4098_v36 = vld [vmem:[%s5882_s3 + $0x2c0] ss:$16 sps:$4 sm:$0xff]   ;;  %v4101_v37 = vld [vmem:[%s5882_s3 + $0x2c8] ss:$16 sps:$4 sm:$0xff]  }
 0x123   :  { %v4109_v39 = vld [vmem:[%s5882_s3 + $0x2ec] ss:$16 sps:$4 sm:$0xff]   ;;  %v179_v40 = vsub.s32 4, %v5123_v8 }
 0x127   :  { %v4383_v38 = vpop.eup %4382 }
 0x128   :  { %v4385_v41 = vpop.eup %4384  ;;  %v1071_v42 = vadd.f32 1.0, %v4383_v38  ;;  %v4106_v38 = vld [vmem:[%s5882_s3 + $0x2e4] ss:$16 sps:$4 sm:$0xff]  }
 0x129   :  { %v4387_v22 = vpop.eup %4386  ;;  %v1072_v43 = vadd.f32 1.0, %v4385_v41  ;;  %v183_v41 = vsub.s32 5, %v5123_v8 }
 0x12a   :  { %v4389_v44 = vpop.eup %4388  ;;  %4394 = vrcp.f32 %v1071_v42  ;;  %v1079_v45 = vadd.f32 1.0, %v4387_v22  ;;  %v4104_v42 = vld [vmem:[%s5882_s3 + $0x2e0] ss:$16 sps:$4 sm:$0xff]   ;;  %v4107_v22 = vld [vmem:[%s5882_s3 + $0x2e8] ss:$16 sps:$4 sm:$0xff]  }
 0x12b   :  { %4396 = vrcp.f32 %v1072_v43  ;;  %v1080_v47 = vadd.f32 1.0, %v4389_v44  ;;  %v4391_v49 = vpop.eup %4390  ;;  %v4112_v43 = vld [vmem:[%s5882_s3 + $0x304] ss:$16 sps:$4 sm:$0xff]   ;;  %v4115_v44 = vld [vmem:[%s5882_s3 + $0x30c] ss:$16 sps:$4 sm:$0xff]  }
 0x12c   :  { %4398 = vrcp.f32 %v1079_v45  ;;  %v4393_v50 = vpop.eup %4392  ;;  %v1073_v53 = vadd.f32 1.0, %v4391_v49  ;;  %v180_v45 = vrot.slane %v5129_v10, %v179_v40 }
 0x12d   :  { %4400 = vrcp.f32 %v1080_v47  ;;  %v1074_v55 = vadd.f32 1.0, %v4393_v50  ;;  %v4110_v47 = vld [vmem:[%s5882_s3 + $0x300] ss:$16 sps:$4 sm:$0xff]   ;;  %v4118_v50 = vld [vmem:[%s5882_s3 + $0x324] ss:$16 sps:$4 sm:$0xff]  }
 0x12e   :  { %4402 = vpow2.f32 %v3584_v46  ;;  %v184_v46 = vrot.slane %v5129_v10, %v183_v41 }
 0x12f   :  { %4404 = vpow2.f32 %v3585_v48  ;;  %v4113_v48 = vld [vmem:[%s5882_s3 + $0x308] ss:$16 sps:$4 sm:$0xff]  }
 0x130   :  { %4406 = vrcp.f32 %v1073_v53 }
 0x131   :  { %4408 = vrcp.f32 %v1074_v55 }
 0x134   :  { %v4395_v51 = vpop.eup %4394 }
 0x135   :  { %v4397_v52 = vpop.eup %4396 }
 0x136   :  { %v4399_v54 = vpop.eup %4398 }
 0x137   :  { %v4401_v56 = vpop.eup %4400  ;;  %v1119_v57 = vpack.c.bf16 %v4399_v54, %v4395_v51  ;;  %v4121_v51 = vld [vmem:[%s5882_s3 + $0x32c] ss:$16 sps:$4 sm:$0xff]   ;;  %v4116_v54 = vld [vmem:[%s5882_s3 + $0x320] ss:$16 sps:$4 sm:$0xff]  }
 0x138   :  { %v4403_v58 = vpop.eup %4402  ;;  %v1120_v59 = vpack.c.bf16 %v4401_v56, %v4397_v52 }
 0x139   :  { %v4405_v62 = vpop.eup %4404  ;;  %v1081_v2 = vadd.f32 1.0, %v4403_v58 }
 0x13a   :  { %2717 = vmatprep.mubr.bf16.mxu0 %v1120_v59  ;;  %2889 = vmatprep.mubr.bf16.mxu1 %v1120_v59  ;;  %v1082_v3 = vadd.f32 1.0, %v4405_v62  ;;  %v4407_v16 = vpop.eup %4406 }
 0x13b   :  { %2718 = vmatmul.mubr.bf16.vlgmr.msra.gmra.mrb[8].mxu0 %v1119_v57  ;;  %2890 = vmatmul.mubr.bf16.vlgmr.msra.gmra.mrb[8].mxu1 %v1119_v57  ;;  %4410 = vrcp.f32 %v1081_v2  ;;  %v4409_v17 = vpop.eup %4408  ;;  %v4119_v57 = vld [vmem:[%s5882_s3 + $0x328] ss:$16 sps:$4 sm:$0xff]   ;;  %v4127_v2 = vld [vmem:[%s5882_s3 + $0x34c] ss:$16 sps:$4 sm:$0xff]  }
 0x13c   :  { %2729 = vmatpush1.bf16.msra.mxu0 %v4062_v60  ;;  %2901 = vmatpush1.bf16.msra.mxu1 %v4065_v61  ;;  %4412 = vrcp.f32 %v1082_v3  ;;  %v4124_v61 = vld [vmem:[%s5882_s3 + $0x344] ss:$16 sps:$4 sm:$0xff]  }
 0x13d   :  { %2730 = vmatprep.subr.bf16.mxu0 %v4070_v63  ;;  %2902 = vmatprep.subr.bf16.mxu1 %v4073_v1  ;;  %v187_v1 = vsub.s32 6, %v5123_v8 }
 0x140   :  { %2731 = vmatpush1.bf16.msra.mxu0 %v4068_v4  ;;  %2903 = vmatpush1.bf16.msra.mxu1 %v4071_v5  ;;  %v191_v4 = vsub.s32 7, %v5123_v8 }
 0x141   :  { %2732 = vmatprep.subr.bf16.mxu0 %v4076_v6  ;;  %2904 = vmatprep.subr.bf16.mxu1 %v4079_v7  ;;  %v4122_v6 = vld [vmem:[%s5882_s3 + $0x340] ss:$16 sps:$4 sm:$0xff]   ;;  %v4125_v7 = vld [vmem:[%s5882_s3 + $0x348] ss:$16 sps:$4 sm:$0xff]  }
 0x144   :  { %2733 = vmatpush1.bf16.msra.mxu0 %v4074_v12  ;;  %2905 = vmatpush1.bf16.msra.mxu1 %v4077_v13  ;;  %v188_v12 = vrot.slane %v5129_v10, %v187_v1  ;;  %v4130_v13 = vld [vmem:[%s5882_s3 + $0x364] ss:$16 sps:$4 sm:$0xff]  }
 0x145   :  { %v4411_v0 = vpop.eup %4410  ;;  %2734 = vmatprep.subr.bf16.mxu0 %v4082_v14  ;;  %2906 = vmatprep.subr.bf16.mxu1 %v4085_v15  ;;  %v4133_v14 = vld [vmem:[%s5882_s3 + $0x36c] ss:$16 sps:$4 sm:$0xff]   ;;  %v192_v15 = vrot.slane %v5129_v10, %v191_v4  ;;  %v4158_v4 = vld [vmem:[%s5882_s3 + $0x400] ss:$16 sps:$4 sm:$0xff]  }
 0x146   :  { %v4413_v23 = vpop.eup %4412  ;;  %v5194_v25 = vpack.c.bf16 %v4411_v0, %v4407_v16  ;;  %v4139_v10 = vld [vmem:[%s5882_s3 + $0x38c] ss:$16 sps:$4 sm:$0xff]  }
 0x147   :  { %v1122_v27 = vpack.c.bf16 %v4413_v23, %v4409_v17  ;;  %v4128_v17 = vld [vmem:[%s5882_s3 + $0x360] ss:$16 sps:$4 sm:$0xff]  }
 0x148   :  { %2735 = vmatpush1.bf16.msra.mxu0 %v4080_v18  ;;  %2907 = vmatpush1.bf16.msra.mxu1 %v4083_v19  ;;  %v4131_v18 = vld [vmem:[%s5882_s3 + $0x368] ss:$16 sps:$4 sm:$0xff]  }
 0x149   :  { %2736 = vmatprep.subr.bf16.mxu0 %v4088_v20  ;;  %2908 = vmatprep.subr.bf16.mxu1 %v4091_v21  ;;  %v4136_v20 = vld [vmem:[%s5882_s3 + $0x384] ss:$16 sps:$4 sm:$0xff]  }
 0x14a   :  { %2760 = vmatprep.mubr.bf16.mxu0 %v1122_v27  ;;  %2932 = vmatprep.mubr.bf16.mxu1 %v1122_v27 }
 0x14c   :  { %2737 = vmatpush1.bf16.msra.mxu0 %v4086_v28  ;;  %2909 = vmatpush1.bf16.msra.mxu1 %v4089_v29 }
 0x14d   :  { %2738 = vmatprep.subr.bf16.mxu0 %v4094_v30  ;;  %2910 = vmatprep.subr.bf16.mxu1 %v4097_v31 }
 0x150   :  { %2739 = vmatpush1.bf16.msra.mxu0 %v4092_v32  ;;  %2911 = vmatpush1.bf16.msra.mxu1 %v4095_v33 }
 0x151   :  { %2740 = vmatprep.subr.bf16.mxu0 %v4100_v34  ;;  %2912 = vmatprep.subr.bf16.mxu1 %v4103_v35  ;;  %v4134_v34 = vld [vmem:[%s5882_s3 + $0x380] ss:$16 sps:$4 sm:$0xff]   ;;  %v4137_v35 = vld [vmem:[%s5882_s3 + $0x388] ss:$16 sps:$4 sm:$0xff]  }
 0x154   :  { %2741 = vmatpush1.bf16.msra.mxu0 %v4098_v36  ;;  %2913 = vmatpush1.bf16.msra.mxu1 %v4101_v37 }
 0x155   :  { %2742 = vmatprep.subr.bf16.mxu0 %v4106_v38  ;;  %2914 = vmatprep.subr.bf16.mxu1 %v4109_v39  ;;  %v4142_v38 = vld [vmem:[%s5882_s3 + $0x3a4] ss:$16 sps:$4 sm:$0xff]   ;;  %v4145_v39 = vld [vmem:[%s5882_s3 + $0x3ac] ss:$16 sps:$4 sm:$0xff]  }
 0x158   :  { %2743 = vmatpush1.bf16.msra.mxu0 %v4104_v42  ;;  %2915 = vmatpush1.bf16.msra.mxu1 %v4107_v22  ;;  %v971_v49 = vpop.f32.mrb[4].mxu0 }
 0x159   :  { %2744 = vmatprep.subr.bf16.mxu0 %v4112_v43  ;;  %2916 = vmatprep.subr.bf16.mxu1 %v4115_v44  ;;  %v972_v52 = vadd.f32 %v971_v49, %v180_v45  ;;  %v973_v53 = vpop.f32.mrb[5].mxu0  ;;  %v1014_v16 = vpop.f32.mrb[4].mxu1  ;;  %v4146_v49 = vld [vmem:[%s5882_s3 + $0x3c0] ss:$16 sps:$4 sm:$0xff]  }
 0x15a   :  { %v974_v55 = vadd.f32 %v973_v53, %v184_v46  ;;  %v975_v56 = vpop.f32.mrb[6].mxu0  ;;  %v1015_v19 = vadd.f32 %v1014_v16, %v188_v12  ;;  %v1016_v0 = vpop.f32.mrb[5].mxu1  ;;  %v4164_v16 = vld [vmem:[%s5882_s3 + $0x420] ss:$16 sps:$4 sm:$0xff]  }
 0x15b   :  { %v3578_v58 = vmul.f32 -1.442695, %v972_v52  ;;  %v976_v59 = vadd.f32 %v975_v56, %v180_v45  ;;  %v977_v60 = vpop.f32.mrb[7].mxu0  ;;  %v1017_v21 = vadd.f32 %v1016_v0, %v192_v15  ;;  %v1018_v23 = vpop.f32.mrb[6].mxu1  ;;  %v4140_v45 = vld [vmem:[%s5882_s3 + $0x3a0] ss:$16 sps:$4 sm:$0xff]  }
 0x15c   :  { %2745 = vmatpush1.bf16.msra.mxu0 %v4110_v47  ;;  %2917 = vmatpush1.bf16.msra.mxu1 %v4113_v48  ;;  %v3579_v62 = vmul.f32 -1.442695, %v974_v55  ;;  %v978_v63 = vadd.f32 %v977_v60, %v184_v46  ;;  %v3580_v27 = vmul.f32 -1.442695, %v1015_v19  ;;  %v1019_v28 = vadd.f32 %v1018_v23, %v188_v12  ;;  %v1020_v29 = vpop.f32.mrb[7].mxu1 }
 0x15d   :  { %2746 = vmatprep.subr.bf16.mxu0 %v4118_v50  ;;  %2918 = vmatprep.subr.bf16.mxu1 %v4121_v51  ;;  %4414 = vpow2.f32 %v3578_v58  ;;  %v3586_v3 = vmul.f32 -1.442695, %v976_v59  ;;  %v3581_v31 = vmul.f32 -1.442695, %v1017_v21  ;;  %v1021_v32 = vadd.f32 %v1020_v29, %v192_v15  ;;  %v4143_v46 = vld [vmem:[%s5882_s3 + $0x3a8] ss:$16 sps:$4 sm:$0xff]  }
 0x15e   :  { %4416 = vpow2.f32 %v3579_v62  ;;  %v3587_v5 = vmul.f32 -1.442695, %v978_v63  ;;  %v3588_v22 = vmul.f32 -1.442695, %v1019_v28  ;;  %v4148_v47 = vld [vmem:[%s5882_s3 + $0x3c4] ss:$16 sps:$4 sm:$0xff]  }
 0x15f   :  { %4418 = vpow2.f32 %v3586_v3  ;;  %v3589_v44 = vmul.f32 -1.442695, %v1021_v32  ;;  %v4151_v48 = vld [vmem:[%s5882_s3 + $0x3cc] ss:$16 sps:$4 sm:$0xff]   ;;  %v4149_v50 = vld [vmem:[%s5882_s3 + $0x3c8] ss:$16 sps:$4 sm:$0xff]  }
 0x160   :  { %2747 = vmatpush1.bf16.msra.mxu0 %v4116_v54  ;;  %2919 = vmatpush1.bf16.msra.mxu1 %v4119_v57  ;;  %4420 = vpow2.f32 %v3587_v5  ;;  %v4154_v51 = vld [vmem:[%s5882_s3 + $0x3e4] ss:$16 sps:$4 sm:$0xff]   ;;  %v4157_v52 = vld [vmem:[%s5882_s3 + $0x3ec] ss:$16 sps:$4 sm:$0xff]   ;;  %v4152_v56 = vld [vmem:[%s5882_s3 + $0x3e0] ss:$16 sps:$4 sm:$0xff]  }
 0x161   :  { %2748 = vmatprep.subr.bf16.mxu0 %v4124_v61  ;;  %2920 = vmatprep.subr.bf16.mxu1 %v4127_v2  ;;  %4422 = vpow2.f32 %v3580_v27  ;;  %v4155_v57 = vld [vmem:[%s5882_s3 + $0x3e8] ss:$16 sps:$4 sm:$0xff]   ;;  %v4160_v59 = vld [vmem:[%s5882_s3 + $0x404] ss:$16 sps:$4 sm:$0xff]   ;;  %v4163_v60 = vld [vmem:[%s5882_s3 + $0x40c] ss:$16 sps:$4 sm:$0xff]  }
 0x162   :  { %4424 = vpow2.f32 %v3581_v31  ;;  %v4161_v5 = vld [vmem:[%s5882_s3 + $0x408] ss:$16 sps:$4 sm:$0xff]   ;;  %v4166_v12 = vld [vmem:[%s5882_s3 + $0x424] ss:$16 sps:$4 sm:$0xff]   ;;  %v4170_v19 = vld [vmem:[%s5882_s3 + $0x440] ss:$16 sps:$4 sm:$0xff]  }
 0x163   :  { %v4173_v0 = vld [vmem:[%s5882_s3 + $0x448] ss:$16 sps:$4 sm:$0xff]   ;;  %v4176_v27 = vld [vmem:[%s5882_s3 + $0x460] ss:$16 sps:$4 sm:$0xff]   ;;  %v4187_v31 = vld [vmem:[%s5882_s3 + $0x48c] ss:$16 sps:$4 sm:$0xff]  }
 0x164   :  { %2749 = vmatpush1.bf16.msra.mxu0 %v4122_v6  ;;  %2921 = vmatpush1.bf16.msra.mxu1 %v4125_v7  ;;  %v4179_v28 = vld [vmem:[%s5882_s3 + $0x468] ss:$16 sps:$4 sm:$0xff]  }
 0x165   :  { %2750 = vmatprep.subr.bf16.mxu0 %v4130_v13  ;;  %2922 = vmatprep.subr.bf16.mxu1 %v4133_v14  ;;  %v4169_v13 = vld [vmem:[%s5882_s3 + $0x42c] ss:$16 sps:$4 sm:$0xff]  }
 0x167   :  { %v4415_v30 = vpop.eup %4414 }
 0x168   :  { %v4417_v33 = vpop.eup %4416  ;;  %2751 = vmatpush1.bf16.msra.mxu0 %v4128_v17  ;;  %2923 = vmatpush1.bf16.msra.mxu1 %v4131_v18  ;;  %v1075_v36 = vadd.f32 1.0, %v4415_v30  ;;  %v4167_v17 = vld [vmem:[%s5882_s3 + $0x428] ss:$16 sps:$4 sm:$0xff]   ;;  %v4172_v18 = vld [vmem:[%s5882_s3 + $0x444] ss:$16 sps:$4 sm:$0xff]  }
 0x169   :  { %v4419_v37 = vpop.eup %4418  ;;  %2752 = vmatprep.subr.bf16.mxu0 %v4136_v20  ;;  %2924 = vmatprep.subr.bf16.mxu1 %v4139_v10  ;;  %v1076_v40 = vadd.f32 1.0, %v4417_v33  ;;  %v4178_v20 = vld [vmem:[%s5882_s3 + $0x464] ss:$16 sps:$4 sm:$0xff]   ;;  %v4181_v10 = vld [vmem:[%s5882_s3 + $0x46c] ss:$16 sps:$4 sm:$0xff]  }
 0x16a   :  { %v4421_v41 = vpop.eup %4420  ;;  %4426 = vrcp.f32 %v1075_v36  ;;  %v1083_v42 = vadd.f32 1.0, %v4419_v37  ;;  %v4184_v30 = vld [vmem:[%s5882_s3 + $0x484] ss:$16 sps:$4 sm:$0xff]   ;;  %v4185_v36 = vld [vmem:[%s5882_s3 + $0x488] ss:$16 sps:$4 sm:$0xff]  }
 0x16b   :  { %4428 = vrcp.f32 %v1076_v40  ;;  %v1084_v43 = vadd.f32 1.0, %v4421_v41  ;;  %v4423_v53 = vpop.eup %4422  ;;  %v4190_v37 = vld [vmem:[%s5882_s3 + $0x4a4] ss:$16 sps:$4 sm:$0xff]   ;;  %v4191_v40 = vld [vmem:[%s5882_s3 + $0x4a8] ss:$16 sps:$4 sm:$0xff]  }
 0x16c   :  { %2753 = vmatpush1.bf16.msra.mxu0 %v4134_v34  ;;  %2925 = vmatpush1.bf16.msra.mxu1 %v4137_v35  ;;  %4430 = vrcp.f32 %v1083_v42  ;;  %v4425_v54 = vpop.eup %4424  ;;  %v1077_v61 = vadd.f32 1.0, %v4423_v53  ;;  %v4182_v35 = vld [vmem:[%s5882_s3 + $0x480] ss:$16 sps:$4 sm:$0xff]   ;;  %v4196_v41 = vld [vmem:[%s5882_s3 + $0x4c4] ss:$16 sps:$4 sm:$0xff]  }
 0x16d   :  { %2754 = vmatprep.subr.bf16.mxu0 %v4142_v38  ;;  %2926 = vmatprep.subr.bf16.mxu1 %v4145_v39  ;;  %4432 = vrcp.f32 %v1084_v43  ;;  %v1078_v63 = vadd.f32 1.0, %v4425_v54  ;;  %v4193_v38 = vld [vmem:[%s5882_s3 + $0x4ac] ss:$16 sps:$4 sm:$0xff]   ;;  %v4188_v39 = vld [vmem:[%s5882_s3 + $0x4a0] ss:$16 sps:$4 sm:$0xff]  }
 0x16e   :  { %4434 = vpow2.f32 %v3588_v22  ;;  %v4199_v42 = vld [vmem:[%s5882_s3 + $0x4cc] ss:$16 sps:$4 sm:$0xff]   ;;  %v4194_v22 = vld [vmem:[%s5882_s3 + $0x4c0] ss:$16 sps:$4 sm:$0xff]   ;;  %v4197_v43 = vld [vmem:[%s5882_s3 + $0x4c8] ss:$16 sps:$4 sm:$0xff]  }
 0x16f   :  { %4436 = vpow2.f32 %v3589_v44  ;;  %v4202_v44 = vld [vmem:[%s5882_s3 + $0x4e4] ss:$16 sps:$4 sm:$0xff]   ;;  %v4217_v53 = vld [vmem:[%s5882_s3 + $0x52c] ss:$16 sps:$4 sm:$0xff]   ;;  %v4212_v54 = vld [vmem:[%s5882_s3 + $0x520] ss:$16 sps:$4 sm:$0xff]  }
 0x170   :  { %2755 = vmatpush1.bf16.msra.mxu0 %v4140_v45  ;;  %2927 = vmatpush1.bf16.msra.mxu1 %v4143_v46  ;;  %4438 = vrcp.f32 %v1077_v61  ;;  %v4205_v45 = vld [vmem:[%s5882_s3 + $0x4ec] ss:$16 sps:$4 sm:$0xff]   ;;  %v4200_v46 = vld [vmem:[%s5882_s3 + $0x4e0] ss:$16 sps:$4 sm:$0xff]  }
 0x171   :  { %2756 = vmatprep.subr.bf16.mxu0 %v4148_v47  ;;  %2928 = vmatprep.subr.bf16.mxu1 %v4151_v48  ;;  %4440 = vrcp.f32 %v1078_v63  ;;  %v4203_v47 = vld [vmem:[%s5882_s3 + $0x4e8] ss:$16 sps:$4 sm:$0xff]   ;;  %v4208_v48 = vld [vmem:[%s5882_s3 + $0x504] ss:$16 sps:$4 sm:$0xff]   ;;  %v4229_v61 = vld [vmem:[%s5882_s3 + $0x56c] ss:$16 sps:$4 sm:$0xff]  }
 0x172   :  { %v4227_v63 = vld [vmem:[%s5882_s3 + $0x568] ss:$16 sps:$4 sm:$0xff]  }
 0x174   :  { %v4427_v55 = vpop.eup %4426  ;;  %2757 = vmatpush1.bf16.msra.mxu0 %v4146_v49  ;;  %2929 = vmatpush1.bf16.msra.mxu1 %v4149_v50  ;;  %v4211_v49 = vld [vmem:[%s5882_s3 + $0x50c] ss:$16 sps:$4 sm:$0xff]   ;;  %v4206_v50 = vld [vmem:[%s5882_s3 + $0x500] ss:$16 sps:$4 sm:$0xff]  }
 0x175   :  { %v4429_v58 = vpop.eup %4428  ;;  %2758 = vmatprep.subr.bf16.mxu0 %v4154_v51  ;;  %2930 = vmatprep.subr.bf16.mxu1 %v4157_v52  ;;  %v4209_v51 = vld [vmem:[%s5882_s3 + $0x508] ss:$16 sps:$4 sm:$0xff]   ;;  %v4214_v52 = vld [vmem:[%s5882_s3 + $0x524] ss:$16 sps:$4 sm:$0xff]  }
 0x176   :  { %v4431_v62 = vpop.eup %4430 }
 0x177   :  { %v4433_v1 = vpop.eup %4432  ;;  %v5348_v2 = vpack.c.bf16 %v4431_v62, %v4427_v55  ;;  %v4215_v55 = vld [vmem:[%s5882_s3 + $0x528] ss:$16 sps:$4 sm:$0xff]   ;;  %v4224_v62 = vld [vmem:[%s5882_s3 + $0x560] ss:$16 sps:$4 sm:$0xff]  }
 0x178   :  { %v4435_v3 = vpop.eup %4434  ;;  %2759 = vmatpush1.bf16.msra.mxu0 %v4152_v56  ;;  %2931 = vmatpush1.bf16.msra.mxu1 %v4155_v57  ;;  %v1124_v6 = vpack.c.bf16 %v4433_v1, %v4429_v58  ;;  %v4220_v56 = vld [vmem:[%s5882_s3 + $0x544] ss:$16 sps:$4 sm:$0xff]   ;;  %v4223_v57 = vld [vmem:[%s5882_s3 + $0x54c] ss:$16 sps:$4 sm:$0xff]   ;;  %v4218_v58 = vld [vmem:[%s5882_s3 + $0x540] ss:$16 sps:$4 sm:$0xff]  }
 0x179   :  { %v4437_v7 = vpop.eup %4436  ;;  %2771 = vmatprep.subr.bf16.mxu0 %v4160_v59  ;;  %2943 = vmatprep.subr.bf16.mxu1 %v4163_v60  ;;  %v1085_v14 = vadd.f32 1.0, %v4435_v3  ;;  %v4221_v59 = vld [vmem:[%s5882_s3 + $0x548] ss:$16 sps:$4 sm:$0xff]   ;;  %v4226_v60 = vld [vmem:[%s5882_s3 + $0x564] ss:$16 sps:$4 sm:$0xff]  }
 0x17a   :  { %v1086_v15 = vadd.f32 1.0, %v4437_v7  ;;  %v4439_v21 = vpop.eup %4438  ;;  %v4232_v1 = vld [vmem:[%s5882_s3 + $0x584] ss:$16 sps:$4 sm:$0xff]   ;;  %v4235_v3 = vld [vmem:[%s5882_s3 + $0x58c] ss:$16 sps:$4 sm:$0xff]  }
 0x17b   :  { %2761 = vmatmul.mubr.bf16.vlgmr.msra.gmra.mrb[8].mxu0 %v5194_v25  ;;  %2933 = vmatmul.mubr.bf16.vlgmr.msra.gmra.mrb[8].mxu1 %v5194_v25  ;;  %4442 = vrcp.f32 %v1085_v14  ;;  %v4175_v25 = vld [vmem:[%s5882_s3 + $0x44c] ss:$16 sps:$4 sm:$0xff]   ;;  %v4441_v23 = vpop.eup %4440  ;;  %v4244_v14 = vld [vmem:[%s5882_s3 + $0x5c4] ss:$16 sps:$4 sm:$0xff]  }
 0x17c   :  { %2772 = vmatpush1.bf16.msra.mxu0 %v4158_v4  ;;  %2944 = vmatpush1.bf16.msra.mxu1 %v4161_v5  ;;  %4444 = vrcp.f32 %v1086_v15  ;;  %v4230_v4 = vld [vmem:[%s5882_s3 + $0x580] ss:$16 sps:$4 sm:$0xff]   ;;  %v4233_v5 = vld [vmem:[%s5882_s3 + $0x588] ss:$16 sps:$4 sm:$0xff]   ;;  %v4241_v7 = vld [vmem:[%s5882_s3 + $0x5ac] ss:$16 sps:$4 sm:$0xff]  }
 0x17d   :  { %2773 = vmatprep.subr.bf16.mxu0 %v4166_v12  ;;  %2945 = vmatprep.subr.bf16.mxu1 %v4169_v13  ;;  %v4236_v12 = vld [vmem:[%s5882_s3 + $0x5a0] ss:$16 sps:$4 sm:$0xff]   ;;  %v4239_v13 = vld [vmem:[%s5882_s3 + $0x5a8] ss:$16 sps:$4 sm:$0xff]   ;;  %v4247_v15 = vld [vmem:[%s5882_s3 + $0x5cc] ss:$16 sps:$4 sm:$0xff]  }
 0x17e   :  { %2803 = vmatprep.mubr.bf16.mxu0 %v1124_v6  ;;  %2975 = vmatprep.mubr.bf16.mxu1 %v1124_v6  ;;  %v4238_v6 = vld [vmem:[%s5882_s3 + $0x5a4] ss:$16 sps:$4 sm:$0xff]  }
 0x180   :  { %2774 = vmatpush1.bf16.msra.mxu0 %v4164_v16  ;;  %2946 = vmatpush1.bf16.msra.mxu1 %v4167_v17  ;;  %v4242_v16 = vld [vmem:[%s5882_s3 + $0x5c0] ss:$16 sps:$4 sm:$0xff]   ;;  %v4245_v17 = vld [vmem:[%s5882_s3 + $0x5c8] ss:$16 sps:$4 sm:$0xff]  }
 0x181   :  { %2775 = vmatprep.subr.bf16.mxu0 %v4172_v18  ;;  %2947 = vmatprep.subr.bf16.mxu1 %v4175_v25  ;;  %v4250_v18 = vld [vmem:[%s5882_s3 + $0x5e4] ss:$16 sps:$4 sm:$0xff]   ;;  %v4253_v25 = vld [vmem:[%s5882_s3 + $0x5ec] ss:$16 sps:$4 sm:$0xff]  }
 0x184   :  { %2776 = vmatpush1.bf16.msra.mxu0 %v4170_v19  ;;  %2948 = vmatpush1.bf16.msra.mxu1 %v4173_v0  ;;  %v4248_v19 = vld [vmem:[%s5882_s3 + $0x5e0] ss:$16 sps:$4 sm:$0xff]   ;;  %v4251_v0 = vld [vmem:[%s5882_s3 + $0x5e8] ss:$16 sps:$4 sm:$0xff]  }
 0x185   :  { %v4443_v29 = vpop.eup %4442  ;;  %2777 = vmatprep.subr.bf16.mxu0 %v4178_v20  ;;  %2949 = vmatprep.subr.bf16.mxu1 %v4181_v10  ;;  %v4256_v20 = vld [vmem:[%s5882_s3 + $0x604] ss:$16 sps:$4 sm:$0xff]   ;;  %v4259_v10 = vld [vmem:[%s5882_s3 + $0x60c] ss:$16 sps:$4 sm:$0xff]  }
 0x186   :  { %v4445_v32 = vpop.eup %4444  ;;  %v5400_v33 = vpack.c.bf16 %v4443_v29, %v4439_v21  ;;  %v4254_v21 = vld [vmem:[%s5882_s3 + $0x600] ss:$16 sps:$4 sm:$0xff]  }
 0x187   :  { %v5402_v34 = vpack.c.bf16 %v4445_v32, %v4441_v23  ;;  %v4257_v23 = vld [vmem:[%s5882_s3 + $0x608] ss:$16 sps:$4 sm:$0xff]   ;;  %v4260_v29 = vld [vmem:[%s5882_s3 + $0x620] ss:$16 sps:$4 sm:$0xff]  }
 0x188   :  { %2778 = vmatpush1.bf16.msra.mxu0 %v4176_v27  ;;  %2950 = vmatpush1.bf16.msra.mxu1 %v4179_v28  ;;  %v4262_v27 = vld [vmem:[%s5882_s3 + $0x624] ss:$16 sps:$4 sm:$0xff]   ;;  %v4265_v28 = vld [vmem:[%s5882_s3 + $0x62c] ss:$16 sps:$4 sm:$0xff]   ;;  %v4266_v32 = vld [vmem:[%s5882_s3 + $0x640] ss:$16 sps:$4 sm:$0xff]  }
 0x189   :  { %2779 = vmatprep.subr.bf16.mxu0 %v4184_v30  ;;  %2951 = vmatprep.subr.bf16.mxu1 %v4187_v31  ;;  %v4263_v30 = vld [vmem:[%s5882_s3 + $0x628] ss:$16 sps:$4 sm:$0xff]   ;;  %v4268_v31 = vld [vmem:[%s5882_s3 + $0x644] ss:$16 sps:$4 sm:$0xff]  }
 0x18c   :  { %2780 = vmatpush1.bf16.msra.mxu0 %v4182_v35  ;;  %2952 = vmatpush1.bf16.msra.mxu1 %v4185_v36  ;;  %v4269_v35 = vld [vmem:[%s5882_s3 + $0x648] ss:$16 sps:$4 sm:$0xff]   ;;  %v4274_v36 = vld [vmem:[%s5882_s3 + $0x664] ss:$16 sps:$4 sm:$0xff]  }
 0x18d   :  { %2781 = vmatprep.subr.bf16.mxu0 %v4190_v37  ;;  %2953 = vmatprep.subr.bf16.mxu1 %v4193_v38  ;;  %v4272_v37 = vld [vmem:[%s5882_s3 + $0x660] ss:$16 sps:$4 sm:$0xff]   ;;  %v4275_v38 = vld [vmem:[%s5882_s3 + $0x668] ss:$16 sps:$4 sm:$0xff]  }
 0x190   :  { %2782 = vmatpush1.bf16.msra.mxu0 %v4188_v39  ;;  %2954 = vmatpush1.bf16.msra.mxu1 %v4191_v40  ;;  %v4280_v39 = vld [vmem:[%s5882_s3 + $0x684] ss:$16 sps:$4 sm:$0xff]   ;;  %v4283_v40 = vld [vmem:[%s5882_s3 + $0x68c] ss:$16 sps:$4 sm:$0xff]  }
 0x191   :  { %2783 = vmatprep.subr.bf16.mxu0 %v4196_v41  ;;  %2955 = vmatprep.subr.bf16.mxu1 %v4199_v42  ;;  %v4278_v41 = vld [vmem:[%s5882_s3 + $0x680] ss:$16 sps:$4 sm:$0xff]   ;;  %v4281_v42 = vld [vmem:[%s5882_s3 + $0x688] ss:$16 sps:$4 sm:$0xff]  }
 0x194   :  { %2784 = vmatpush1.bf16.msra.mxu0 %v4194_v22  ;;  %2956 = vmatpush1.bf16.msra.mxu1 %v4197_v43  ;;  %v4286_v22 = vld [vmem:[%s5882_s3 + $0x6a4] ss:$16 sps:$4 sm:$0xff]   ;;  %v4289_v43 = vld [vmem:[%s5882_s3 + $0x6ac] ss:$16 sps:$4 sm:$0xff]  }
 0x195   :  { %2785 = vmatprep.subr.bf16.mxu0 %v4202_v44  ;;  %2957 = vmatprep.subr.bf16.mxu1 %v4205_v45  ;;  %v4284_v44 = vld [vmem:[%s5882_s3 + $0x6a0] ss:$16 sps:$4 sm:$0xff]   ;;  %v4287_v45 = vld [vmem:[%s5882_s3 + $0x6a8] ss:$16 sps:$4 sm:$0xff]  }
 0x198   :  { %2786 = vmatpush1.bf16.msra.mxu0 %v4200_v46  ;;  %2958 = vmatpush1.bf16.msra.mxu1 %v4203_v47  ;;  %v4292_v46 = vld [vmem:[%s5882_s3 + $0x6c4] ss:$16 sps:$4 sm:$0xff]   ;;  %v4295_v47 = vld [vmem:[%s5882_s3 + $0x6cc] ss:$16 sps:$4 sm:$0xff]  }
 0x199   :  { %2787 = vmatprep.subr.bf16.mxu0 %v4208_v48  ;;  %2959 = vmatprep.subr.bf16.mxu1 %v4211_v49  ;;  %v4290_v48 = vld [vmem:[%s5882_s3 + $0x6c0] ss:$16 sps:$4 sm:$0xff]   ;;  %v4293_v49 = vld [vmem:[%s5882_s3 + $0x6c8] ss:$16 sps:$4 sm:$0xff]  }
 0x19c   :  { %2788 = vmatpush1.bf16.msra.mxu0 %v4206_v50  ;;  %2960 = vmatpush1.bf16.msra.mxu1 %v4209_v51  ;;  %v4298_v50 = vld [vmem:[%s5882_s3 + $0x6e4] ss:$16 sps:$4 sm:$0xff]   ;;  %v4301_v51 = vld [vmem:[%s5882_s3 + $0x6ec] ss:$16 sps:$4 sm:$0xff]  }
 0x19d   :  { %2789 = vmatprep.subr.bf16.mxu0 %v4214_v52  ;;  %2961 = vmatprep.subr.bf16.mxu1 %v4217_v53  ;;  %v4296_v52 = vld [vmem:[%s5882_s3 + $0x6e0] ss:$16 sps:$4 sm:$0xff]   ;;  %v4299_v53 = vld [vmem:[%s5882_s3 + $0x6e8] ss:$16 sps:$4 sm:$0xff]  }
 0x1a0   :  { %2790 = vmatpush1.bf16.msra.mxu0 %v4212_v54  ;;  %2962 = vmatpush1.bf16.msra.mxu1 %v4215_v55  ;;  %v4304_v54 = vld [vmem:[%s5882_s3 + $0x704] ss:$16 sps:$4 sm:$0xff]   ;;  %v4307_v55 = vld [vmem:[%s5882_s3 + $0x70c] ss:$16 sps:$4 sm:$0xff]  }
 0x1a1   :  { %2791 = vmatprep.subr.bf16.mxu0 %v4220_v56  ;;  %2963 = vmatprep.subr.bf16.mxu1 %v4223_v57  ;;  %v4302_v56 = vld [vmem:[%s5882_s3 + $0x700] ss:$16 sps:$4 sm:$0xff]   ;;  %v4305_v57 = vld [vmem:[%s5882_s3 + $0x708] ss:$16 sps:$4 sm:$0xff]  }
 0x1a4   :  { %2792 = vmatpush1.bf16.msra.mxu0 %v4218_v58  ;;  %2964 = vmatpush1.bf16.msra.mxu1 %v4221_v59  ;;  %v4310_v58 = vld [vmem:[%s5882_s3 + $0x724] ss:$16 sps:$4 sm:$0xff]   ;;  %v4313_v59 = vld [vmem:[%s5882_s3 + $0x72c] ss:$16 sps:$4 sm:$0xff]  }
 0x1a5   :  { %2793 = vmatprep.subr.bf16.mxu0 %v4226_v60  ;;  %2965 = vmatprep.subr.bf16.mxu1 %v4229_v61  ;;  %v4308_v60 = vld [vmem:[%s5882_s3 + $0x720] ss:$16 sps:$4 sm:$0xff]   ;;  %v4311_v61 = vld [vmem:[%s5882_s3 + $0x728] ss:$16 sps:$4 sm:$0xff]  }
 0x1a8   :  { %2794 = vmatpush1.bf16.msra.mxu0 %v4224_v62  ;;  %2966 = vmatpush1.bf16.msra.mxu1 %v4227_v63  ;;  %v4316_v62 = vld [vmem:[%s5882_s3 + $0x744] ss:$16 sps:$4 sm:$0xff]   ;;  %v4319_v63 = vld [vmem:[%s5882_s3 + $0x74c] ss:$16 sps:$4 sm:$0xff]  }
 0x1a9   :  { %2795 = vmatprep.subr.bf16.mxu0 %v4232_v1  ;;  %2967 = vmatprep.subr.bf16.mxu1 %v4235_v3  ;;  %v4314_v1 = vld [vmem:[%s5882_s3 + $0x740] ss:$16 sps:$4 sm:$0xff]   ;;  %v4317_v3 = vld [vmem:[%s5882_s3 + $0x748] ss:$16 sps:$4 sm:$0xff]  }
 0x1ac   :  { %2796 = vmatpush1.bf16.msra.mxu0 %v4230_v4  ;;  %2968 = vmatpush1.bf16.msra.mxu1 %v4233_v5  ;;  %v4322_v4 = vld [vmem:[%s5882_s3 + $0x764] ss:$16 sps:$4 sm:$0xff]   ;;  %v4325_v5 = vld [vmem:[%s5882_s3 + $0x76c] ss:$16 sps:$4 sm:$0xff]  }
 0x1ad   :  { %2797 = vmatprep.subr.bf16.mxu0 %v4238_v6  ;;  %2969 = vmatprep.subr.bf16.mxu1 %v4241_v7  ;;  %v4320_v6 = vld [vmem:[%s5882_s3 + $0x760] ss:$16 sps:$4 sm:$0xff]   ;;  %v4323_v7 = vld [vmem:[%s5882_s3 + $0x768] ss:$16 sps:$4 sm:$0xff]  }
 0x1b0   :  { %2798 = vmatpush1.bf16.msra.mxu0 %v4236_v12  ;;  %2970 = vmatpush1.bf16.msra.mxu1 %v4239_v13  ;;  %v4328_v12 = vld [vmem:[%s5882_s3 + $0x784] ss:$16 sps:$4 sm:$0xff]   ;;  %v4331_v13 = vld [vmem:[%s5882_s3 + $0x78c] ss:$16 sps:$4 sm:$0xff]  }
 0x1b1   :  { %2799 = vmatprep.subr.bf16.mxu0 %v4244_v14  ;;  %2971 = vmatprep.subr.bf16.mxu1 %v4247_v15  ;;  %v4326_v14 = vld [vmem:[%s5882_s3 + $0x780] ss:$16 sps:$4 sm:$0xff]   ;;  %v4329_v15 = vld [vmem:[%s5882_s3 + $0x788] ss:$16 sps:$4 sm:$0xff]  }
 0x1b4   :  { %2800 = vmatpush1.bf16.msra.mxu0 %v4242_v16  ;;  %2972 = vmatpush1.bf16.msra.mxu1 %v4245_v17  ;;  %v4334_v16 = vld [vmem:[%s5882_s3 + $0x7a4] ss:$16 sps:$4 sm:$0xff]   ;;  %v4337_v17 = vld [vmem:[%s5882_s3 + $0x7ac] ss:$16 sps:$4 sm:$0xff]  }
 0x1b5   :  { %2801 = vmatprep.subr.bf16.mxu0 %v4250_v18  ;;  %2973 = vmatprep.subr.bf16.mxu1 %v4253_v25  ;;  %v4332_v18 = vld [vmem:[%s5882_s3 + $0x7a0] ss:$16 sps:$4 sm:$0xff]   ;;  %v4335_v25 = vld [vmem:[%s5882_s3 + $0x7a8] ss:$16 sps:$4 sm:$0xff]  }
 0x1b8   :  { %2802 = vmatpush1.bf16.msra.mxu0 %v4248_v19  ;;  %2974 = vmatpush1.bf16.msra.mxu1 %v4251_v0  ;;  %v4340_v19 = vld [vmem:[%s5882_s3 + $0x7c4] ss:$16 sps:$4 sm:$0xff]   ;;  %v4343_v0 = vld [vmem:[%s5882_s3 + $0x7cc] ss:$16 sps:$4 sm:$0xff]  }
 0x1b9   :  { %2814 = vmatprep.subr.bf16.mxu0 %v4256_v20  ;;  %2986 = vmatprep.subr.bf16.mxu1 %v4259_v10  ;;  %v4338_v20 = vld [vmem:[%s5882_s3 + $0x7c0] ss:$16 sps:$4 sm:$0xff]   ;;  %v4341_v10 = vld [vmem:[%s5882_s3 + $0x7c8] ss:$16 sps:$4 sm:$0xff]  }
 0x1bb   :  { %2804 = vmatmul.mubr.bf16.vlgmr.msra.gmra.mrb[8].mxu0 %v5348_v2  ;;  %2976 = vmatmul.mubr.bf16.vlgmr.msra.gmra.mrb[8].mxu1 %v5348_v2  ;;  %v4271_v2 = vld [vmem:[%s5882_s3 + $0x64c] ss:$16 sps:$4 sm:$0xff]  }
 0x1bc   :  { %2815 = vmatpush1.bf16.msra.mxu0 %v4254_v21  ;;  %2987 = vmatpush1.bf16.msra.mxu1 %v4257_v23  ;;  %v4346_v21 = vld [vmem:[%s5882_s3 + $0x7e4] ss:$16 sps:$4 sm:$0xff]   ;;  %v4349_v23 = vld [vmem:[%s5882_s3 + $0x7ec] ss:$16 sps:$4 sm:$0xff]  }
 0x1bd   :  { %2816 = vmatprep.subr.bf16.mxu0 %v4262_v27  ;;  %2988 = vmatprep.subr.bf16.mxu1 %v4265_v28  ;;  %v4344_v27 = vld [vmem:[%s5882_s3 + $0x7e0] ss:$16 sps:$4 sm:$0xff]   ;;  %v4347_v28 = vld [vmem:[%s5882_s3 + $0x7e8] ss:$16 sps:$4 sm:$0xff]  }
 0x1be   :  { %2846 = vmatprep.mubr.bf16.mxu0 %v5402_v34  ;;  %3018 = vmatprep.mubr.bf16.mxu1 %v5402_v34  ;;  %v4277_v34 = vld [vmem:[%s5882_s3 + $0x66c] ss:$16 sps:$4 sm:$0xff]  }
 0x1c0   :  { %2817 = vmatpush1.bf16.msra.mxu0 %v4260_v29  ;;  %2989 = vmatpush1.bf16.msra.mxu1 %v4263_v30  ;;  %v4350_v29 = vld [vmem:[%s5884_s5 + $0x40] sm:$0xff]  }
 0x1c1   :  { %2818 = vmatprep.subr.bf16.mxu0 %v4268_v31  ;;  %2990 = vmatprep.subr.bf16.mxu1 %v4271_v2  ;;  %v4351_v30 = vld [vmem:[%s5884_s5 + $0xc0] sm:$0xff]  }
 0x1c2   :  { %v4352_v31 = vld [vmem:[%s5884_s5] sm:$0xff]  }
 0x1c3   :  { %v4353_v2 = vld [vmem:[%s5884_s5 + $0x80] sm:$0xff]  }
 0x1c4   :  { %2819 = vmatpush1.bf16.msra.mxu0 %v4266_v32  ;;  %2991 = vmatpush1.bf16.msra.mxu1 %v4269_v35  ;;  %v4355_v32 = vld [vmem:[%s5884_s5 + $0xc8] sm:$0xff]  }
 0x1c5   :  { %2820 = vmatprep.subr.bf16.mxu0 %v4274_v36  ;;  %2992 = vmatprep.subr.bf16.mxu1 %v4277_v34  ;;  %v4356_v35 = vld [vmem:[%s5884_s5 + $0x8] sm:$0xff]   ;;  %v4358_v34 = vld [vmem:[%s5884_s5 + $0x50] sm:$0xff]  }
 0x1c6   :  { %v4357_v36 = vld [vmem:[%s5884_s5 + $0x88] sm:$0xff]  }
 0x1c8   :  { %2821 = vmatpush1.bf16.msra.mxu0 %v4272_v37  ;;  %2993 = vmatpush1.bf16.msra.mxu1 %v4275_v38  ;;  %v4359_v37 = vld [vmem:[%s5884_s5 + $0xd0] sm:$0xff]  }
 0x1c9   :  { %2822 = vmatprep.subr.bf16.mxu0 %v4280_v39  ;;  %2994 = vmatprep.subr.bf16.mxu1 %v4283_v40  ;;  %v4360_v38 = vld [vmem:[%s5884_s5 + $0x10] sm:$0xff]   ;;  %v4362_v40 = vld [vmem:[%s5884_s5 + $0x58] sm:$0xff]  }
 0x1ca   :  { %v4361_v39 = vld [vmem:[%s5884_s5 + $0x90] sm:$0xff]  }
 0x1cc   :  { %2823 = vmatpush1.bf16.msra.mxu0 %v4278_v41  ;;  %2995 = vmatpush1.bf16.msra.mxu1 %v4281_v42  ;;  %v4363_v41 = vld [vmem:[%s5884_s5 + $0xd8] sm:$0xff]  }
 0x1cd   :  { %2824 = vmatprep.subr.bf16.mxu0 %v4286_v22  ;;  %2996 = vmatprep.subr.bf16.mxu1 %v4289_v43  ;;  %v4364_v42 = vld [vmem:[%s5884_s5 + $0x18] sm:$0xff]   ;;  %v4366_v43 = vld [vmem:[%s5884_s5 + $0x60] sm:$0xff]  }
 0x1ce   :  { %v4365_v22 = vld [vmem:[%s5884_s5 + $0x98] sm:$0xff]  }
 0x1d0   :  { %2825 = vmatpush1.bf16.msra.mxu0 %v4284_v44  ;;  %2997 = vmatpush1.bf16.msra.mxu1 %v4287_v45  ;;  %v4367_v44 = vld [vmem:[%s5884_s5 + $0xe0] sm:$0xff]  }
 0x1d1   :  { %2826 = vmatprep.subr.bf16.mxu0 %v4292_v46  ;;  %2998 = vmatprep.subr.bf16.mxu1 %v4295_v47  ;;  %v4368_v45 = vld [vmem:[%s5884_s5 + $0x20] sm:$0xff]   ;;  %v4370_v47 = vld [vmem:[%s5884_s5 + $0x68] sm:$0xff]  }
 0x1d2   :  { %v4369_v46 = vld [vmem:[%s5884_s5 + $0xa0] sm:$0xff]  }
 0x1d4   :  { %2827 = vmatpush1.bf16.msra.mxu0 %v4290_v48  ;;  %2999 = vmatpush1.bf16.msra.mxu1 %v4293_v49  ;;  %v4371_v48 = vld [vmem:[%s5884_s5 + $0xe8] sm:$0xff]  }
 0x1d5   :  { %2828 = vmatprep.subr.bf16.mxu0 %v4298_v50  ;;  %3000 = vmatprep.subr.bf16.mxu1 %v4301_v51  ;;  %v4372_v49 = vld [vmem:[%s5884_s5 + $0x28] sm:$0xff]   ;;  %v4374_v51 = vld [vmem:[%s5884_s5 + $0x70] sm:$0xff]  }
 0x1d6   :  { %v4373_v50 = vld [vmem:[%s5884_s5 + $0xa8] sm:$0xff]  }
 0x1d8   :  { %2829 = vmatpush1.bf16.msra.mxu0 %v4296_v52  ;;  %3001 = vmatpush1.bf16.msra.mxu1 %v4299_v53  ;;  %v4375_v52 = vld [vmem:[%s5884_s5 + $0xf0] sm:$0xff]  }
 0x1d9   :  { %2830 = vmatprep.subr.bf16.mxu0 %v4304_v54  ;;  %3002 = vmatprep.subr.bf16.mxu1 %v4307_v55  ;;  %v4376_v53 = vld [vmem:[%s5884_s5 + $0x30] sm:$0xff]   ;;  %v4378_v55 = vld [vmem:[%s5884_s5 + $0x78] sm:$0xff]  }
 0x1da   :  { %v4377_v54 = vld [vmem:[%s5884_s5 + $0xb0] sm:$0xff]  }
 0x1dc   :  { %2831 = vmatpush1.bf16.msra.mxu0 %v4302_v56  ;;  %3003 = vmatpush1.bf16.msra.mxu1 %v4305_v57  ;;  %v4379_v56 = vld [vmem:[%s5884_s5 + $0xf8] sm:$0xff]  }
 0x1dd   :  { %2832 = vmatprep.subr.bf16.mxu0 %v4310_v58  ;;  %3004 = vmatprep.subr.bf16.mxu1 %v4313_v59  ;;  %v4380_v57 = vld [vmem:[%s5884_s5 + $0x38] sm:$0xff]   ;;  %v1383_v59 = vld [vmem:[%s5885_s4] sm:$0xf] }
 0x1de   :  { %v4381_v58 = vld [vmem:[%s5884_s5 + $0xb8] sm:$0xff]  }
 0x1e0   :  { %2833 = vmatpush1.bf16.msra.mxu0 %v4308_v60  ;;  %3005 = vmatpush1.bf16.msra.mxu1 %v4311_v61  ;;  %v1388_v60 = vrot.slane %v1383_v59, %v163_v9  ;;  %v1396_v61 = vrot.slane %v1383_v59, %v171_v24 }
 0x1e1   :  { %2834 = vmatprep.subr.bf16.mxu0 %v4316_v62  ;;  %3006 = vmatprep.subr.bf16.mxu1 %v4319_v63  ;;  %v1392_v62 = vrot.slane %v1383_v59, %v167_v11  ;;  %v1400_v63 = vrot.slane %v1383_v59, %v175_v26 }
 0x1e4   :  { %2835 = vmatpush1.bf16.msra.mxu0 %v4314_v1  ;;  %3007 = vmatpush1.bf16.msra.mxu1 %v4317_v3 }
 0x1e5   :  { %2836 = vmatprep.subr.bf16.mxu0 %v4322_v4  ;;  %3008 = vmatprep.subr.bf16.mxu1 %v4325_v5 }
 0x1e8   :  { %2837 = vmatpush1.bf16.msra.mxu0 %v4320_v6  ;;  %3009 = vmatpush1.bf16.msra.mxu1 %v4323_v7 }
 0x1e9   :  { %2838 = vmatprep.subr.bf16.mxu0 %v4328_v12  ;;  %3010 = vmatprep.subr.bf16.mxu1 %v4331_v13 }
 0x1ec   :  { %2839 = vmatpush1.bf16.msra.mxu0 %v4326_v14  ;;  %3011 = vmatpush1.bf16.msra.mxu1 %v4329_v15 }
 0x1ed   :  { %2840 = vmatprep.subr.bf16.mxu0 %v4334_v16  ;;  %3012 = vmatprep.subr.bf16.mxu1 %v4337_v17 }
 0x1f0   :  { %2841 = vmatpush1.bf16.msra.mxu0 %v4332_v18  ;;  %3013 = vmatpush1.bf16.msra.mxu1 %v4335_v25 }
 0x1f1   :  { %2842 = vmatprep.subr.bf16.mxu0 %v4340_v19  ;;  %3014 = vmatprep.subr.bf16.mxu1 %v4343_v0 }
 0x1f4   :  { %2843 = vmatpush1.bf16.msra.mxu0 %v4338_v20  ;;  %3015 = vmatpush1.bf16.msra.mxu1 %v4341_v10 }
 0x1f5   :  { %2844 = vmatprep.subr.bf16.mxu0 %v4346_v21  ;;  %3016 = vmatprep.subr.bf16.mxu1 %v4349_v23 }
 0x1f8   :  { %2845 = vmatpush1.bf16.msra.mxu0 %v4344_v27  ;;  %3017 = vmatpush1.bf16.msra.mxu1 %v4347_v28 }
 0x1f9   :  { %3887 = vmatprep.subr.bf16.mxu0 %v4350_v29  ;;  %3909 = vmatprep.subr.bf16.mxu1 %v4351_v30 }
 0x1fb   :  { %2847 = vmatmul.mubr.bf16.vlgmr.msra.gmra.mrb[8].mxu0 %v5400_v33  ;;  %3019 = vmatmul.mubr.bf16.vlgmr.msra.gmra.mrb[8].mxu1 %v5400_v33  ;;  %v4354_v33 = vld [vmem:[%s5884_s5 + $0x48] sm:$0xff]  }
 0x1fc   :  { %3888 = vmatpush3.bf16.msra.mxu0 %v4352_v31  ;;  %3910 = vmatpush3.bf16.msra.mxu1 %v4353_v2 }
 0x1fd   :  { %3889 = vmatprep.subr.bf16.mxu0 %v4354_v33  ;;  %3911 = vmatprep.subr.bf16.mxu1 %v4355_v32 }
 0x200   :  { %3890 = vmatpush3.bf16.msra.mxu0 %v4356_v35  ;;  %3912 = vmatpush3.bf16.msra.mxu1 %v4357_v36 }
 0x201   :  { %3891 = vmatprep.subr.bf16.mxu0 %v4358_v34  ;;  %3913 = vmatprep.subr.bf16.mxu1 %v4359_v37 }
 0x204   :  { %3892 = vmatpush3.bf16.msra.mxu0 %v4360_v38  ;;  %3914 = vmatpush3.bf16.msra.mxu1 %v4361_v39 }
 0x205   :  { %3893 = vmatprep.subr.bf16.mxu0 %v4362_v40  ;;  %3915 = vmatprep.subr.bf16.mxu1 %v4363_v41 }
 0x208   :  { %3894 = vmatpush3.bf16.msra.mxu0 %v4364_v42  ;;  %3916 = vmatpush3.bf16.msra.mxu1 %v4365_v22 }
 0x209   :  { %3895 = vmatprep.subr.bf16.mxu0 %v4366_v43  ;;  %3917 = vmatprep.subr.bf16.mxu1 %v4367_v44 }
 0x20c   :  { %3896 = vmatpush3.bf16.msra.mxu0 %v4368_v45  ;;  %3918 = vmatpush3.bf16.msra.mxu1 %v4369_v46 }
 0x20d   :  { %3897 = vmatprep.subr.bf16.mxu0 %v4370_v47  ;;  %3919 = vmatprep.subr.bf16.mxu1 %v4371_v48 }
 0x210   :  { %3898 = vmatpush3.bf16.msra.mxu0 %v4372_v49  ;;  %3920 = vmatpush3.bf16.msra.mxu1 %v4373_v50 }
 0x211   :  { %3899 = vmatprep.subr.bf16.mxu0 %v4374_v51  ;;  %3921 = vmatprep.subr.bf16.mxu1 %v4375_v52 }
 0x214   :  { %3900 = vmatpush3.bf16.msra.mxu0 %v4376_v53  ;;  %3922 = vmatpush3.bf16.msra.mxu1 %v4377_v54  ;;  %v3854_v54 = vld [vmem:[%s5887_s6] ss:$0 sm:$0xff] }
 0x215   :  { %3901 = vmatprep.subr.bf16.mxu0 %v4378_v55  ;;  %3923 = vmatprep.subr.bf16.mxu1 %v4379_v56 }
 0x218   :  { %3902 = vmatpush3.bf16.msra.mxu0 %v4380_v57  ;;  %3924 = vmatpush3.bf16.msra.mxu1 %v4381_v58 }
 0x2ce   :  { %v2848_v1 = vpop.f32.mrb[8].mxu0  ;;  %v3020_v3 = vpop.f32.mrb[8].mxu1 }
 0x2cf   :  { %v3931_v4 = vadd.f32 %v2848_v1, %v1388_v60  ;;  %v3935_v5 = vadd.f32 %v3020_v3, %v1396_v61  ;;  %v2850_v6 = vpop.f32.mrb[9].mxu0  ;;  %v3022_v7 = vpop.f32.mrb[9].mxu1 }
 0x2d0   :  { %v3932_v12 = vadd.f32 %v2850_v6, %v1392_v62  ;;  %v3936_v13 = vadd.f32 %v3022_v7, %v1400_v63  ;;  %v2852_v14 = vpop.f32.mrb[10].mxu0  ;;  %v3024_v15 = vpop.f32.mrb[10].mxu1 }
 0x2d1   :  { %v3846_v9 = vmul.f32 -1.442695, %v3931_v4  ;;  %v3848_v16 = vmul.f32 -1.442695, %v3935_v5  ;;  %v3933_v17 = vadd.f32 %v2852_v14, %v1388_v60  ;;  %v3937_v24 = vadd.f32 %v3024_v15, %v1396_v61  ;;  %v2854_v18 = vpop.f32.mrb[11].mxu0  ;;  %v3026_v25 = vpop.f32.mrb[11].mxu1 }
 0x2d2   :  { %v3847_v11 = vmul.f32 -1.442695, %v3932_v12  ;;  %v3849_v19 = vmul.f32 -1.442695, %v3936_v13  ;;  %v3934_v8 = vadd.f32 %v2854_v18, %v1392_v62  ;;  %v3938_v26 = vadd.f32 %v3026_v25, %v1400_v63 }
 0x2d3   :  { %4446 = vpow2.f32 %v3846_v9  ;;  %v3850_v0 = vmul.f32 -1.442695, %v3933_v17  ;;  %v3852_v20 = vmul.f32 -1.442695, %v3937_v24 }
 0x2d4   :  { %4448 = vpow2.f32 %v3848_v16  ;;  %v3851_v10 = vmul.f32 -1.442695, %v3934_v8  ;;  %v3853_v21 = vmul.f32 -1.442695, %v3938_v26 }
 0x2d5   :  { %4450 = vpow2.f32 %v3847_v11 }
 0x2d6   :  { %4452 = vpow2.f32 %v3849_v19 }
 0x2d7   :  { %4454 = vpow2.f32 %v3850_v0 }
 0x2d8   :  { %4456 = vpow2.f32 %v3852_v20 }
 0x2d9   :  { %4458 = vpow2.f32 %v3851_v10 }
 0x2da   :  { %4460 = vpow2.f32 %v3853_v21 }
 0x2dd   :  { %v4447_v23 = vpop.eup %4446 }
 0x2de   :  { %v4449_v27 = vpop.eup %4448  ;;  %v3053_v28 = vadd.f32 1.0, %v4447_v23 }
 0x2df   :  { %v4451_v29 = vpop.eup %4450  ;;  %v3055_v30 = vadd.f32 1.0, %v4449_v27 }
 0x2e0   :  { %v4453_v31 = vpop.eup %4452  ;;  %4462 = vrcp.f32 %v3053_v28  ;;  %v3054_v2 = vadd.f32 1.0, %v4451_v29 }
 0x2e1   :  { %v4455_v33 = vpop.eup %4454  ;;  %4464 = vrcp.f32 %v3055_v30  ;;  %v3056_v32 = vadd.f32 1.0, %v4453_v31 }
 0x2e2   :  { %v4457_v35 = vpop.eup %4456  ;;  %4466 = vrcp.f32 %v3054_v2  ;;  %v3057_v36 = vadd.f32 1.0, %v4455_v33 }
 0x2e3   :  { %v4459_v34 = vpop.eup %4458  ;;  %4468 = vrcp.f32 %v3056_v32  ;;  %v3059_v37 = vadd.f32 1.0, %v4457_v35 }
 0x2e4   :  { %v4461_v38 = vpop.eup %4460  ;;  %4470 = vrcp.f32 %v3057_v36  ;;  %v3058_v39 = vadd.f32 1.0, %v4459_v34 }
 0x2e5   :  { %4472 = vrcp.f32 %v3059_v37  ;;  %v3060_v40 = vadd.f32 1.0, %v4461_v38 }
 0x2e6   :  { %4474 = vrcp.f32 %v3058_v39 }
 0x2e7   :  { %4476 = vrcp.f32 %v3060_v40 }
 0x2ea   :  { %v4463_v41 = vpop.eup %4462 }
 0x2eb   :  { %v4465_v42 = vpop.eup %4464  ;;  %3077 = vst [vmem:[%s5886_s8] sm:$0xff] %v4463_v41 }
 0x2ec   :  { %v4467_v22 = vpop.eup %4466  ;;  %3079 = vst [vmem:[%s5886_s8 + $0x10] sm:$0xff] %v4465_v42 }
 0x2ed   :  { %v4469_v43 = vpop.eup %4468  ;;  %3078 = vst [vmem:[%s5886_s8 + $0x8] sm:$0xff] %v4467_v22 }
 0x2ee   :  { %v4471_v44 = vpop.eup %4470  ;;  %3080 = vst [vmem:[%s5886_s8 + $0x18] sm:$0xff] %v4469_v43 }
 0x2ef   :  { %v4473_v45 = vpop.eup %4472  ;;  %3081 = vst [vmem:[%s5886_s8 + $0x20] sm:$0xff] %v4471_v44  ;;  %v3085_v46 = vpack.c.bf16 %v4471_v44, %v4463_v41 }
 0x2f0   :  { %v4475_v47 = vpop.eup %4474  ;;  %3083 = vst [vmem:[%s5886_s8 + $0x30] sm:$0xff] %v4473_v45  ;;  %v3087_v48 = vpack.c.bf16 %v4473_v45, %v4465_v42 }
 0x2f1   :  { %v4477_v49 = vpop.eup %4476  ;;  %3082 = vst [vmem:[%s5886_s8 + $0x28] sm:$0xff] %v4475_v47  ;;  %v3086_v50 = vpack.c.bf16 %v4475_v47, %v4467_v22 }
 0x2f2   :  { %3084 = vst [vmem:[%s5886_s8 + $0x38] sm:$0xff] %v4477_v49  ;;  %v3088_v51 = vpack.c.bf16 %v4477_v49, %v4469_v43 }
 0x2f3   :  { %3384 = vmatprep.mubr.bf16.mxu0 %v3086_v50 }
 0x2f4   :  { %3425 = vmatprep.mubr.bf16.mxu1 %v3088_v51  ;;  %3385 = vmatmul.mubr.bf16.vlgmr.msra.gmra.mrb[12].mxu0 %v3085_v46 }
 0x2f5   :  { %3426 = vmatmul.mubr.bf16.vlgmr.msra.gmra.mrb[12].mxu1 %v3087_v48 }
 0x3c7   :  { %v3903_v52 = vpop.f32.mrb[12].mxu0 }
 0x3c8   :  { %v3925_v53 = vpop.f32.mrb[12].mxu1  ;;  %v3904_v55 = vpop.f32.mrb[13].mxu0 }
 0x3c9   :  { %v3905_v56 = vadd.f32 %v3904_v55, %v3903_v52  ;;  %v3926_v57 = vpop.f32.mrb[13].mxu1  ;;  %v3906_v58 = vpop.f32.mrb[14].mxu0 }
 0x3ca   :  { %v3927_v59 = vadd.f32 %v3926_v57, %v3925_v53  ;;  %v3928_v60 = vpop.f32.mrb[14].mxu1  ;;  %v3907_v61 = vpop.f32.mrb[15].mxu0 }
 0x3cb   :  { %v3387_v62 = vadd.f32 %v3905_v56, %v3854_v54  ;;  %v3908_v63 = vadd.f32 %v3907_v61, %v3906_v58  ;;  %v3929_v1 = vpop.f32.mrb[15].mxu1 }
 0x3cc   :  { %v3930_v3 = vadd.f32 %v3929_v1, %v3928_v60 }
 0x3cd   :  { %v3428_v4 = vadd.f32 %v3927_v59, %v3387_v62  ;;  %v3390_v5 = vadd.f32 %v3908_v63, %v3854_v54 }
 0x3cf   :  { %3434 = vst [vmem:[%s5888_s7] sm:$0xff] %v3428_v4  ;;  %v3431_v6 = vadd.f32 %v3930_v3, %v3390_v5 }
 0x3d1   :  { %3435 = vst [vmem:[%s5888_s7 + $0x8] sm:$0xff] %v3431_v6 }

</bundles_post_ra>
